<compile_context>
chip_gen: v7x
topology: tpu7x:2x2x1
jax: 0.10.0
libtpu: 0.0.40
codegen_flags: <defaults>
</compile_context>

<pallas_src>
import functools
import numpy as np

import jax
import jax.numpy as jnp
from jax.experimental import pallas as pl
from jax.experimental.pallas import tpu as pltpu


# ----------------------------------------------------------------------------
# Deterministic "parameter" setup (matches _fspecial_gauss_1d in the module)
# ----------------------------------------------------------------------------
def _fspecial_gauss_1d_np(size: int, sigma: float) -> np.ndarray:
    coords = np.arange(size, dtype=np.float32)
    coords -= size // 2
    g = np.exp(-(coords ** 2) / (2.0 * sigma ** 2))
    g /= g.sum()
    return g.astype(np.float32)  # shape (size,)


def _conv_matrix(n: int, win: np.ndarray) -> np.ndarray:
    """Valid 1-D correlation with `win` along an axis of length n, as a matrix.

    If n < win_size the Gaussian smoothing along that axis is skipped (same
    behaviour as gaussian_filter's warning branch) -> identity matrix.
    """
    ws = win.shape[0]
    if n < ws:
        return np.eye(n, dtype=np.float32)
    m = np.zeros((n - ws + 1, n), dtype=np.float32)
    for i in range(n - ws + 1):
        m[i, i:i + ws] = win
    return m


def _pool_matrix(n: int) -> np.ndarray:
    """avg_pool (kernel=2, stride=2, padding=n%2, count_include_pad=True)."""
    pad = n % 2
    n_out = (n + 2 * pad - 2) // 2 + 1
    m = np.zeros((n_out, n), dtype=np.float32)
    for i in range(n_out):
        for j in (2 * i - pad, 2 * i - pad + 1):
            if 0 <= j < n:
                m[i, j] = 0.5  # 0.5 * 0.5 == 1/4 after the two-sided matmul
    return m


# ----------------------------------------------------------------------------
# Fused all-levels MS-SSIM kernel.
#
# One grid step processes `bp` image planes, laid out as a (bp*H, W) slab.
# For every level l it computes the SSIM/CS statistics of all bp planes and
# (except at the last level) the 2x2 average-pooled planes for the next level,
# all in VMEM.  Only the (levels, bp) ssim / cs tiles leave the kernel.
# ----------------------------------------------------------------------------
def _fused_msssim_kernel(x_ref, y_ref, *refs, bp, dims, C1, C2):
    levels = len(dims)
    gh_refs = refs[0:levels]                       # (Ho_l, H_l)   per level
    gwT_refs = refs[levels:2 * levels]             # (W_l, Wo_l)   per level
    ph_refs = refs[2 * levels:3 * levels - 1]      # (H_{l+1}, H_l)
    pwT_refs = refs[3 * levels - 1:4 * levels - 2]  # (W_l, W_{l+1})
    ssim_ref = refs[4 * levels - 2]
    cs_ref = refs[4 * levels - 1]

    # Whole plane block, upcast once (supports the optional bf16 input path).
    x = x_ref[0].astype(jnp.float32)   # (bp*H0, W0)
    y = y_ref[0].astype(jnp.float32)

    ssim_rows = []
    cs_rows = []
    for l in range(levels):
        H, W, Ho, Wo, H1, W1 = dims[l]
        gh = gh_refs[l][...]           # (Ho, H)
        gwT = gwT_refs[l][...]         # (W, Wo)
        inv_area = 1.0 / float(Ho * Wo)

        # ---- W-direction Gaussian pass: one big MXU matmul for all
        #      5 maps x bp planes (M = 5*bp*H).
        slab = jnp.concatenate([x, y, x * x, y * y, x * y], axis=0)  # (5*bp*H, W)
        t = jnp.dot(slab, gwT, preferred_element_type=jnp.float32)   # (5*bp*H, Wo)

        # ---- H-direction Gaussian pass + SSIM map math, per plane.
        s_cols = []
        c_cols = []
        for p in range(bp):
            def gchunk(m, _p=p):
                off = (m * bp + _p) * H
                return jnp.dot(gh, t[off:off + H, :],
                               preferred_element_type=jnp.float32)   # (Ho, Wo)

            mu1 = gchunk(0)
            mu2 = gchunk(1)
            e_xx = gchunk(2)
            e_yy = gchunk(3)
            e_xy = gchunk(4)

            mu1_sq = mu1 * mu1
            mu2_sq = mu2 * mu2
            mu1_mu2 = mu1 * mu2
            sigma1_sq = e_xx - mu1_sq
            sigma2_sq = e_yy - mu2_sq
            sigma12 = e_xy - mu1_mu2

            cs_map = (2.0 * sigma12 + C2) / (sigma1_sq + sigma2_sq + C2)
            ssim_map = ((2.0 * mu1_mu2 + C1) / (mu1_sq + mu2_sq + C1)) * cs_map

            s_cols.append(
                jnp.sum(jnp.sum(ssim_map, axis=1, keepdims=True),
                        axis=0, keepdims=True) * inv_area)           # (1, 1)
            c_cols.append(
                jnp.sum(jnp.sum(cs_map, axis=1, keepdims=True),
                        axis=0, keepdims=True) * inv_area)           # (1, 1)

        ssim_rows.append(jnp.concatenate(s_cols, axis=1))             # (1, bp)
        cs_rows.append(jnp.concatenate(c_cols, axis=1))               # (1, bp)

        # ---- fused 2x2 average pool for the next level (stays in VMEM).
        if l < levels - 1:
            ph = ph_refs[l][...]       # (H1, H)
            pwT = pwT_refs[l][...]     # (W, W1)
            pslab = jnp.concatenate([x, y], axis=0)                       # (2*bp*H, W)
            pt = jnp.dot(pslab, pwT, preferred_element_type=jnp.float32)  # (2*bp*H, W1)
            x_chunks = []
            y_chunks = []
            for p in range(bp):
                x_chunks.append(jnp.dot(ph, pt[p * H:(p + 1) * H, :],
                                        preferred_element_type=jnp.float32))
                y_chunks.append(jnp.dot(ph, pt[(bp + p) * H:(bp + p + 1) * H, :],
                                        preferred_element_type=jnp.float32))
            x = jnp.concatenate(x_chunks, axis=0)                     # (bp*H1, W1)
            y = jnp.concatenate(y_chunks, axis=0)

    # Single lane/sublane-dense store per output per grid step.
    ssim_ref[0] = jnp.concatenate(ssim_rows, axis=0)                  # (levels, bp)
    cs_ref[0] = jnp.concatenate(cs_rows, axis=0)


# ----------------------------------------------------------------------------
# MS-SSIM module equivalent
# ----------------------------------------------------------------------------
class MSSSIMPallas:
    """Pallas/TPU equivalent of the PyTorch MS_SSIM module (spatial_dims=2)."""

    def __init__(self, data_range=255.0, size_average=True, win_size=11,
                 win_sigma=1.5, channel=3, spatial_dims=2, weights=None,
                 K=(0.01, 0.03), input_dtype=jnp.float32):
        assert spatial_dims == 2, "only 2-D spatial inputs supported here"
        if win_size % 2 != 1:
            raise ValueError("Window size should be odd.")
        self.win_size = win_size
        self.win = _fspecial_gauss_1d_np(win_size, win_sigma)   # (win_size,)
        self.size_average = size_average
        self.data_range = float(data_range)
        self.weights = ([0.0448, 0.2856, 0.3001, 0.2363, 0.1333]
                        if weights is None else list(weights))
        self.K = K
        self.channel = channel
        # Optional HBM-bandwidth optimization: DMA the images as bfloat16 and
        # upcast inside the kernel (all products stay f32).  Default f32 keeps
        # exact reference semantics.
        self.input_dtype = input_dtype

    def __call__(self, X, Y):
        if X.shape != Y.shape:
            raise ValueError("Input images should have the same dimensions")
        N, C, H, W = X.shape
        smaller_side = min(H, W)
        assert smaller_side > (self.win_size - 1) * (2 ** 4), (
            "Image size should be larger than %d due to the 4 downsamplings "
            "in ms-ssim" % ((self.win_size - 1) * (2 ** 4)))

        levels = len(self.weights)

        # ---- planes per grid step: all channels of one image by default,
        # but keep >= 2 grid steps (v7x megacore) whenever possible.
        P = N * C
        bp = C
        if P // bp < 2:
            for cand in range(C, 0, -1):
                if C % cand == 0 and P // cand >= 2:
                    bp = cand
                    break
        num_blocks = P // bp

        # ---- per-level constant matrices (host-side, deterministic).
        dims = []
        gh_mats, gwT_mats, ph_mats, pwT_mats = [], [], [], []
        Hl, Wl = H, W
        for l in range(levels):
            gh_np = _conv_matrix(Hl, self.win)
            gw_np = _conv_matrix(Wl, self.win)
            Ho, Wo = gh_np.shape[0], gw_np.shape[0]
            gh_mats.append(jnp.asarray(gh_np))
            gwT_mats.append(jnp.asarray(gw_np.T))
            if l < levels - 1:
                ph_np = _pool_matrix(Hl)
                pw_np = _pool_matrix(Wl)
                H1, W1 = ph_np.shape[0], pw_np.shape[0]
                ph_mats.append(jnp.asarray(ph_np))
                pwT_mats.append(jnp.asarray(pw_np.T))
            else:
                H1 = W1 = 0
            dims.append((Hl, Wl, Ho, Wo, H1, W1))
            Hl, Wl = H1, W1
        dims = tuple(dims)

        K1, K2 = self.K
        C1 = float((K1 * self.data_range) ** 2)
        C2 = float((K2 * self.data_range) ** 2)

        in_dtype = self.input_dtype
        Xb = X.astype(in_dtype).reshape(num_blocks, bp * H, W)
        Yb = Y.astype(in_dtype).reshape(num_blocks, bp * H, W)

        const_mats = gh_mats + gwT_mats + ph_mats + pwT_mats

        kernel = functools.partial(_fused_msssim_kernel, bp=bp, dims=dims,
                                   C1=C1, C2=C2)

        in_specs = [pl.BlockSpec((1, bp * H, W), lambda b: (b, 0, 0)),
                    pl.BlockSpec((1, bp * H, W), lambda b: (b, 0, 0))]
        for m in const_mats:
            # Constant operands: index_map is grid-invariant so they are only
            # DMA'd once.  (Single-buffering them via pl.Buffered(1) would save
            # a little more VMEM; kept default for robustness.)
            in_specs.append(pl.BlockSpec(m.shape, lambda b: (0, 0)))

        out_specs = (pl.BlockSpec((1, levels, bp), lambda b: (b, 0, 0)),
                     pl.BlockSpec((1, levels, bp), lambda b: (b, 0, 0)))
        out_shape = (jax.ShapeDtypeStruct((num_blocks, levels, bp), jnp.float32),
                     jax.ShapeDtypeStruct((num_blocks, levels, bp), jnp.float32))

        # ---- explicit VMEM budget: generous estimate of the per-step working
        # set, clamped to 64 MiB (v7x physical VMEM; v5e scoped default is only
        # 16 MiB so we must raise it explicitly).
        plane_f32 = bp * H * W * 4
        in_bytes = 2 * bp * H * W * int(jnp.dtype(in_dtype).itemsize)
        const_bytes = sum(int(np.prod(m.shape)) * 4 for m in const_mats)
        vmem_est = 4 * in_bytes + 2 * const_bytes + 24 * plane_f32 + (4 << 20)
        vmem_limit = int(min(max(vmem_est, 32 << 20), 64 << 20))
        # TODO(synk): for very large level-0 planes (>= ~512^2 f32 per block)
        # the fused-level working set can exceed v7x/v5e VMEM; an H-tiled
        # level-0 pre-pass would be needed there.

        ssim_pb, cs_pb = pl.pallas_call(
            kernel,
            out_shape=out_shape,
            grid=(num_blocks,),
            in_specs=in_specs,
            out_specs=out_specs,
            compiler_params=pltpu.CompilerParams(
                dimension_semantics=("parallel",),
                vmem_limit_bytes=vmem_limit),
        )(Xb, Yb, *const_mats)

        # ---- tiny per-level combination (plain JAX glue).
        def to_ncl(a):  # (num_blocks, levels, bp) -> (N, C, levels)
            return jnp.transpose(a, (0, 2, 1)).reshape(N, C, levels)

        ssim_ncl = to_ncl(ssim_pb)
        cs_ncl = to_ncl(cs_pb)
        vals = jnp.concatenate(
            [jnp.maximum(cs_ncl[..., :levels - 1], 0.0),     # relu(cs), lvls 0..L-2
             jnp.maximum(ssim_ncl[..., levels - 1:], 0.0)],  # relu(ssim), last lvl
            axis=-1)                                          # (N, C, levels)
        w = jnp.asarray(self.weights, jnp.float32)
        ms = jnp.prod(vals ** w, axis=-1)                     # (N, C)
        if self.size_average:
            return jnp.mean(ms)
        return jnp.mean(ms, axis=1)


# ----------------------------------------------------------------------------
# Plain-JAX reference (same math, no Pallas) for correctness cross-check
# ----------------------------------------------------------------------------
def _ms_ssim_reference_jax(X, Y, win_np, data_range, K, weights):
    K1, K2 = K
    C1 = (K1 * data_range) ** 2
    C2 = (K2 * data_range) ** 2
    levels = len(weights)
    X = X.astype(jnp.float32)
    Y = Y.astype(jnp.float32)
    mcs = []
    ssim_pc = None
    for l in range(levels):
        N, C, H, W = X.shape
        gh = jnp.asarray(_conv_matrix(H, win_np))
        gw = jnp.asarray(_conv_matrix(W, win_np))

        def gf(v):
            return jnp.einsum('ij,ncjk,lk->ncil', gh, v, gw)

        mu1 = gf(X)
        mu2 = gf(Y)
        mu1_sq = mu1 * mu1
        mu2_sq = mu2 * mu2
        mu1_mu2 = mu1 * mu2
        sigma1_sq = gf(X * X) - mu1_sq
        sigma2_sq = gf(Y * Y) - mu2_sq
        sigma12 = gf(X * Y) - mu1_mu2
        cs_map = (2 * sigma12 + C2) / (sigma1_sq + sigma2_sq + C2)
        ssim_map = ((2 * mu1_mu2 + C1) / (mu1_sq + mu2_sq + C1)) * cs_map
        ssim_pc = ssim_map.reshape(N, C, -1).mean(-1)
        cs = cs_map.reshape(N, C, -1).mean(-1)
        if l < levels - 1:
            mcs.append(jnp.maximum(cs, 0.0))
            ph = jnp.asarray(_pool_matrix(H))
            pw = jnp.asarray(_pool_matrix(W))
            X = jnp.einsum('ij,ncjk,lk->ncil', ph, X, pw)
            Y = jnp.einsum('ij,ncjk,lk->ncil', ph, Y, pw)
    stacked = jnp.stack(mcs + [jnp.maximum(ssim_pc, 0.0)], axis=0)
    w = jnp.asarray(weights, jnp.float32).reshape(-1, 1, 1)
    return jnp.mean(jnp.prod(stacked ** w, axis=0))


# ----------------------------------------------------------------------------
# Demo
# ----------------------------------------------------------------------------
if __name__ == "__main__":
    # Small shapes consistent with the module's constraint
    # smaller_side > (win_size - 1) * 16  ->  use win_size=3, H=W=48.
    N, C, H, W = 2, 3, 48, 48
    key = jax.random.PRNGKey(0)
    kx, ky = jax.random.split(key)
    X = jax.random.uniform(kx, (N, C, H, W), dtype=jnp.float32)
    noise = 0.05 * jax.random.normal(ky, (N, C, H, W), dtype=jnp.float32)
    Y = jnp.clip(X + noise, 0.0, 1.0)

    model = MSSSIMPallas(data_range=1.0, size_average=True,
                         win_size=3, win_sigma=1.5, channel=C)

    val = jax.block_until_ready(model(X, Y))
    assert bool(jnp.isfinite(val)), "ms-ssim produced non-finite value"
    assert 0.0 <= float(val) <= 1.0 + 1e-4, float(val)

    # Sanity: identical images -> MS-SSIM == 1 (exactly, up to fp identity)
    self_val = jax.block_until_ready(model(X, X))
    assert abs(float(self_val) - 1.0) < 1e-4, float(self_val)

    # Cross-check against a plain-JAX reference of the same math
    ref_val = jax.block_until_ready(
        _ms_ssim_reference_jax(X, Y, model.win, model.data_range, model.K,
                               model.weights))
    assert abs(float(val) - float(ref_val)) < 2e-2, (float(val), float(ref_val))

    print("KERNEL_OK")
</pallas_src>

<mosaic_0001>
module attributes {stable_mosaic.version = 11 : i64} {
  func.func @_fused_msssim_kernel(%arg0: i32, %arg1: memref<1x144x48xf32, #tpu.memory_space<vmem>>, %arg2: memref<1x144x48xf32, #tpu.memory_space<vmem>>, %arg3: memref<46x48xf32, #tpu.memory_space<vmem>>, %arg4: memref<22x24xf32, #tpu.memory_space<vmem>>, %arg5: memref<10x12xf32, #tpu.memory_space<vmem>>, %arg6: memref<4x6xf32, #tpu.memory_space<vmem>>, %arg7: memref<1x3xf32, #tpu.memory_space<vmem>>, %arg8: memref<48x46xf32, #tpu.memory_space<vmem>>, %arg9: memref<24x22xf32, #tpu.memory_space<vmem>>, %arg10: memref<12x10xf32, #tpu.memory_space<vmem>>, %arg11: memref<6x4xf32, #tpu.memory_space<vmem>>, %arg12: memref<3x1xf32, #tpu.memory_space<vmem>>, %arg13: memref<24x48xf32, #tpu.memory_space<vmem>>, %arg14: memref<12x24xf32, #tpu.memory_space<vmem>>, %arg15: memref<6x12xf32, #tpu.memory_space<vmem>>, %arg16: memref<3x6xf32, #tpu.memory_space<vmem>>, %arg17: memref<48x24xf32, #tpu.memory_space<vmem>>, %arg18: memref<24x12xf32, #tpu.memory_space<vmem>>, %arg19: memref<12x6xf32, #tpu.memory_space<vmem>>, %arg20: memref<6x3xf32, #tpu.memory_space<vmem>>, %arg21: memref<1x5x3xf32, #tpu.memory_space<vmem>>, %arg22: memref<1x5x3xf32, #tpu.memory_space<vmem>>) attributes {dimension_semantics = [#tpu.dimension_semantics<parallel>], iteration_bounds = array<i64: 2>, scalar_prefetch = 0 : i64, scratch_operands = 0 : i64, tpu.core_type = #tpu.core_type<tc>, window_params = [{transform_indices = @transform_0, window_bounds = array<i64: 1, 144, 48>}, {transform_indices = @transform_1, window_bounds = array<i64: 1, 144, 48>}, {pipeline_mode = #tpu.pipeline_mode<synchronous>, transform_indices = @transform_2, window_bounds = array<i64: 46, 48>}, {pipeline_mode = #tpu.pipeline_mode<synchronous>, transform_indices = @transform_3, window_bounds = array<i64: 22, 24>}, {pipeline_mode = #tpu.pipeline_mode<synchronous>, transform_indices = @transform_4, window_bounds = array<i64: 10, 12>}, {pipeline_mode = #tpu.pipeline_mode<synchronous>, transform_indices = @transform_5, window_bounds = array<i64: 4, 6>}, {pipeline_mode = #tpu.pipeline_mode<synchronous>, transform_indices = @transform_6, window_bounds = array<i64: 1, 3>}, {pipeline_mode = #tpu.pipeline_mode<synchronous>, transform_indices = @transform_7, window_bounds = array<i64: 48, 46>}, {pipeline_mode = #tpu.pipeline_mode<synchronous>, transform_indices = @transform_8, window_bounds = array<i64: 24, 22>}, {pipeline_mode = #tpu.pipeline_mode<synchronous>, transform_indices = @transform_9, window_bounds = array<i64: 12, 10>}, {pipeline_mode = #tpu.pipeline_mode<synchronous>, transform_indices = @transform_10, window_bounds = array<i64: 6, 4>}, {pipeline_mode = #tpu.pipeline_mode<synchronous>, transform_indices = @transform_11, window_bounds = array<i64: 3, 1>}, {pipeline_mode = #tpu.pipeline_mode<synchronous>, transform_indices = @transform_12, window_bounds = array<i64: 24, 48>}, {pipeline_mode = #tpu.pipeline_mode<synchronous>, transform_indices = @transform_13, window_bounds = array<i64: 12, 24>}, {pipeline_mode = #tpu.pipeline_mode<synchronous>, transform_indices = @transform_14, window_bounds = array<i64: 6, 12>}, {pipeline_mode = #tpu.pipeline_mode<synchronous>, transform_indices = @transform_15, window_bounds = array<i64: 3, 6>}, {pipeline_mode = #tpu.pipeline_mode<synchronous>, transform_indices = @transform_16, window_bounds = array<i64: 48, 24>}, {pipeline_mode = #tpu.pipeline_mode<synchronous>, transform_indices = @transform_17, window_bounds = array<i64: 24, 12>}, {pipeline_mode = #tpu.pipeline_mode<synchronous>, transform_indices = @transform_18, window_bounds = array<i64: 12, 6>}, {pipeline_mode = #tpu.pipeline_mode<synchronous>, transform_indices = @transform_19, window_bounds = array<i64: 6, 3>}, {transform_indices = @transform_20, window_bounds = array<i64: 1, 5, 3>}, {transform_indices = @transform_21, window_bounds = array<i64: 1, 5, 3>}]} {
    %c0 = arith.constant 0 : index
    %c0_0 = arith.constant 0 : index
    %c0_1 = arith.constant 0 : index
    %0 = vector.load %arg1[%c0, %c0_0, %c0_1] : memref<1x144x48xf32, #tpu.memory_space<vmem>>, vector<1x144x48xf32>
    %1 = vector.shape_cast %0 : vector<1x144x48xf32> to vector<144x48xf32>
    %c0_2 = arith.constant 0 : index
    %c0_3 = arith.constant 0 : index
    %c0_4 = arith.constant 0 : index
    %2 = vector.load %arg2[%c0_2, %c0_3, %c0_4] : memref<1x144x48xf32, #tpu.memory_space<vmem>>, vector<1x144x48xf32>
    %3 = vector.shape_cast %2 : vector<1x144x48xf32> to vector<144x48xf32>
    %c0_5 = arith.constant 0 : index
    %c0_6 = arith.constant 0 : index
    %4 = vector.load %arg3[%c0_5, %c0_6] : memref<46x48xf32, #tpu.memory_space<vmem>>, vector<46x48xf32>
    %c0_7 = arith.constant 0 : index
    %c0_8 = arith.constant 0 : index
    %5 = vector.load %arg8[%c0_7, %c0_8] : memref<48x46xf32, #tpu.memory_space<vmem>>, vector<48x46xf32>
    %6 = arith.mulf %1, %1 : vector<144x48xf32>
    %7 = arith.mulf %3, %3 : vector<144x48xf32>
    %8 = arith.mulf %1, %3 : vector<144x48xf32>
    %9 = tpu.concatenate %1, %3, %6, %7, %8 in 0 : vector<144x48xf32>, vector<144x48xf32>, vector<144x48xf32>, vector<144x48xf32>, vector<144x48xf32> -> vector<720x48xf32>
    %cst = arith.constant dense<0.000000e+00> : vector<720x46xf32>
    %10 = tpu.matmul %9, %5, %cst {dimension_numbers = #tpu.dot_dimension_numbers<[1], [0], [0], [1], [0, 0, 1, 1], [], []>} : vector<720x48xf32>, vector<48x46xf32>, vector<720x46xf32> -> vector<720x46xf32>
    %11 = vector.extract_strided_slice %10 {offsets = [0, 0], sizes = [48, 46], strides = [1, 1]} : vector<720x46xf32> to vector<48x46xf32>
    %cst_9 = arith.constant dense<0.000000e+00> : vector<46x46xf32>
    %12 = tpu.matmul %4, %11, %cst_9 {dimension_numbers = #tpu.dot_dimension_numbers<[1], [0], [0], [1], [0, 0, 1, 1], [], []>} : vector<46x48xf32>, vector<48x46xf32>, vector<46x46xf32> -> vector<46x46xf32>
    %13 = vector.extract_strided_slice %10 {offsets = [144, 0], sizes = [48, 46], strides = [1, 1]} : vector<720x46xf32> to vector<48x46xf32>
    %cst_10 = arith.constant dense<0.000000e+00> : vector<46x46xf32>
    %14 = tpu.matmul %4, %13, %cst_10 {dimension_numbers = #tpu.dot_dimension_numbers<[1], [0], [0], [1], [0, 0, 1, 1], [], []>} : vector<46x48xf32>, vector<48x46xf32>, vector<46x46xf32> -> vector<46x46xf32>
    %15 = vector.extract_strided_slice %10 {offsets = [288, 0], sizes = [48, 46], strides = [1, 1]} : vector<720x46xf32> to vector<48x46xf32>
    %cst_11 = arith.constant dense<0.000000e+00> : vector<46x46xf32>
    %16 = tpu.matmul %4, %15, %cst_11 {dimension_numbers = #tpu.dot_dimension_numbers<[1], [0], [0], [1], [0, 0, 1, 1], [], []>} : vector<46x48xf32>, vector<48x46xf32>, vector<46x46xf32> -> vector<46x46xf32>
    %17 = vector.extract_strided_slice %10 {offsets = [432, 0], sizes = [48, 46], strides = [1, 1]} : vector<720x46xf32> to vector<48x46xf32>
    %cst_12 = arith.constant dense<0.000000e+00> : vector<46x46xf32>
    %18 = tpu.matmul %4, %17, %cst_12 {dimension_numbers = #tpu.dot_dimension_numbers<[1], [0], [0], [1], [0, 0, 1, 1], [], []>} : vector<46x48xf32>, vector<48x46xf32>, vector<46x46xf32> -> vector<46x46xf32>
    %19 = vector.extract_strided_slice %10 {offsets = [576, 0], sizes = [48, 46], strides = [1, 1]} : vector<720x46xf32> to vector<48x46xf32>
    %cst_13 = arith.constant dense<0.000000e+00> : vector<46x46xf32>
    %20 = tpu.matmul %4, %19, %cst_13 {dimension_numbers = #tpu.dot_dimension_numbers<[1], [0], [0], [1], [0, 0, 1, 1], [], []>} : vector<46x48xf32>, vector<48x46xf32>, vector<46x46xf32> -> vector<46x46xf32>
    %21 = arith.mulf %12, %12 : vector<46x46xf32>
    %22 = arith.mulf %14, %14 : vector<46x46xf32>
    %23 = arith.mulf %12, %14 : vector<46x46xf32>
    %24 = arith.subf %16, %21 : vector<46x46xf32>
    %25 = arith.subf %18, %22 : vector<46x46xf32>
    %26 = arith.subf %20, %23 : vector<46x46xf32>
    %cst_14 = arith.constant 2.000000e+00 : f32
    %27 = vector.broadcast %cst_14 : f32 to vector<46x46xf32>
    %28 = arith.mulf %27, %26 : vector<46x46xf32>
    %cst_15 = arith.constant 8.99999984E-4 : f32
    %29 = vector.broadcast %cst_15 : f32 to vector<46x46xf32>
    %30 = arith.addf %28, %29 : vector<46x46xf32>
    %31 = arith.addf %24, %25 : vector<46x46xf32>
    %cst_16 = arith.constant 8.99999984E-4 : f32
    %32 = vector.broadcast %cst_16 : f32 to vector<46x46xf32>
    %33 = arith.addf %31, %32 : vector<46x46xf32>
    %34 = arith.divf %30, %33 : vector<46x46xf32>
    %cst_17 = arith.constant 2.000000e+00 : f32
    %35 = vector.broadcast %cst_17 : f32 to vector<46x46xf32>
    %36 = arith.mulf %35, %23 : vector<46x46xf32>
    %cst_18 = arith.constant 9.99999974E-5 : f32
    %37 = vector.broadcast %cst_18 : f32 to vector<46x46xf32>
    %38 = arith.addf %36, %37 : vector<46x46xf32>
    %39 = arith.addf %21, %22 : vector<46x46xf32>
    %cst_19 = arith.constant 9.99999974E-5 : f32
    %40 = vector.broadcast %cst_19 : f32 to vector<46x46xf32>
    %41 = arith.addf %39, %40 : vector<46x46xf32>
    %42 = arith.divf %38, %41 : vector<46x46xf32>
    %43 = arith.mulf %42, %34 : vector<46x46xf32>
    %cst_20 = arith.constant dense<0.000000e+00> : vector<46xf32>
    %44 = vector.multi_reduction <add>, %43, %cst_20 [1] : vector<46x46xf32> to vector<46xf32>
    %45 = vector.shape_cast %44 : vector<46xf32> to vector<46x1xf32>
    %cst_21 = arith.constant dense<0.000000e+00> : vector<1xf32>
    %46 = vector.multi_reduction <add>, %45, %cst_21 [0] : vector<46x1xf32> to vector<1xf32>
    %47 = vector.shape_cast %46 : vector<1xf32> to vector<1x1xf32>
    %cst_22 = arith.constant 4.72589803E-4 : f32
    %48 = vector.broadcast %cst_22 : f32 to vector<1x1xf32>
    %49 = arith.mulf %47, %48 : vector<1x1xf32>
    %cst_23 = arith.constant dense<0.000000e+00> : vector<46xf32>
    %50 = vector.multi_reduction <add>, %34, %cst_23 [1] : vector<46x46xf32> to vector<46xf32>
    %51 = vector.shape_cast %50 : vector<46xf32> to vector<46x1xf32>
    %cst_24 = arith.constant dense<0.000000e+00> : vector<1xf32>
    %52 = vector.multi_reduction <add>, %51, %cst_24 [0] : vector<46x1xf32> to vector<1xf32>
    %53 = vector.shape_cast %52 : vector<1xf32> to vector<1x1xf32>
    %cst_25 = arith.constant 4.72589803E-4 : f32
    %54 = vector.broadcast %cst_25 : f32 to vector<1x1xf32>
    %55 = arith.mulf %53, %54 : vector<1x1xf32>
    %56 = vector.extract_strided_slice %10 {offsets = [48, 0], sizes = [48, 46], strides = [1, 1]} : vector<720x46xf32> to vector<48x46xf32>
    %cst_26 = arith.constant dense<0.000000e+00> : vector<46x46xf32>
    %57 = tpu.matmul %4, %56, %cst_26 {dimension_numbers = #tpu.dot_dimension_numbers<[1], [0], [0], [1], [0, 0, 1, 1], [], []>} : vector<46x48xf32>, vector<48x46xf32>, vector<46x46xf32> -> vector<46x46xf32>
    %58 = vector.extract_strided_slice %10 {offsets = [192, 0], sizes = [48, 46], strides = [1, 1]} : vector<720x46xf32> to vector<48x46xf32>
    %cst_27 = arith.constant dense<0.000000e+00> : vector<46x46xf32>
    %59 = tpu.matmul %4, %58, %cst_27 {dimension_numbers = #tpu.dot_dimension_numbers<[1], [0], [0], [1], [0, 0, 1, 1], [], []>} : vector<46x48xf32>, vector<48x46xf32>, vector<46x46xf32> -> vector<46x46xf32>
    %60 = vector.extract_strided_slice %10 {offsets = [336, 0], sizes = [48, 46], strides = [1, 1]} : vector<720x46xf32> to vector<48x46xf32>
    %cst_28 = arith.constant dense<0.000000e+00> : vector<46x46xf32>
    %61 = tpu.matmul %4, %60, %cst_28 {dimension_numbers = #tpu.dot_dimension_numbers<[1], [0], [0], [1], [0, 0, 1, 1], [], []>} : vector<46x48xf32>, vector<48x46xf32>, vector<46x46xf32> -> vector<46x46xf32>
    %62 = vector.extract_strided_slice %10 {offsets = [480, 0], sizes = [48, 46], strides = [1, 1]} : vector<720x46xf32> to vector<48x46xf32>
    %cst_29 = arith.constant dense<0.000000e+00> : vector<46x46xf32>
    %63 = tpu.matmul %4, %62, %cst_29 {dimension_numbers = #tpu.dot_dimension_numbers<[1], [0], [0], [1], [0, 0, 1, 1], [], []>} : vector<46x48xf32>, vector<48x46xf32>, vector<46x46xf32> -> vector<46x46xf32>
    %64 = vector.extract_strided_slice %10 {offsets = [624, 0], sizes = [48, 46], strides = [1, 1]} : vector<720x46xf32> to vector<48x46xf32>
    %cst_30 = arith.constant dense<0.000000e+00> : vector<46x46xf32>
    %65 = tpu.matmul %4, %64, %cst_30 {dimension_numbers = #tpu.dot_dimension_numbers<[1], [0], [0], [1], [0, 0, 1, 1], [], []>} : vector<46x48xf32>, vector<48x46xf32>, vector<46x46xf32> -> vector<46x46xf32>
    %66 = arith.mulf %57, %57 : vector<46x46xf32>
    %67 = arith.mulf %59, %59 : vector<46x46xf32>
    %68 = arith.mulf %57, %59 : vector<46x46xf32>
    %69 = arith.subf %61, %66 : vector<46x46xf32>
    %70 = arith.subf %63, %67 : vector<46x46xf32>
    %71 = arith.subf %65, %68 : vector<46x46xf32>
    %cst_31 = arith.constant 2.000000e+00 : f32
    %72 = vector.broadcast %cst_31 : f32 to vector<46x46xf32>
    %73 = arith.mulf %72, %71 : vector<46x46xf32>
    %cst_32 = arith.constant 8.99999984E-4 : f32
    %74 = vector.broadcast %cst_32 : f32 to vector<46x46xf32>
    %75 = arith.addf %73, %74 : vector<46x46xf32>
    %76 = arith.addf %69, %70 : vector<46x46xf32>
    %cst_33 = arith.constant 8.99999984E-4 : f32
    %77 = vector.broadcast %cst_33 : f32 to vector<46x46xf32>
    %78 = arith.addf %76, %77 : vector<46x46xf32>
    %79 = arith.divf %75, %78 : vector<46x46xf32>
    %cst_34 = arith.constant 2.000000e+00 : f32
    %80 = vector.broadcast %cst_34 : f32 to vector<46x46xf32>
    %81 = arith.mulf %80, %68 : vector<46x46xf32>
    %cst_35 = arith.constant 9.99999974E-5 : f32
    %82 = vector.broadcast %cst_35 : f32 to vector<46x46xf32>
    %83 = arith.addf %81, %82 : vector<46x46xf32>
    %84 = arith.addf %66, %67 : vector<46x46xf32>
    %cst_36 = arith.constant 9.99999974E-5 : f32
    %85 = vector.broadcast %cst_36 : f32 to vector<46x46xf32>
    %86 = arith.addf %84, %85 : vector<46x46xf32>
    %87 = arith.divf %83, %86 : vector<46x46xf32>
    %88 = arith.mulf %87, %79 : vector<46x46xf32>
    %cst_37 = arith.constant dense<0.000000e+00> : vector<46xf32>
    %89 = vector.multi_reduction <add>, %88, %cst_37 [1] : vector<46x46xf32> to vector<46xf32>
    %90 = vector.shape_cast %89 : vector<46xf32> to vector<46x1xf32>
    %cst_38 = arith.constant dense<0.000000e+00> : vector<1xf32>
    %91 = vector.multi_reduction <add>, %90, %cst_38 [0] : vector<46x1xf32> to vector<1xf32>
    %92 = vector.shape_cast %91 : vector<1xf32> to vector<1x1xf32>
    %cst_39 = arith.constant 4.72589803E-4 : f32
    %93 = vector.broadcast %cst_39 : f32 to vector<1x1xf32>
    %94 = arith.mulf %92, %93 : vector<1x1xf32>
    %cst_40 = arith.constant dense<0.000000e+00> : vector<46xf32>
    %95 = vector.multi_reduction <add>, %79, %cst_40 [1] : vector<46x46xf32> to vector<46xf32>
    %96 = vector.shape_cast %95 : vector<46xf32> to vector<46x1xf32>
    %cst_41 = arith.constant dense<0.000000e+00> : vector<1xf32>
    %97 = vector.multi_reduction <add>, %96, %cst_41 [0] : vector<46x1xf32> to vector<1xf32>
    %98 = vector.shape_cast %97 : vector<1xf32> to vector<1x1xf32>
    %cst_42 = arith.constant 4.72589803E-4 : f32
    %99 = vector.broadcast %cst_42 : f32 to vector<1x1xf32>
    %100 = arith.mulf %98, %99 : vector<1x1xf32>
    %101 = vector.extract_strided_slice %10 {offsets = [96, 0], sizes = [48, 46], strides = [1, 1]} : vector<720x46xf32> to vector<48x46xf32>
    %cst_43 = arith.constant dense<0.000000e+00> : vector<46x46xf32>
    %102 = tpu.matmul %4, %101, %cst_43 {dimension_numbers = #tpu.dot_dimension_numbers<[1], [0], [0], [1], [0, 0, 1, 1], [], []>} : vector<46x48xf32>, vector<48x46xf32>, vector<46x46xf32> -> vector<46x46xf32>
    %103 = vector.extract_strided_slice %10 {offsets = [240, 0], sizes = [48, 46], strides = [1, 1]} : vector<720x46xf32> to vector<48x46xf32>
    %cst_44 = arith.constant dense<0.000000e+00> : vector<46x46xf32>
    %104 = tpu.matmul %4, %103, %cst_44 {dimension_numbers = #tpu.dot_dimension_numbers<[1], [0], [0], [1], [0, 0, 1, 1], [], []>} : vector<46x48xf32>, vector<48x46xf32>, vector<46x46xf32> -> vector<46x46xf32>
    %105 = vector.extract_strided_slice %10 {offsets = [384, 0], sizes = [48, 46], strides = [1, 1]} : vector<720x46xf32> to vector<48x46xf32>
    %cst_45 = arith.constant dense<0.000000e+00> : vector<46x46xf32>
    %106 = tpu.matmul %4, %105, %cst_45 {dimension_numbers = #tpu.dot_dimension_numbers<[1], [0], [0], [1], [0, 0, 1, 1], [], []>} : vector<46x48xf32>, vector<48x46xf32>, vector<46x46xf32> -> vector<46x46xf32>
    %107 = vector.extract_strided_slice %10 {offsets = [528, 0], sizes = [48, 46], strides = [1, 1]} : vector<720x46xf32> to vector<48x46xf32>
    %cst_46 = arith.constant dense<0.000000e+00> : vector<46x46xf32>
    %108 = tpu.matmul %4, %107, %cst_46 {dimension_numbers = #tpu.dot_dimension_numbers<[1], [0], [0], [1], [0, 0, 1, 1], [], []>} : vector<46x48xf32>, vector<48x46xf32>, vector<46x46xf32> -> vector<46x46xf32>
    %109 = vector.extract_strided_slice %10 {offsets = [672, 0], sizes = [48, 46], strides = [1, 1]} : vector<720x46xf32> to vector<48x46xf32>
    %cst_47 = arith.constant dense<0.000000e+00> : vector<46x46xf32>
    %110 = tpu.matmul %4, %109, %cst_47 {dimension_numbers = #tpu.dot_dimension_numbers<[1], [0], [0], [1], [0, 0, 1, 1], [], []>} : vector<46x48xf32>, vector<48x46xf32>, vector<46x46xf32> -> vector<46x46xf32>
    %111 = arith.mulf %102, %102 : vector<46x46xf32>
    %112 = arith.mulf %104, %104 : vector<46x46xf32>
    %113 = arith.mulf %102, %104 : vector<46x46xf32>
    %114 = arith.subf %106, %111 : vector<46x46xf32>
    %115 = arith.subf %108, %112 : vector<46x46xf32>
    %116 = arith.subf %110, %113 : vector<46x46xf32>
    %cst_48 = arith.constant 2.000000e+00 : f32
    %117 = vector.broadcast %cst_48 : f32 to vector<46x46xf32>
    %118 = arith.mulf %117, %116 : vector<46x46xf32>
    %cst_49 = arith.constant 8.99999984E-4 : f32
    %119 = vector.broadcast %cst_49 : f32 to vector<46x46xf32>
    %120 = arith.addf %118, %119 : vector<46x46xf32>
    %121 = arith.addf %114, %115 : vector<46x46xf32>
    %cst_50 = arith.constant 8.99999984E-4 : f32
    %122 = vector.broadcast %cst_50 : f32 to vector<46x46xf32>
    %123 = arith.addf %121, %122 : vector<46x46xf32>
    %124 = arith.divf %120, %123 : vector<46x46xf32>
    %cst_51 = arith.constant 2.000000e+00 : f32
    %125 = vector.broadcast %cst_51 : f32 to vector<46x46xf32>
    %126 = arith.mulf %125, %113 : vector<46x46xf32>
    %cst_52 = arith.constant 9.99999974E-5 : f32
    %127 = vector.broadcast %cst_52 : f32 to vector<46x46xf32>
    %128 = arith.addf %126, %127 : vector<46x46xf32>
    %129 = arith.addf %111, %112 : vector<46x46xf32>
    %cst_53 = arith.constant 9.99999974E-5 : f32
    %130 = vector.broadcast %cst_53 : f32 to vector<46x46xf32>
    %131 = arith.addf %129, %130 : vector<46x46xf32>
    %132 = arith.divf %128, %131 : vector<46x46xf32>
    %133 = arith.mulf %132, %124 : vector<46x46xf32>
    %cst_54 = arith.constant dense<0.000000e+00> : vector<46xf32>
    %134 = vector.multi_reduction <add>, %133, %cst_54 [1] : vector<46x46xf32> to vector<46xf32>
    %135 = vector.shape_cast %134 : vector<46xf32> to vector<46x1xf32>
    %cst_55 = arith.constant dense<0.000000e+00> : vector<1xf32>
    %136 = vector.multi_reduction <add>, %135, %cst_55 [0] : vector<46x1xf32> to vector<1xf32>
    %137 = vector.shape_cast %136 : vector<1xf32> to vector<1x1xf32>
    %cst_56 = arith.constant 4.72589803E-4 : f32
    %138 = vector.broadcast %cst_56 : f32 to vector<1x1xf32>
    %139 = arith.mulf %137, %138 : vector<1x1xf32>
    %cst_57 = arith.constant dense<0.000000e+00> : vector<46xf32>
    %140 = vector.multi_reduction <add>, %124, %cst_57 [1] : vector<46x46xf32> to vector<46xf32>
    %141 = vector.shape_cast %140 : vector<46xf32> to vector<46x1xf32>
    %cst_58 = arith.constant dense<0.000000e+00> : vector<1xf32>
    %142 = vector.multi_reduction <add>, %141, %cst_58 [0] : vector<46x1xf32> to vector<1xf32>
    %143 = vector.shape_cast %142 : vector<1xf32> to vector<1x1xf32>
    %cst_59 = arith.constant 4.72589803E-4 : f32
    %144 = vector.broadcast %cst_59 : f32 to vector<1x1xf32>
    %145 = arith.mulf %143, %144 : vector<1x1xf32>
    %146 = tpu.concatenate %49, %94, %139 in 1 : vector<1x1xf32>, vector<1x1xf32>, vector<1x1xf32> -> vector<1x3xf32>
    %147 = tpu.concatenate %55, %100, %145 in 1 : vector<1x1xf32>, vector<1x1xf32>, vector<1x1xf32> -> vector<1x3xf32>
    %c0_60 = arith.constant 0 : index
    %c0_61 = arith.constant 0 : index
    %148 = vector.load %arg13[%c0_60, %c0_61] : memref<24x48xf32, #tpu.memory_space<vmem>>, vector<24x48xf32>
    %c0_62 = arith.constant 0 : index
    %c0_63 = arith.constant 0 : index
    %149 = vector.load %arg17[%c0_62, %c0_63] : memref<48x24xf32, #tpu.memory_space<vmem>>, vector<48x24xf32>
    %150 = tpu.concatenate %1, %3 in 0 : vector<144x48xf32>, vector<144x48xf32> -> vector<288x48xf32>
    %cst_64 = arith.constant dense<0.000000e+00> : vector<288x24xf32>
    %151 = tpu.matmul %150, %149, %cst_64 {dimension_numbers = #tpu.dot_dimension_numbers<[1], [0], [0], [1], [0, 0, 1, 1], [], []>} : vector<288x48xf32>, vector<48x24xf32>, vector<288x24xf32> -> vector<288x24xf32>
    %152 = vector.extract_strided_slice %151 {offsets = [0, 0], sizes = [48, 24], strides = [1, 1]} : vector<288x24xf32> to vector<48x24xf32>
    %cst_65 = arith.constant dense<0.000000e+00> : vector<24x24xf32>
    %153 = tpu.matmul %148, %152, %cst_65 {dimension_numbers = #tpu.dot_dimension_numbers<[1], [0], [0], [1], [0, 0, 1, 1], [], []>} : vector<24x48xf32>, vector<48x24xf32>, vector<24x24xf32> -> vector<24x24xf32>
    %154 = vector.extract_strided_slice %151 {offsets = [144, 0], sizes = [48, 24], strides = [1, 1]} : vector<288x24xf32> to vector<48x24xf32>
    %cst_66 = arith.constant dense<0.000000e+00> : vector<24x24xf32>
    %155 = tpu.matmul %148, %154, %cst_66 {dimension_numbers = #tpu.dot_dimension_numbers<[1], [0], [0], [1], [0, 0, 1, 1], [], []>} : vector<24x48xf32>, vector<48x24xf32>, vector<24x24xf32> -> vector<24x24xf32>
    %156 = vector.extract_strided_slice %151 {offsets = [48, 0], sizes = [48, 24], strides = [1, 1]} : vector<288x24xf32> to vector<48x24xf32>
    %cst_67 = arith.constant dense<0.000000e+00> : vector<24x24xf32>
    %157 = tpu.matmul %148, %156, %cst_67 {dimension_numbers = #tpu.dot_dimension_numbers<[1], [0], [0], [1], [0, 0, 1, 1], [], []>} : vector<24x48xf32>, vector<48x24xf32>, vector<24x24xf32> -> vector<24x24xf32>
    %158 = vector.extract_strided_slice %151 {offsets = [192, 0], sizes = [48, 24], strides = [1, 1]} : vector<288x24xf32> to vector<48x24xf32>
    %cst_68 = arith.constant dense<0.000000e+00> : vector<24x24xf32>
    %159 = tpu.matmul %148, %158, %cst_68 {dimension_numbers = #tpu.dot_dimension_numbers<[1], [0], [0], [1], [0, 0, 1, 1], [], []>} : vector<24x48xf32>, vector<48x24xf32>, vector<24x24xf32> -> vector<24x24xf32>
    %160 = vector.extract_strided_slice %151 {offsets = [96, 0], sizes = [48, 24], strides = [1, 1]} : vector<288x24xf32> to vector<48x24xf32>
    %cst_69 = arith.constant dense<0.000000e+00> : vector<24x24xf32>
    %161 = tpu.matmul %148, %160, %cst_69 {dimension_numbers = #tpu.dot_dimension_numbers<[1], [0], [0], [1], [0, 0, 1, 1], [], []>} : vector<24x48xf32>, vector<48x24xf32>, vector<24x24xf32> -> vector<24x24xf32>
    %162 = vector.extract_strided_slice %151 {offsets = [240, 0], sizes = [48, 24], strides = [1, 1]} : vector<288x24xf32> to vector<48x24xf32>
    %cst_70 = arith.constant dense<0.000000e+00> : vector<24x24xf32>
    %163 = tpu.matmul %148, %162, %cst_70 {dimension_numbers = #tpu.dot_dimension_numbers<[1], [0], [0], [1], [0, 0, 1, 1], [], []>} : vector<24x48xf32>, vector<48x24xf32>, vector<24x24xf32> -> vector<24x24xf32>
    %164 = tpu.concatenate %153, %157, %161 in 0 : vector<24x24xf32>, vector<24x24xf32>, vector<24x24xf32> -> vector<72x24xf32>
    %165 = tpu.concatenate %155, %159, %163 in 0 : vector<24x24xf32>, vector<24x24xf32>, vector<24x24xf32> -> vector<72x24xf32>
    %c0_71 = arith.constant 0 : index
    %c0_72 = arith.constant 0 : index
    %166 = vector.load %arg4[%c0_71, %c0_72] : memref<22x24xf32, #tpu.memory_space<vmem>>, vector<22x24xf32>
    %c0_73 = arith.constant 0 : index
    %c0_74 = arith.constant 0 : index
    %167 = vector.load %arg9[%c0_73, %c0_74] : memref<24x22xf32, #tpu.memory_space<vmem>>, vector<24x22xf32>
    %168 = arith.mulf %164, %164 : vector<72x24xf32>
    %169 = arith.mulf %165, %165 : vector<72x24xf32>
    %170 = arith.mulf %164, %165 : vector<72x24xf32>
    %171 = tpu.concatenate %164, %165, %168, %169, %170 in 0 : vector<72x24xf32>, vector<72x24xf32>, vector<72x24xf32>, vector<72x24xf32>, vector<72x24xf32> -> vector<360x24xf32>
    %cst_75 = arith.constant dense<0.000000e+00> : vector<360x22xf32>
    %172 = tpu.matmul %171, %167, %cst_75 {dimension_numbers = #tpu.dot_dimension_numbers<[1], [0], [0], [1], [0, 0, 1, 1], [], []>} : vector<360x24xf32>, vector<24x22xf32>, vector<360x22xf32> -> vector<360x22xf32>
    %173 = vector.extract_strided_slice %172 {offsets = [0, 0], sizes = [24, 22], strides = [1, 1]} : vector<360x22xf32> to vector<24x22xf32>
    %cst_76 = arith.constant dense<0.000000e+00> : vector<22x22xf32>
    %174 = tpu.matmul %166, %173, %cst_76 {dimension_numbers = #tpu.dot_dimension_numbers<[1], [0], [0], [1], [0, 0, 1, 1], [], []>} : vector<22x24xf32>, vector<24x22xf32>, vector<22x22xf32> -> vector<22x22xf32>
    %175 = vector.extract_strided_slice %172 {offsets = [72, 0], sizes = [24, 22], strides = [1, 1]} : vector<360x22xf32> to vector<24x22xf32>
    %cst_77 = arith.constant dense<0.000000e+00> : vector<22x22xf32>
    %176 = tpu.matmul %166, %175, %cst_77 {dimension_numbers = #tpu.dot_dimension_numbers<[1], [0], [0], [1], [0, 0, 1, 1], [], []>} : vector<22x24xf32>, vector<24x22xf32>, vector<22x22xf32> -> vector<22x22xf32>
    %177 = vector.extract_strided_slice %172 {offsets = [144, 0], sizes = [24, 22], strides = [1, 1]} : vector<360x22xf32> to vector<24x22xf32>
    %cst_78 = arith.constant dense<0.000000e+00> : vector<22x22xf32>
    %178 = tpu.matmul %166, %177, %cst_78 {dimension_numbers = #tpu.dot_dimension_numbers<[1], [0], [0], [1], [0, 0, 1, 1], [], []>} : vector<22x24xf32>, vector<24x22xf32>, vector<22x22xf32> -> vector<22x22xf32>
    %179 = vector.extract_strided_slice %172 {offsets = [216, 0], sizes = [24, 22], strides = [1, 1]} : vector<360x22xf32> to vector<24x22xf32>
    %cst_79 = arith.constant dense<0.000000e+00> : vector<22x22xf32>
    %180 = tpu.matmul %166, %179, %cst_79 {dimension_numbers = #tpu.dot_dimension_numbers<[1], [0], [0], [1], [0, 0, 1, 1], [], []>} : vector<22x24xf32>, vector<24x22xf32>, vector<22x22xf32> -> vector<22x22xf32>
    %181 = vector.extract_strided_slice %172 {offsets = [288, 0], sizes = [24, 22], strides = [1, 1]} : vector<360x22xf32> to vector<24x22xf32>
    %cst_80 = arith.constant dense<0.000000e+00> : vector<22x22xf32>
    %182 = tpu.matmul %166, %181, %cst_80 {dimension_numbers = #tpu.dot_dimension_numbers<[1], [0], [0], [1], [0, 0, 1, 1], [], []>} : vector<22x24xf32>, vector<24x22xf32>, vector<22x22xf32> -> vector<22x22xf32>
    %183 = arith.mulf %174, %174 : vector<22x22xf32>
    %184 = arith.mulf %176, %176 : vector<22x22xf32>
    %185 = arith.mulf %174, %176 : vector<22x22xf32>
    %186 = arith.subf %178, %183 : vector<22x22xf32>
    %187 = arith.subf %180, %184 : vector<22x22xf32>
    %188 = arith.subf %182, %185 : vector<22x22xf32>
    %cst_81 = arith.constant 2.000000e+00 : f32
    %189 = vector.broadcast %cst_81 : f32 to vector<22x22xf32>
    %190 = arith.mulf %189, %188 : vector<22x22xf32>
    %cst_82 = arith.constant 8.99999984E-4 : f32
    %191 = vector.broadcast %cst_82 : f32 to vector<22x22xf32>
    %192 = arith.addf %190, %191 : vector<22x22xf32>
    %193 = arith.addf %186, %187 : vector<22x22xf32>
    %cst_83 = arith.constant 8.99999984E-4 : f32
    %194 = vector.broadcast %cst_83 : f32 to vector<22x22xf32>
    %195 = arith.addf %193, %194 : vector<22x22xf32>
    %196 = arith.divf %192, %195 : vector<22x22xf32>
    %cst_84 = arith.constant 2.000000e+00 : f32
    %197 = vector.broadcast %cst_84 : f32 to vector<22x22xf32>
    %198 = arith.mulf %197, %185 : vector<22x22xf32>
    %cst_85 = arith.constant 9.99999974E-5 : f32
    %199 = vector.broadcast %cst_85 : f32 to vector<22x22xf32>
    %200 = arith.addf %198, %199 : vector<22x22xf32>
    %201 = arith.addf %183, %184 : vector<22x22xf32>
    %cst_86 = arith.constant 9.99999974E-5 : f32
    %202 = vector.broadcast %cst_86 : f32 to vector<22x22xf32>
    %203 = arith.addf %201, %202 : vector<22x22xf32>
    %204 = arith.divf %200, %203 : vector<22x22xf32>
    %205 = arith.mulf %204, %196 : vector<22x22xf32>
    %cst_87 = arith.constant dense<0.000000e+00> : vector<22xf32>
    %206 = vector.multi_reduction <add>, %205, %cst_87 [1] : vector<22x22xf32> to vector<22xf32>
    %207 = vector.shape_cast %206 : vector<22xf32> to vector<22x1xf32>
    %cst_88 = arith.constant dense<0.000000e+00> : vector<1xf32>
    %208 = vector.multi_reduction <add>, %207, %cst_88 [0] : vector<22x1xf32> to vector<1xf32>
    %209 = vector.shape_cast %208 : vector<1xf32> to vector<1x1xf32>
    %cst_89 = arith.constant 0.00206611562 : f32
    %210 = vector.broadcast %cst_89 : f32 to vector<1x1xf32>
    %211 = arith.mulf %209, %210 : vector<1x1xf32>
    %cst_90 = arith.constant dense<0.000000e+00> : vector<22xf32>
    %212 = vector.multi_reduction <add>, %196, %cst_90 [1] : vector<22x22xf32> to vector<22xf32>
    %213 = vector.shape_cast %212 : vector<22xf32> to vector<22x1xf32>
    %cst_91 = arith.constant dense<0.000000e+00> : vector<1xf32>
    %214 = vector.multi_reduction <add>, %213, %cst_91 [0] : vector<22x1xf32> to vector<1xf32>
    %215 = vector.shape_cast %214 : vector<1xf32> to vector<1x1xf32>
    %cst_92 = arith.constant 0.00206611562 : f32
    %216 = vector.broadcast %cst_92 : f32 to vector<1x1xf32>
    %217 = arith.mulf %215, %216 : vector<1x1xf32>
    %218 = vector.extract_strided_slice %172 {offsets = [24, 0], sizes = [24, 22], strides = [1, 1]} : vector<360x22xf32> to vector<24x22xf32>
    %cst_93 = arith.constant dense<0.000000e+00> : vector<22x22xf32>
    %219 = tpu.matmul %166, %218, %cst_93 {dimension_numbers = #tpu.dot_dimension_numbers<[1], [0], [0], [1], [0, 0, 1, 1], [], []>} : vector<22x24xf32>, vector<24x22xf32>, vector<22x22xf32> -> vector<22x22xf32>
    %220 = vector.extract_strided_slice %172 {offsets = [96, 0], sizes = [24, 22], strides = [1, 1]} : vector<360x22xf32> to vector<24x22xf32>
    %cst_94 = arith.constant dense<0.000000e+00> : vector<22x22xf32>
    %221 = tpu.matmul %166, %220, %cst_94 {dimension_numbers = #tpu.dot_dimension_numbers<[1], [0], [0], [1], [0, 0, 1, 1], [], []>} : vector<22x24xf32>, vector<24x22xf32>, vector<22x22xf32> -> vector<22x22xf32>
    %222 = vector.extract_strided_slice %172 {offsets = [168, 0], sizes = [24, 22], strides = [1, 1]} : vector<360x22xf32> to vector<24x22xf32>
    %cst_95 = arith.constant dense<0.000000e+00> : vector<22x22xf32>
    %223 = tpu.matmul %166, %222, %cst_95 {dimension_numbers = #tpu.dot_dimension_numbers<[1], [0], [0], [1], [0, 0, 1, 1], [], []>} : vector<22x24xf32>, vector<24x22xf32>, vector<22x22xf32> -> vector<22x22xf32>
    %224 = vector.extract_strided_slice %172 {offsets = [240, 0], sizes = [24, 22], strides = [1, 1]} : vector<360x22xf32> to vector<24x22xf32>
    %cst_96 = arith.constant dense<0.000000e+00> : vector<22x22xf32>
    %225 = tpu.matmul %166, %224, %cst_96 {dimension_numbers = #tpu.dot_dimension_numbers<[1], [0], [0], [1], [0, 0, 1, 1], [], []>} : vector<22x24xf32>, vector<24x22xf32>, vector<22x22xf32> -> vector<22x22xf32>
    %226 = vector.extract_strided_slice %172 {offsets = [312, 0], sizes = [24, 22], strides = [1, 1]} : vector<360x22xf32> to vector<24x22xf32>
    %cst_97 = arith.constant dense<0.000000e+00> : vector<22x22xf32>
    %227 = tpu.matmul %166, %226, %cst_97 {dimension_numbers = #tpu.dot_dimension_numbers<[1], [0], [0], [1], [0, 0, 1, 1], [], []>} : vector<22x24xf32>, vector<24x22xf32>, vector<22x22xf32> -> vector<22x22xf32>
    %228 = arith.mulf %219, %219 : vector<22x22xf32>
    %229 = arith.mulf %221, %221 : vector<22x22xf32>
    %230 = arith.mulf %219, %221 : vector<22x22xf32>
    %231 = arith.subf %223, %228 : vector<22x22xf32>
    %232 = arith.subf %225, %229 : vector<22x22xf32>
    %233 = arith.subf %227, %230 : vector<22x22xf32>
    %cst_98 = arith.constant 2.000000e+00 : f32
    %234 = vector.broadcast %cst_98 : f32 to vector<22x22xf32>
    %235 = arith.mulf %234, %233 : vector<22x22xf32>
    %cst_99 = arith.constant 8.99999984E-4 : f32
    %236 = vector.broadcast %cst_99 : f32 to vector<22x22xf32>
    %237 = arith.addf %235, %236 : vector<22x22xf32>
    %238 = arith.addf %231, %232 : vector<22x22xf32>
    %cst_100 = arith.constant 8.99999984E-4 : f32
    %239 = vector.broadcast %cst_100 : f32 to vector<22x22xf32>
    %240 = arith.addf %238, %239 : vector<22x22xf32>
    %241 = arith.divf %237, %240 : vector<22x22xf32>
    %cst_101 = arith.constant 2.000000e+00 : f32
    %242 = vector.broadcast %cst_101 : f32 to vector<22x22xf32>
    %243 = arith.mulf %242, %230 : vector<22x22xf32>
    %cst_102 = arith.constant 9.99999974E-5 : f32
    %244 = vector.broadcast %cst_102 : f32 to vector<22x22xf32>
    %245 = arith.addf %243, %244 : vector<22x22xf32>
    %246 = arith.addf %228, %229 : vector<22x22xf32>
    %cst_103 = arith.constant 9.99999974E-5 : f32
    %247 = vector.broadcast %cst_103 : f32 to vector<22x22xf32>
    %248 = arith.addf %246, %247 : vector<22x22xf32>
    %249 = arith.divf %245, %248 : vector<22x22xf32>
    %250 = arith.mulf %249, %241 : vector<22x22xf32>
    %cst_104 = arith.constant dense<0.000000e+00> : vector<22xf32>
    %251 = vector.multi_reduction <add>, %250, %cst_104 [1] : vector<22x22xf32> to vector<22xf32>
    %252 = vector.shape_cast %251 : vector<22xf32> to vector<22x1xf32>
    %cst_105 = arith.constant dense<0.000000e+00> : vector<1xf32>
    %253 = vector.multi_reduction <add>, %252, %cst_105 [0] : vector<22x1xf32> to vector<1xf32>
    %254 = vector.shape_cast %253 : vector<1xf32> to vector<1x1xf32>
    %cst_106 = arith.constant 0.00206611562 : f32
    %255 = vector.broadcast %cst_106 : f32 to vector<1x1xf32>
    %256 = arith.mulf %254, %255 : vector<1x1xf32>
    %cst_107 = arith.constant dense<0.000000e+00> : vector<22xf32>
    %257 = vector.multi_reduction <add>, %241, %cst_107 [1] : vector<22x22xf32> to vector<22xf32>
    %258 = vector.shape_cast %257 : vector<22xf32> to vector<22x1xf32>
    %cst_108 = arith.constant dense<0.000000e+00> : vector<1xf32>
    %259 = vector.multi_reduction <add>, %258, %cst_108 [0] : vector<22x1xf32> to vector<1xf32>
    %260 = vector.shape_cast %259 : vector<1xf32> to vector<1x1xf32>
    %cst_109 = arith.constant 0.00206611562 : f32
    %261 = vector.broadcast %cst_109 : f32 to vector<1x1xf32>
    %262 = arith.mulf %260, %261 : vector<1x1xf32>
    %263 = vector.extract_strided_slice %172 {offsets = [48, 0], sizes = [24, 22], strides = [1, 1]} : vector<360x22xf32> to vector<24x22xf32>
    %cst_110 = arith.constant dense<0.000000e+00> : vector<22x22xf32>
    %264 = tpu.matmul %166, %263, %cst_110 {dimension_numbers = #tpu.dot_dimension_numbers<[1], [0], [0], [1], [0, 0, 1, 1], [], []>} : vector<22x24xf32>, vector<24x22xf32>, vector<22x22xf32> -> vector<22x22xf32>
    %265 = vector.extract_strided_slice %172 {offsets = [120, 0], sizes = [24, 22], strides = [1, 1]} : vector<360x22xf32> to vector<24x22xf32>
    %cst_111 = arith.constant dense<0.000000e+00> : vector<22x22xf32>
    %266 = tpu.matmul %166, %265, %cst_111 {dimension_numbers = #tpu.dot_dimension_numbers<[1], [0], [0], [1], [0, 0, 1, 1], [], []>} : vector<22x24xf32>, vector<24x22xf32>, vector<22x22xf32> -> vector<22x22xf32>
    %267 = vector.extract_strided_slice %172 {offsets = [192, 0], sizes = [24, 22], strides = [1, 1]} : vector<360x22xf32> to vector<24x22xf32>
    %cst_112 = arith.constant dense<0.000000e+00> : vector<22x22xf32>
    %268 = tpu.matmul %166, %267, %cst_112 {dimension_numbers = #tpu.dot_dimension_numbers<[1], [0], [0], [1], [0, 0, 1, 1], [], []>} : vector<22x24xf32>, vector<24x22xf32>, vector<22x22xf32> -> vector<22x22xf32>
    %269 = vector.extract_strided_slice %172 {offsets = [264, 0], sizes = [24, 22], strides = [1, 1]} : vector<360x22xf32> to vector<24x22xf32>
    %cst_113 = arith.constant dense<0.000000e+00> : vector<22x22xf32>
    %270 = tpu.matmul %166, %269, %cst_113 {dimension_numbers = #tpu.dot_dimension_numbers<[1], [0], [0], [1], [0, 0, 1, 1], [], []>} : vector<22x24xf32>, vector<24x22xf32>, vector<22x22xf32> -> vector<22x22xf32>
    %271 = vector.extract_strided_slice %172 {offsets = [336, 0], sizes = [24, 22], strides = [1, 1]} : vector<360x22xf32> to vector<24x22xf32>
    %cst_114 = arith.constant dense<0.000000e+00> : vector<22x22xf32>
    %272 = tpu.matmul %166, %271, %cst_114 {dimension_numbers = #tpu.dot_dimension_numbers<[1], [0], [0], [1], [0, 0, 1, 1], [], []>} : vector<22x24xf32>, vector<24x22xf32>, vector<22x22xf32> -> vector<22x22xf32>
    %273 = arith.mulf %264, %264 : vector<22x22xf32>
    %274 = arith.mulf %266, %266 : vector<22x22xf32>
    %275 = arith.mulf %264, %266 : vector<22x22xf32>
    %276 = arith.subf %268, %273 : vector<22x22xf32>
    %277 = arith.subf %270, %274 : vector<22x22xf32>
    %278 = arith.subf %272, %275 : vector<22x22xf32>
    %cst_115 = arith.constant 2.000000e+00 : f32
    %279 = vector.broadcast %cst_115 : f32 to vector<22x22xf32>
    %280 = arith.mulf %279, %278 : vector<22x22xf32>
    %cst_116 = arith.constant 8.99999984E-4 : f32
    %281 = vector.broadcast %cst_116 : f32 to vector<22x22xf32>
    %282 = arith.addf %280, %281 : vector<22x22xf32>
    %283 = arith.addf %276, %277 : vector<22x22xf32>
    %cst_117 = arith.constant 8.99999984E-4 : f32
    %284 = vector.broadcast %cst_117 : f32 to vector<22x22xf32>
    %285 = arith.addf %283, %284 : vector<22x22xf32>
    %286 = arith.divf %282, %285 : vector<22x22xf32>
    %cst_118 = arith.constant 2.000000e+00 : f32
    %287 = vector.broadcast %cst_118 : f32 to vector<22x22xf32>
    %288 = arith.mulf %287, %275 : vector<22x22xf32>
    %cst_119 = arith.constant 9.99999974E-5 : f32
    %289 = vector.broadcast %cst_119 : f32 to vector<22x22xf32>
    %290 = arith.addf %288, %289 : vector<22x22xf32>
    %291 = arith.addf %273, %274 : vector<22x22xf32>
    %cst_120 = arith.constant 9.99999974E-5 : f32
    %292 = vector.broadcast %cst_120 : f32 to vector<22x22xf32>
    %293 = arith.addf %291, %292 : vector<22x22xf32>
    %294 = arith.divf %290, %293 : vector<22x22xf32>
    %295 = arith.mulf %294, %286 : vector<22x22xf32>
    %cst_121 = arith.constant dense<0.000000e+00> : vector<22xf32>
    %296 = vector.multi_reduction <add>, %295, %cst_121 [1] : vector<22x22xf32> to vector<22xf32>
    %297 = vector.shape_cast %296 : vector<22xf32> to vector<22x1xf32>
    %cst_122 = arith.constant dense<0.000000e+00> : vector<1xf32>
    %298 = vector.multi_reduction <add>, %297, %cst_122 [0] : vector<22x1xf32> to vector<1xf32>
    %299 = vector.shape_cast %298 : vector<1xf32> to vector<1x1xf32>
    %cst_123 = arith.constant 0.00206611562 : f32
    %300 = vector.broadcast %cst_123 : f32 to vector<1x1xf32>
    %301 = arith.mulf %299, %300 : vector<1x1xf32>
    %cst_124 = arith.constant dense<0.000000e+00> : vector<22xf32>
    %302 = vector.multi_reduction <add>, %286, %cst_124 [1] : vector<22x22xf32> to vector<22xf32>
    %303 = vector.shape_cast %302 : vector<22xf32> to vector<22x1xf32>
    %cst_125 = arith.constant dense<0.000000e+00> : vector<1xf32>
    %304 = vector.multi_reduction <add>, %303, %cst_125 [0] : vector<22x1xf32> to vector<1xf32>
    %305 = vector.shape_cast %304 : vector<1xf32> to vector<1x1xf32>
    %cst_126 = arith.constant 0.00206611562 : f32
    %306 = vector.broadcast %cst_126 : f32 to vector<1x1xf32>
    %307 = arith.mulf %305, %306 : vector<1x1xf32>
    %308 = tpu.concatenate %211, %256, %301 in 1 : vector<1x1xf32>, vector<1x1xf32>, vector<1x1xf32> -> vector<1x3xf32>
    %309 = tpu.concatenate %217, %262, %307 in 1 : vector<1x1xf32>, vector<1x1xf32>, vector<1x1xf32> -> vector<1x3xf32>
    %c0_127 = arith.constant 0 : index
    %c0_128 = arith.constant 0 : index
    %310 = vector.load %arg14[%c0_127, %c0_128] : memref<12x24xf32, #tpu.memory_space<vmem>>, vector<12x24xf32>
    %c0_129 = arith.constant 0 : index
    %c0_130 = arith.constant 0 : index
    %311 = vector.load %arg18[%c0_129, %c0_130] : memref<24x12xf32, #tpu.memory_space<vmem>>, vector<24x12xf32>
    %312 = tpu.concatenate %164, %165 in 0 : vector<72x24xf32>, vector<72x24xf32> -> vector<144x24xf32>
    %cst_131 = arith.constant dense<0.000000e+00> : vector<144x12xf32>
    %313 = tpu.matmul %312, %311, %cst_131 {dimension_numbers = #tpu.dot_dimension_numbers<[1], [0], [0], [1], [0, 0, 1, 1], [], []>} : vector<144x24xf32>, vector<24x12xf32>, vector<144x12xf32> -> vector<144x12xf32>
    %314 = vector.extract_strided_slice %313 {offsets = [0, 0], sizes = [24, 12], strides = [1, 1]} : vector<144x12xf32> to vector<24x12xf32>
    %cst_132 = arith.constant dense<0.000000e+00> : vector<12x12xf32>
    %315 = tpu.matmul %310, %314, %cst_132 {dimension_numbers = #tpu.dot_dimension_numbers<[1], [0], [0], [1], [0, 0, 1, 1], [], []>} : vector<12x24xf32>, vector<24x12xf32>, vector<12x12xf32> -> vector<12x12xf32>
    %316 = vector.extract_strided_slice %313 {offsets = [72, 0], sizes = [24, 12], strides = [1, 1]} : vector<144x12xf32> to vector<24x12xf32>
    %cst_133 = arith.constant dense<0.000000e+00> : vector<12x12xf32>
    %317 = tpu.matmul %310, %316, %cst_133 {dimension_numbers = #tpu.dot_dimension_numbers<[1], [0], [0], [1], [0, 0, 1, 1], [], []>} : vector<12x24xf32>, vector<24x12xf32>, vector<12x12xf32> -> vector<12x12xf32>
    %318 = vector.extract_strided_slice %313 {offsets = [24, 0], sizes = [24, 12], strides = [1, 1]} : vector<144x12xf32> to vector<24x12xf32>
    %cst_134 = arith.constant dense<0.000000e+00> : vector<12x12xf32>
    %319 = tpu.matmul %310, %318, %cst_134 {dimension_numbers = #tpu.dot_dimension_numbers<[1], [0], [0], [1], [0, 0, 1, 1], [], []>} : vector<12x24xf32>, vector<24x12xf32>, vector<12x12xf32> -> vector<12x12xf32>
    %320 = vector.extract_strided_slice %313 {offsets = [96, 0], sizes = [24, 12], strides = [1, 1]} : vector<144x12xf32> to vector<24x12xf32>
    %cst_135 = arith.constant dense<0.000000e+00> : vector<12x12xf32>
    %321 = tpu.matmul %310, %320, %cst_135 {dimension_numbers = #tpu.dot_dimension_numbers<[1], [0], [0], [1], [0, 0, 1, 1], [], []>} : vector<12x24xf32>, vector<24x12xf32>, vector<12x12xf32> -> vector<12x12xf32>
    %322 = vector.extract_strided_slice %313 {offsets = [48, 0], sizes = [24, 12], strides = [1, 1]} : vector<144x12xf32> to vector<24x12xf32>
    %cst_136 = arith.constant dense<0.000000e+00> : vector<12x12xf32>
    %323 = tpu.matmul %310, %322, %cst_136 {dimension_numbers = #tpu.dot_dimension_numbers<[1], [0], [0], [1], [0, 0, 1, 1], [], []>} : vector<12x24xf32>, vector<24x12xf32>, vector<12x12xf32> -> vector<12x12xf32>
    %324 = vector.extract_strided_slice %313 {offsets = [120, 0], sizes = [24, 12], strides = [1, 1]} : vector<144x12xf32> to vector<24x12xf32>
    %cst_137 = arith.constant dense<0.000000e+00> : vector<12x12xf32>
    %325 = tpu.matmul %310, %324, %cst_137 {dimension_numbers = #tpu.dot_dimension_numbers<[1], [0], [0], [1], [0, 0, 1, 1], [], []>} : vector<12x24xf32>, vector<24x12xf32>, vector<12x12xf32> -> vector<12x12xf32>
    %326 = tpu.concatenate %315, %319, %323 in 0 : vector<12x12xf32>, vector<12x12xf32>, vector<12x12xf32> -> vector<36x12xf32>
    %327 = tpu.concatenate %317, %321, %325 in 0 : vector<12x12xf32>, vector<12x12xf32>, vector<12x12xf32> -> vector<36x12xf32>
    %c0_138 = arith.constant 0 : index
    %c0_139 = arith.constant 0 : index
    %328 = vector.load %arg5[%c0_138, %c0_139] : memref<10x12xf32, #tpu.memory_space<vmem>>, vector<10x12xf32>
    %c0_140 = arith.constant 0 : index
    %c0_141 = arith.constant 0 : index
    %329 = vector.load %arg10[%c0_140, %c0_141] : memref<12x10xf32, #tpu.memory_space<vmem>>, vector<12x10xf32>
    %330 = arith.mulf %326, %326 : vector<36x12xf32>
    %331 = arith.mulf %327, %327 : vector<36x12xf32>
    %332 = arith.mulf %326, %327 : vector<36x12xf32>
    %333 = tpu.concatenate %326, %327, %330, %331, %332 in 0 : vector<36x12xf32>, vector<36x12xf32>, vector<36x12xf32>, vector<36x12xf32>, vector<36x12xf32> -> vector<180x12xf32>
    %cst_142 = arith.constant dense<0.000000e+00> : vector<180x10xf32>
    %334 = tpu.matmul %333, %329, %cst_142 {dimension_numbers = #tpu.dot_dimension_numbers<[1], [0], [0], [1], [0, 0, 1, 1], [], []>} : vector<180x12xf32>, vector<12x10xf32>, vector<180x10xf32> -> vector<180x10xf32>
    %335 = vector.extract_strided_slice %334 {offsets = [0, 0], sizes = [12, 10], strides = [1, 1]} : vector<180x10xf32> to vector<12x10xf32>
    %cst_143 = arith.constant dense<0.000000e+00> : vector<10x10xf32>
    %336 = tpu.matmul %328, %335, %cst_143 {dimension_numbers = #tpu.dot_dimension_numbers<[1], [0], [0], [1], [0, 0, 1, 1], [], []>} : vector<10x12xf32>, vector<12x10xf32>, vector<10x10xf32> -> vector<10x10xf32>
    %337 = vector.extract_strided_slice %334 {offsets = [36, 0], sizes = [12, 10], strides = [1, 1]} : vector<180x10xf32> to vector<12x10xf32>
    %cst_144 = arith.constant dense<0.000000e+00> : vector<10x10xf32>
    %338 = tpu.matmul %328, %337, %cst_144 {dimension_numbers = #tpu.dot_dimension_numbers<[1], [0], [0], [1], [0, 0, 1, 1], [], []>} : vector<10x12xf32>, vector<12x10xf32>, vector<10x10xf32> -> vector<10x10xf32>
    %339 = vector.extract_strided_slice %334 {offsets = [72, 0], sizes = [12, 10], strides = [1, 1]} : vector<180x10xf32> to vector<12x10xf32>
    %cst_145 = arith.constant dense<0.000000e+00> : vector<10x10xf32>
    %340 = tpu.matmul %328, %339, %cst_145 {dimension_numbers = #tpu.dot_dimension_numbers<[1], [0], [0], [1], [0, 0, 1, 1], [], []>} : vector<10x12xf32>, vector<12x10xf32>, vector<10x10xf32> -> vector<10x10xf32>
    %341 = vector.extract_strided_slice %334 {offsets = [108, 0], sizes = [12, 10], strides = [1, 1]} : vector<180x10xf32> to vector<12x10xf32>
    %cst_146 = arith.constant dense<0.000000e+00> : vector<10x10xf32>
    %342 = tpu.matmul %328, %341, %cst_146 {dimension_numbers = #tpu.dot_dimension_numbers<[1], [0], [0], [1], [0, 0, 1, 1], [], []>} : vector<10x12xf32>, vector<12x10xf32>, vector<10x10xf32> -> vector<10x10xf32>
    %343 = vector.extract_strided_slice %334 {offsets = [144, 0], sizes = [12, 10], strides = [1, 1]} : vector<180x10xf32> to vector<12x10xf32>
    %cst_147 = arith.constant dense<0.000000e+00> : vector<10x10xf32>
    %344 = tpu.matmul %328, %343, %cst_147 {dimension_numbers = #tpu.dot_dimension_numbers<[1], [0], [0], [1], [0, 0, 1, 1], [], []>} : vector<10x12xf32>, vector<12x10xf32>, vector<10x10xf32> -> vector<10x10xf32>
    %345 = arith.mulf %336, %336 : vector<10x10xf32>
    %346 = arith.mulf %338, %338 : vector<10x10xf32>
    %347 = arith.mulf %336, %338 : vector<10x10xf32>
    %348 = arith.subf %340, %345 : vector<10x10xf32>
    %349 = arith.subf %342, %346 : vector<10x10xf32>
    %350 = arith.subf %344, %347 : vector<10x10xf32>
    %cst_148 = arith.constant 2.000000e+00 : f32
    %351 = vector.broadcast %cst_148 : f32 to vector<10x10xf32>
    %352 = arith.mulf %351, %350 : vector<10x10xf32>
    %cst_149 = arith.constant 8.99999984E-4 : f32
    %353 = vector.broadcast %cst_149 : f32 to vector<10x10xf32>
    %354 = arith.addf %352, %353 : vector<10x10xf32>
    %355 = arith.addf %348, %349 : vector<10x10xf32>
    %cst_150 = arith.constant 8.99999984E-4 : f32
    %356 = vector.broadcast %cst_150 : f32 to vector<10x10xf32>
    %357 = arith.addf %355, %356 : vector<10x10xf32>
    %358 = arith.divf %354, %357 : vector<10x10xf32>
    %cst_151 = arith.constant 2.000000e+00 : f32
    %359 = vector.broadcast %cst_151 : f32 to vector<10x10xf32>
    %360 = arith.mulf %359, %347 : vector<10x10xf32>
    %cst_152 = arith.constant 9.99999974E-5 : f32
    %361 = vector.broadcast %cst_152 : f32 to vector<10x10xf32>
    %362 = arith.addf %360, %361 : vector<10x10xf32>
    %363 = arith.addf %345, %346 : vector<10x10xf32>
    %cst_153 = arith.constant 9.99999974E-5 : f32
    %364 = vector.broadcast %cst_153 : f32 to vector<10x10xf32>
    %365 = arith.addf %363, %364 : vector<10x10xf32>
    %366 = arith.divf %362, %365 : vector<10x10xf32>
    %367 = arith.mulf %366, %358 : vector<10x10xf32>
    %cst_154 = arith.constant dense<0.000000e+00> : vector<10xf32>
    %368 = vector.multi_reduction <add>, %367, %cst_154 [1] : vector<10x10xf32> to vector<10xf32>
    %369 = vector.shape_cast %368 : vector<10xf32> to vector<10x1xf32>
    %cst_155 = arith.constant dense<0.000000e+00> : vector<1xf32>
    %370 = vector.multi_reduction <add>, %369, %cst_155 [0] : vector<10x1xf32> to vector<1xf32>
    %371 = vector.shape_cast %370 : vector<1xf32> to vector<1x1xf32>
    %cst_156 = arith.constant 0.00999999977 : f32
    %372 = vector.broadcast %cst_156 : f32 to vector<1x1xf32>
    %373 = arith.mulf %371, %372 : vector<1x1xf32>
    %cst_157 = arith.constant dense<0.000000e+00> : vector<10xf32>
    %374 = vector.multi_reduction <add>, %358, %cst_157 [1] : vector<10x10xf32> to vector<10xf32>
    %375 = vector.shape_cast %374 : vector<10xf32> to vector<10x1xf32>
    %cst_158 = arith.constant dense<0.000000e+00> : vector<1xf32>
    %376 = vector.multi_reduction <add>, %375, %cst_158 [0] : vector<10x1xf32> to vector<1xf32>
    %377 = vector.shape_cast %376 : vector<1xf32> to vector<1x1xf32>
    %cst_159 = arith.constant 0.00999999977 : f32
    %378 = vector.broadcast %cst_159 : f32 to vector<1x1xf32>
    %379 = arith.mulf %377, %378 : vector<1x1xf32>
    %380 = vector.extract_strided_slice %334 {offsets = [12, 0], sizes = [12, 10], strides = [1, 1]} : vector<180x10xf32> to vector<12x10xf32>
    %cst_160 = arith.constant dense<0.000000e+00> : vector<10x10xf32>
    %381 = tpu.matmul %328, %380, %cst_160 {dimension_numbers = #tpu.dot_dimension_numbers<[1], [0], [0], [1], [0, 0, 1, 1], [], []>} : vector<10x12xf32>, vector<12x10xf32>, vector<10x10xf32> -> vector<10x10xf32>
    %382 = vector.extract_strided_slice %334 {offsets = [48, 0], sizes = [12, 10], strides = [1, 1]} : vector<180x10xf32> to vector<12x10xf32>
    %cst_161 = arith.constant dense<0.000000e+00> : vector<10x10xf32>
    %383 = tpu.matmul %328, %382, %cst_161 {dimension_numbers = #tpu.dot_dimension_numbers<[1], [0], [0], [1], [0, 0, 1, 1], [], []>} : vector<10x12xf32>, vector<12x10xf32>, vector<10x10xf32> -> vector<10x10xf32>
    %384 = vector.extract_strided_slice %334 {offsets = [84, 0], sizes = [12, 10], strides = [1, 1]} : vector<180x10xf32> to vector<12x10xf32>
    %cst_162 = arith.constant dense<0.000000e+00> : vector<10x10xf32>
    %385 = tpu.matmul %328, %384, %cst_162 {dimension_numbers = #tpu.dot_dimension_numbers<[1], [0], [0], [1], [0, 0, 1, 1], [], []>} : vector<10x12xf32>, vector<12x10xf32>, vector<10x10xf32> -> vector<10x10xf32>
    %386 = vector.extract_strided_slice %334 {offsets = [120, 0], sizes = [12, 10], strides = [1, 1]} : vector<180x10xf32> to vector<12x10xf32>
    %cst_163 = arith.constant dense<0.000000e+00> : vector<10x10xf32>
    %387 = tpu.matmul %328, %386, %cst_163 {dimension_numbers = #tpu.dot_dimension_numbers<[1], [0], [0], [1], [0, 0, 1, 1], [], []>} : vector<10x12xf32>, vector<12x10xf32>, vector<10x10xf32> -> vector<10x10xf32>
    %388 = vector.extract_strided_slice %334 {offsets = [156, 0], sizes = [12, 10], strides = [1, 1]} : vector<180x10xf32> to vector<12x10xf32>
    %cst_164 = arith.constant dense<0.000000e+00> : vector<10x10xf32>
    %389 = tpu.matmul %328, %388, %cst_164 {dimension_numbers = #tpu.dot_dimension_numbers<[1], [0], [0], [1], [0, 0, 1, 1], [], []>} : vector<10x12xf32>, vector<12x10xf32>, vector<10x10xf32> -> vector<10x10xf32>
    %390 = arith.mulf %381, %381 : vector<10x10xf32>
    %391 = arith.mulf %383, %383 : vector<10x10xf32>
    %392 = arith.mulf %381, %383 : vector<10x10xf32>
    %393 = arith.subf %385, %390 : vector<10x10xf32>
    %394 = arith.subf %387, %391 : vector<10x10xf32>
    %395 = arith.subf %389, %392 : vector<10x10xf32>
    %cst_165 = arith.constant 2.000000e+00 : f32
    %396 = vector.broadcast %cst_165 : f32 to vector<10x10xf32>
    %397 = arith.mulf %396, %395 : vector<10x10xf32>
    %cst_166 = arith.constant 8.99999984E-4 : f32
    %398 = vector.broadcast %cst_166 : f32 to vector<10x10xf32>
    %399 = arith.addf %397, %398 : vector<10x10xf32>
    %400 = arith.addf %393, %394 : vector<10x10xf32>
    %cst_167 = arith.constant 8.99999984E-4 : f32
    %401 = vector.broadcast %cst_167 : f32 to vector<10x10xf32>
    %402 = arith.addf %400, %401 : vector<10x10xf32>
    %403 = arith.divf %399, %402 : vector<10x10xf32>
    %cst_168 = arith.constant 2.000000e+00 : f32
    %404 = vector.broadcast %cst_168 : f32 to vector<10x10xf32>
    %405 = arith.mulf %404, %392 : vector<10x10xf32>
    %cst_169 = arith.constant 9.99999974E-5 : f32
    %406 = vector.broadcast %cst_169 : f32 to vector<10x10xf32>
    %407 = arith.addf %405, %406 : vector<10x10xf32>
    %408 = arith.addf %390, %391 : vector<10x10xf32>
    %cst_170 = arith.constant 9.99999974E-5 : f32
    %409 = vector.broadcast %cst_170 : f32 to vector<10x10xf32>
    %410 = arith.addf %408, %409 : vector<10x10xf32>
    %411 = arith.divf %407, %410 : vector<10x10xf32>
    %412 = arith.mulf %411, %403 : vector<10x10xf32>
    %cst_171 = arith.constant dense<0.000000e+00> : vector<10xf32>
    %413 = vector.multi_reduction <add>, %412, %cst_171 [1] : vector<10x10xf32> to vector<10xf32>
    %414 = vector.shape_cast %413 : vector<10xf32> to vector<10x1xf32>
    %cst_172 = arith.constant dense<0.000000e+00> : vector<1xf32>
    %415 = vector.multi_reduction <add>, %414, %cst_172 [0] : vector<10x1xf32> to vector<1xf32>
    %416 = vector.shape_cast %415 : vector<1xf32> to vector<1x1xf32>
    %cst_173 = arith.constant 0.00999999977 : f32
    %417 = vector.broadcast %cst_173 : f32 to vector<1x1xf32>
    %418 = arith.mulf %416, %417 : vector<1x1xf32>
    %cst_174 = arith.constant dense<0.000000e+00> : vector<10xf32>
    %419 = vector.multi_reduction <add>, %403, %cst_174 [1] : vector<10x10xf32> to vector<10xf32>
    %420 = vector.shape_cast %419 : vector<10xf32> to vector<10x1xf32>
    %cst_175 = arith.constant dense<0.000000e+00> : vector<1xf32>
    %421 = vector.multi_reduction <add>, %420, %cst_175 [0] : vector<10x1xf32> to vector<1xf32>
    %422 = vector.shape_cast %421 : vector<1xf32> to vector<1x1xf32>
    %cst_176 = arith.constant 0.00999999977 : f32
    %423 = vector.broadcast %cst_176 : f32 to vector<1x1xf32>
    %424 = arith.mulf %422, %423 : vector<1x1xf32>
    %425 = vector.extract_strided_slice %334 {offsets = [24, 0], sizes = [12, 10], strides = [1, 1]} : vector<180x10xf32> to vector<12x10xf32>
    %cst_177 = arith.constant dense<0.000000e+00> : vector<10x10xf32>
    %426 = tpu.matmul %328, %425, %cst_177 {dimension_numbers = #tpu.dot_dimension_numbers<[1], [0], [0], [1], [0, 0, 1, 1], [], []>} : vector<10x12xf32>, vector<12x10xf32>, vector<10x10xf32> -> vector<10x10xf32>
    %427 = vector.extract_strided_slice %334 {offsets = [60, 0], sizes = [12, 10], strides = [1, 1]} : vector<180x10xf32> to vector<12x10xf32>
    %cst_178 = arith.constant dense<0.000000e+00> : vector<10x10xf32>
    %428 = tpu.matmul %328, %427, %cst_178 {dimension_numbers = #tpu.dot_dimension_numbers<[1], [0], [0], [1], [0, 0, 1, 1], [], []>} : vector<10x12xf32>, vector<12x10xf32>, vector<10x10xf32> -> vector<10x10xf32>
    %429 = vector.extract_strided_slice %334 {offsets = [96, 0], sizes = [12, 10], strides = [1, 1]} : vector<180x10xf32> to vector<12x10xf32>
    %cst_179 = arith.constant dense<0.000000e+00> : vector<10x10xf32>
    %430 = tpu.matmul %328, %429, %cst_179 {dimension_numbers = #tpu.dot_dimension_numbers<[1], [0], [0], [1], [0, 0, 1, 1], [], []>} : vector<10x12xf32>, vector<12x10xf32>, vector<10x10xf32> -> vector<10x10xf32>
    %431 = vector.extract_strided_slice %334 {offsets = [132, 0], sizes = [12, 10], strides = [1, 1]} : vector<180x10xf32> to vector<12x10xf32>
    %cst_180 = arith.constant dense<0.000000e+00> : vector<10x10xf32>
    %432 = tpu.matmul %328, %431, %cst_180 {dimension_numbers = #tpu.dot_dimension_numbers<[1], [0], [0], [1], [0, 0, 1, 1], [], []>} : vector<10x12xf32>, vector<12x10xf32>, vector<10x10xf32> -> vector<10x10xf32>
    %433 = vector.extract_strided_slice %334 {offsets = [168, 0], sizes = [12, 10], strides = [1, 1]} : vector<180x10xf32> to vector<12x10xf32>
    %cst_181 = arith.constant dense<0.000000e+00> : vector<10x10xf32>
    %434 = tpu.matmul %328, %433, %cst_181 {dimension_numbers = #tpu.dot_dimension_numbers<[1], [0], [0], [1], [0, 0, 1, 1], [], []>} : vector<10x12xf32>, vector<12x10xf32>, vector<10x10xf32> -> vector<10x10xf32>
    %435 = arith.mulf %426, %426 : vector<10x10xf32>
    %436 = arith.mulf %428, %428 : vector<10x10xf32>
    %437 = arith.mulf %426, %428 : vector<10x10xf32>
    %438 = arith.subf %430, %435 : vector<10x10xf32>
    %439 = arith.subf %432, %436 : vector<10x10xf32>
    %440 = arith.subf %434, %437 : vector<10x10xf32>
    %cst_182 = arith.constant 2.000000e+00 : f32
    %441 = vector.broadcast %cst_182 : f32 to vector<10x10xf32>
    %442 = arith.mulf %441, %440 : vector<10x10xf32>
    %cst_183 = arith.constant 8.99999984E-4 : f32
    %443 = vector.broadcast %cst_183 : f32 to vector<10x10xf32>
    %444 = arith.addf %442, %443 : vector<10x10xf32>
    %445 = arith.addf %438, %439 : vector<10x10xf32>
    %cst_184 = arith.constant 8.99999984E-4 : f32
    %446 = vector.broadcast %cst_184 : f32 to vector<10x10xf32>
    %447 = arith.addf %445, %446 : vector<10x10xf32>
    %448 = arith.divf %444, %447 : vector<10x10xf32>
    %cst_185 = arith.constant 2.000000e+00 : f32
    %449 = vector.broadcast %cst_185 : f32 to vector<10x10xf32>
    %450 = arith.mulf %449, %437 : vector<10x10xf32>
    %cst_186 = arith.constant 9.99999974E-5 : f32
    %451 = vector.broadcast %cst_186 : f32 to vector<10x10xf32>
    %452 = arith.addf %450, %451 : vector<10x10xf32>
    %453 = arith.addf %435, %436 : vector<10x10xf32>
    %cst_187 = arith.constant 9.99999974E-5 : f32
    %454 = vector.broadcast %cst_187 : f32 to vector<10x10xf32>
    %455 = arith.addf %453, %454 : vector<10x10xf32>
    %456 = arith.divf %452, %455 : vector<10x10xf32>
    %457 = arith.mulf %456, %448 : vector<10x10xf32>
    %cst_188 = arith.constant dense<0.000000e+00> : vector<10xf32>
    %458 = vector.multi_reduction <add>, %457, %cst_188 [1] : vector<10x10xf32> to vector<10xf32>
    %459 = vector.shape_cast %458 : vector<10xf32> to vector<10x1xf32>
    %cst_189 = arith.constant dense<0.000000e+00> : vector<1xf32>
    %460 = vector.multi_reduction <add>, %459, %cst_189 [0] : vector<10x1xf32> to vector<1xf32>
    %461 = vector.shape_cast %460 : vector<1xf32> to vector<1x1xf32>
    %cst_190 = arith.constant 0.00999999977 : f32
    %462 = vector.broadcast %cst_190 : f32 to vector<1x1xf32>
    %463 = arith.mulf %461, %462 : vector<1x1xf32>
    %cst_191 = arith.constant dense<0.000000e+00> : vector<10xf32>
    %464 = vector.multi_reduction <add>, %448, %cst_191 [1] : vector<10x10xf32> to vector<10xf32>
    %465 = vector.shape_cast %464 : vector<10xf32> to vector<10x1xf32>
    %cst_192 = arith.constant dense<0.000000e+00> : vector<1xf32>
    %466 = vector.multi_reduction <add>, %465, %cst_192 [0] : vector<10x1xf32> to vector<1xf32>
    %467 = vector.shape_cast %466 : vector<1xf32> to vector<1x1xf32>
    %cst_193 = arith.constant 0.00999999977 : f32
    %468 = vector.broadcast %cst_193 : f32 to vector<1x1xf32>
    %469 = arith.mulf %467, %468 : vector<1x1xf32>
    %470 = tpu.concatenate %373, %418, %463 in 1 : vector<1x1xf32>, vector<1x1xf32>, vector<1x1xf32> -> vector<1x3xf32>
    %471 = tpu.concatenate %379, %424, %469 in 1 : vector<1x1xf32>, vector<1x1xf32>, vector<1x1xf32> -> vector<1x3xf32>
    %c0_194 = arith.constant 0 : index
    %c0_195 = arith.constant 0 : index
    %472 = vector.load %arg15[%c0_194, %c0_195] : memref<6x12xf32, #tpu.memory_space<vmem>>, vector<6x12xf32>
    %c0_196 = arith.constant 0 : index
    %c0_197 = arith.constant 0 : index
    %473 = vector.load %arg19[%c0_196, %c0_197] : memref<12x6xf32, #tpu.memory_space<vmem>>, vector<12x6xf32>
    %474 = tpu.concatenate %326, %327 in 0 : vector<36x12xf32>, vector<36x12xf32> -> vector<72x12xf32>
    %cst_198 = arith.constant dense<0.000000e+00> : vector<72x6xf32>
    %475 = tpu.matmul %474, %473, %cst_198 {dimension_numbers = #tpu.dot_dimension_numbers<[1], [0], [0], [1], [0, 0, 1, 1], [], []>} : vector<72x12xf32>, vector<12x6xf32>, vector<72x6xf32> -> vector<72x6xf32>
    %476 = vector.extract_strided_slice %475 {offsets = [0, 0], sizes = [12, 6], strides = [1, 1]} : vector<72x6xf32> to vector<12x6xf32>
    %cst_199 = arith.constant dense<0.000000e+00> : vector<6x6xf32>
    %477 = tpu.matmul %472, %476, %cst_199 {dimension_numbers = #tpu.dot_dimension_numbers<[1], [0], [0], [1], [0, 0, 1, 1], [], []>} : vector<6x12xf32>, vector<12x6xf32>, vector<6x6xf32> -> vector<6x6xf32>
    %478 = vector.extract_strided_slice %475 {offsets = [36, 0], sizes = [12, 6], strides = [1, 1]} : vector<72x6xf32> to vector<12x6xf32>
    %cst_200 = arith.constant dense<0.000000e+00> : vector<6x6xf32>
    %479 = tpu.matmul %472, %478, %cst_200 {dimension_numbers = #tpu.dot_dimension_numbers<[1], [0], [0], [1], [0, 0, 1, 1], [], []>} : vector<6x12xf32>, vector<12x6xf32>, vector<6x6xf32> -> vector<6x6xf32>
    %480 = vector.extract_strided_slice %475 {offsets = [12, 0], sizes = [12, 6], strides = [1, 1]} : vector<72x6xf32> to vector<12x6xf32>
    %cst_201 = arith.constant dense<0.000000e+00> : vector<6x6xf32>
    %481 = tpu.matmul %472, %480, %cst_201 {dimension_numbers = #tpu.dot_dimension_numbers<[1], [0], [0], [1], [0, 0, 1, 1], [], []>} : vector<6x12xf32>, vector<12x6xf32>, vector<6x6xf32> -> vector<6x6xf32>
    %482 = vector.extract_strided_slice %475 {offsets = [48, 0], sizes = [12, 6], strides = [1, 1]} : vector<72x6xf32> to vector<12x6xf32>
    %cst_202 = arith.constant dense<0.000000e+00> : vector<6x6xf32>
    %483 = tpu.matmul %472, %482, %cst_202 {dimension_numbers = #tpu.dot_dimension_numbers<[1], [0], [0], [1], [0, 0, 1, 1], [], []>} : vector<6x12xf32>, vector<12x6xf32>, vector<6x6xf32> -> vector<6x6xf32>
    %484 = vector.extract_strided_slice %475 {offsets = [24, 0], sizes = [12, 6], strides = [1, 1]} : vector<72x6xf32> to vector<12x6xf32>
    %cst_203 = arith.constant dense<0.000000e+00> : vector<6x6xf32>
    %485 = tpu.matmul %472, %484, %cst_203 {dimension_numbers = #tpu.dot_dimension_numbers<[1], [0], [0], [1], [0, 0, 1, 1], [], []>} : vector<6x12xf32>, vector<12x6xf32>, vector<6x6xf32> -> vector<6x6xf32>
    %486 = vector.extract_strided_slice %475 {offsets = [60, 0], sizes = [12, 6], strides = [1, 1]} : vector<72x6xf32> to vector<12x6xf32>
    %cst_204 = arith.constant dense<0.000000e+00> : vector<6x6xf32>
    %487 = tpu.matmul %472, %486, %cst_204 {dimension_numbers = #tpu.dot_dimension_numbers<[1], [0], [0], [1], [0, 0, 1, 1], [], []>} : vector<6x12xf32>, vector<12x6xf32>, vector<6x6xf32> -> vector<6x6xf32>
    %488 = tpu.concatenate %477, %481, %485 in 0 : vector<6x6xf32>, vector<6x6xf32>, vector<6x6xf32> -> vector<18x6xf32>
    %489 = tpu.concatenate %479, %483, %487 in 0 : vector<6x6xf32>, vector<6x6xf32>, vector<6x6xf32> -> vector<18x6xf32>
    %c0_205 = arith.constant 0 : index
    %c0_206 = arith.constant 0 : index
    %490 = vector.load %arg6[%c0_205, %c0_206] : memref<4x6xf32, #tpu.memory_space<vmem>>, vector<4x6xf32>
    %c0_207 = arith.constant 0 : index
    %c0_208 = arith.constant 0 : index
    %491 = vector.load %arg11[%c0_207, %c0_208] : memref<6x4xf32, #tpu.memory_space<vmem>>, vector<6x4xf32>
    %492 = arith.mulf %488, %488 : vector<18x6xf32>
    %493 = arith.mulf %489, %489 : vector<18x6xf32>
    %494 = arith.mulf %488, %489 : vector<18x6xf32>
    %495 = tpu.concatenate %488, %489, %492, %493, %494 in 0 : vector<18x6xf32>, vector<18x6xf32>, vector<18x6xf32>, vector<18x6xf32>, vector<18x6xf32> -> vector<90x6xf32>
    %cst_209 = arith.constant dense<0.000000e+00> : vector<90x4xf32>
    %496 = tpu.matmul %495, %491, %cst_209 {dimension_numbers = #tpu.dot_dimension_numbers<[1], [0], [0], [1], [0, 0, 1, 1], [], []>} : vector<90x6xf32>, vector<6x4xf32>, vector<90x4xf32> -> vector<90x4xf32>
    %497 = vector.extract_strided_slice %496 {offsets = [0, 0], sizes = [6, 4], strides = [1, 1]} : vector<90x4xf32> to vector<6x4xf32>
    %cst_210 = arith.constant dense<0.000000e+00> : vector<4x4xf32>
    %498 = tpu.matmul %490, %497, %cst_210 {dimension_numbers = #tpu.dot_dimension_numbers<[1], [0], [0], [1], [0, 0, 1, 1], [], []>} : vector<4x6xf32>, vector<6x4xf32>, vector<4x4xf32> -> vector<4x4xf32>
    %499 = vector.extract_strided_slice %496 {offsets = [18, 0], sizes = [6, 4], strides = [1, 1]} : vector<90x4xf32> to vector<6x4xf32>
    %cst_211 = arith.constant dense<0.000000e+00> : vector<4x4xf32>
    %500 = tpu.matmul %490, %499, %cst_211 {dimension_numbers = #tpu.dot_dimension_numbers<[1], [0], [0], [1], [0, 0, 1, 1], [], []>} : vector<4x6xf32>, vector<6x4xf32>, vector<4x4xf32> -> vector<4x4xf32>
    %501 = vector.extract_strided_slice %496 {offsets = [36, 0], sizes = [6, 4], strides = [1, 1]} : vector<90x4xf32> to vector<6x4xf32>
    %cst_212 = arith.constant dense<0.000000e+00> : vector<4x4xf32>
    %502 = tpu.matmul %490, %501, %cst_212 {dimension_numbers = #tpu.dot_dimension_numbers<[1], [0], [0], [1], [0, 0, 1, 1], [], []>} : vector<4x6xf32>, vector<6x4xf32>, vector<4x4xf32> -> vector<4x4xf32>
    %503 = vector.extract_strided_slice %496 {offsets = [54, 0], sizes = [6, 4], strides = [1, 1]} : vector<90x4xf32> to vector<6x4xf32>
    %cst_213 = arith.constant dense<0.000000e+00> : vector<4x4xf32>
    %504 = tpu.matmul %490, %503, %cst_213 {dimension_numbers = #tpu.dot_dimension_numbers<[1], [0], [0], [1], [0, 0, 1, 1], [], []>} : vector<4x6xf32>, vector<6x4xf32>, vector<4x4xf32> -> vector<4x4xf32>
    %505 = vector.extract_strided_slice %496 {offsets = [72, 0], sizes = [6, 4], strides = [1, 1]} : vector<90x4xf32> to vector<6x4xf32>
    %cst_214 = arith.constant dense<0.000000e+00> : vector<4x4xf32>
    %506 = tpu.matmul %490, %505, %cst_214 {dimension_numbers = #tpu.dot_dimension_numbers<[1], [0], [0], [1], [0, 0, 1, 1], [], []>} : vector<4x6xf32>, vector<6x4xf32>, vector<4x4xf32> -> vector<4x4xf32>
    %507 = arith.mulf %498, %498 : vector<4x4xf32>
    %508 = arith.mulf %500, %500 : vector<4x4xf32>
    %509 = arith.mulf %498, %500 : vector<4x4xf32>
    %510 = arith.subf %502, %507 : vector<4x4xf32>
    %511 = arith.subf %504, %508 : vector<4x4xf32>
    %512 = arith.subf %506, %509 : vector<4x4xf32>
    %cst_215 = arith.constant 2.000000e+00 : f32
    %513 = vector.broadcast %cst_215 : f32 to vector<4x4xf32>
    %514 = arith.mulf %513, %512 : vector<4x4xf32>
    %cst_216 = arith.constant 8.99999984E-4 : f32
    %515 = vector.broadcast %cst_216 : f32 to vector<4x4xf32>
    %516 = arith.addf %514, %515 : vector<4x4xf32>
    %517 = arith.addf %510, %511 : vector<4x4xf32>
    %cst_217 = arith.constant 8.99999984E-4 : f32
    %518 = vector.broadcast %cst_217 : f32 to vector<4x4xf32>
    %519 = arith.addf %517, %518 : vector<4x4xf32>
    %520 = arith.divf %516, %519 : vector<4x4xf32>
    %cst_218 = arith.constant 2.000000e+00 : f32
    %521 = vector.broadcast %cst_218 : f32 to vector<4x4xf32>
    %522 = arith.mulf %521, %509 : vector<4x4xf32>
    %cst_219 = arith.constant 9.99999974E-5 : f32
    %523 = vector.broadcast %cst_219 : f32 to vector<4x4xf32>
    %524 = arith.addf %522, %523 : vector<4x4xf32>
    %525 = arith.addf %507, %508 : vector<4x4xf32>
    %cst_220 = arith.constant 9.99999974E-5 : f32
    %526 = vector.broadcast %cst_220 : f32 to vector<4x4xf32>
    %527 = arith.addf %525, %526 : vector<4x4xf32>
    %528 = arith.divf %524, %527 : vector<4x4xf32>
    %529 = arith.mulf %528, %520 : vector<4x4xf32>
    %cst_221 = arith.constant dense<0.000000e+00> : vector<4xf32>
    %530 = vector.multi_reduction <add>, %529, %cst_221 [1] : vector<4x4xf32> to vector<4xf32>
    %531 = vector.shape_cast %530 : vector<4xf32> to vector<4x1xf32>
    %cst_222 = arith.constant dense<0.000000e+00> : vector<1xf32>
    %532 = vector.multi_reduction <add>, %531, %cst_222 [0] : vector<4x1xf32> to vector<1xf32>
    %533 = vector.shape_cast %532 : vector<1xf32> to vector<1x1xf32>
    %cst_223 = arith.constant 6.250000e-02 : f32
    %534 = vector.broadcast %cst_223 : f32 to vector<1x1xf32>
    %535 = arith.mulf %533, %534 : vector<1x1xf32>
    %cst_224 = arith.constant dense<0.000000e+00> : vector<4xf32>
    %536 = vector.multi_reduction <add>, %520, %cst_224 [1] : vector<4x4xf32> to vector<4xf32>
    %537 = vector.shape_cast %536 : vector<4xf32> to vector<4x1xf32>
    %cst_225 = arith.constant dense<0.000000e+00> : vector<1xf32>
    %538 = vector.multi_reduction <add>, %537, %cst_225 [0] : vector<4x1xf32> to vector<1xf32>
    %539 = vector.shape_cast %538 : vector<1xf32> to vector<1x1xf32>
    %cst_226 = arith.constant 6.250000e-02 : f32
    %540 = vector.broadcast %cst_226 : f32 to vector<1x1xf32>
    %541 = arith.mulf %539, %540 : vector<1x1xf32>
    %542 = vector.extract_strided_slice %496 {offsets = [6, 0], sizes = [6, 4], strides = [1, 1]} : vector<90x4xf32> to vector<6x4xf32>
    %cst_227 = arith.constant dense<0.000000e+00> : vector<4x4xf32>
    %543 = tpu.matmul %490, %542, %cst_227 {dimension_numbers = #tpu.dot_dimension_numbers<[1], [0], [0], [1], [0, 0, 1, 1], [], []>} : vector<4x6xf32>, vector<6x4xf32>, vector<4x4xf32> -> vector<4x4xf32>
    %544 = vector.extract_strided_slice %496 {offsets = [24, 0], sizes = [6, 4], strides = [1, 1]} : vector<90x4xf32> to vector<6x4xf32>
    %cst_228 = arith.constant dense<0.000000e+00> : vector<4x4xf32>
    %545 = tpu.matmul %490, %544, %cst_228 {dimension_numbers = #tpu.dot_dimension_numbers<[1], [0], [0], [1], [0, 0, 1, 1], [], []>} : vector<4x6xf32>, vector<6x4xf32>, vector<4x4xf32> -> vector<4x4xf32>
    %546 = vector.extract_strided_slice %496 {offsets = [42, 0], sizes = [6, 4], strides = [1, 1]} : vector<90x4xf32> to vector<6x4xf32>
    %cst_229 = arith.constant dense<0.000000e+00> : vector<4x4xf32>
    %547 = tpu.matmul %490, %546, %cst_229 {dimension_numbers = #tpu.dot_dimension_numbers<[1], [0], [0], [1], [0, 0, 1, 1], [], []>} : vector<4x6xf32>, vector<6x4xf32>, vector<4x4xf32> -> vector<4x4xf32>
    %548 = vector.extract_strided_slice %496 {offsets = [60, 0], sizes = [6, 4], strides = [1, 1]} : vector<90x4xf32> to vector<6x4xf32>
    %cst_230 = arith.constant dense<0.000000e+00> : vector<4x4xf32>
    %549 = tpu.matmul %490, %548, %cst_230 {dimension_numbers = #tpu.dot_dimension_numbers<[1], [0], [0], [1], [0, 0, 1, 1], [], []>} : vector<4x6xf32>, vector<6x4xf32>, vector<4x4xf32> -> vector<4x4xf32>
    %550 = vector.extract_strided_slice %496 {offsets = [78, 0], sizes = [6, 4], strides = [1, 1]} : vector<90x4xf32> to vector<6x4xf32>
    %cst_231 = arith.constant dense<0.000000e+00> : vector<4x4xf32>
    %551 = tpu.matmul %490, %550, %cst_231 {dimension_numbers = #tpu.dot_dimension_numbers<[1], [0], [0], [1], [0, 0, 1, 1], [], []>} : vector<4x6xf32>, vector<6x4xf32>, vector<4x4xf32> -> vector<4x4xf32>
    %552 = arith.mulf %543, %543 : vector<4x4xf32>
    %553 = arith.mulf %545, %545 : vector<4x4xf32>
    %554 = arith.mulf %543, %545 : vector<4x4xf32>
    %555 = arith.subf %547, %552 : vector<4x4xf32>
    %556 = arith.subf %549, %553 : vector<4x4xf32>
    %557 = arith.subf %551, %554 : vector<4x4xf32>
    %cst_232 = arith.constant 2.000000e+00 : f32
    %558 = vector.broadcast %cst_232 : f32 to vector<4x4xf32>
    %559 = arith.mulf %558, %557 : vector<4x4xf32>
    %cst_233 = arith.constant 8.99999984E-4 : f32
    %560 = vector.broadcast %cst_233 : f32 to vector<4x4xf32>
    %561 = arith.addf %559, %560 : vector<4x4xf32>
    %562 = arith.addf %555, %556 : vector<4x4xf32>
    %cst_234 = arith.constant 8.99999984E-4 : f32
    %563 = vector.broadcast %cst_234 : f32 to vector<4x4xf32>
    %564 = arith.addf %562, %563 : vector<4x4xf32>
    %565 = arith.divf %561, %564 : vector<4x4xf32>
    %cst_235 = arith.constant 2.000000e+00 : f32
    %566 = vector.broadcast %cst_235 : f32 to vector<4x4xf32>
    %567 = arith.mulf %566, %554 : vector<4x4xf32>
    %cst_236 = arith.constant 9.99999974E-5 : f32
    %568 = vector.broadcast %cst_236 : f32 to vector<4x4xf32>
    %569 = arith.addf %567, %568 : vector<4x4xf32>
    %570 = arith.addf %552, %553 : vector<4x4xf32>
    %cst_237 = arith.constant 9.99999974E-5 : f32
    %571 = vector.broadcast %cst_237 : f32 to vector<4x4xf32>
    %572 = arith.addf %570, %571 : vector<4x4xf32>
    %573 = arith.divf %569, %572 : vector<4x4xf32>
    %574 = arith.mulf %573, %565 : vector<4x4xf32>
    %cst_238 = arith.constant dense<0.000000e+00> : vector<4xf32>
    %575 = vector.multi_reduction <add>, %574, %cst_238 [1] : vector<4x4xf32> to vector<4xf32>
    %576 = vector.shape_cast %575 : vector<4xf32> to vector<4x1xf32>
    %cst_239 = arith.constant dense<0.000000e+00> : vector<1xf32>
    %577 = vector.multi_reduction <add>, %576, %cst_239 [0] : vector<4x1xf32> to vector<1xf32>
    %578 = vector.shape_cast %577 : vector<1xf32> to vector<1x1xf32>
    %cst_240 = arith.constant 6.250000e-02 : f32
    %579 = vector.broadcast %cst_240 : f32 to vector<1x1xf32>
    %580 = arith.mulf %578, %579 : vector<1x1xf32>
    %cst_241 = arith.constant dense<0.000000e+00> : vector<4xf32>
    %581 = vector.multi_reduction <add>, %565, %cst_241 [1] : vector<4x4xf32> to vector<4xf32>
    %582 = vector.shape_cast %581 : vector<4xf32> to vector<4x1xf32>
    %cst_242 = arith.constant dense<0.000000e+00> : vector<1xf32>
    %583 = vector.multi_reduction <add>, %582, %cst_242 [0] : vector<4x1xf32> to vector<1xf32>
    %584 = vector.shape_cast %583 : vector<1xf32> to vector<1x1xf32>
    %cst_243 = arith.constant 6.250000e-02 : f32
    %585 = vector.broadcast %cst_243 : f32 to vector<1x1xf32>
    %586 = arith.mulf %584, %585 : vector<1x1xf32>
    %587 = vector.extract_strided_slice %496 {offsets = [12, 0], sizes = [6, 4], strides = [1, 1]} : vector<90x4xf32> to vector<6x4xf32>
    %cst_244 = arith.constant dense<0.000000e+00> : vector<4x4xf32>
    %588 = tpu.matmul %490, %587, %cst_244 {dimension_numbers = #tpu.dot_dimension_numbers<[1], [0], [0], [1], [0, 0, 1, 1], [], []>} : vector<4x6xf32>, vector<6x4xf32>, vector<4x4xf32> -> vector<4x4xf32>
    %589 = vector.extract_strided_slice %496 {offsets = [30, 0], sizes = [6, 4], strides = [1, 1]} : vector<90x4xf32> to vector<6x4xf32>
    %cst_245 = arith.constant dense<0.000000e+00> : vector<4x4xf32>
    %590 = tpu.matmul %490, %589, %cst_245 {dimension_numbers = #tpu.dot_dimension_numbers<[1], [0], [0], [1], [0, 0, 1, 1], [], []>} : vector<4x6xf32>, vector<6x4xf32>, vector<4x4xf32> -> vector<4x4xf32>
    %591 = vector.extract_strided_slice %496 {offsets = [48, 0], sizes = [6, 4], strides = [1, 1]} : vector<90x4xf32> to vector<6x4xf32>
    %cst_246 = arith.constant dense<0.000000e+00> : vector<4x4xf32>
    %592 = tpu.matmul %490, %591, %cst_246 {dimension_numbers = #tpu.dot_dimension_numbers<[1], [0], [0], [1], [0, 0, 1, 1], [], []>} : vector<4x6xf32>, vector<6x4xf32>, vector<4x4xf32> -> vector<4x4xf32>
    %593 = vector.extract_strided_slice %496 {offsets = [66, 0], sizes = [6, 4], strides = [1, 1]} : vector<90x4xf32> to vector<6x4xf32>
    %cst_247 = arith.constant dense<0.000000e+00> : vector<4x4xf32>
    %594 = tpu.matmul %490, %593, %cst_247 {dimension_numbers = #tpu.dot_dimension_numbers<[1], [0], [0], [1], [0, 0, 1, 1], [], []>} : vector<4x6xf32>, vector<6x4xf32>, vector<4x4xf32> -> vector<4x4xf32>
    %595 = vector.extract_strided_slice %496 {offsets = [84, 0], sizes = [6, 4], strides = [1, 1]} : vector<90x4xf32> to vector<6x4xf32>
    %cst_248 = arith.constant dense<0.000000e+00> : vector<4x4xf32>
    %596 = tpu.matmul %490, %595, %cst_248 {dimension_numbers = #tpu.dot_dimension_numbers<[1], [0], [0], [1], [0, 0, 1, 1], [], []>} : vector<4x6xf32>, vector<6x4xf32>, vector<4x4xf32> -> vector<4x4xf32>
    %597 = arith.mulf %588, %588 : vector<4x4xf32>
    %598 = arith.mulf %590, %590 : vector<4x4xf32>
    %599 = arith.mulf %588, %590 : vector<4x4xf32>
    %600 = arith.subf %592, %597 : vector<4x4xf32>
    %601 = arith.subf %594, %598 : vector<4x4xf32>
    %602 = arith.subf %596, %599 : vector<4x4xf32>
    %cst_249 = arith.constant 2.000000e+00 : f32
    %603 = vector.broadcast %cst_249 : f32 to vector<4x4xf32>
    %604 = arith.mulf %603, %602 : vector<4x4xf32>
    %cst_250 = arith.constant 8.99999984E-4 : f32
    %605 = vector.broadcast %cst_250 : f32 to vector<4x4xf32>
    %606 = arith.addf %604, %605 : vector<4x4xf32>
    %607 = arith.addf %600, %601 : vector<4x4xf32>
    %cst_251 = arith.constant 8.99999984E-4 : f32
    %608 = vector.broadcast %cst_251 : f32 to vector<4x4xf32>
    %609 = arith.addf %607, %608 : vector<4x4xf32>
    %610 = arith.divf %606, %609 : vector<4x4xf32>
    %cst_252 = arith.constant 2.000000e+00 : f32
    %611 = vector.broadcast %cst_252 : f32 to vector<4x4xf32>
    %612 = arith.mulf %611, %599 : vector<4x4xf32>
    %cst_253 = arith.constant 9.99999974E-5 : f32
    %613 = vector.broadcast %cst_253 : f32 to vector<4x4xf32>
    %614 = arith.addf %612, %613 : vector<4x4xf32>
    %615 = arith.addf %597, %598 : vector<4x4xf32>
    %cst_254 = arith.constant 9.99999974E-5 : f32
    %616 = vector.broadcast %cst_254 : f32 to vector<4x4xf32>
    %617 = arith.addf %615, %616 : vector<4x4xf32>
    %618 = arith.divf %614, %617 : vector<4x4xf32>
    %619 = arith.mulf %618, %610 : vector<4x4xf32>
    %cst_255 = arith.constant dense<0.000000e+00> : vector<4xf32>
    %620 = vector.multi_reduction <add>, %619, %cst_255 [1] : vector<4x4xf32> to vector<4xf32>
    %621 = vector.shape_cast %620 : vector<4xf32> to vector<4x1xf32>
    %cst_256 = arith.constant dense<0.000000e+00> : vector<1xf32>
    %622 = vector.multi_reduction <add>, %621, %cst_256 [0] : vector<4x1xf32> to vector<1xf32>
    %623 = vector.shape_cast %622 : vector<1xf32> to vector<1x1xf32>
    %cst_257 = arith.constant 6.250000e-02 : f32
    %624 = vector.broadcast %cst_257 : f32 to vector<1x1xf32>
    %625 = arith.mulf %623, %624 : vector<1x1xf32>
    %cst_258 = arith.constant dense<0.000000e+00> : vector<4xf32>
    %626 = vector.multi_reduction <add>, %610, %cst_258 [1] : vector<4x4xf32> to vector<4xf32>
    %627 = vector.shape_cast %626 : vector<4xf32> to vector<4x1xf32>
    %cst_259 = arith.constant dense<0.000000e+00> : vector<1xf32>
    %628 = vector.multi_reduction <add>, %627, %cst_259 [0] : vector<4x1xf32> to vector<1xf32>
    %629 = vector.shape_cast %628 : vector<1xf32> to vector<1x1xf32>
    %cst_260 = arith.constant 6.250000e-02 : f32
    %630 = vector.broadcast %cst_260 : f32 to vector<1x1xf32>
    %631 = arith.mulf %629, %630 : vector<1x1xf32>
    %632 = tpu.concatenate %535, %580, %625 in 1 : vector<1x1xf32>, vector<1x1xf32>, vector<1x1xf32> -> vector<1x3xf32>
    %633 = tpu.concatenate %541, %586, %631 in 1 : vector<1x1xf32>, vector<1x1xf32>, vector<1x1xf32> -> vector<1x3xf32>
    %c0_261 = arith.constant 0 : index
    %c0_262 = arith.constant 0 : index
    %634 = vector.load %arg16[%c0_261, %c0_262] : memref<3x6xf32, #tpu.memory_space<vmem>>, vector<3x6xf32>
    %c0_263 = arith.constant 0 : index
    %c0_264 = arith.constant 0 : index
    %635 = vector.load %arg20[%c0_263, %c0_264] : memref<6x3xf32, #tpu.memory_space<vmem>>, vector<6x3xf32>
    %636 = tpu.concatenate %488, %489 in 0 : vector<18x6xf32>, vector<18x6xf32> -> vector<36x6xf32>
    %cst_265 = arith.constant dense<0.000000e+00> : vector<36x3xf32>
    %637 = tpu.matmul %636, %635, %cst_265 {dimension_numbers = #tpu.dot_dimension_numbers<[1], [0], [0], [1], [0, 0, 1, 1], [], []>} : vector<36x6xf32>, vector<6x3xf32>, vector<36x3xf32> -> vector<36x3xf32>
    %638 = vector.extract_strided_slice %637 {offsets = [0, 0], sizes = [6, 3], strides = [1, 1]} : vector<36x3xf32> to vector<6x3xf32>
    %cst_266 = arith.constant dense<0.000000e+00> : vector<3x3xf32>
    %639 = tpu.matmul %634, %638, %cst_266 {dimension_numbers = #tpu.dot_dimension_numbers<[1], [0], [0], [1], [0, 0, 1, 1], [], []>} : vector<3x6xf32>, vector<6x3xf32>, vector<3x3xf32> -> vector<3x3xf32>
    %640 = vector.extract_strided_slice %637 {offsets = [18, 0], sizes = [6, 3], strides = [1, 1]} : vector<36x3xf32> to vector<6x3xf32>
    %cst_267 = arith.constant dense<0.000000e+00> : vector<3x3xf32>
    %641 = tpu.matmul %634, %640, %cst_267 {dimension_numbers = #tpu.dot_dimension_numbers<[1], [0], [0], [1], [0, 0, 1, 1], [], []>} : vector<3x6xf32>, vector<6x3xf32>, vector<3x3xf32> -> vector<3x3xf32>
    %642 = vector.extract_strided_slice %637 {offsets = [6, 0], sizes = [6, 3], strides = [1, 1]} : vector<36x3xf32> to vector<6x3xf32>
    %cst_268 = arith.constant dense<0.000000e+00> : vector<3x3xf32>
    %643 = tpu.matmul %634, %642, %cst_268 {dimension_numbers = #tpu.dot_dimension_numbers<[1], [0], [0], [1], [0, 0, 1, 1], [], []>} : vector<3x6xf32>, vector<6x3xf32>, vector<3x3xf32> -> vector<3x3xf32>
    %644 = vector.extract_strided_slice %637 {offsets = [24, 0], sizes = [6, 3], strides = [1, 1]} : vector<36x3xf32> to vector<6x3xf32>
    %cst_269 = arith.constant dense<0.000000e+00> : vector<3x3xf32>
    %645 = tpu.matmul %634, %644, %cst_269 {dimension_numbers = #tpu.dot_dimension_numbers<[1], [0], [0], [1], [0, 0, 1, 1], [], []>} : vector<3x6xf32>, vector<6x3xf32>, vector<3x3xf32> -> vector<3x3xf32>
    %646 = vector.extract_strided_slice %637 {offsets = [12, 0], sizes = [6, 3], strides = [1, 1]} : vector<36x3xf32> to vector<6x3xf32>
    %cst_270 = arith.constant dense<0.000000e+00> : vector<3x3xf32>
    %647 = tpu.matmul %634, %646, %cst_270 {dimension_numbers = #tpu.dot_dimension_numbers<[1], [0], [0], [1], [0, 0, 1, 1], [], []>} : vector<3x6xf32>, vector<6x3xf32>, vector<3x3xf32> -> vector<3x3xf32>
    %648 = vector.extract_strided_slice %637 {offsets = [30, 0], sizes = [6, 3], strides = [1, 1]} : vector<36x3xf32> to vector<6x3xf32>
    %cst_271 = arith.constant dense<0.000000e+00> : vector<3x3xf32>
    %649 = tpu.matmul %634, %648, %cst_271 {dimension_numbers = #tpu.dot_dimension_numbers<[1], [0], [0], [1], [0, 0, 1, 1], [], []>} : vector<3x6xf32>, vector<6x3xf32>, vector<3x3xf32> -> vector<3x3xf32>
    %650 = tpu.concatenate %639, %643, %647 in 0 : vector<3x3xf32>, vector<3x3xf32>, vector<3x3xf32> -> vector<9x3xf32>
    %651 = tpu.concatenate %641, %645, %649 in 0 : vector<3x3xf32>, vector<3x3xf32>, vector<3x3xf32> -> vector<9x3xf32>
    %c0_272 = arith.constant 0 : index
    %c0_273 = arith.constant 0 : index
    %652 = vector.load %arg7[%c0_272, %c0_273] : memref<1x3xf32, #tpu.memory_space<vmem>>, vector<1x3xf32>
    %c0_274 = arith.constant 0 : index
    %c0_275 = arith.constant 0 : index
    %653 = vector.load %arg12[%c0_274, %c0_275] : memref<3x1xf32, #tpu.memory_space<vmem>>, vector<3x1xf32>
    %654 = arith.mulf %650, %650 : vector<9x3xf32>
    %655 = arith.mulf %651, %651 : vector<9x3xf32>
    %656 = arith.mulf %650, %651 : vector<9x3xf32>
    %657 = tpu.concatenate %650, %651, %654, %655, %656 in 0 : vector<9x3xf32>, vector<9x3xf32>, vector<9x3xf32>, vector<9x3xf32>, vector<9x3xf32> -> vector<45x3xf32>
    %cst_276 = arith.constant dense<0.000000e+00> : vector<45x1xf32>
    %658 = tpu.matmul %657, %653, %cst_276 {dimension_numbers = #tpu.dot_dimension_numbers<[1], [0], [0], [1], [0, 0, 1, 1], [], []>} : vector<45x3xf32>, vector<3x1xf32>, vector<45x1xf32> -> vector<45x1xf32>
    %659 = vector.extract_strided_slice %658 {offsets = [0, 0], sizes = [3, 1], strides = [1, 1]} : vector<45x1xf32> to vector<3x1xf32>
    %cst_277 = arith.constant dense<0.000000e+00> : vector<1x1xf32>
    %660 = tpu.matmul %652, %659, %cst_277 {dimension_numbers = #tpu.dot_dimension_numbers<[1], [0], [0], [1], [0, 0, 1, 1], [], []>} : vector<1x3xf32>, vector<3x1xf32>, vector<1x1xf32> -> vector<1x1xf32>
    %661 = vector.extract_strided_slice %658 {offsets = [9, 0], sizes = [3, 1], strides = [1, 1]} : vector<45x1xf32> to vector<3x1xf32>
    %cst_278 = arith.constant dense<0.000000e+00> : vector<1x1xf32>
    %662 = tpu.matmul %652, %661, %cst_278 {dimension_numbers = #tpu.dot_dimension_numbers<[1], [0], [0], [1], [0, 0, 1, 1], [], []>} : vector<1x3xf32>, vector<3x1xf32>, vector<1x1xf32> -> vector<1x1xf32>
    %663 = vector.extract_strided_slice %658 {offsets = [18, 0], sizes = [3, 1], strides = [1, 1]} : vector<45x1xf32> to vector<3x1xf32>
    %cst_279 = arith.constant dense<0.000000e+00> : vector<1x1xf32>
    %664 = tpu.matmul %652, %663, %cst_279 {dimension_numbers = #tpu.dot_dimension_numbers<[1], [0], [0], [1], [0, 0, 1, 1], [], []>} : vector<1x3xf32>, vector<3x1xf32>, vector<1x1xf32> -> vector<1x1xf32>
    %665 = vector.extract_strided_slice %658 {offsets = [27, 0], sizes = [3, 1], strides = [1, 1]} : vector<45x1xf32> to vector<3x1xf32>
    %cst_280 = arith.constant dense<0.000000e+00> : vector<1x1xf32>
    %666 = tpu.matmul %652, %665, %cst_280 {dimension_numbers = #tpu.dot_dimension_numbers<[1], [0], [0], [1], [0, 0, 1, 1], [], []>} : vector<1x3xf32>, vector<3x1xf32>, vector<1x1xf32> -> vector<1x1xf32>
    %667 = vector.extract_strided_slice %658 {offsets = [36, 0], sizes = [3, 1], strides = [1, 1]} : vector<45x1xf32> to vector<3x1xf32>
    %cst_281 = arith.constant dense<0.000000e+00> : vector<1x1xf32>
    %668 = tpu.matmul %652, %667, %cst_281 {dimension_numbers = #tpu.dot_dimension_numbers<[1], [0], [0], [1], [0, 0, 1, 1], [], []>} : vector<1x3xf32>, vector<3x1xf32>, vector<1x1xf32> -> vector<1x1xf32>
    %669 = arith.mulf %660, %660 : vector<1x1xf32>
    %670 = arith.mulf %662, %662 : vector<1x1xf32>
    %671 = arith.mulf %660, %662 : vector<1x1xf32>
    %672 = arith.subf %664, %669 : vector<1x1xf32>
    %673 = arith.subf %666, %670 : vector<1x1xf32>
    %674 = arith.subf %668, %671 : vector<1x1xf32>
    %cst_282 = arith.constant 2.000000e+00 : f32
    %675 = vector.broadcast %cst_282 : f32 to vector<1x1xf32>
    %676 = arith.mulf %675, %674 : vector<1x1xf32>
    %cst_283 = arith.constant 8.99999984E-4 : f32
    %677 = vector.broadcast %cst_283 : f32 to vector<1x1xf32>
    %678 = arith.addf %676, %677 : vector<1x1xf32>
    %679 = arith.addf %672, %673 : vector<1x1xf32>
    %cst_284 = arith.constant 8.99999984E-4 : f32
    %680 = vector.broadcast %cst_284 : f32 to vector<1x1xf32>
    %681 = arith.addf %679, %680 : vector<1x1xf32>
    %682 = arith.divf %678, %681 : vector<1x1xf32>
    %cst_285 = arith.constant 2.000000e+00 : f32
    %683 = vector.broadcast %cst_285 : f32 to vector<1x1xf32>
    %684 = arith.mulf %683, %671 : vector<1x1xf32>
    %cst_286 = arith.constant 9.99999974E-5 : f32
    %685 = vector.broadcast %cst_286 : f32 to vector<1x1xf32>
    %686 = arith.addf %684, %685 : vector<1x1xf32>
    %687 = arith.addf %669, %670 : vector<1x1xf32>
    %cst_287 = arith.constant 9.99999974E-5 : f32
    %688 = vector.broadcast %cst_287 : f32 to vector<1x1xf32>
    %689 = arith.addf %687, %688 : vector<1x1xf32>
    %690 = arith.divf %686, %689 : vector<1x1xf32>
    %691 = arith.mulf %690, %682 : vector<1x1xf32>
    %cst_288 = arith.constant dense<0.000000e+00> : vector<1xf32>
    %692 = vector.multi_reduction <add>, %691, %cst_288 [1] : vector<1x1xf32> to vector<1xf32>
    %693 = vector.shape_cast %692 : vector<1xf32> to vector<1x1xf32>
    %cst_289 = arith.constant dense<0.000000e+00> : vector<1xf32>
    %694 = vector.multi_reduction <add>, %693, %cst_289 [0] : vector<1x1xf32> to vector<1xf32>
    %695 = vector.shape_cast %694 : vector<1xf32> to vector<1x1xf32>
    %cst_290 = arith.constant 1.000000e+00 : f32
    %696 = vector.broadcast %cst_290 : f32 to vector<1x1xf32>
    %697 = arith.mulf %695, %696 : vector<1x1xf32>
    %cst_291 = arith.constant dense<0.000000e+00> : vector<1xf32>
    %698 = vector.multi_reduction <add>, %682, %cst_291 [1] : vector<1x1xf32> to vector<1xf32>
    %699 = vector.shape_cast %698 : vector<1xf32> to vector<1x1xf32>
    %cst_292 = arith.constant dense<0.000000e+00> : vector<1xf32>
    %700 = vector.multi_reduction <add>, %699, %cst_292 [0] : vector<1x1xf32> to vector<1xf32>
    %701 = vector.shape_cast %700 : vector<1xf32> to vector<1x1xf32>
    %cst_293 = arith.constant 1.000000e+00 : f32
    %702 = vector.broadcast %cst_293 : f32 to vector<1x1xf32>
    %703 = arith.mulf %701, %702 : vector<1x1xf32>
    %704 = vector.extract_strided_slice %658 {offsets = [3, 0], sizes = [3, 1], strides = [1, 1]} : vector<45x1xf32> to vector<3x1xf32>
    %cst_294 = arith.constant dense<0.000000e+00> : vector<1x1xf32>
    %705 = tpu.matmul %652, %704, %cst_294 {dimension_numbers = #tpu.dot_dimension_numbers<[1], [0], [0], [1], [0, 0, 1, 1], [], []>} : vector<1x3xf32>, vector<3x1xf32>, vector<1x1xf32> -> vector<1x1xf32>
    %706 = vector.extract_strided_slice %658 {offsets = [12, 0], sizes = [3, 1], strides = [1, 1]} : vector<45x1xf32> to vector<3x1xf32>
    %cst_295 = arith.constant dense<0.000000e+00> : vector<1x1xf32>
    %707 = tpu.matmul %652, %706, %cst_295 {dimension_numbers = #tpu.dot_dimension_numbers<[1], [0], [0], [1], [0, 0, 1, 1], [], []>} : vector<1x3xf32>, vector<3x1xf32>, vector<1x1xf32> -> vector<1x1xf32>
    %708 = vector.extract_strided_slice %658 {offsets = [21, 0], sizes = [3, 1], strides = [1, 1]} : vector<45x1xf32> to vector<3x1xf32>
    %cst_296 = arith.constant dense<0.000000e+00> : vector<1x1xf32>
    %709 = tpu.matmul %652, %708, %cst_296 {dimension_numbers = #tpu.dot_dimension_numbers<[1], [0], [0], [1], [0, 0, 1, 1], [], []>} : vector<1x3xf32>, vector<3x1xf32>, vector<1x1xf32> -> vector<1x1xf32>
    %710 = vector.extract_strided_slice %658 {offsets = [30, 0], sizes = [3, 1], strides = [1, 1]} : vector<45x1xf32> to vector<3x1xf32>
    %cst_297 = arith.constant dense<0.000000e+00> : vector<1x1xf32>
    %711 = tpu.matmul %652, %710, %cst_297 {dimension_numbers = #tpu.dot_dimension_numbers<[1], [0], [0], [1], [0, 0, 1, 1], [], []>} : vector<1x3xf32>, vector<3x1xf32>, vector<1x1xf32> -> vector<1x1xf32>
    %712 = vector.extract_strided_slice %658 {offsets = [39, 0], sizes = [3, 1], strides = [1, 1]} : vector<45x1xf32> to vector<3x1xf32>
    %cst_298 = arith.constant dense<0.000000e+00> : vector<1x1xf32>
    %713 = tpu.matmul %652, %712, %cst_298 {dimension_numbers = #tpu.dot_dimension_numbers<[1], [0], [0], [1], [0, 0, 1, 1], [], []>} : vector<1x3xf32>, vector<3x1xf32>, vector<1x1xf32> -> vector<1x1xf32>
    %714 = arith.mulf %705, %705 : vector<1x1xf32>
    %715 = arith.mulf %707, %707 : vector<1x1xf32>
    %716 = arith.mulf %705, %707 : vector<1x1xf32>
    %717 = arith.subf %709, %714 : vector<1x1xf32>
    %718 = arith.subf %711, %715 : vector<1x1xf32>
    %719 = arith.subf %713, %716 : vector<1x1xf32>
    %cst_299 = arith.constant 2.000000e+00 : f32
    %720 = vector.broadcast %cst_299 : f32 to vector<1x1xf32>
    %721 = arith.mulf %720, %719 : vector<1x1xf32>
    %cst_300 = arith.constant 8.99999984E-4 : f32
    %722 = vector.broadcast %cst_300 : f32 to vector<1x1xf32>
    %723 = arith.addf %721, %722 : vector<1x1xf32>
    %724 = arith.addf %717, %718 : vector<1x1xf32>
    %cst_301 = arith.constant 8.99999984E-4 : f32
    %725 = vector.broadcast %cst_301 : f32 to vector<1x1xf32>
    %726 = arith.addf %724, %725 : vector<1x1xf32>
    %727 = arith.divf %723, %726 : vector<1x1xf32>
    %cst_302 = arith.constant 2.000000e+00 : f32
    %728 = vector.broadcast %cst_302 : f32 to vector<1x1xf32>
    %729 = arith.mulf %728, %716 : vector<1x1xf32>
    %cst_303 = arith.constant 9.99999974E-5 : f32
    %730 = vector.broadcast %cst_303 : f32 to vector<1x1xf32>
    %731 = arith.addf %729, %730 : vector<1x1xf32>
    %732 = arith.addf %714, %715 : vector<1x1xf32>
    %cst_304 = arith.constant 9.99999974E-5 : f32
    %733 = vector.broadcast %cst_304 : f32 to vector<1x1xf32>
    %734 = arith.addf %732, %733 : vector<1x1xf32>
    %735 = arith.divf %731, %734 : vector<1x1xf32>
    %736 = arith.mulf %735, %727 : vector<1x1xf32>
    %cst_305 = arith.constant dense<0.000000e+00> : vector<1xf32>
    %737 = vector.multi_reduction <add>, %736, %cst_305 [1] : vector<1x1xf32> to vector<1xf32>
    %738 = vector.shape_cast %737 : vector<1xf32> to vector<1x1xf32>
    %cst_306 = arith.constant dense<0.000000e+00> : vector<1xf32>
    %739 = vector.multi_reduction <add>, %738, %cst_306 [0] : vector<1x1xf32> to vector<1xf32>
    %740 = vector.shape_cast %739 : vector<1xf32> to vector<1x1xf32>
    %cst_307 = arith.constant 1.000000e+00 : f32
    %741 = vector.broadcast %cst_307 : f32 to vector<1x1xf32>
    %742 = arith.mulf %740, %741 : vector<1x1xf32>
    %cst_308 = arith.constant dense<0.000000e+00> : vector<1xf32>
    %743 = vector.multi_reduction <add>, %727, %cst_308 [1] : vector<1x1xf32> to vector<1xf32>
    %744 = vector.shape_cast %743 : vector<1xf32> to vector<1x1xf32>
    %cst_309 = arith.constant dense<0.000000e+00> : vector<1xf32>
    %745 = vector.multi_reduction <add>, %744, %cst_309 [0] : vector<1x1xf32> to vector<1xf32>
    %746 = vector.shape_cast %745 : vector<1xf32> to vector<1x1xf32>
    %cst_310 = arith.constant 1.000000e+00 : f32
    %747 = vector.broadcast %cst_310 : f32 to vector<1x1xf32>
    %748 = arith.mulf %746, %747 : vector<1x1xf32>
    %749 = vector.extract_strided_slice %658 {offsets = [6, 0], sizes = [3, 1], strides = [1, 1]} : vector<45x1xf32> to vector<3x1xf32>
    %cst_311 = arith.constant dense<0.000000e+00> : vector<1x1xf32>
    %750 = tpu.matmul %652, %749, %cst_311 {dimension_numbers = #tpu.dot_dimension_numbers<[1], [0], [0], [1], [0, 0, 1, 1], [], []>} : vector<1x3xf32>, vector<3x1xf32>, vector<1x1xf32> -> vector<1x1xf32>
    %751 = vector.extract_strided_slice %658 {offsets = [15, 0], sizes = [3, 1], strides = [1, 1]} : vector<45x1xf32> to vector<3x1xf32>
    %cst_312 = arith.constant dense<0.000000e+00> : vector<1x1xf32>
    %752 = tpu.matmul %652, %751, %cst_312 {dimension_numbers = #tpu.dot_dimension_numbers<[1], [0], [0], [1], [0, 0, 1, 1], [], []>} : vector<1x3xf32>, vector<3x1xf32>, vector<1x1xf32> -> vector<1x1xf32>
    %753 = vector.extract_strided_slice %658 {offsets = [24, 0], sizes = [3, 1], strides = [1, 1]} : vector<45x1xf32> to vector<3x1xf32>
    %cst_313 = arith.constant dense<0.000000e+00> : vector<1x1xf32>
    %754 = tpu.matmul %652, %753, %cst_313 {dimension_numbers = #tpu.dot_dimension_numbers<[1], [0], [0], [1], [0, 0, 1, 1], [], []>} : vector<1x3xf32>, vector<3x1xf32>, vector<1x1xf32> -> vector<1x1xf32>
    %755 = vector.extract_strided_slice %658 {offsets = [33, 0], sizes = [3, 1], strides = [1, 1]} : vector<45x1xf32> to vector<3x1xf32>
    %cst_314 = arith.constant dense<0.000000e+00> : vector<1x1xf32>
    %756 = tpu.matmul %652, %755, %cst_314 {dimension_numbers = #tpu.dot_dimension_numbers<[1], [0], [0], [1], [0, 0, 1, 1], [], []>} : vector<1x3xf32>, vector<3x1xf32>, vector<1x1xf32> -> vector<1x1xf32>
    %757 = vector.extract_strided_slice %658 {offsets = [42, 0], sizes = [3, 1], strides = [1, 1]} : vector<45x1xf32> to vector<3x1xf32>
    %cst_315 = arith.constant dense<0.000000e+00> : vector<1x1xf32>
    %758 = tpu.matmul %652, %757, %cst_315 {dimension_numbers = #tpu.dot_dimension_numbers<[1], [0], [0], [1], [0, 0, 1, 1], [], []>} : vector<1x3xf32>, vector<3x1xf32>, vector<1x1xf32> -> vector<1x1xf32>
    %759 = arith.mulf %750, %750 : vector<1x1xf32>
    %760 = arith.mulf %752, %752 : vector<1x1xf32>
    %761 = arith.mulf %750, %752 : vector<1x1xf32>
    %762 = arith.subf %754, %759 : vector<1x1xf32>
    %763 = arith.subf %756, %760 : vector<1x1xf32>
    %764 = arith.subf %758, %761 : vector<1x1xf32>
    %cst_316 = arith.constant 2.000000e+00 : f32
    %765 = vector.broadcast %cst_316 : f32 to vector<1x1xf32>
    %766 = arith.mulf %765, %764 : vector<1x1xf32>
    %cst_317 = arith.constant 8.99999984E-4 : f32
    %767 = vector.broadcast %cst_317 : f32 to vector<1x1xf32>
    %768 = arith.addf %766, %767 : vector<1x1xf32>
    %769 = arith.addf %762, %763 : vector<1x1xf32>
    %cst_318 = arith.constant 8.99999984E-4 : f32
    %770 = vector.broadcast %cst_318 : f32 to vector<1x1xf32>
    %771 = arith.addf %769, %770 : vector<1x1xf32>
    %772 = arith.divf %768, %771 : vector<1x1xf32>
    %cst_319 = arith.constant 2.000000e+00 : f32
    %773 = vector.broadcast %cst_319 : f32 to vector<1x1xf32>
    %774 = arith.mulf %773, %761 : vector<1x1xf32>
    %cst_320 = arith.constant 9.99999974E-5 : f32
    %775 = vector.broadcast %cst_320 : f32 to vector<1x1xf32>
    %776 = arith.addf %774, %775 : vector<1x1xf32>
    %777 = arith.addf %759, %760 : vector<1x1xf32>
    %cst_321 = arith.constant 9.99999974E-5 : f32
    %778 = vector.broadcast %cst_321 : f32 to vector<1x1xf32>
    %779 = arith.addf %777, %778 : vector<1x1xf32>
    %780 = arith.divf %776, %779 : vector<1x1xf32>
    %781 = arith.mulf %780, %772 : vector<1x1xf32>
    %cst_322 = arith.constant dense<0.000000e+00> : vector<1xf32>
    %782 = vector.multi_reduction <add>, %781, %cst_322 [1] : vector<1x1xf32> to vector<1xf32>
    %783 = vector.shape_cast %782 : vector<1xf32> to vector<1x1xf32>
    %cst_323 = arith.constant dense<0.000000e+00> : vector<1xf32>
    %784 = vector.multi_reduction <add>, %783, %cst_323 [0] : vector<1x1xf32> to vector<1xf32>
    %785 = vector.shape_cast %784 : vector<1xf32> to vector<1x1xf32>
    %cst_324 = arith.constant 1.000000e+00 : f32
    %786 = vector.broadcast %cst_324 : f32 to vector<1x1xf32>
    %787 = arith.mulf %785, %786 : vector<1x1xf32>
    %cst_325 = arith.constant dense<0.000000e+00> : vector<1xf32>
    %788 = vector.multi_reduction <add>, %772, %cst_325 [1] : vector<1x1xf32> to vector<1xf32>
    %789 = vector.shape_cast %788 : vector<1xf32> to vector<1x1xf32>
    %cst_326 = arith.constant dense<0.000000e+00> : vector<1xf32>
    %790 = vector.multi_reduction <add>, %789, %cst_326 [0] : vector<1x1xf32> to vector<1xf32>
    %791 = vector.shape_cast %790 : vector<1xf32> to vector<1x1xf32>
    %cst_327 = arith.constant 1.000000e+00 : f32
    %792 = vector.broadcast %cst_327 : f32 to vector<1x1xf32>
    %793 = arith.mulf %791, %792 : vector<1x1xf32>
    %794 = tpu.concatenate %697, %742, %787 in 1 : vector<1x1xf32>, vector<1x1xf32>, vector<1x1xf32> -> vector<1x3xf32>
    %795 = tpu.concatenate %703, %748, %793 in 1 : vector<1x1xf32>, vector<1x1xf32>, vector<1x1xf32> -> vector<1x3xf32>
    %796 = tpu.concatenate %146, %308, %470, %632, %794 in 0 : vector<1x3xf32>, vector<1x3xf32>, vector<1x3xf32>, vector<1x3xf32>, vector<1x3xf32> -> vector<5x3xf32>
    %c0_328 = arith.constant 0 : index
    %c0_329 = arith.constant 0 : index
    %c0_330 = arith.constant 0 : index
    %797 = vector.load %arg21[%c0_328, %c0_329, %c0_330] : memref<1x5x3xf32, #tpu.memory_space<vmem>>, vector<1x5x3xf32>
    %798 = vector.shape_cast %797 : vector<1x5x3xf32> to vector<5x3xf32>
    %799 = vector.shape_cast %796 : vector<5x3xf32> to vector<1x5x3xf32>
    tpu.vector_store %arg21[%c0_328, %c0_329, %c0_330], %799 {strides = array<i32>} : memref<1x5x3xf32, #tpu.memory_space<vmem>>, vector<1x5x3xf32>,
    %800 = tpu.concatenate %147, %309, %471, %633, %795 in 0 : vector<1x3xf32>, vector<1x3xf32>, vector<1x3xf32>, vector<1x3xf32>, vector<1x3xf32> -> vector<5x3xf32>
    %c0_331 = arith.constant 0 : index
    %c0_332 = arith.constant 0 : index
    %c0_333 = arith.constant 0 : index
    %801 = vector.load %arg22[%c0_331, %c0_332, %c0_333] : memref<1x5x3xf32, #tpu.memory_space<vmem>>, vector<1x5x3xf32>
    %802 = vector.shape_cast %801 : vector<1x5x3xf32> to vector<5x3xf32>
    %803 = vector.shape_cast %800 : vector<5x3xf32> to vector<1x5x3xf32>
    tpu.vector_store %arg22[%c0_331, %c0_332, %c0_333], %803 {strides = array<i32>} : memref<1x5x3xf32, #tpu.memory_space<vmem>>, vector<1x5x3xf32>,
    return
  }
  func.func @transform_0(%arg0: i32) -> (i32, i32, i32) {
    %c0_i32 = arith.constant 0 : i32
    %c0_i32_0 = arith.constant 0 : i32
    %c0_i32_1 = arith.constant 0 : i32
    return %arg0, %c0_i32, %c0_i32_0 : i32, i32, i32
  }
  func.func @transform_1(%arg0: i32) -> (i32, i32, i32) {
    %c0_i32 = arith.constant 0 : i32
    %c0_i32_0 = arith.constant 0 : i32
    %c0_i32_1 = arith.constant 0 : i32
    return %arg0, %c0_i32, %c0_i32_0 : i32, i32, i32
  }
  func.func @transform_2(%arg0: i32) -> (i32, i32) {
    %c0_i32 = arith.constant 0 : i32
    %c0_i32_0 = arith.constant 0 : i32
    %c0_i32_1 = arith.constant 0 : i32
    return %c0_i32, %c0_i32_0 : i32, i32
  }
  func.func @transform_3(%arg0: i32) -> (i32, i32) {
    %c0_i32 = arith.constant 0 : i32
    %c0_i32_0 = arith.constant 0 : i32
    %c0_i32_1 = arith.constant 0 : i32
    return %c0_i32, %c0_i32_0 : i32, i32
  }
  func.func @transform_4(%arg0: i32) -> (i32, i32) {
    %c0_i32 = arith.constant 0 : i32
    %c0_i32_0 = arith.constant 0 : i32
    %c0_i32_1 = arith.constant 0 : i32
    return %c0_i32, %c0_i32_0 : i32, i32
  }
  func.func @transform_5(%arg0: i32) -> (i32, i32) {
    %c0_i32 = arith.constant 0 : i32
    %c0_i32_0 = arith.constant 0 : i32
    %c0_i32_1 = arith.constant 0 : i32
    return %c0_i32, %c0_i32_0 : i32, i32
  }
  func.func @transform_6(%arg0: i32) -> (i32, i32) {
    %c0_i32 = arith.constant 0 : i32
    %c0_i32_0 = arith.constant 0 : i32
    %c0_i32_1 = arith.constant 0 : i32
    return %c0_i32, %c0_i32_0 : i32, i32
  }
  func.func @transform_7(%arg0: i32) -> (i32, i32) {
    %c0_i32 = arith.constant 0 : i32
    %c0_i32_0 = arith.constant 0 : i32
    %c0_i32_1 = arith.constant 0 : i32
    return %c0_i32, %c0_i32_0 : i32, i32
  }
  func.func @transform_8(%arg0: i32) -> (i32, i32) {
    %c0_i32 = arith.constant 0 : i32
    %c0_i32_0 = arith.constant 0 : i32
    %c0_i32_1 = arith.constant 0 : i32
    return %c0_i32, %c0_i32_0 : i32, i32
  }
  func.func @transform_9(%arg0: i32) -> (i32, i32) {
    %c0_i32 = arith.constant 0 : i32
    %c0_i32_0 = arith.constant 0 : i32
    %c0_i32_1 = arith.constant 0 : i32
    return %c0_i32, %c0_i32_0 : i32, i32
  }
  func.func @transform_10(%arg0: i32) -> (i32, i32) {
    %c0_i32 = arith.constant 0 : i32
    %c0_i32_0 = arith.constant 0 : i32
    %c0_i32_1 = arith.constant 0 : i32
    return %c0_i32, %c0_i32_0 : i32, i32
  }
  func.func @transform_11(%arg0: i32) -> (i32, i32) {
    %c0_i32 = arith.constant 0 : i32
    %c0_i32_0 = arith.constant 0 : i32
    %c0_i32_1 = arith.constant 0 : i32
    return %c0_i32, %c0_i32_0 : i32, i32
  }
  func.func @transform_12(%arg0: i32) -> (i32, i32) {
    %c0_i32 = arith.constant 0 : i32
    %c0_i32_0 = arith.constant 0 : i32
    %c0_i32_1 = arith.constant 0 : i32
    return %c0_i32, %c0_i32_0 : i32, i32
  }
  func.func @transform_13(%arg0: i32) -> (i32, i32) {
    %c0_i32 = arith.constant 0 : i32
    %c0_i32_0 = arith.constant 0 : i32
    %c0_i32_1 = arith.constant 0 : i32
    return %c0_i32, %c0_i32_0 : i32, i32
  }
  func.func @transform_14(%arg0: i32) -> (i32, i32) {
    %c0_i32 = arith.constant 0 : i32
    %c0_i32_0 = arith.constant 0 : i32
    %c0_i32_1 = arith.constant 0 : i32
    return %c0_i32, %c0_i32_0 : i32, i32
  }
  func.func @transform_15(%arg0: i32) -> (i32, i32) {
    %c0_i32 = arith.constant 0 : i32
    %c0_i32_0 = arith.constant 0 : i32
    %c0_i32_1 = arith.constant 0 : i32
    return %c0_i32, %c0_i32_0 : i32, i32
  }
  func.func @transform_16(%arg0: i32) -> (i32, i32) {
    %c0_i32 = arith.constant 0 : i32
    %c0_i32_0 = arith.constant 0 : i32
    %c0_i32_1 = arith.constant 0 : i32
    return %c0_i32, %c0_i32_0 : i32, i32
  }
  func.func @transform_17(%arg0: i32) -> (i32, i32) {
    %c0_i32 = arith.constant 0 : i32
    %c0_i32_0 = arith.constant 0 : i32
    %c0_i32_1 = arith.constant 0 : i32
    return %c0_i32, %c0_i32_0 : i32, i32
  }
  func.func @transform_18(%arg0: i32) -> (i32, i32) {
    %c0_i32 = arith.constant 0 : i32
    %c0_i32_0 = arith.constant 0 : i32
    %c0_i32_1 = arith.constant 0 : i32
    return %c0_i32, %c0_i32_0 : i32, i32
  }
  func.func @transform_19(%arg0: i32) -> (i32, i32) {
    %c0_i32 = arith.constant 0 : i32
    %c0_i32_0 = arith.constant 0 : i32
    %c0_i32_1 = arith.constant 0 : i32
    return %c0_i32, %c0_i32_0 : i32, i32
  }
  func.func @transform_20(%arg0: i32) -> (i32, i32, i32) {
    %c0_i32 = arith.constant 0 : i32
    %c0_i32_0 = arith.constant 0 : i32
    %c0_i32_1 = arith.constant 0 : i32
    return %arg0, %c0_i32, %c0_i32_0 : i32, i32, i32
  }
  func.func @transform_21(%arg0: i32) -> (i32, i32, i32) {
    %c0_i32 = arith.constant 0 : i32
    %c0_i32_0 = arith.constant 0 : i32
    %c0_i32_1 = arith.constant 0 : i32
    return %arg0, %c0_i32, %c0_i32_0 : i32, i32, i32
  }
}

</mosaic_0001>

<bundles_post_ra>
// kernel: tpu_custom_call.1
= control target key start
LH: loop header
LB: loop body
LE: loop exit
PB: predicated region body
PF: predicated region fallthrough
CT: control target
= control target key end

     0   :  { %s19459_s0 = inlined_call_operand.vmem [shape: f32[2,144,48], index: 0, kind: input, shape index: {}]   ;;  %s19460_s1 = inlined_call_operand.vmem [shape: f32[2,144,48], index: 1, kind: input, shape index: {}]   ;;  %s19461_s2 = inlined_call_operand.vmem [shape: f32[46,48], index: 2, kind: input, shape index: {}]   ;;  %s19462_s3 = inlined_call_operand.vmem [shape: f32[22,24], index: 3, kind: input, shape index: {}]   ;;  %s19463_s4 = inlined_call_operand.vmem [shape: f32[10,12], index: 4, kind: input, shape index: {}]   ;;  %s19464_s5 = inlined_call_operand.vmem [shape: f32[4,6], index: 5, kind: input, shape index: {}]   ;;  %s19465_s6 = inlined_call_operand.vmem [shape: f32[1,3], index: 6, kind: input, shape index: {}]   ;;  %s19466_s7 = inlined_call_operand.vmem [shape: f32[48,46], index: 7, kind: input, shape index: {}]   ;;  %s19467_s8 = inlined_call_operand.vmem [shape: f32[24,22], index: 8, kind: input, shape index: {}]   ;;  %s19468_s9 = inlined_call_operand.vmem [shape: f32[12,10], index: 9, kind: input, shape index: {}]   ;;  %s19469_s10 = inlined_call_operand.vmem [shape: f32[6,4], index: 10, kind: input, shape index: {}]   ;;  %s19470_s11 = inlined_call_operand.vmem [shape: f32[3,1], index: 11, kind: input, shape index: {}]   ;;  %s19471_s12 = inlined_call_operand.vmem [shape: f32[24,48], index: 12, kind: input, shape index: {}]   ;;  %s19472_s13 = inlined_call_operand.vmem [shape: f32[12,24], index: 13, kind: input, shape index: {}]   ;;  %s19473_s14 = inlined_call_operand.vmem [shape: f32[6,12], index: 14, kind: input, shape index: {}]   ;;  %s19474_s15 = inlined_call_operand.vmem [shape: f32[3,6], index: 15, kind: input, shape index: {}]   ;;  %s19475_s16 = inlined_call_operand.vmem [shape: f32[48,24], index: 16, kind: input, shape index: {}]   ;;  %s19476_s17 = inlined_call_operand.vmem [shape: f32[24,12], index: 17, kind: input, shape index: {}]   ;;  %s19477_s18 = inlined_call_operand.vmem [shape: f32[12,6], index: 18, kind: input, shape index: {}]   ;;  %s19478_s19 = inlined_call_operand.vmem [shape: f32[6,3], index: 19, kind: input, shape index: {}]   ;;  %s19479_s20 = inlined_call_operand.vmem [shape: f32[2,5,3], index: 20, kind: output, shape index: {0}]   ;;  %s19480_s21 = inlined_call_operand.vmem [shape: f32[2,5,3], index: 21, kind: output, shape index: {1}]  }
   0x1   :  { %19497 = sst [smem:[#allocation11_spill]] %s19459_s0 }
   0x2   :  { %19498 = sst [smem:[#allocation12_spill]] %s19460_s1 }
   0x3   :  { %19499 = sst [smem:[#allocation13_spill]] %s19461_s2  ;;  %s16349_s2 = smov 0  }
   0x4   :  { %19500 = sst [smem:[#allocation14_spill]] %s19462_s3 }
   0x5   :  { %19501 = sst [smem:[#allocation15_spill]] %s19463_s4 }
   0x6   :  { %19502 = sst [smem:[#allocation16_spill]] %s19464_s5 }
   0x7 LB: > { %s12685_s25 = sadd.s32 4294967295, %s16231_s2   ;;  %p12689_p0 = scmp.ge.s32.totalorder %s16231_s2, 1  ;;  %s16231_s2 = sphi %s16349_s2, %s32_s2  }
   0x8   : > { %p600_p1 = scmp.lt.s32.totalorder %s16231_s2, 3 }
   0xa   : > { %p601_p2 = pnand %p12689_p0, %p600_p1 }
   0xc   : > { %604 = sbr.rel (%p601_p2) target bundleno = 3608 (0xe18), region = 100 }
  0x13   : > { %v728_v0 = vld [vmem:[%s19466_s7] sm:$0xff]  ;;  %v729_v1 = vld [vmem:[%s19466_s7 + $0x8] sm:$0xff]  ;;  %v730_v2 = vld [vmem:[%s19466_s7 + $0x10] sm:$0xff]  ;;  %p668_p3 = scmp.lt.s32.totalorder %s12685_s25, 1  ;;  %vm788_vm0 = vcmask 392192   ;;  %s19503_s3 = sld [smem:[#allocation11_spill]] }
  0x14   : > { %v15598_v3 = vpack.c.bf16 %v729_v1, %v728_v0  ;;  %v731_v4 = vld [vmem:[%s19466_s7 + $0x18] sm:$0xff]  ;;  %v732_v6 = vld [vmem:[%s19466_s7 + $0x20] sm:$0xff]  ;;  %v733_v7 = vld [vmem:[%s19466_s7 + $0x28] sm:$0xff]  ;;  %s19505_s22 = sld [smem:[#allocation13_spill]]  ;;  %vm16234_vm1 = vmmov 0   ;;  %vm2181_vm2 = vcmask 375808  }
  0x15   : > { %v15602_v5 = vpack.c.bf16 %v731_v4, %v730_v2  ;;  %s19550_s25 = smov (!%p668_p3, %s12685_s25), 1  ;;  %v15606_v8 = vpack.c.bf16 %v733_v7, %v732_v6  ;;  %v3557_v18 = vld [vmem:[%s19475_s16] sm:$0xff]  ;;  %v3558_v19 = vld [vmem:[%s19475_s16 + $0x8] sm:$0xff]  ;;  %v3559_v28 = vld [vmem:[%s19475_s16 + $0x10] sm:$0xff]  ;;  %vm2197_vm3 = vcmask 373760   ;;  %vm4330_vm4 = vcmask 195584  }
  0x16   : > { %15599 = vmatprep.subr.bf16.mxu0 %v15598_v3  ;;  %s16054_s24 = smul.u32 144, %s19550_s25  ;;  %v15790_v21 = vpack.c.bf16 %v3558_v19, %v3557_v18  ;;  %v3560_v29 = vld [vmem:[%s19475_s16 + $0x18] sm:$0xff]  ;;  %vm2205_vm5 = vcmask 1045504   ;;  %vm3548_vm6 = vcmask 7168   ;;  %vm3550_vm7 = vcmask 15360   ;;  %s19547_s30 = sld [smem:[#allocation15_spill]] }
  0x17   : > { %15601 = vmatpush3.bf16.msra.mxu0 %v15598_v3  ;;  %v15794_v31 = vpack.c.bf16 %v3560_v29, %v3559_v28  ;;  %vm6874_vm8 = vcmask 1043456   ;;  %vm16236_vm9 = vmmov 1   ;;  %vm5222_vm11 = vcmask 179200   ;;  %s19548_s1 = sld [smem:[#allocation16_spill]]  ;;  %s16237_s23 = smov 1  }
  0x18   : > { %15603 = vmatprep.subr.bf16.mxu0 %v15602_v5  ;;  %vm18587_vm10 = vmpackc.low %vm6874_vm8, %vm16236_vm9  ;;  %vm5229_vm12 = vcmask 177152   ;;  %vm6939_vm13 = vcmask 97280   ;;  %vm11209_vm14 = vcmask 1040384   ;;  %vm7631_vm15 = vcmask 74752   ;;  %s12692_s26 = sshll.u32 %s19550_s25, 3 }
  0x19   : > { %s16383_s28 = scalar_lea.vmem %s19503_s3, %s16054_s24  ;;  %s19504_s3 = sld [smem:[#allocation12_spill]]  ;;  %vm11189_vm9 = vcmask 1042432  }
  0x1a   : > { %v16386_v9 = vld [vmem:[%s16383_s28] sm:$0xff]  ;;  %v16391_v10 = vld [vmem:[%s16383_s28 + $0x8] sm:$0xff]  ;;  %v16394_v11 = vld [vmem:[%s16383_s28 + $0x10] sm:$0xff]  ;;  %s685_s0 = scalar_lea.vmem %s19480_s21, %s12692_s26 }
  0x1b   : > { %15605 = vmatpush3.bf16.msra.mxu0 %v15602_v5  ;;  %14024 = vmatprep.mubr.msk.f32.mxu0 %vm788_vm0, %v16386_v9  ;;  %v16401_v12 = vld [vmem:[%s16383_s28 + $0x18] sm:$0xff]  ;;  %v16404_v13 = vld [vmem:[%s16383_s28 + $0x20] sm:$0xff]  ;;  %v16411_v14 = vld [vmem:[%s16383_s28 + $0x28] sm:$0xff]  ;;  %v734_v51 = vmul.f32 %v16386_v9, %v16386_v9  ;;  %v735_v52 = vmul.f32 %v16391_v10, %v16391_v10  ;;  %v736_v53 = vmul.f32 %v16394_v11, %v16394_v11 }
  0x1c   : > { %15607 = vmatprep.subr.bf16.mxu0 %v15606_v8  ;;  %v16414_v15 = vld [vmem:[%s16383_s28 + $0x30] sm:$0xff]  ;;  %v16421_v16 = vld [vmem:[%s16383_s28 + $0x38] sm:$0xff]  ;;  %v16424_v17 = vld [vmem:[%s16383_s28 + $0x40] sm:$0xff]  ;;  %v737_v54 = vmul.f32 %v16401_v12, %v16401_v12  ;;  %v738_v55 = vmul.f32 %v16404_v13, %v16404_v13  ;;  %v739_v56 = vmul.f32 %v16411_v14, %v16411_v14 }
  0x1d   : > { %v16437_v20 = vld [vmem:[%s16383_s28 + $0x48] sm:$0xff]  ;;  %v16440_v22 = vld [vmem:[%s16383_s28 + $0x50] sm:$0xff]  ;;  %v16447_v23 = vld [vmem:[%s16383_s28 + $0x58] sm:$0xff]  ;;  %v740_v57 = vmul.f32 %v16414_v15, %v16414_v15  ;;  %v741_v58 = vmul.f32 %v16421_v16, %v16421_v16  ;;  %v742_v59 = vmul.f32 %v16424_v17, %v16424_v17 }
  0x1e   : > { %v16450_v24 = vld [vmem:[%s16383_s28 + $0x60] sm:$0xff]  ;;  %v16457_v25 = vld [vmem:[%s16383_s28 + $0x68] sm:$0xff]  ;;  %v16460_v26 = vld [vmem:[%s16383_s28 + $0x70] sm:$0xff]  ;;  %v743_v60 = vmul.f32 %v16437_v20, %v16437_v20  ;;  %v744_v61 = vmul.f32 %v16440_v22, %v16440_v22  ;;  %v745_v62 = vmul.f32 %v16447_v23, %v16447_v23 }
  0x1f   : > { %15609 = vmatpush3.bf16.msra.mxu0 %v15606_v8  ;;  %v16467_v27 = vld [vmem:[%s16383_s28 + $0x78] sm:$0xff]  ;;  %v16476_v30 = vld [vmem:[%s16383_s28 + $0x80] sm:$0xff]  ;;  %s16483_s29 = scalar_lea.vmem %s19504_s3, %s16054_s24  ;;  %v16490_v32 = vld [vmem:[%s16383_s28 + $0x88] sm:$0xff]  ;;  %v746_v63 = vmul.f32 %v16450_v24, %v16450_v24  ;;  %v747_v0 = vmul.f32 %v16457_v25, %v16457_v25  ;;  %v748_v1 = vmul.f32 %v16460_v26, %v16460_v26  ;;  %s19544_s24 = sld [smem:[#allocation14_spill]] }
  0x20   : > { %15791 = vmatprep.subr.bf16.mxu0 %v15790_v21  ;;  %v16493_v33 = vld [vmem:[%s16483_s29] sm:$0xff]  ;;  %v16500_v34 = vld [vmem:[%s16483_s29 + $0x8] sm:$0xff]  ;;  %v16503_v35 = vld [vmem:[%s16483_s29 + $0x10] sm:$0xff]  ;;  %v749_v2 = vmul.f32 %v16467_v27, %v16467_v27  ;;  %v750_v3 = vmul.f32 %v16476_v30, %v16476_v30  ;;  %v751_v4 = vmul.f32 %v16490_v32, %v16490_v32 }
  0x21   : > { %v16510_v36 = vld [vmem:[%s16483_s29 + $0x18] sm:$0xff]  ;;  %v16513_v37 = vld [vmem:[%s16483_s29 + $0x20] sm:$0xff]  ;;  %v16520_v38 = vld [vmem:[%s16483_s29 + $0x28] sm:$0xff]  ;;  %v752_v5 = vmul.f32 %v16493_v33, %v16493_v33  ;;  %v753_v6 = vmul.f32 %v16500_v34, %v16500_v34  ;;  %v754_v7 = vmul.f32 %v16503_v35, %v16503_v35 }
  0x22   : > { %14025 = vmatmul.mubr.msk.f32.vlgmr.msra.gmra.mrb[0].mxu0 %vm788_vm0, %v16391_v10  ;;  %v16523_v39 = vld [vmem:[%s16483_s29 + $0x30] sm:$0xff]  ;;  %v16530_v40 = vld [vmem:[%s16483_s29 + $0x38] sm:$0xff]  ;;  %v16533_v41 = vld [vmem:[%s16483_s29 + $0x40] sm:$0xff]  ;;  %v755_v8 = vmul.f32 %v16510_v36, %v16510_v36  ;;  %v756_v18 = vmul.f32 %v16513_v37, %v16513_v37  ;;  %v757_v19 = vmul.f32 %v16520_v38, %v16520_v38 }
  0x23   : > { %14027 = vmatprep.mubr.msk.f32.mxu0 %vm788_vm0, %v16394_v11  ;;  %15793 = vmatpush3.bf16.msra.mxu0 %v15790_v21  ;;  %v16540_v42 = vld [vmem:[%s16483_s29 + $0x48] sm:$0xff]  ;;  %v16543_v43 = vld [vmem:[%s16483_s29 + $0x50] sm:$0xff]  ;;  %v16550_v44 = vld [vmem:[%s16483_s29 + $0x58] sm:$0xff]  ;;  %v758_v21 = vmul.f32 %v16523_v39, %v16523_v39  ;;  %v759_v28 = vmul.f32 %v16530_v40, %v16530_v40  ;;  %v760_v29 = vmul.f32 %v16533_v41, %v16533_v41 }
  0x24   : > { %15795 = vmatprep.subr.bf16.mxu0 %v15794_v31  ;;  %v16553_v45 = vld [vmem:[%s16483_s29 + $0x60] sm:$0xff]  ;;  %v16560_v46 = vld [vmem:[%s16483_s29 + $0x68] sm:$0xff]  ;;  %v16563_v47 = vld [vmem:[%s16483_s29 + $0x70] sm:$0xff] }
  0x25   : > { %v16570_v48 = vld [vmem:[%s16483_s29 + $0x78] sm:$0xff]  ;;  %v16573_v49 = vld [vmem:[%s16483_s29 + $0x80] sm:$0xff]  ;;  %v16580_v50 = vld [vmem:[%s16483_s29 + $0x88] sm:$0xff]  ;;  %s681_s29 = scalar_lea.vmem %s19479_s20, %s12692_s26 }
  0x26   : > { %14028 = vmatmul.mubr.msk.f32.gmra.mrb[2].mxu0 %vm788_vm0, %v16401_v12 }
  0x27   : > { %14030 = vmatprep.mubr.msk.f32.mxu0 %vm788_vm0, %v16404_v13  ;;  %15797 = vmatpush3.bf16.msra.mxu0 %v15794_v31  ;;  %v3561_v31 = vld [vmem:[%s19475_s16 + $0x20] sm:$0xff] }
  0x2a   : > { %14031 = vmatmul.mubr.msk.f32.gmra.mrb[4].mxu0 %vm788_vm0, %v16411_v14 }
  0x2b   : > { %14033 = vmatprep.mubr.msk.f32.mxu0 %vm788_vm0, %v16414_v15 }
  0x2e   : > { %14034 = vmatmul.mubr.msk.f32.gmra.mrb[6].mxu0 %vm788_vm0, %v16421_v16 }
  0x2f   : > { %14036 = vmatprep.mubr.msk.f32.mxu0 %vm788_vm0, %v16424_v17 }
  0x32   : > { %14037 = vmatmul.mubr.msk.f32.gmra.mrb[8].mxu0 %vm788_vm0, %v16437_v20 }
  0x33   : > { %14039 = vmatprep.mubr.msk.f32.mxu0 %vm788_vm0, %v16440_v22 }
  0x36   : > { %14040 = vmatmul.mubr.msk.f32.gmra.mrb[10].mxu0 %vm788_vm0, %v16447_v23 }
  0x37   : > { %14042 = vmatprep.mubr.msk.f32.mxu0 %vm788_vm0, %v16450_v24 }
  0x3a   : > { %14043 = vmatmul.mubr.msk.f32.gmra.mrb[12].mxu0 %vm788_vm0, %v16457_v25 }
  0x3b   : > { %14045 = vmatprep.mubr.msk.f32.mxu0 %vm788_vm0, %v16460_v26 }
  0x3e   : > { %14046 = vmatmul.mubr.msk.f32.gmra.mrb[14].mxu0 %vm788_vm0, %v16467_v27 }
  0x3f   : > { %14048 = vmatprep.mubr.msk.f32.mxu0 %vm788_vm0, %v16476_v30 }
  0x42   : > { %14049 = vmatmul.mubr.msk.f32.gmra.mrb[16].mxu0 %vm788_vm0, %v16490_v32 }
  0x43   : > { %14051 = vmatprep.mubr.msk.f32.mxu0 %vm788_vm0, %v16493_v33 }
  0x46   : > { %14052 = vmatmul.mubr.msk.f32.gmra.mrb[18].mxu0 %vm788_vm0, %v16500_v34 }
  0x47   : > { %14054 = vmatprep.mubr.msk.f32.mxu0 %vm788_vm0, %v16503_v35 }
  0x4a   : > { %14055 = vmatmul.mubr.msk.f32.gmra.mrb[20].mxu0 %vm788_vm0, %v16510_v36 }
  0x4b   : > { %14057 = vmatprep.mubr.msk.f32.mxu0 %vm788_vm0, %v16513_v37 }
  0x4e   : > { %14058 = vmatmul.mubr.msk.f32.gmra.mrb[22].mxu0 %vm788_vm0, %v16520_v38 }
  0x4f   : > { %14060 = vmatprep.mubr.msk.f32.mxu0 %vm788_vm0, %v16523_v39 }
  0x52   : > { %14061 = vmatmul.mubr.msk.f32.gmra.mrb[24].mxu0 %vm788_vm0, %v16530_v40 }
  0x53   : > { %14063 = vmatprep.mubr.msk.f32.mxu0 %vm788_vm0, %v16533_v41 }
  0x56   : > { %14064 = vmatmul.mubr.msk.f32.gmra.mrb[26].mxu0 %vm788_vm0, %v16540_v42 }
  0x57   : > { %14066 = vmatprep.mubr.msk.f32.mxu0 %vm788_vm0, %v16543_v43 }
  0x5a   : > { %14067 = vmatmul.mubr.msk.f32.gmra.mrb[28].mxu0 %vm788_vm0, %v16550_v44 }
  0x5b   : > { %14069 = vmatprep.mubr.msk.f32.mxu0 %vm788_vm0, %v16553_v45 }
  0x5e   : > { %14070 = vmatmul.mubr.msk.f32.gmra.mrb[30].mxu0 %vm788_vm0, %v16560_v46 }
  0x5f   : > { %14072 = vmatprep.mubr.msk.f32.mxu0 %vm788_vm0, %v16563_v47 }
  0x62   : > { %14073 = vmatmul.mubr.msk.f32.gmra.mrb[32].mxu0 %vm788_vm0, %v16570_v48 }
  0x63   : > { %14075 = vmatprep.mubr.msk.f32.mxu0 %vm788_vm0, %v16573_v49 }
  0x66   : > { %14076 = vmatmul.mubr.msk.f32.gmra.mrb[34].mxu0 %vm788_vm0, %v16580_v50 }
  0x67   : > { %14078 = vmatprep.mubr.msk.f32.mxu0 %vm788_vm0, %v734_v51  ;;  %v3562_v51 = vld [vmem:[%s19475_s16 + $0x28] sm:$0xff] }
  0x6a   : > { %14079 = vmatmul.mubr.msk.f32.gmra.mrb[36].mxu0 %vm788_vm0, %v735_v52  ;;  %v15798_v52 = vpack.c.bf16 %v3562_v51, %v3561_v31  ;;  %v785_v31 = vmul.f32 %v16570_v48, %v16467_v27  ;;  %v786_v51 = vmul.f32 %v16573_v49, %v16476_v30 }
  0x6b   : > { %14081 = vmatprep.mubr.msk.f32.mxu0 %vm788_vm0, %v736_v53  ;;  %v761_v53 = vmul.f32 %v16540_v42, %v16540_v42 }
  0x6c   : > { %15799 = vmatprep.subr.bf16.mxu0 %v15798_v52 }
  0x6d   : > { %15801 = vmatpush3.bf16.msra.mxu0 %v15798_v52  ;;  %v787_v52 = vmul.f32 %v16580_v50, %v16490_v32 }
  0x6e   : > { %14082 = vmatmul.mubr.msk.f32.gmra.mrb[38].mxu0 %vm788_vm0, %v737_v54  ;;  %v762_v54 = vmul.f32 %v16543_v43, %v16543_v43 }
  0x6f   : > { %14084 = vmatprep.mubr.msk.f32.mxu0 %vm788_vm0, %v738_v55  ;;  %v16678_v55 = vld [vmem:[%s19505_s22] sm:$0xff] }
  0x70   : > { %14171 = vmatprep.mubr.msk.f32.mxu1 %vm788_vm0, %v16678_v55 }
  0x72   : > { %14085 = vmatmul.mubr.msk.f32.gmra.mrb[40].mxu0 %vm788_vm0, %v739_v56  ;;  %v763_v56 = vmul.f32 %v16550_v44, %v16550_v44 }
  0x73   : > { %14087 = vmatprep.mubr.msk.f32.mxu0 %vm788_vm0, %v740_v57  ;;  %v764_v57 = vmul.f32 %v16553_v45, %v16553_v45 }
  0x76   : > { %14088 = vmatmul.mubr.msk.f32.gmra.mrb[42].mxu0 %vm788_vm0, %v741_v58  ;;  %v765_v58 = vmul.f32 %v16560_v46, %v16560_v46 }
  0x77   : > { %14090 = vmatprep.mubr.msk.f32.mxu0 %vm788_vm0, %v742_v59  ;;  %v766_v59 = vmul.f32 %v16563_v47, %v16563_v47 }
  0x7a   : > { %14091 = vmatmul.mubr.msk.f32.gmra.mrb[44].mxu0 %vm788_vm0, %v743_v60  ;;  %v767_v60 = vmul.f32 %v16570_v48, %v16570_v48 }
  0x7b   : > { %14093 = vmatprep.mubr.msk.f32.mxu0 %vm788_vm0, %v744_v61  ;;  %v768_v61 = vmul.f32 %v16573_v49, %v16573_v49 }
  0x7e   : > { %14094 = vmatmul.mubr.msk.f32.gmra.mrb[46].mxu0 %vm788_vm0, %v745_v62  ;;  %v769_v62 = vmul.f32 %v16580_v50, %v16580_v50 }
  0x7f   : > { %14096 = vmatprep.mubr.msk.f32.mxu0 %vm788_vm0, %v746_v63  ;;  %v770_v63 = vmul.f32 %v16493_v33, %v16386_v9 }
  0x82   : > { %14097 = vmatmul.mubr.msk.f32.gmra.mrb[48].mxu0 %vm788_vm0, %v747_v0  ;;  %v771_v0 = vmul.f32 %v16500_v34, %v16391_v10 }
  0x83   : > { %14099 = vmatprep.mubr.msk.f32.mxu0 %vm788_vm0, %v748_v1  ;;  %v772_v1 = vmul.f32 %v16503_v35, %v16394_v11 }
  0x86   : > { %14100 = vmatmul.mubr.msk.f32.gmra.mrb[50].mxu0 %vm788_vm0, %v749_v2  ;;  %v773_v2 = vmul.f32 %v16510_v36, %v16401_v12 }
  0x87   : > { %14102 = vmatprep.mubr.msk.f32.mxu0 %vm788_vm0, %v750_v3  ;;  %v774_v3 = vmul.f32 %v16513_v37, %v16404_v13 }
  0x8a   : > { %14103 = vmatmul.mubr.msk.f32.gmra.mrb[52].mxu0 %vm788_vm0, %v751_v4  ;;  %v775_v4 = vmul.f32 %v16520_v38, %v16411_v14 }
  0x8b   : > { %14105 = vmatprep.mubr.msk.f32.mxu0 %vm788_vm0, %v752_v5  ;;  %v776_v5 = vmul.f32 %v16523_v39, %v16414_v15 }
  0x8e   : > { %14106 = vmatmul.mubr.msk.f32.gmra.mrb[54].mxu0 %vm788_vm0, %v753_v6  ;;  %v777_v6 = vmul.f32 %v16530_v40, %v16421_v16 }
  0x8f   : > { %14108 = vmatprep.mubr.msk.f32.mxu0 %vm788_vm0, %v754_v7  ;;  %v778_v7 = vmul.f32 %v16533_v41, %v16424_v17 }
  0x92   : > { %14109 = vmatmul.mubr.msk.f32.gmra.mrb[56].mxu0 %vm788_vm0, %v755_v8  ;;  %v779_v8 = vmul.f32 %v16540_v42, %v16437_v20 }
  0x93   : > { %14111 = vmatprep.mubr.msk.f32.mxu0 %vm788_vm0, %v756_v18  ;;  %v780_v18 = vmul.f32 %v16543_v43, %v16440_v22 }
  0x96   : > { %14112 = vmatmul.mubr.msk.f32.gmra.mrb[58].mxu0 %vm788_vm0, %v757_v19  ;;  %v781_v19 = vmul.f32 %v16550_v44, %v16447_v23 }
  0x97   : > { %14114 = vmatprep.mubr.msk.f32.mxu0 %vm788_vm0, %v758_v21  ;;  %v782_v21 = vmul.f32 %v16553_v45, %v16450_v24 }
  0x9a   : > { %14115 = vmatmul.mubr.msk.f32.gmra.mrb[60].mxu0 %vm788_vm0, %v759_v28  ;;  %v783_v28 = vmul.f32 %v16560_v46, %v16457_v25 }
  0x9b   : > { %14117 = vmatprep.mubr.msk.f32.mxu0 %vm788_vm0, %v760_v29  ;;  %v784_v29 = vmul.f32 %v16563_v47, %v16460_v26 }
  0x9e   : > { %14118 = vmatmul.mubr.msk.f32.gmra.mrb[62].mxu0 %vm788_vm0, %v761_v53 }
  0x9f   : > { %14120 = vmatprep.mubr.msk.f32.mxu0 %vm788_vm0, %v762_v54 }
  0xa2   : > { %14121 = vmatmul.mubr.msk.f32.gmra.mrb[64].mxu0 %vm788_vm0, %v763_v56 }
  0xa3   : > { %14123 = vmatprep.mubr.msk.f32.mxu0 %vm788_vm0, %v764_v57 }
  0xa6   : > { %14124 = vmatmul.mubr.msk.f32.gmra.mrb[66].mxu0 %vm788_vm0, %v765_v58 }
  0xa7   : > { %14126 = vmatprep.mubr.msk.f32.mxu0 %vm788_vm0, %v766_v59 }
  0xaa   : > { %14127 = vmatmul.mubr.msk.f32.gmra.mrb[68].mxu0 %vm788_vm0, %v767_v60 }
  0xab   : > { %14129 = vmatprep.mubr.msk.f32.mxu0 %vm788_vm0, %v768_v61 }
  0xae   : > { %14130 = vmatmul.mubr.msk.f32.gmra.mrb[70].mxu0 %vm788_vm0, %v769_v62 }
  0xaf   : > { %14132 = vmatprep.mubr.msk.f32.mxu0 %vm788_vm0, %v770_v63 }
  0xb2   : > { %14133 = vmatmul.mubr.msk.f32.gmra.mrb[72].mxu0 %vm788_vm0, %v771_v0 }
  0xb3   : > { %14135 = vmatprep.mubr.msk.f32.mxu0 %vm788_vm0, %v772_v1 }
  0xb6   : > { %14136 = vmatmul.mubr.msk.f32.gmra.mrb[74].mxu0 %vm788_vm0, %v773_v2 }
  0xb7   : > { %14138 = vmatprep.mubr.msk.f32.mxu0 %vm788_vm0, %v774_v3 }
  0xba   : > { %14139 = vmatmul.mubr.msk.f32.gmra.mrb[76].mxu0 %vm788_vm0, %v775_v4 }
  0xbb   : > { %14141 = vmatprep.mubr.msk.f32.mxu0 %vm788_vm0, %v776_v5 }
  0xbe   : > { %14142 = vmatmul.mubr.msk.f32.gmra.mrb[78].mxu0 %vm788_vm0, %v777_v6 }
  0xbf   : > { %14144 = vmatprep.mubr.msk.f32.mxu0 %vm788_vm0, %v778_v7 }
  0xc2   : > { %14145 = vmatmul.mubr.msk.f32.gmra.mrb[80].mxu0 %vm788_vm0, %v779_v8 }
  0xc3   : > { %14147 = vmatprep.mubr.msk.f32.mxu0 %vm788_vm0, %v780_v18 }
  0xc6   : > { %14148 = vmatmul.mubr.msk.f32.gmra.mrb[82].mxu0 %vm788_vm0, %v781_v19 }
  0xc7   : > { %14150 = vmatprep.mubr.msk.f32.mxu0 %vm788_vm0, %v782_v21 }
  0xca   : > { %14151 = vmatmul.mubr.msk.f32.gmra.mrb[84].mxu0 %vm788_vm0, %v783_v28 }
  0xcb   : > { %14153 = vmatprep.mubr.msk.f32.mxu0 %vm788_vm0, %v784_v29 }
  0xce   : > { %14154 = vmatmul.mubr.msk.f32.gmra.mrb[86].mxu0 %vm788_vm0, %v785_v31 }
  0xcf   : > { %14156 = vmatprep.mubr.msk.f32.mxu0 %vm788_vm0, %v786_v51 }
  0xd2   : > { %14157 = vmatmul.mubr.msk.f32.gmra.mrb[88].mxu0 %vm788_vm0, %v787_v52 }
  0xd3   : > { %14486 = vmatprep.mubr.msk.f32.mxu0 %vm788_vm0, %v16386_v9 }
  0xd6   : > { %14487 = vmatmul.mubr.msk.f32.vlgmr.msra.gmra.mrb[90].mxu0 %vm788_vm0, %v16391_v10 }
  0xd7   : > { %14489 = vmatprep.mubr.msk.f32.mxu0 %vm788_vm0, %v16394_v11 }
  0xda   : > { %14490 = vmatmul.mubr.msk.f32.gmra.mrb[92].mxu0 %vm788_vm0, %v16401_v12 }
  0xdb   : > { %14492 = vmatprep.mubr.msk.f32.mxu0 %vm788_vm0, %v16404_v13 }
  0xde   : > { %14493 = vmatmul.mubr.msk.f32.gmra.mrb[94].mxu0 %vm788_vm0, %v16411_v14 }
  0xdf   : > { %14495 = vmatprep.mubr.msk.f32.mxu0 %vm788_vm0, %v16414_v15 }
  0xe2   : > { %14496 = vmatmul.mubr.msk.f32.gmra.mrb[96].mxu0 %vm788_vm0, %v16421_v16 }
  0xe3   : > { %14498 = vmatprep.mubr.msk.f32.mxu0 %vm788_vm0, %v16424_v17 }
  0xe6   : > { %14499 = vmatmul.mubr.msk.f32.gmra.mrb[98].mxu0 %vm788_vm0, %v16437_v20 }
  0xe7   : > { %14501 = vmatprep.mubr.msk.f32.mxu0 %vm788_vm0, %v16440_v22 }
  0xea   : > { %14502 = vmatmul.mubr.msk.f32.gmra.mrb[100].mxu0 %vm788_vm0, %v16447_v23  ;;  %v16808_v23 = vld [vmem:[%s19505_s22 + $0x8] sm:$0xff] }
  0xeb   : > { %14504 = vmatprep.mubr.msk.f32.mxu0 %vm788_vm0, %v16450_v24 }
  0xee   : > { %14505 = vmatmul.mubr.msk.f32.gmra.mrb[102].mxu0 %vm788_vm0, %v16457_v25  ;;  %v16817_v25 = vld [vmem:[%s19505_s22 + $0x10] sm:$0xff] }
  0xef   : > { %14507 = vmatprep.mubr.msk.f32.mxu0 %vm788_vm0, %v16460_v26 }
  0xf2   : > { %14508 = vmatmul.mubr.msk.f32.gmra.mrb[104].mxu0 %vm788_vm0, %v16467_v27 }
  0xf3   : > { %14510 = vmatprep.mubr.msk.f32.mxu0 %vm788_vm0, %v16476_v30  ;;  %v16828_v30 = vld [vmem:[%s19505_s22 + $0x18] sm:$0xff] }
  0xf5   : > { %v14026_v9 = vpop.f32.mrb[0].mxu0 }
  0xf6   : > { %v1125_v10 = vpop.f32.mrb[1].mxu0  ;;  %14511 = vmatmul.mubr.msk.f32.gmra.mrb[106].mxu0 %vm788_vm0, %v16490_v32 }
  0xf7   : > { %v15610_v11 = vpack.c.bf16 %v14026_v9, %v1125_v10  ;;  %14513 = vmatprep.mubr.msk.f32.mxu0 %vm788_vm0, %v16493_v33  ;;  %v16837_v33 = vld [vmem:[%s19505_s22 + $0x20] sm:$0xff] }
  0xf9   : > { %v14029_v12 = vpop.f32.mrb[2].mxu0  ;;  %15611 = vmatprep.subr.bf16.mxu1 %v15610_v11 }
  0xfa   : > { %v1135_v13 = vpop.f32.mrb[3].mxu0  ;;  %15613 = vmatpush3.bf16.msra.mxu1 %v15610_v11  ;;  %14514 = vmatmul.mubr.msk.f32.gmra.mrb[108].mxu0 %vm788_vm0, %v16500_v34 }
  0xfb   : > { %v15614_v14 = vpack.c.bf16 %v14029_v12, %v1135_v13  ;;  %14516 = vmatprep.mubr.msk.f32.mxu0 %vm788_vm0, %v16503_v35 }
  0xfd   : > { %v14032_v15 = vpop.f32.mrb[4].mxu0  ;;  %15615 = vmatprep.subr.bf16.mxu1 %v15614_v14 }
  0xfe   : > { %v1145_v16 = vpop.f32.mrb[5].mxu0  ;;  %15617 = vmatpush3.bf16.msra.mxu1 %v15614_v14  ;;  %14517 = vmatmul.mubr.msk.f32.gmra.mrb[110].mxu0 %vm788_vm0, %v16510_v36  ;;  %v16848_v36 = vld [vmem:[%s19505_s22 + $0x28] sm:$0x3f] }
  0xff   : > { %v15618_v17 = vpack.c.bf16 %v14032_v15, %v1145_v16  ;;  %14519 = vmatprep.mubr.msk.f32.mxu0 %vm788_vm0, %v16513_v37 }
 0x101   : > { %v14035_v20 = vpop.f32.mrb[6].mxu0  ;;  %15619 = vmatprep.subr.bf16.mxu1 %v15618_v17 }
 0x102   : > { %v1155_v22 = vpop.f32.mrb[7].mxu0  ;;  %15621 = vmatpush3.bf16.msra.mxu1 %v15618_v17  ;;  %14520 = vmatmul.mubr.msk.f32.gmra.mrb[112].mxu0 %vm788_vm0, %v16520_v38 }
 0x103   : > { %v16812_v24 = vpack.c.bf16 %v14035_v20, %v1155_v22  ;;  %14522 = vmatprep.mubr.msk.f32.mxu0 %vm788_vm0, %v16523_v39 }
 0x105   : > { %v14038_v26 = vpop.f32.mrb[8].mxu0  ;;  %14172 = vmatmul.mubr.msk.f32.vlgmr.msra.gmra.mrb[0].mxu1 %vm788_vm0, %v16808_v23 }
 0x106   : > { %v1165_v27 = vpop.f32.mrb[9].mxu0  ;;  %14174 = vmatprep.mubr.msk.f32.mxu1 %vm788_vm0, %v16817_v25  ;;  %14523 = vmatmul.mubr.msk.f32.gmra.mrb[114].mxu0 %vm788_vm0, %v16530_v40 }
 0x107   : > { %v16832_v32 = vpack.c.bf16 %v14038_v26, %v1165_v27  ;;  %14525 = vmatprep.mubr.msk.f32.mxu0 %vm788_vm0, %v16533_v41 }
 0x109   : > { %v14041_v34 = vpop.f32.mrb[10].mxu0  ;;  %14175 = vmatmul.mubr.msk.f32.gmra.mrb[2].mxu1 %vm788_vm0, %v16828_v30 }
 0x10a   : > { %v1175_v35 = vpop.f32.mrb[11].mxu0  ;;  %14177 = vmatprep.mubr.msk.f32.mxu1 %vm788_vm0, %v16837_v33  ;;  %14526 = vmatmul.mubr.msk.f32.gmra.mrb[116].mxu0 %vm788_vm0, %v16540_v42 }
 0x10b   : > { %v16852_v37 = vpack.c.bf16 %v14041_v34, %v1175_v35  ;;  %14528 = vmatprep.mubr.msk.f32.mxu0 %vm788_vm0, %v16543_v43 }
 0x10d   : > { %v14044_v38 = vpop.f32.mrb[12].mxu0  ;;  %14178 = vmatmul.mubr.msk.f32.gmra.mrb[4].mxu1 %vm788_vm0, %v16848_v36 }
 0x10e   : > { %v1185_v39 = vpop.f32.mrb[13].mxu0  ;;  %14192 = vmatprep.mubr.msk.f32.mxu1 %vm788_vm0, %v16678_v55  ;;  %14529 = vmatmul.mubr.msk.f32.gmra.mrb[118].mxu0 %vm788_vm0, %v16550_v44 }
 0x10f   : > { %v16862_v40 = vpack.c.bf16 %v14044_v38, %v1185_v39  ;;  %14531 = vmatprep.mubr.msk.f32.mxu0 %vm788_vm0, %v16553_v45 }
 0x111   : > { %v14047_v41 = vpop.f32.mrb[14].mxu0 }
 0x112   : > { %v1195_v42 = vpop.f32.mrb[15].mxu0  ;;  %14532 = vmatmul.mubr.msk.f32.gmra.mrb[120].mxu0 %vm788_vm0, %v16560_v46 }
 0x113   : > { %v16868_v43 = vpack.c.bf16 %v14047_v41, %v1195_v42  ;;  %14534 = vmatprep.mubr.msk.f32.mxu0 %vm788_vm0, %v16563_v47 }
 0x115   : > { %v14050_v53 = vpop.f32.mrb[16].mxu0 }
 0x116   : > { %v1205_v54 = vpop.f32.mrb[17].mxu0  ;;  %14535 = vmatmul.mubr.msk.f32.gmra.mrb[122].mxu0 %vm788_vm0, %v16570_v48 }
 0x117   : > { %v16874_v44 = vpack.c.bf16 %v14050_v53, %v1205_v54  ;;  %14537 = vmatprep.mubr.msk.f32.mxu0 %vm788_vm0, %v16573_v49 }
 0x119   : > { %v14053_v45 = vpop.f32.mrb[18].mxu0 }
 0x11a   : > { %v1215_v56 = vpop.f32.mrb[19].mxu0  ;;  %14538 = vmatmul.mubr.msk.f32.gmra.mrb[124].mxu0 %vm788_vm0, %v16580_v50 }
 0x11b   : > { %v15622_v46 = vpack.c.bf16 %v14053_v45, %v1215_v56 }
 0x11d   : > { %v14056_v57 = vpop.f32.mrb[20].mxu0  ;;  %15623 = vmatprep.subr.bf16.mxu1 %v15622_v46 }
 0x11e   : > { %v1225_v58 = vpop.f32.mrb[21].mxu0  ;;  %15625 = vmatpush3.bf16.msra.mxu1 %v15622_v46 }
 0x11f   : > { %v15626_v47 = vpack.c.bf16 %v14056_v57, %v1225_v58 }
 0x121   : > { %v14059_v59 = vpop.f32.mrb[22].mxu0  ;;  %15627 = vmatprep.subr.bf16.mxu1 %v15626_v47 }
 0x122   : > { %v1235_v60 = vpop.f32.mrb[23].mxu0  ;;  %15629 = vmatpush3.bf16.msra.mxu1 %v15626_v47 }
 0x123   : > { %v15630_v48 = vpack.c.bf16 %v14059_v59, %v1235_v60 }
 0x125   : > { %v14062_v61 = vpop.f32.mrb[24].mxu0  ;;  %15631 = vmatprep.subr.bf16.mxu1 %v15630_v48 }
 0x126   : > { %v1245_v62 = vpop.f32.mrb[25].mxu0  ;;  %15633 = vmatpush3.bf16.msra.mxu1 %v15630_v48 }
 0x127   : > { %v16880_v49 = vpack.c.bf16 %v14062_v61, %v1245_v62 }
 0x129   : > { %v14065_v63 = vpop.f32.mrb[26].mxu0  ;;  %14193 = vmatmul.mubr.msk.f32.vlgmr.msra.gmra.mrb[6].mxu1 %vm788_vm0, %v16808_v23 }
 0x12a   : > { %v1255_v50 = vpop.f32.mrb[27].mxu0  ;;  %14195 = vmatprep.mubr.msk.f32.mxu1 %vm788_vm0, %v16817_v25 }
 0x12b   : > { %v16886_v0 = vpack.c.bf16 %v14065_v63, %v1255_v50 }
 0x12d   : > { %v14068_v1 = vpop.f32.mrb[28].mxu0  ;;  %14196 = vmatmul.mubr.msk.f32.gmra.mrb[8].mxu1 %vm788_vm0, %v16828_v30 }
 0x12e   : > { %v1265_v2 = vpop.f32.mrb[29].mxu0  ;;  %14198 = vmatprep.mubr.msk.f32.mxu1 %vm788_vm0, %v16837_v33 }
 0x12f   : > { %v16892_v3 = vpack.c.bf16 %v14068_v1, %v1265_v2 }
 0x131   : > { %v14071_v4 = vpop.f32.mrb[30].mxu0  ;;  %14199 = vmatmul.mubr.msk.f32.gmra.mrb[10].mxu1 %vm788_vm0, %v16848_v36 }
 0x132   : > { %v1275_v5 = vpop.f32.mrb[31].mxu0  ;;  %14213 = vmatprep.mubr.msk.f32.mxu1 %vm788_vm0, %v16678_v55 }
 0x133   : > { %v16898_v6 = vpack.c.bf16 %v14071_v4, %v1275_v5 }
 0x135   : > { %v14074_v7 = vpop.f32.mrb[32].mxu0 }
 0x136   : > { %v1285_v8 = vpop.f32.mrb[33].mxu0 }
 0x137   : > { %v16900_v18 = vpack.c.bf16 %v14074_v7, %v1285_v8 }
 0x139   : > { %v14077_v19 = vpop.f32.mrb[34].mxu0 }
 0x13a   : > { %v1295_v21 = vpop.f32.mrb[35].mxu0 }
 0x13b   : > { %v16902_v28 = vpack.c.bf16 %v14077_v19, %v1295_v21 }
 0x13d   : > { %v14080_v29 = vpop.f32.mrb[36].mxu0 }
 0x13e   : > { %v1305_v31 = vpop.f32.mrb[37].mxu0 }
 0x13f   : > { %v15634_v51 = vpack.c.bf16 %v14080_v29, %v1305_v31 }
 0x141   : > { %v14083_v52 = vpop.f32.mrb[38].mxu0  ;;  %15635 = vmatprep.subr.bf16.mxu1 %v15634_v51 }
 0x142   : > { %v1315_v9 = vpop.f32.mrb[39].mxu0  ;;  %15637 = vmatpush3.bf16.msra.mxu1 %v15634_v51 }
 0x143   : > { %v15638_v10 = vpack.c.bf16 %v14083_v52, %v1315_v9 }
 0x145   : > { %v14086_v11 = vpop.f32.mrb[40].mxu0  ;;  %15639 = vmatprep.subr.bf16.mxu1 %v15638_v10 }
 0x146   : > { %v1325_v12 = vpop.f32.mrb[41].mxu0  ;;  %15641 = vmatpush3.bf16.msra.mxu1 %v15638_v10 }
 0x147   : > { %v15642_v13 = vpack.c.bf16 %v14086_v11, %v1325_v12 }
 0x149   : > { %v14089_v14 = vpop.f32.mrb[42].mxu0  ;;  %15643 = vmatprep.subr.bf16.mxu1 %v15642_v13 }
 0x14a   : > { %v1335_v15 = vpop.f32.mrb[43].mxu0  ;;  %15645 = vmatpush3.bf16.msra.mxu1 %v15642_v13 }
 0x14b   : > { %v16904_v16 = vpack.c.bf16 %v14089_v14, %v1335_v15 }
 0x14d   : > { %v14092_v17 = vpop.f32.mrb[44].mxu0  ;;  %14214 = vmatmul.mubr.msk.f32.vlgmr.msra.gmra.mrb[12].mxu1 %vm788_vm0, %v16808_v23 }
 0x14e   : > { %v1345_v20 = vpop.f32.mrb[45].mxu0  ;;  %14216 = vmatprep.mubr.msk.f32.mxu1 %vm788_vm0, %v16817_v25 }
 0x14f   : > { %v16910_v22 = vpack.c.bf16 %v14092_v17, %v1345_v20 }
 0x151   : > { %v14095_v26 = vpop.f32.mrb[46].mxu0  ;;  %14217 = vmatmul.mubr.msk.f32.gmra.mrb[14].mxu1 %vm788_vm0, %v16828_v30 }
 0x152   : > { %v1355_v27 = vpop.f32.mrb[47].mxu0  ;;  %14219 = vmatprep.mubr.msk.f32.mxu1 %vm788_vm0, %v16837_v33 }
 0x153   : > { %v16916_v34 = vpack.c.bf16 %v14095_v26, %v1355_v27 }
 0x155   : > { %v14098_v35 = vpop.f32.mrb[48].mxu0  ;;  %14220 = vmatmul.mubr.msk.f32.gmra.mrb[16].mxu1 %vm788_vm0, %v16848_v36 }
 0x156   : > { %v1365_v38 = vpop.f32.mrb[49].mxu0  ;;  %14234 = vmatprep.mubr.msk.f32.mxu1 %vm788_vm0, %v16678_v55 }
 0x157   : > { %v16922_v39 = vpack.c.bf16 %v14098_v35, %v1365_v38  ;;  %v19486_v35 = vmov 0.0|0.0  }
 0x158   : > { %15856 = vmatprep.subr.bf16.mxu0 %v19486_v35 }
 0x159   : > { %v14101_v41 = vpop.f32.mrb[50].mxu0 }
 0x15a   : > { %v1375_v42 = vpop.f32.mrb[51].mxu0 }
 0x15b   : > { %v16924_v53 = vpack.c.bf16 %v14101_v41, %v1375_v42 }
 0x15d   : > { %v14104_v54 = vpop.f32.mrb[52].mxu0 }
 0x15e   : > { %v1385_v45 = vpop.f32.mrb[53].mxu0 }
 0x15f   : > { %v16926_v56 = vpack.c.bf16 %v14104_v54, %v1385_v45 }
 0x161   : > { %v14107_v46 = vpop.f32.mrb[54].mxu0 }
 0x162   : > { %v1395_v57 = vpop.f32.mrb[55].mxu0 }
 0x163   : > { %v15646_v58 = vpack.c.bf16 %v14107_v46, %v1395_v57 }
 0x165   : > { %v14110_v47 = vpop.f32.mrb[56].mxu0  ;;  %15647 = vmatprep.subr.bf16.mxu1 %v15646_v58 }
 0x166   : > { %v1405_v59 = vpop.f32.mrb[57].mxu0  ;;  %15649 = vmatpush3.bf16.msra.mxu1 %v15646_v58 }
 0x167   : > { %v15650_v60 = vpack.c.bf16 %v14110_v47, %v1405_v59  ;;  %v19484_v47 = vmov 0.0  }
 0x168   : > { %14672 = vmatprep.mubr.msk.f32.mxu0 %vm16234_vm1, %v19484_v47 }
 0x169   : > { %v14113_v48 = vpop.f32.mrb[58].mxu0  ;;  %15651 = vmatprep.subr.bf16.mxu1 %v15650_v60 }
 0x16a   : > { %v1415_v61 = vpop.f32.mrb[59].mxu0  ;;  %15653 = vmatpush3.bf16.msra.mxu1 %v15650_v60 }
 0x16b   : > { %v15654_v62 = vpack.c.bf16 %v14113_v48, %v1415_v61 }
 0x16d   : > { %v14116_v63 = vpop.f32.mrb[60].mxu0  ;;  %15655 = vmatprep.subr.bf16.mxu1 %v15654_v62 }
 0x16e   : > { %v1425_v50 = vpop.f32.mrb[61].mxu0  ;;  %15657 = vmatpush3.bf16.msra.mxu1 %v15654_v62 }
 0x16f   : > { %v16928_v1 = vpack.c.bf16 %v14116_v63, %v1425_v50 }
 0x171   : > { %v14119_v2 = vpop.f32.mrb[62].mxu0  ;;  %14235 = vmatmul.mubr.msk.f32.vlgmr.msra.gmra.mrb[18].mxu1 %vm788_vm0, %v16808_v23 }
 0x172   : > { %v1435_v4 = vpop.f32.mrb[63].mxu0  ;;  %14237 = vmatprep.mubr.msk.f32.mxu1 %vm788_vm0, %v16817_v25 }
 0x173   : > { %v16934_v5 = vpack.c.bf16 %v14119_v2, %v1435_v4 }
 0x175   : > { %v14122_v7 = vpop.f32.mrb[64].mxu0  ;;  %14238 = vmatmul.mubr.msk.f32.gmra.mrb[20].mxu1 %vm788_vm0, %v16828_v30 }
 0x176   : > { %v1445_v8 = vpop.f32.mrb[65].mxu0  ;;  %14240 = vmatprep.mubr.msk.f32.mxu1 %vm788_vm0, %v16837_v33 }
 0x177   : > { %v16940_v19 = vpack.c.bf16 %v14122_v7, %v1445_v8 }
 0x179   : > { %v14125_v21 = vpop.f32.mrb[66].mxu0  ;;  %14241 = vmatmul.mubr.msk.f32.gmra.mrb[22].mxu1 %vm788_vm0, %v16848_v36 }
 0x17a   : > { %v1455_v29 = vpop.f32.mrb[67].mxu0  ;;  %14255 = vmatprep.mubr.msk.f32.mxu1 %vm788_vm0, %v16678_v55 }
 0x17b   : > { %v16946_v31 = vpack.c.bf16 %v14125_v21, %v1455_v29 }
 0x17d   : > { %v14128_v51 = vpop.f32.mrb[68].mxu0 }
 0x17e   : > { %v1465_v52 = vpop.f32.mrb[69].mxu0 }
 0x17f   : > { %v16948_v9 = vpack.c.bf16 %v14128_v51, %v1465_v52 }
 0x181   : > { %v14131_v10 = vpop.f32.mrb[70].mxu0 }
 0x182   : > { %v1475_v11 = vpop.f32.mrb[71].mxu0 }
 0x183   : > { %v16950_v12 = vpack.c.bf16 %v14131_v10, %v1475_v11 }
 0x185   : > { %v14134_v13 = vpop.f32.mrb[72].mxu0 }
 0x186   : > { %v1485_v14 = vpop.f32.mrb[73].mxu0 }
 0x187   : > { %v15658_v15 = vpack.c.bf16 %v14134_v13, %v1485_v14 }
 0x189   : > { %v14137_v17 = vpop.f32.mrb[74].mxu0  ;;  %15659 = vmatprep.subr.bf16.mxu1 %v15658_v15 }
 0x18a   : > { %v1495_v20 = vpop.f32.mrb[75].mxu0  ;;  %15661 = vmatpush3.bf16.msra.mxu1 %v15658_v15 }
 0x18b   : > { %v15662_v26 = vpack.c.bf16 %v14137_v17, %v1495_v20 }
 0x18d   : > { %v14140_v27 = vpop.f32.mrb[76].mxu0  ;;  %15663 = vmatprep.subr.bf16.mxu1 %v15662_v26 }
 0x18e   : > { %v1505_v38 = vpop.f32.mrb[77].mxu0  ;;  %15665 = vmatpush3.bf16.msra.mxu1 %v15662_v26 }
 0x18f   : > { %v15666_v41 = vpack.c.bf16 %v14140_v27, %v1505_v38 }
 0x191   : > { %15667 = vmatprep.subr.bf16.mxu1 %v15666_v41  ;;  %v14143_v42 = vpop.f32.mrb[78].mxu0 }
 0x192   : > { %15669 = vmatpush3.bf16.msra.mxu1 %v15666_v41  ;;  %v1515_v54 = vpop.f32.mrb[79].mxu0 }
 0x193   : > { %15671 = vmatprep.subr.bf16.mxu1 %v16812_v24  ;;  %v16954_v45 = vpack.c.bf16 %v14143_v42, %v1515_v54 }
 0x195   : > { %14256 = vmatmul.mubr.msk.f32.vlgmr.msra.gmra.mrb[24].mxu1 %vm788_vm0, %v16808_v23  ;;  %v14146_v46 = vpop.f32.mrb[80].mxu0 }
 0x196   : > { %15673 = vmatpush3.bf16.msra.mxu1 %v16812_v24  ;;  %14258 = vmatprep.mubr.msk.f32.mxu1 %vm788_vm0, %v16817_v25  ;;  %v1525_v57 = vpop.f32.mrb[81].mxu0 }
 0x197   : > { %15675 = vmatprep.subr.bf16.mxu1 %v16832_v32  ;;  %v16962_v58 = vpack.c.bf16 %v14146_v46, %v1525_v57 }
 0x199   : > { %14259 = vmatmul.mubr.msk.f32.gmra.mrb[26].mxu1 %vm788_vm0, %v16828_v30  ;;  %v14149_v59 = vpop.f32.mrb[82].mxu0 }
 0x19a   : > { %15677 = vmatpush3.bf16.msra.mxu1 %v16832_v32  ;;  %14261 = vmatprep.mubr.msk.f32.mxu1 %vm788_vm0, %v16837_v33  ;;  %v1535_v24 = vpop.f32.mrb[83].mxu0 }
 0x19b   : > { %15679 = vmatprep.subr.bf16.mxu1 %v16852_v37  ;;  %v16972_v60 = vpack.c.bf16 %v14149_v59, %v1535_v24 }
 0x19d   : > { %14262 = vmatmul.mubr.msk.f32.gmra.mrb[28].mxu1 %vm788_vm0, %v16848_v36  ;;  %v14152_v48 = vpop.f32.mrb[84].mxu0 }
 0x19e   : > { %15681 = vmatpush3.bf16.msra.mxu1 %v16852_v37  ;;  %14276 = vmatprep.mubr.msk.f32.mxu1 %vm788_vm0, %v16678_v55  ;;  %v1545_v61 = vpop.f32.mrb[85].mxu0 }
 0x19f   : > { %15683 = vmatprep.subr.bf16.mxu1 %v16880_v49  ;;  %v16980_v32 = vpack.c.bf16 %v14152_v48, %v1545_v61 }
 0x1a1   : > { %14277 = vmatmul.mubr.msk.f32.vlgmr.msra.gmra.mrb[30].mxu1 %vm788_vm0, %v16808_v23  ;;  %v14155_v62 = vpop.f32.mrb[86].mxu0 }
 0x1a2   : > { %15685 = vmatpush3.bf16.msra.mxu1 %v16880_v49  ;;  %14279 = vmatprep.mubr.msk.f32.mxu1 %vm788_vm0, %v16817_v25  ;;  %v1555_v63 = vpop.f32.mrb[87].mxu0 }
 0x1a3   : > { %15687 = vmatprep.subr.bf16.mxu1 %v16886_v0  ;;  %v16988_v37 = vpack.c.bf16 %v14155_v62, %v1555_v63 }
 0x1a5   : > { %14280 = vmatmul.mubr.msk.f32.gmra.mrb[32].mxu1 %vm788_vm0, %v16828_v30  ;;  %v14158_v50 = vpop.f32.mrb[88].mxu0 }
 0x1a6   : > { %15689 = vmatpush3.bf16.msra.mxu1 %v16886_v0  ;;  %14282 = vmatprep.mubr.msk.f32.mxu1 %vm788_vm0, %v16837_v33  ;;  %v1565_v2 = vpop.f32.mrb[89].mxu0 }
 0x1a7   : > { %15691 = vmatprep.subr.bf16.mxu1 %v16892_v3  ;;  %v16996_v49 = vpack.c.bf16 %v14158_v50, %v1565_v2 }
 0x1a9   : > { %14283 = vmatmul.mubr.msk.f32.gmra.mrb[34].mxu1 %vm788_vm0, %v16848_v36  ;;  %v17000_v4 = vpop.f32.mrb[90].mxu0 }
 0x1aa   : > { %15693 = vmatpush3.bf16.msra.mxu1 %v16892_v3  ;;  %14297 = vmatprep.mubr.msk.f32.mxu1 %vm788_vm0, %v16678_v55  ;;  %v17005_v7 = vpop.f32.mrb[91].mxu0 }
 0x1ab   : > { %15695 = vmatprep.subr.bf16.mxu1 %v16904_v16 }
 0x1ad   : > { %14298 = vmatmul.mubr.msk.f32.vlgmr.msra.gmra.mrb[36].mxu1 %vm788_vm0, %v16808_v23  ;;  %v17012_v8 = vpop.f32.mrb[92].mxu0 }
 0x1ae   : > { %15697 = vmatpush3.bf16.msra.mxu1 %v16904_v16  ;;  %14300 = vmatprep.mubr.msk.f32.mxu1 %vm788_vm0, %v16817_v25  ;;  %v17017_v3 = vpop.f32.mrb[93].mxu0 }
 0x1af   : > { %15699 = vmatprep.subr.bf16.mxu1 %v16910_v22 }
 0x1b1   : > { %14301 = vmatmul.mubr.msk.f32.gmra.mrb[38].mxu1 %vm788_vm0, %v16828_v30  ;;  %v17024_v29 = vpop.f32.mrb[94].mxu0 }
 0x1b2   : > { %15701 = vmatpush3.bf16.msra.mxu1 %v16910_v22  ;;  %14303 = vmatprep.mubr.msk.f32.mxu1 %vm788_vm0, %v16837_v33  ;;  %v17029_v16 = vpop.f32.mrb[95].mxu0 }
 0x1b3   : > { %15703 = vmatprep.subr.bf16.mxu1 %v16916_v34 }
 0x1b5   : > { %14304 = vmatmul.mubr.msk.f32.gmra.mrb[40].mxu1 %vm788_vm0, %v16848_v36  ;;  %v17036_v52 = vpop.f32.mrb[96].mxu0 }
 0x1b6   : > { %15705 = vmatpush3.bf16.msra.mxu1 %v16916_v34  ;;  %14318 = vmatprep.mubr.msk.f32.mxu1 %vm788_vm0, %v16678_v55  ;;  %v17041_v22 = vpop.f32.mrb[97].mxu0 }
 0x1b7   : > { %15707 = vmatprep.subr.bf16.mxu1 %v16928_v1 }
 0x1b9   : > { %14319 = vmatmul.mubr.msk.f32.vlgmr.msra.gmra.mrb[42].mxu1 %vm788_vm0, %v16808_v23  ;;  %v17048_v11 = vpop.f32.mrb[98].mxu0 }
 0x1ba   : > { %15709 = vmatpush3.bf16.msra.mxu1 %v16928_v1  ;;  %14321 = vmatprep.mubr.msk.f32.mxu1 %vm788_vm0, %v16817_v25  ;;  %v17053_v34 = vpop.f32.mrb[99].mxu0 }
 0x1bb   : > { %15711 = vmatprep.subr.bf16.mxu1 %v16934_v5 }
 0x1bd   : > { %14322 = vmatmul.mubr.msk.f32.gmra.mrb[44].mxu1 %vm788_vm0, %v16828_v30  ;;  %v17060_v14 = vpop.f32.mrb[100].mxu0 }
 0x1be   : > { %15713 = vmatpush3.bf16.msra.mxu1 %v16934_v5  ;;  %14324 = vmatprep.mubr.msk.f32.mxu1 %vm788_vm0, %v16837_v33  ;;  %v17065_v1 = vpop.f32.mrb[101].mxu0 }
 0x1bf   : > { %15715 = vmatprep.subr.bf16.mxu1 %v16940_v19 }
 0x1c1   : > { %14325 = vmatmul.mubr.msk.f32.gmra.mrb[46].mxu1 %vm788_vm0, %v16848_v36  ;;  %v17072_v17 = vpop.f32.mrb[102].mxu0 }
 0x1c2   : > { %15717 = vmatpush3.bf16.msra.mxu1 %v16940_v19  ;;  %14339 = vmatprep.mubr.msk.f32.mxu1 %vm788_vm0, %v16678_v55  ;;  %v17077_v5 = vpop.f32.mrb[103].mxu0 }
 0x1c3   : > { %15719 = vmatprep.subr.bf16.mxu1 %v16954_v45 }
 0x1c5   : > { %14340 = vmatmul.mubr.msk.f32.vlgmr.msra.gmra.mrb[48].mxu1 %vm788_vm0, %v16808_v23  ;;  %v17084_v26 = vpop.f32.mrb[104].mxu0 }
 0x1c6   : > { %15721 = vmatpush3.bf16.msra.mxu1 %v16954_v45  ;;  %14342 = vmatprep.mubr.msk.f32.mxu1 %vm788_vm0, %v16817_v25  ;;  %v17089_v19 = vpop.f32.mrb[105].mxu0 }
 0x1c7   : > { %15723 = vmatprep.subr.bf16.mxu1 %v16962_v58 }
 0x1c9   : > { %14343 = vmatmul.mubr.msk.f32.gmra.mrb[50].mxu1 %vm788_vm0, %v16828_v30  ;;  %v17096_v38 = vpop.f32.mrb[106].mxu0 }
 0x1ca   : > { %15725 = vmatpush3.bf16.msra.mxu1 %v16962_v58  ;;  %14345 = vmatprep.mubr.msk.f32.mxu1 %vm788_vm0, %v16837_v33  ;;  %v17101_v41 = vpop.f32.mrb[107].mxu0 }
 0x1cb   : > { %15727 = vmatprep.subr.bf16.mxu1 %v16972_v60 }
 0x1cd   : > { %14346 = vmatmul.mubr.msk.f32.gmra.mrb[52].mxu1 %vm788_vm0, %v16848_v36  ;;  %v17108_v54 = vpop.f32.mrb[108].mxu0 }
 0x1ce   : > { %15729 = vmatpush3.bf16.msra.mxu1 %v16972_v60  ;;  %14360 = vmatprep.mubr.msk.f32.mxu1 %vm788_vm0, %v16678_v55  ;;  %v17113_v45 = vpop.f32.mrb[109].mxu0 }
 0x1cf   : > { %15731 = vmatprep.subr.bf16.mxu1 %v16862_v40 }
 0x1d1   : > { %14361 = vmatmul.mubr.msk.f32.vlgmr.msra.gmra.mrb[54].mxu1 %vm788_vm0, %v16808_v23  ;;  %v17120_v57 = vpop.f32.mrb[110].mxu0 }
 0x1d2   : > { %15733 = vmatpush3.bf16.msra.mxu1 %v16862_v40  ;;  %14363 = vmatprep.mubr.msk.f32.mxu1 %vm788_vm0, %v16817_v25  ;;  %v17125_v58 = vpop.f32.mrb[111].mxu0 }
 0x1d3   : > { %15735 = vmatprep.subr.bf16.mxu1 %v16868_v43 }
 0x1d5   : > { %14364 = vmatmul.mubr.msk.f32.gmra.mrb[56].mxu1 %vm788_vm0, %v16828_v30  ;;  %v17132_v24 = vpop.f32.mrb[112].mxu0 }
 0x1d6   : > { %15737 = vmatpush3.bf16.msra.mxu1 %v16868_v43  ;;  %14366 = vmatprep.mubr.msk.f32.mxu1 %vm788_vm0, %v16837_v33  ;;  %v17137_v40 = vpop.f32.mrb[113].mxu0 }
 0x1d7   : > { %15739 = vmatprep.subr.bf16.mxu1 %v16874_v44 }
 0x1d8   : > { %v17142_v48 = vpop.f32.mrb[0].mxu1 }
 0x1d9   : > { %14367 = vmatmul.mubr.msk.f32.gmra.mrb[58].mxu1 %vm788_vm0, %v16848_v36  ;;  %v17146_v61 = vpop.f32.mrb[1].mxu1  ;;  %v17148_v62 = vpop.f32.mrb[114].mxu0 }
 0x1da   : > { %15741 = vmatpush3.bf16.msra.mxu1 %v16874_v44  ;;  %14381 = vmatprep.mubr.msk.f32.mxu1 %vm788_vm0, %v16678_v55  ;;  %v17153_v43 = vpop.f32.mrb[115].mxu0 }
 0x1db   : > { %15743 = vmatprep.subr.bf16.mxu1 %v16898_v6 }
 0x1dc   : > { %v17158_v50 = vpop.f32.mrb[2].mxu1 }
 0x1dd   : > { %14382 = vmatmul.mubr.msk.f32.vlgmr.msra.gmra.mrb[60].mxu1 %vm788_vm0, %v16808_v23  ;;  %v17162_v2 = vpop.f32.mrb[3].mxu1  ;;  %v17164_v42 = vpop.f32.mrb[116].mxu0  ;;  %v17270_v51 = vmul.f32 %v17158_v50, %v17158_v50 }
 0x1de   : > { %15745 = vmatpush3.bf16.msra.mxu1 %v16898_v6  ;;  %14384 = vmatprep.mubr.msk.f32.mxu1 %vm788_vm0, %v16817_v25  ;;  %v17169_v44 = vpop.f32.mrb[117].mxu0 }
 0x1df   : > { %15747 = vmatprep.subr.bf16.mxu1 %v16900_v18 }
 0x1e0   : > { %v17174_v20 = vpop.f32.mrb[4].mxu1 }
 0x1e1   : > { %14385 = vmatmul.mubr.msk.f32.gmra.mrb[62].mxu1 %vm788_vm0, %v16828_v30  ;;  %v17178_v63 = vpop.f32.mrb[5].mxu1  ;;  %v17180_v15 = vpop.f32.mrb[118].mxu0 }
 0x1e2   : > { %15749 = vmatpush3.bf16.msra.mxu1 %v16900_v18  ;;  %14387 = vmatprep.mubr.msk.f32.mxu1 %vm788_vm0, %v16837_v33  ;;  %v17185_v6 = vpop.f32.mrb[119].mxu0 }
 0x1e3   : > { %15751 = vmatprep.subr.bf16.mxu1 %v16902_v28 }
 0x1e5   : > { %14388 = vmatmul.mubr.msk.f32.gmra.mrb[64].mxu1 %vm788_vm0, %v16848_v36  ;;  %v17192_v13 = vpop.f32.mrb[120].mxu0 }
 0x1e6   : > { %19506 = vst [vmem:[#allocation2_spill] sm:$0xff] %v17192_v13  ;;  %15753 = vmatpush3.bf16.msra.mxu1 %v16902_v28  ;;  %14402 = vmatprep.mubr.msk.f32.mxu1 %vm788_vm0, %v16678_v55  ;;  %v17197_v18 = vpop.f32.mrb[121].mxu0 }
 0x1e7   : > { %19507 = vst [vmem:[#allocation3_spill] sm:$0xff] %v17197_v18  ;;  %15755 = vmatprep.subr.bf16.mxu1 %v16922_v39 }
 0x1e9   : > { %14403 = vmatmul.mubr.msk.f32.vlgmr.msra.gmra.mrb[66].mxu1 %vm788_vm0, %v16808_v23  ;;  %v17204_v27 = vpop.f32.mrb[122].mxu0 }
 0x1ea   : > { %19508 = vst [vmem:[#allocation4_spill] sm:$0xff] %v17204_v27  ;;  %15757 = vmatpush3.bf16.msra.mxu1 %v16922_v39  ;;  %14405 = vmatprep.mubr.msk.f32.mxu1 %vm788_vm0, %v16817_v25  ;;  %v17209_v28 = vpop.f32.mrb[123].mxu0 }
 0x1eb   : > { %19509 = vst [vmem:[#allocation5_spill] sm:$0xff] %v17209_v28  ;;  %15759 = vmatprep.subr.bf16.mxu1 %v16924_v53 }
 0x1ed   : > { %14406 = vmatmul.mubr.msk.f32.gmra.mrb[68].mxu1 %vm788_vm0, %v16828_v30  ;;  %v17216_v10 = vpop.f32.mrb[124].mxu0 }
 0x1ee   : > { %19510 = vst [vmem:[#allocation6_spill] sm:$0xff] %v17216_v10  ;;  %15761 = vmatpush3.bf16.msra.mxu1 %v16924_v53  ;;  %14408 = vmatprep.mubr.msk.f32.mxu1 %vm788_vm0, %v16837_v33  ;;  %v17221_v39 = vpop.f32.mrb[125].mxu0  ;;  %v17246_v53 = vmul.f32 %v17142_v48, %v17142_v48 }
 0x1ef   : > { %19511 = vst [vmem:[#allocation7_spill] sm:$0xff] %v17221_v39  ;;  %15763 = vmatprep.subr.bf16.mxu1 %v16926_v56 }
 0x1f1   : > { %14409 = vmatmul.mubr.msk.f32.gmra.mrb[70].mxu1 %vm788_vm0, %v16848_v36 }
 0x1f2   : > { %15765 = vmatpush3.bf16.msra.mxu1 %v16926_v56  ;;  %14423 = vmatprep.mubr.msk.f32.mxu1 %vm788_vm0, %v16678_v55 }
 0x1f3   : > { %15767 = vmatprep.subr.bf16.mxu1 %v16946_v31 }
 0x1f5   : > { %14424 = vmatmul.mubr.msk.f32.vlgmr.msra.gmra.mrb[72].mxu1 %vm788_vm0, %v16808_v23 }
 0x1f6   : > { %15769 = vmatpush3.bf16.msra.mxu1 %v16946_v31  ;;  %14426 = vmatprep.mubr.msk.f32.mxu1 %vm788_vm0, %v16817_v25  ;;  %v17250_v31 = vmul.f32 %v17146_v61, %v17146_v61 }
 0x1f7   : > { %15771 = vmatprep.subr.bf16.mxu1 %v16948_v9 }
 0x1f9   : > { %14427 = vmatmul.mubr.msk.f32.gmra.mrb[74].mxu1 %vm788_vm0, %v16828_v30 }
 0x1fa   : > { %15773 = vmatpush3.bf16.msra.mxu1 %v16948_v9  ;;  %14429 = vmatprep.mubr.msk.f32.mxu1 %vm788_vm0, %v16837_v33 }
 0x1fb   : > { %15775 = vmatprep.subr.bf16.mxu1 %v16950_v12 }
 0x1fc   : > { %v14194_v56 = vpop.f32.mrb[6].mxu1 }
 0x1fd   : > { %14430 = vmatmul.mubr.msk.f32.gmra.mrb[76].mxu1 %vm788_vm0, %v16848_v36  ;;  %v1753_v59 = vpop.f32.mrb[7].mxu1  ;;  %v17254_v60 = vmul.f32 %v14194_v56, %v14194_v56  ;;  %v17257_v9 = vmul.f32 %v14194_v56, %v17142_v48 }
 0x1fe   : > { %15777 = vmatpush3.bf16.msra.mxu1 %v16950_v12  ;;  %14444 = vmatprep.mubr.msk.f32.mxu1 %vm788_vm0, %v16678_v55  ;;  %v17262_v46 = vmul.f32 %v1753_v59, %v1753_v59  ;;  %v17265_v47 = vmul.f32 %v1753_v59, %v17146_v61  ;;  %v17276_v12 = vmul.f32 %v17162_v2, %v17162_v2 }
 0x1ff   : > { %19512 = vst [vmem:[#allocation8_spill] sm:$0xff] %v17257_v9  ;;  %15779 = vmatprep.subr.bf16.mxu1 %v16980_v32  ;;  %v2152_v48 = vadd.f32 %v17254_v60, %v17246_v53 }
 0x200   : > { %19513 = vst [vmem:[#allocation9_spill] sm:$0xff] %v17265_v47  ;;  %v14197_v56 = vpop.f32.mrb[8].mxu1  ;;  %v2151_v21 = vadd.f32 %v17262_v46, %v17250_v31 }
 0x201   : > { %14445 = vmatmul.mubr.msk.f32.vlgmr.msra.gmra.mrb[78].mxu1 %vm788_vm0, %v16808_v23  ;;  %v1763_v59 = vpop.f32.mrb[9].mxu1  ;;  %v2158_v61 = vadd.f32 0.0001, %v2152_v48  ;;  %v17282_v0 = vmul.f32 %v14197_v56, %v14197_v56  ;;  %v17285_v35 = vmul.f32 %v14197_v56, %v17158_v50  ;;  %v17298_v48 = vmul.f32 %v17174_v20, %v17174_v20 }
 0x202   : > { %15781 = vmatpush3.bf16.msra.mxu1 %v16980_v32  ;;  %14447 = vmatprep.mubr.msk.f32.mxu1 %vm788_vm0, %v16817_v25  ;;  %v2157_v39 = vadd.f32 0.0001, %v2151_v21  ;;  %v17290_v10 = vmul.f32 %v1763_v59, %v1763_v59  ;;  %v17293_v28 = vmul.f32 %v1763_v59, %v17162_v2  ;;  %v17304_v56 = vmul.f32 %v17178_v63, %v17178_v63 }
 0x203   : > { %15783 = vmatprep.subr.bf16.mxu1 %v16988_v37  ;;  %16069 = vrcp.f32 %v2158_v61  ;;  %v2154_v50 = vadd.f32 %v17282_v0, %v17270_v51 }
 0x204   : > { %19514 = vst [vmem:[#allocation10_spill] sm:$0xff] %v17290_v10  ;;  %v14200_v32 = vpop.f32.mrb[10].mxu1  ;;  %16071 = vrcp.f32 %v2157_v39  ;;  %v2153_v21 = vadd.f32 %v17290_v10, %v17276_v12  ;;  %v2140_v10 = vmul.f32 2.0, %v17257_v9 }
 0x205   : > { %14448 = vmatmul.mubr.msk.f32.gmra.mrb[80].mxu1 %vm788_vm0, %v16828_v30  ;;  %v1773_v2 = vpop.f32.mrb[11].mxu1  ;;  %v2160_v59 = vadd.f32 0.0001, %v2154_v50  ;;  %v17310_v27 = vmul.f32 %v14200_v32, %v14200_v32  ;;  %v17313_v61 = vmul.f32 %v14200_v32, %v17174_v20  ;;  %v2139_v50 = vmul.f32 2.0, %v17265_v47 }
 0x206   : > { %15785 = vmatpush3.bf16.msra.mxu1 %v16988_v37  ;;  %14450 = vmatprep.mubr.msk.f32.mxu1 %vm788_vm0, %v16837_v33  ;;  %v2159_v18 = vadd.f32 0.0001, %v2153_v21  ;;  %v17318_v39 = vmul.f32 %v1773_v2, %v1773_v2  ;;  %v17321_v13 = vmul.f32 %v1773_v2, %v17178_v63  ;;  %v2146_v21 = vadd.f32 0.0001, %v2140_v10 }
 0x207   : > { %15787 = vmatprep.subr.bf16.mxu1 %v16996_v49  ;;  %16073 = vrcp.f32 %v2160_v59  ;;  %v2156_v20 = vadd.f32 %v17310_v27, %v17298_v48  ;;  %v2142_v2 = vmul.f32 2.0, %v17285_v35  ;;  %v19515_v59 = vmov 0.0|0.0  }
 0x208   : > { %16075 = vrcp.f32 %v2159_v18  ;;  %v2155_v37 = vadd.f32 %v17318_v39, %v17304_v56  ;;  %v2145_v18 = vadd.f32 0.0001, %v2139_v50  ;;  %v2141_v47 = vmul.f32 2.0, %v17293_v28 }
 0x209   : > { %14451 = vmatmul.mubr.msk.f32.gmra.mrb[82].mxu1 %vm788_vm0, %v16848_v36  ;;  %v2162_v32 = vadd.f32 0.0001, %v2156_v20  ;;  %v2148_v10 = vadd.f32 0.0001, %v2142_v2  ;;  %v2144_v50 = vmul.f32 2.0, %v17313_v61 }
 0x20a   : > { %15789 = vmatpush3.bf16.msra.mxu1 %v16996_v49  ;;  %14465 = vmatprep.mubr.msk.f32.mxu1 %vm788_vm0, %v16678_v55  ;;  %v2161_v63 = vadd.f32 0.0001, %v2155_v37  ;;  %v19516_v49 = vpack.c.bf16 %v17000_v4, %v17005_v7 }
 0x20b   : > { %15802 = vmatprep.subr.bf16.mxu1 %v19515_v59  ;;  %16077 = vrcp.f32 %v2162_v32  ;;  %v2147_v32 = vadd.f32 0.0001, %v2141_v47 }
 0x20c   : > { %16079 = vrcp.f32 %v2161_v63 }
 0x20d   : > { %v16070_v9 = vpop.eup %16069  ;;  %14466 = vmatmul.mubr.msk.f32.vlgmr.msra.gmra.mrb[84].mxu1 %vm788_vm0, %v16808_v23  ;;  %v2143_v23 = vmul.f32 2.0, %v17321_v13 }
 0x20e   : > { %v16072_v20 = vpop.eup %16071  ;;  %15804 = vmatpush3.bf16.msra.mxu1 %v19516_v49  ;;  %14468 = vmatprep.mubr.msk.f32.mxu1 %vm788_vm0, %v16817_v25  ;;  %v17345_v55 = vmul.f32 %v16070_v9, %v2146_v21  ;;  %v19517_v25 = vpack.c.bf16 %v17012_v8, %v17017_v3  ;;  %v2150_v9 = vadd.f32 0.0001, %v2144_v50  ;;  %v19518_v8 = vpack.c.bf16 %v17024_v29, %v17029_v16  ;;  %v17391_v29 = vld [vmem:[%s19471_s12 + $0x8] sm:$0xff] }
 0x20f   : > { %15805 = vmatprep.subr.bf16.mxu1 %v19515_v59  ;;  %v17349_v37 = vmul.f32 %v16072_v20, %v2145_v18  ;;  %v2149_v21 = vadd.f32 0.0001, %v2143_v23  ;;  %v19519_v3 = vmov 0.0   ;;  %v19521_v16 = vpack.c.bf16 %v17120_v57, %v17125_v58 }
 0x210   : > { %v19522_v57 = vpack.c.bf16 %v17132_v24, %v17137_v40 }
 0x211   : > { %v16074_v63 = vpop.eup %16073  ;;  %14469 = vmatmul.mubr.msk.f32.gmra.mrb[86].mxu1 %vm788_vm0, %v16828_v30 }
 0x212   : > { %v16076_v4 = vpop.eup %16075  ;;  %15807 = vmatpush3.bf16.msra.mxu1 %v19517_v25  ;;  %14471 = vmatprep.mubr.msk.f32.mxu1 %vm788_vm0, %v16837_v33  ;;  %v17359_v7 = vmul.f32 %v16074_v63, %v2148_v10  ;;  %v17374_v33 = vld [vmem:[%s19471_s12] sm:$0xff] }
 0x213   : > { %15808 = vmatprep.subr.bf16.mxu1 %v19515_v59  ;;  %v17362_v47 = vmul.f32 %v16076_v4, %v2147_v32 }
 0x215   : > { %v16078_v2 = vpop.eup %16077  ;;  %14472 = vmatmul.mubr.msk.f32.gmra.mrb[88].mxu1 %vm788_vm0, %v16848_v36  ;;  %v19520_v36 = vpack.c.bf16 %v17108_v54, %v17113_v45  ;;  %v17404_v54 = vld [vmem:[%s19471_s12 + $0x10] sm:$0xff] }
 0x216   : > { %v16080_v30 = vpop.eup %16079  ;;  %15810 = vmatpush3.bf16.msra.mxu1 %v19518_v8  ;;  %14552 = vmatprep.mubr.msk.f32.mxu1 %vm16234_vm1, %v19519_v3  ;;  %v17376_v18 = vmul.f32 %v16078_v2, %v2150_v9  ;;  %v19536_v2 = vld [vmem:[#allocation4_spill] sm:$0xff] }
 0x217   : > { %15811 = vmatprep.subr.bf16.mxu1 %v19515_v59  ;;  %v17379_v20 = vmul.f32 %v16080_v30, %v2149_v21  ;;  %v19537_v30 = vld [vmem:[#allocation5_spill] sm:$0xff] }
 0x218   : > { %v19538_v8 = vpack.c.bf16 %v19536_v2, %v19537_v30 }
 0x219   : > { %14553 = vmatmul.mubr.msk.f32.vlgmr.msra.gmra.mrb[90].mxu1 %vm788_vm0, %v17374_v33 }
 0x21a   : > { %15813 = vmatpush3.bf16.msra.mxu1 %v19520_v36  ;;  %14555 = vmatprep.mubr.msk.f32.mxu1 %vm16234_vm1, %v19519_v3 }
 0x21b   : > { %15814 = vmatprep.subr.bf16.mxu1 %v19515_v59 }
 0x21d   : > { %14556 = vmatmul.mubr.msk.f32.gmra.mrb[92].mxu1 %vm788_vm0, %v17391_v29 }
 0x21e   : > { %15816 = vmatpush3.bf16.msra.mxu1 %v19521_v16  ;;  %14558 = vmatprep.mubr.msk.f32.mxu1 %vm16234_vm1, %v19519_v3 }
 0x21f   : > { %15817 = vmatprep.subr.bf16.mxu1 %v19515_v59 }
 0x220   : > { %v14215_v45 = vpop.f32.mrb[12].mxu1 }
 0x221   : > { %14559 = vmatmul.mubr.msk.f32.gmra.mrb[94].mxu1 %vm788_vm0, %v17404_v54  ;;  %v2086_v49 = vsub.f32 %v14215_v45, %v17246_v53  ;;  %v1848_v10 = vpop.f32.mrb[13].mxu1  ;;  %v19523_v53 = vpack.c.bf16 %v17036_v52, %v17041_v22  ;;  %v19525_v22 = vpack.c.bf16 %v17060_v14, %v17065_v1  ;;  %v19528_v14 = vpack.c.bf16 %v17180_v15, %v17185_v6  ;;  %v19540_v45 = vld [vmem:[#allocation7_spill] sm:$0xff] }
 0x222   : > { %15819 = vmatpush3.bf16.msra.mxu1 %v19522_v57  ;;  %14573 = vmatprep.mubr.msk.f32.mxu1 %vm16234_vm1, %v19519_v3  ;;  %v2085_v58 = vsub.f32 %v1848_v10, %v17250_v31  ;;  %v19529_v1 = vpack.c.bf16 %v17072_v17, %v17077_v5  ;;  %v19530_v15 = vpack.c.bf16 %v17084_v26, %v17089_v19 }
 0x223   : > { %15820 = vmatprep.subr.bf16.mxu1 %v19515_v59 }
 0x224   : > { %v14218_v50 = vpop.f32.mrb[14].mxu1 }
 0x225   : > { %14574 = vmatmul.mubr.msk.f32.vlgmr.msra.gmra.mrb[96].mxu1 %vm788_vm0, %v17374_v33  ;;  %v2088_v32 = vsub.f32 %v14218_v50, %v17270_v51  ;;  %v1858_v23 = vpop.f32.mrb[15].mxu1  ;;  %v19524_v51 = vpack.c.bf16 %v17048_v11, %v17053_v34  ;;  %v19526_v11 = vpack.c.bf16 %v17148_v62, %v17153_v43  ;;  %v19527_v34 = vpack.c.bf16 %v17164_v42, %v17169_v44 }
 0x226   : > { %15822 = vmatpush3.bf16.msra.mxu1 %v19523_v53  ;;  %14576 = vmatprep.mubr.msk.f32.mxu1 %vm16234_vm1, %v19519_v3  ;;  %v2087_v24 = vsub.f32 %v1858_v23, %v17276_v12  ;;  %v19531_v43 = vpack.c.bf16 %v17096_v38, %v17101_v41  ;;  %v19532_v12 = vld [vmem:[#allocation10_spill] sm:$0xff]  ;;  %v19542_v53 = vld [vmem:[#allocation8_spill] sm:$0xff] }
 0x227   : > { %15823 = vmatprep.subr.bf16.mxu1 %v19515_v59 }
 0x228   : > { %v14221_v40 = vpop.f32.mrb[16].mxu1 }
 0x229   : > { %14577 = vmatmul.mubr.msk.f32.gmra.mrb[98].mxu1 %vm788_vm0, %v17391_v29  ;;  %v2090_v31 = vsub.f32 %v14221_v40, %v17298_v48  ;;  %v1868_v63 = vpop.f32.mrb[17].mxu1  ;;  %v19533_v48 = vld [vmem:[#allocation2_spill] sm:$0xff] }
 0x22a   : > { %15825 = vmatpush3.bf16.msra.mxu1 %v19524_v51  ;;  %14579 = vmatprep.mubr.msk.f32.mxu1 %vm16234_vm1, %v19519_v3  ;;  %v2089_v52 = vsub.f32 %v1868_v63, %v17304_v56  ;;  %v19534_v56 = vld [vmem:[#allocation3_spill] sm:$0xff] }
 0x22b   : > { %15826 = vmatprep.subr.bf16.mxu1 %v19515_v59  ;;  %v19535_v38 = vpack.c.bf16 %v19533_v48, %v19534_v56 }
 0x22d   : > { %14580 = vmatmul.mubr.msk.f32.gmra.mrb[100].mxu1 %vm788_vm0, %v17404_v54 }
 0x22e   : > { %15828 = vmatpush3.bf16.msra.mxu1 %v19525_v22  ;;  %14594 = vmatprep.mubr.msk.f32.mxu1 %vm16234_vm1, %v19519_v3 }
 0x22f   : > { %15829 = vmatprep.subr.bf16.mxu1 %v19515_v59 }
 0x231   : > { %14595 = vmatmul.mubr.msk.f32.vlgmr.msra.gmra.mrb[102].mxu1 %vm788_vm0, %v17374_v33 }
 0x232   : > { %15831 = vmatpush3.bf16.msra.mxu1 %v19526_v11  ;;  %14597 = vmatprep.mubr.msk.f32.mxu1 %vm16234_vm1, %v19519_v3 }
 0x233   : > { %15832 = vmatprep.subr.bf16.mxu1 %v19515_v59 }
 0x235   : > { %14598 = vmatmul.mubr.msk.f32.gmra.mrb[104].mxu1 %vm788_vm0, %v17391_v29 }
 0x236   : > { %15834 = vmatpush3.bf16.msra.mxu1 %v19527_v34  ;;  %14600 = vmatprep.mubr.msk.f32.mxu1 %vm16234_vm1, %v19519_v3 }
 0x237   : > { %15835 = vmatprep.subr.bf16.mxu1 %v19515_v59 }
 0x239   : > { %14601 = vmatmul.mubr.msk.f32.gmra.mrb[106].mxu1 %vm788_vm0, %v17404_v54 }
 0x23a   : > { %15837 = vmatpush3.bf16.msra.mxu1 %v19528_v14  ;;  %14615 = vmatprep.mubr.msk.f32.mxu1 %vm16234_vm1, %v19519_v3 }
 0x23b   : > { %15838 = vmatprep.subr.bf16.mxu1 %v19515_v59 }
 0x23d   : > { %14616 = vmatmul.mubr.msk.f32.vlgmr.msra.gmra.mrb[108].mxu1 %vm788_vm0, %v17374_v33 }
 0x23e   : > { %15840 = vmatpush3.bf16.msra.mxu1 %v19529_v1  ;;  %14618 = vmatprep.mubr.msk.f32.mxu1 %vm16234_vm1, %v19519_v3 }
 0x23f   : > { %15841 = vmatprep.subr.bf16.mxu1 %v19515_v59 }
 0x241   : > { %14619 = vmatmul.mubr.msk.f32.gmra.mrb[110].mxu1 %vm788_vm0, %v17391_v29 }
 0x242   : > { %15843 = vmatpush3.bf16.msra.mxu1 %v19530_v15  ;;  %14621 = vmatprep.mubr.msk.f32.mxu1 %vm16234_vm1, %v19519_v3 }
 0x243   : > { %15844 = vmatprep.subr.bf16.mxu1 %v19515_v59 }
 0x244   : > { %v14236_v42 = vpop.f32.mrb[18].mxu1 }
 0x245   : > { %v2092_v17 = vsub.f32 %v14236_v42, %v17254_v60  ;;  %v1943_v5 = vpop.f32.mrb[19].mxu1  ;;  %14622 = vmatmul.mubr.msk.f32.gmra.mrb[112].mxu1 %vm788_vm0, %v17404_v54 }
 0x246   : > { %v2091_v62 = vsub.f32 %v1943_v5, %v17262_v46  ;;  %15846 = vmatpush3.bf16.msra.mxu1 %v19531_v43  ;;  %14636 = vmatprep.mubr.msk.f32.mxu1 %vm16234_vm1, %v19519_v3 }
 0x247   : > { %v2116_v26 = vadd.f32 %v2092_v17, %v2086_v49  ;;  %15847 = vmatprep.subr.bf16.mxu1 %v19515_v59 }
 0x248   : > { %v2115_v19 = vadd.f32 %v2091_v62, %v2085_v58  ;;  %v14239_v44 = vpop.f32.mrb[20].mxu1  ;;  %v4300_v58 = vld [vmem:[%s19467_s8] sm:$0xff] }
 0x249   : > { %v2094_v60 = vsub.f32 %v14239_v44, %v17282_v0  ;;  %v1953_v6 = vpop.f32.mrb[21].mxu1  ;;  %14637 = vmatmul.mubr.msk.f32.vlgmr.msra.gmra.mrb[114].mxu1 %vm788_vm0, %v17374_v33 }
 0x24a   : > { %v2093_v46 = vsub.f32 %v1953_v6, %v19532_v12  ;;  %15849 = vmatpush3.bf16.msra.mxu1 %v19535_v38  ;;  %14639 = vmatprep.mubr.msk.f32.mxu1 %vm16234_vm1, %v19519_v3  ;;  %v2121_v10 = vadd.f32 0.0009, %v2115_v19 }
 0x24b   : > { %v2118_v41 = vadd.f32 %v2094_v60, %v2088_v32  ;;  %15850 = vmatprep.subr.bf16.mxu1 %v19515_v59 }
 0x24c   : > { %v2117_v4 = vadd.f32 %v2093_v46, %v2087_v24  ;;  %v14242_v25 = vpop.f32.mrb[22].mxu1 }
 0x24d   : > { %v2096_v0 = vsub.f32 %v14242_v25, %v17310_v27  ;;  %v1963_v9 = vpop.f32.mrb[23].mxu1  ;;  %14640 = vmatmul.mubr.msk.f32.gmra.mrb[116].mxu1 %vm788_vm0, %v17391_v29  ;;  %v19539_v27 = vld [vmem:[#allocation6_spill] sm:$0xff]  ;;  %v2124_v57 = vadd.f32 0.0009, %v2118_v41 }
 0x24e   : > { %v2095_v21 = vsub.f32 %v1963_v9, %v17318_v39  ;;  %15852 = vmatpush3.bf16.msra.mxu1 %v19538_v8  ;;  %14642 = vmatprep.mubr.msk.f32.mxu1 %vm16234_vm1, %v19519_v3  ;;  %v19541_v49 = vpack.c.bf16 %v19539_v27, %v19540_v45  ;;  %v2122_v39 = vadd.f32 0.0009, %v2116_v26 }
 0x24f   : > { %v2120_v36 = vadd.f32 %v2096_v0, %v2090_v31  ;;  %15853 = vmatprep.subr.bf16.mxu1 %v19515_v59  ;;  %v19543_v31 = vld [vmem:[#allocation9_spill] sm:$0xff] }
 0x250   : > { %v2119_v16 = vadd.f32 %v2095_v21, %v2089_v52  ;;  %16081 = vrcp.f32 %v2122_v39  ;;  %v4302_v52 = vld [vmem:[%s19467_s8 + $0x10] sm:$0xff] }
 0x251   : > { %14643 = vmatmul.mubr.msk.f32.gmra.mrb[118].mxu1 %vm788_vm0, %v17404_v54  ;;  %16083 = vrcp.f32 %v2121_v10 }
 0x252   : > { %15855 = vmatpush3.bf16.msra.mxu1 %v19541_v49  ;;  %14657 = vmatprep.mubr.msk.f32.mxu1 %vm16234_vm1, %v19519_v3  ;;  %16085 = vrcp.f32 %v2124_v57  ;;  %v2125_v23 = vadd.f32 0.0009, %v2119_v16 }
 0x253   : > { %15859 = vmatprep.subr.bf16.mxu1 %v19515_v59 }
 0x255   : > { %14658 = vmatmul.mubr.msk.f32.vlgmr.msra.gmra.mrb[120].mxu1 %vm788_vm0, %v17374_v33  ;;  %v2123_v33 = vadd.f32 0.0009, %v2117_v4 }
 0x256   : > { %14660 = vmatprep.mubr.msk.f32.mxu1 %vm16234_vm1, %v19519_v3 }
 0x257   : > { %16087 = vrcp.f32 %v2123_v33 }
 0x259   : > { %14661 = vmatmul.mubr.msk.f32.gmra.mrb[122].mxu1 %vm788_vm0, %v17391_v29  ;;  %v4301_v29 = vld [vmem:[%s19467_s8 + $0x8] sm:$0xff] }
 0x25a   : > { %14663 = vmatprep.mubr.msk.f32.mxu1 %vm16234_vm1, %v19519_v3  ;;  %v15857_v50 = vpack.c.bf16 %v4301_v29, %v4300_v58  ;;  %v16082_v15 = vpop.eup %16081 }
 0x25b   : > { %v16084_v5 = vpop.eup %16083 }
 0x25c   : > { %15858 = vmatpush3.bf16.msra.mxu0 %v15857_v50  ;;  %v16086_v48 = vpop.eup %16085 }
 0x25d   : > { %14664 = vmatmul.mubr.msk.f32.gmra.mrb[124].mxu1 %vm788_vm0, %v17404_v54  ;;  %v2126_v54 = vadd.f32 0.0009, %v2120_v36  ;;  %14670 = vmatprep.subr.mxu0 %v19519_v3  ;;  %vm7627_vm0 = vcmask 80896  }
 0x25e   : > { %14813 = vmatprep.mubr.msk.f32.mxu1 %vm16234_vm1, %v19519_v3 }
 0x25f   : > { %16089 = vrcp.f32 %v2126_v54 }
 0x260   : > { %14671 = vmatpush3.msra.mxu0 %v4302_v52  ;;  %16091 = vrcp.f32 %v2125_v23 }
 0x261   : > { %v16088_v4 = vpop.eup %16087 }
 0x268   : > { %v14257_v32 = vpop.f32.mrb[24].mxu1 }
 0x269   : > { %v2098_v24 = vsub.f32 %v14257_v32, %v19542_v53  ;;  %v2038_v40 = vpop.f32.mrb[25].mxu1  ;;  %v16090_v36 = vpop.eup %16089 }
 0x26a   : > { %v2097_v63 = vsub.f32 %v2038_v40, %v19543_v31  ;;  %v16092_v27 = vpop.eup %16091 }
 0x26b   : > { %v2104_v51 = vmul.f32 2.0, %v2098_v24 }
 0x26c   : > { %v2103_v22 = vmul.f32 2.0, %v2097_v63  ;;  %v14260_v11 = vpop.f32.mrb[26].mxu1 }
 0x26d   : > { %v2100_v34 = vsub.f32 %v14260_v11, %v17285_v35  ;;  %v2048_v14 = vpop.f32.mrb[27].mxu1  ;;  %v2110_v1 = vadd.f32 0.0009, %v2104_v51 }
 0x26e   : > { %v2099_v42 = vsub.f32 %v2048_v14, %v17293_v28  ;;  %v2109_v17 = vadd.f32 0.0009, %v2103_v22 }
 0x26f   : > { %v2106_v62 = vmul.f32 2.0, %v2100_v34  ;;  %v2130_v43 = vmul.f32 %v16082_v15, %v2110_v1 }
 0x270   : > { %v2105_v26 = vmul.f32 2.0, %v2099_v42  ;;  %v14263_v19 = vpop.f32.mrb[28].mxu1  ;;  %v2128_v44 = vmul.f32 %v16084_v5, %v2109_v17 }
 0x271   : > { %v2102_v60 = vsub.f32 %v14263_v19, %v17313_v61  ;;  %v2058_v6 = vpop.f32.mrb[29].mxu1  ;;  %v2218_v12 = vsel %vm2181_vm2, %v2130_v43, 0.0  ;;  %v2112_v46 = vadd.f32 0.0009, %v2106_v62  ;;  %v2176_v35 = vmul.f32 %v17345_v55, %v2130_v43 }
 0x272   : > { %v2111_v56 = vadd.f32 0.0009, %v2105_v26  ;;  %v2101_v28 = vsub.f32 %v2058_v6, %v17321_v13  ;;  %2219 = vadd.xlane.f32.xlu1 %v2218_v12  ;;  %v2215_v38 = vsel %vm2181_vm2, %v2128_v44, 0.0  ;;  %v2175_v41 = vmul.f32 %v17349_v37, %v2128_v44 }
 0x273   : > { %v2108_v25 = vmul.f32 2.0, %v2102_v60  ;;  %2216 = vadd.xlane.f32.xlu0 %v2215_v38  ;;  %v2134_v0 = vmul.f32 %v16086_v48, %v2112_v46  ;;  %v2185_v13 = vsel %vm2181_vm2, %v2176_v35, 0.0 }
 0x274   : > { %v2107_v61 = vmul.f32 2.0, %v2101_v28  ;;  %v14278_v9 = vpop.f32.mrb[30].mxu1  ;;  %v2132_v21 = vmul.f32 %v16088_v4, %v2111_v56 }
 0x275   : > { %v2312_v2 = vpop.f32.mrb[31].mxu1  ;;  %v2224_v30 = vsel %vm2181_vm2, %v2134_v0, 0.0  ;;  %v2178_v55 = vmul.f32 %v17359_v7, %v2134_v0  ;;  %v2114_v8 = vadd.f32 0.0009, %v2108_v25  ;;  %v2182_v7 = vsel %vm2181_vm2, %v2175_v41, 0.0 }
 0x276   : > { %2225 = vadd.xlane.f32.xlu1 %v2224_v30  ;;  %v2177_v16 = vmul.f32 %v17362_v47, %v2132_v21  ;;  %v2113_v37 = vadd.f32 0.0009, %v2107_v61  ;;  %v2221_v54 = vsel %vm2181_vm2, %v2132_v21, 0.0  ;;  %v17573_v31 = vmul.f32 %v2312_v2, %v2312_v2 }
 0x277   : > { %2186 = vadd.xlane.f32.xlu0 %v2185_v13  ;;  %v2138_v45 = vmul.f32 %v16090_v36, %v2114_v8  ;;  %v2191_v57 = vsel %vm2181_vm2, %v2178_v55, 0.0 }
 0x278   : > { %v14281_v49 = vpop.f32.mrb[32].mxu1  ;;  %v2136_v39 = vmul.f32 %v16092_v27, %v2113_v37  ;;  %v2188_v47 = vsel %vm2181_vm2, %v2177_v16, 0.0 }
 0x279   : > { %v2322_v10 = vpop.f32.mrb[33].mxu1  ;;  %v2180_v33 = vmul.f32 %v17376_v18, %v2138_v45  ;;  %v2230_v53 = vsel %vm2197_vm3, %v2138_v45, 0.0  ;;  %v17566_v18 = vmul.f32 %v14278_v9, %v14278_v9  ;;  %v17581_v11 = vmul.f32 %v14281_v49, %v14281_v49 }
 0x27a   : > { %2192 = vadd.xlane.f32.xlu1 %v2191_v57  ;;  %v2179_v58 = vmul.f32 %v17379_v20, %v2136_v39  ;;  %v2227_v20 = vsel %vm2181_vm2, %v2136_v39, 0.0  ;;  %v17583_v34 = vmul.f32 %v2322_v10, %v2322_v10 }
 0x27b   : > { %2183 = vadd.xlane.f32.xlu0 %v2182_v7  ;;  %v2198_v15 = vsel %vm2197_vm3, %v2180_v33, 0.0 }
 0x27c   : > { %v14284_v29 = vpop.f32.mrb[34].mxu1  ;;  %v2194_v62 = vsel %vm2181_vm2, %v2179_v58, 0.0 }
 0x27d   : > { %v2332_v50 = vpop.f32.mrb[35].mxu1  ;;  %v17601_v46 = vmul.f32 %v14284_v29, %v14284_v29 }
 0x27e   : > { %2189 = vadd.xlane.f32.xlu1 %v2188_v47  ;;  %v17607_v28 = vmul.f32 %v2332_v50, %v2332_v50 }
 0x27f   : > { %2222 = vadd.xlane.f32.xlu0 %v2221_v54 }
 0x280   : > { %v14299_v32 = vpop.f32.mrb[36].mxu1 }
 0x281   : > { %v2407_v23 = vpop.f32.mrb[37].mxu1  ;;  %v17568_v24 = vmul.f32 %v14299_v32, %v14299_v32  ;;  %v17570_v40 = vmul.f32 %v14299_v32, %v14278_v9 }
 0x282   : > { %2231 = vadd.xlane.f32.xlu1 %v2230_v53  ;;  %v17575_v63 = vmul.f32 %v2407_v23, %v2407_v23  ;;  %v17577_v51 = vmul.f32 %v2407_v23, %v2312_v2 }
 0x283   : > { %2228 = vadd.xlane.f32.xlu0 %v2227_v20  ;;  %v2806_v52 = vadd.f32 %v17568_v24, %v17566_v18  ;;  %v2794_v9 = vmul.f32 2.0, %v17570_v40 }
 0x284   : > { %v14302_v22 = vpop.f32.mrb[38].mxu1  ;;  %v2805_v14 = vadd.f32 %v17575_v63, %v17573_v31  ;;  %v2793_v55 = vmul.f32 2.0, %v17577_v51 }
 0x285   : > { %v2417_v1 = vpop.f32.mrb[39].mxu1  ;;  %v2812_v42 = vadd.f32 0.0001, %v2806_v52  ;;  %v17588_v17 = vmul.f32 %v14302_v22, %v14302_v22  ;;  %v17590_v5 = vmul.f32 %v14302_v22, %v14281_v49  ;;  %v2800_v16 = vadd.f32 0.0001, %v2794_v9 }
 0x286   : > { %2199 = vadd.xlane.f32.xlu1 %v2198_v15  ;;  %v2811_v43 = vadd.f32 0.0001, %v2805_v14  ;;  %v17593_v26 = vmul.f32 %v2417_v1, %v2417_v1  ;;  %v17595_v19 = vmul.f32 %v2417_v1, %v2322_v10  ;;  %v2799_v39 = vadd.f32 0.0001, %v2793_v55 }
 0x287   : > { %2195 = vadd.xlane.f32.xlu0 %v2194_v62  ;;  %16093 = vrcp.f32 %v2812_v42  ;;  %v2808_v44 = vadd.f32 %v17588_v17, %v17581_v11  ;;  %v2796_v37 = vmul.f32 2.0, %v17590_v5 }
 0x288   : > { %v14305_v60 = vpop.f32.mrb[40].mxu1  ;;  %16095 = vrcp.f32 %v2811_v43  ;;  %v2807_v6 = vadd.f32 %v17593_v26, %v17583_v34  ;;  %v2795_v10 = vmul.f32 2.0, %v17595_v19 }
 0x289   : > { %v2427_v12 = vpop.f32.mrb[41].mxu1  ;;  %v2814_v35 = vadd.f32 0.0001, %v2808_v44  ;;  %v17603_v48 = vmul.f32 %v14305_v60, %v14305_v60  ;;  %v17605_v56 = vmul.f32 %v14305_v60, %v14284_v29 }
 0x28a   : > { %v2813_v38 = vadd.f32 0.0001, %v2807_v6  ;;  %v17609_v41 = vmul.f32 %v2427_v12, %v2427_v12  ;;  %v17611_v4 = vmul.f32 %v2427_v12, %v2332_v50  ;;  %v2802_v50 = vadd.f32 0.0001, %v2796_v37 }
 0x28b   : > { %16097 = vrcp.f32 %v2814_v35  ;;  %v2810_v25 = vadd.f32 %v17603_v48, %v17601_v46  ;;  %v2798_v47 = vmul.f32 2.0, %v17605_v56  ;;  %v2801_v53 = vadd.f32 0.0001, %v2795_v10 }
 0x28c   : > { %v14320_v0 = vpop.f32.mrb[42].mxu1  ;;  %16099 = vrcp.f32 %v2813_v38  ;;  %v2809_v61 = vadd.f32 %v17609_v41, %v17607_v28 }
 0x28d   : > { %v2740_v21 = vsub.f32 %v14320_v0, %v17566_v18  ;;  %v2502_v2 = vpop.f32.mrb[43].mxu1  ;;  %v2816_v30 = vadd.f32 0.0001, %v2810_v25  ;;  %v2797_v18 = vmul.f32 2.0, %v17611_v4 }
 0x28e   : > { %v2739_v8 = vsub.f32 %v2502_v2, %v17573_v31  ;;  %v2815_v36 = vadd.f32 0.0001, %v2809_v61 }
 0x28f   : > { %16101 = vrcp.f32 %v2816_v30  ;;  %v2803_v42 = vadd.f32 0.0001, %v2797_v18 }
 0x290   : > { %v14323_v13 = vpop.f32.mrb[44].mxu1  ;;  %16103 = vrcp.f32 %v2815_v36 }
 0x291   : > { %v16094_v27 = vpop.eup %16093  ;;  %v2742_v45 = vsub.f32 %v14323_v13, %v17581_v11  ;;  %v2512_v49 = vpop.f32.mrb[45].mxu1 }
 0x292   : > { %v16096_v57 = vpop.eup %16095  ;;  %v2741_v33 = vsub.f32 %v2512_v49, %v17583_v34  ;;  %v17625_v7 = vmul.f32 %v16094_v27, %v2800_v16  ;;  %v2804_v34 = vadd.f32 0.0001, %v2798_v47 }
 0x293   : > { %v17627_v58 = vmul.f32 %v16096_v57, %v2799_v39 }
 0x294   : > { %v14326_v29 = vpop.f32.mrb[46].mxu1 }
 0x295   : > { %v16098_v54 = vpop.eup %16097  ;;  %v2744_v32 = vsub.f32 %v14326_v29, %v17601_v46  ;;  %v2522_v23 = vpop.f32.mrb[47].mxu1 }
 0x296   : > { %v16100_v20 = vpop.eup %16099  ;;  %v2743_v31 = vsub.f32 %v2522_v23, %v17607_v28  ;;  %v17633_v52 = vmul.f32 %v16098_v54, %v2802_v50 }
 0x297   : > { %v17635_v22 = vmul.f32 %v16100_v20, %v2801_v53 }
 0x298   : > { %v14341_v11 = vpop.f32.mrb[48].mxu1 }
 0x299   : > { %v16102_v14 = vpop.eup %16101  ;;  %v2746_v1 = vsub.f32 %v14341_v11, %v17568_v24  ;;  %v2597_v15 = vpop.f32.mrb[49].mxu1 }
 0x29a   : > { %v16104_v62 = vpop.eup %16103  ;;  %v2745_v43 = vsub.f32 %v2597_v15, %v17575_v63  ;;  %v17639_v44 = vmul.f32 %v16102_v14, %v2804_v34 }
 0x29b   : > { %v2770_v60 = vadd.f32 %v2746_v1, %v2740_v21  ;;  %v17641_v6 = vmul.f32 %v16104_v62, %v2803_v42 }
 0x29c   : > { %v2769_v12 = vadd.f32 %v2745_v43, %v2739_v8  ;;  %v14344_v46 = vpop.f32.mrb[50].mxu1 }
 0x29d   : > { %v2776_v35 = vadd.f32 0.0009, %v2770_v60  ;;  %v2748_v28 = vsub.f32 %v14344_v46, %v17588_v17  ;;  %v2607_v38 = vpop.f32.mrb[51].mxu1 }
 0x29e   : > { %v2775_v25 = vadd.f32 0.0009, %v2769_v12  ;;  %v2747_v0 = vsub.f32 %v2607_v38, %v17593_v26 }
 0x29f   : > { %16105 = vrcp.f32 %v2776_v35  ;;  %v2772_v24 = vadd.f32 %v2748_v28, %v2742_v45 }
 0x2a0   : > { %16107 = vrcp.f32 %v2775_v25  ;;  %v2771_v61 = vadd.f32 %v2747_v0, %v2741_v33  ;;  %v14347_v9 = vpop.f32.mrb[52].mxu1 }
 0x2a1   : > { %v2778_v63 = vadd.f32 0.0009, %v2772_v24  ;;  %v2750_v2 = vsub.f32 %v14347_v9, %v17603_v48  ;;  %v2617_v21 = vpop.f32.mrb[53].mxu1 }
 0x2a2   : > { %v2777_v30 = vadd.f32 0.0009, %v2771_v61  ;;  %v2749_v55 = vsub.f32 %v2617_v21, %v17609_v41 }
 0x2a3   : > { %16109 = vrcp.f32 %v2778_v63  ;;  %v2774_v8 = vadd.f32 %v2750_v2, %v2744_v32 }
 0x2a4   : > { %16111 = vrcp.f32 %v2777_v30  ;;  %v2773_v17 = vadd.f32 %v2749_v55, %v2743_v31  ;;  %v14362_v36 = vpop.f32.mrb[54].mxu1 }
 0x2a5   : > { %v2780_v13 = vadd.f32 0.0009, %v2774_v8  ;;  %v2752_v26 = vsub.f32 %v14362_v36, %v17570_v40  ;;  %v2692_v16 = vpop.f32.mrb[55].mxu1 }
 0x2a6   : > { %v2779_v37 = vadd.f32 0.0009, %v2773_v17  ;;  %v2751_v27 = vsub.f32 %v2692_v16, %v17577_v51 }
 0x2a7   : > { %16113 = vrcp.f32 %v2780_v13  ;;  %v2758_v45 = vmul.f32 2.0, %v2752_v26 }
 0x2a8   : > { %16115 = vrcp.f32 %v2779_v37  ;;  %v2757_v48 = vmul.f32 2.0, %v2751_v27  ;;  %v14365_v49 = vpop.f32.mrb[56].mxu1 }
 0x2a9   : > { %v16106_v39 = vpop.eup %16105  ;;  %v2754_v41 = vsub.f32 %v14365_v49, %v17590_v5  ;;  %v2702_v10 = vpop.f32.mrb[57].mxu1  ;;  %v2764_v57 = vadd.f32 0.0009, %v2758_v45 }
 0x2aa   : > { %v16108_v33 = vpop.eup %16107  ;;  %v2753_v29 = vsub.f32 %v2702_v10, %v17595_v19  ;;  %v2763_v50 = vadd.f32 0.0009, %v2757_v48 }
 0x2ab   : > { %v2760_v47 = vmul.f32 2.0, %v2754_v41  ;;  %v2784_v40 = vmul.f32 %v16106_v39, %v2764_v57 }
 0x2ac   : > { %v2759_v54 = vmul.f32 2.0, %v2753_v29  ;;  %v14368_v32 = vpop.f32.mrb[58].mxu1  ;;  %v2782_v23 = vmul.f32 %v16108_v33, %v2763_v50 }
 0x2ad   : > { %v16110_v51 = vpop.eup %16109  ;;  %v2756_v53 = vsub.f32 %v14368_v32, %v17605_v56  ;;  %v2712_v18 = vpop.f32.mrb[59].mxu1  ;;  %v2869_v20 = vsel %vm2181_vm2, %v2784_v40, 0.0  ;;  %v2830_v31 = vmul.f32 %v17625_v7, %v2784_v40  ;;  %v2766_v5 = vadd.f32 0.0009, %v2760_v47 }
 0x2ae   : > { %v16112_v11 = vpop.eup %16111  ;;  %v2755_v34 = vsub.f32 %v2712_v18, %v17611_v4  ;;  %2870 = vadd.xlane.f32.xlu1 %v2869_v20  ;;  %v2866_v19 = vsel %vm2181_vm2, %v2782_v23, 0.0  ;;  %v2829_v14 = vmul.f32 %v17627_v58, %v2782_v23  ;;  %v2765_v1 = vadd.f32 0.0009, %v2759_v54 }
 0x2af   : > { %v2762_v15 = vmul.f32 2.0, %v2756_v53  ;;  %2867 = vadd.xlane.f32.xlu0 %v2866_v19  ;;  %v2788_v42 = vmul.f32 %v16110_v51, %v2766_v5  ;;  %v2838_v7 = vsel %vm2181_vm2, %v2830_v31, 0.0 }
 0x2b0   : > { %v2761_v62 = vmul.f32 2.0, %v2755_v34  ;;  %v14383_v56 = vpop.f32.mrb[60].mxu1  ;;  %v2786_v43 = vmul.f32 %v16112_v11, %v2765_v1  ;;  %v2835_v28 = vsel %vm2181_vm2, %v2829_v14, 0.0 }
 0x2b1   : > { %v16114_v60 = vpop.eup %16113  ;;  %v2963_v12 = vpop.f32.mrb[61].mxu1  ;;  %v2832_v46 = vmul.f32 %v17633_v52, %v2788_v42  ;;  %v2768_v35 = vadd.f32 0.0009, %v2762_v15  ;;  %v2875_v9 = vsel %vm2181_vm2, %v2788_v42, 0.0  ;;  %v17668_v13 = vmul.f32 %v14383_v56, %v14383_v56 }
 0x2b2   : > { %v16116_v4 = vpop.eup %16115  ;;  %2839 = vadd.xlane.f32.xlu1 %v2838_v7  ;;  %v2831_v58 = vmul.f32 %v17635_v22, %v2786_v43  ;;  %v2767_v38 = vadd.f32 0.0009, %v2761_v62  ;;  %v2872_v52 = vsel %vm2181_vm2, %v2786_v43, 0.0  ;;  %v17675_v16 = vmul.f32 %v2963_v12, %v2963_v12 }
 0x2b3   : > { %2836 = vadd.xlane.f32.xlu0 %v2835_v28  ;;  %v2792_v25 = vmul.f32 %v16114_v60, %v2768_v35  ;;  %v2844_v22 = vsel %vm2181_vm2, %v2832_v46, 0.0 }
 0x2b4   : > { %v14386_v0 = vpop.f32.mrb[62].mxu1  ;;  %v2790_v24 = vmul.f32 %v16116_v4, %v2767_v38  ;;  %v2841_v55 = vsel %vm2181_vm2, %v2831_v58, 0.0 }
 0x2b5   : > { %v2973_v61 = vpop.f32.mrb[63].mxu1  ;;  %v2834_v63 = vmul.f32 %v17639_v44, %v2792_v25  ;;  %v2881_v36 = vsel %vm2197_vm3, %v2792_v25, 0.0  ;;  %v17683_v49 = vmul.f32 %v14386_v0, %v14386_v0 }
 0x2b6   : > { %2876 = vadd.xlane.f32.xlu1 %v2875_v9  ;;  %v2833_v2 = vmul.f32 %v17641_v6, %v2790_v24  ;;  %v2878_v6 = vsel %vm2181_vm2, %v2790_v24, 0.0  ;;  %v17685_v39 = vmul.f32 %v2973_v61, %v2973_v61 }
 0x2b7   : > { %2873 = vadd.xlane.f32.xlu0 %v2872_v52  ;;  %v2850_v57 = vsel %vm2197_vm3, %v2834_v63, 0.0 }
 0x2b8   : > { %v14389_v21 = vpop.f32.mrb[64].mxu1  ;;  %v2847_v47 = vsel %vm2181_vm2, %v2833_v2, 0.0 }
 0x2b9   : > { %v2983_v30 = vpop.f32.mrb[65].mxu1  ;;  %v17703_v20 = vmul.f32 %v14389_v21, %v14389_v21 }
 0x2ba   : > { %2845 = vadd.xlane.f32.xlu1 %v2844_v22  ;;  %v17709_v34 = vmul.f32 %v2983_v30, %v2983_v30 }
 0x2bb   : > { %2842 = vadd.xlane.f32.xlu0 %v2841_v55 }
 0x2bc   : > { %v14404_v8 = vpop.f32.mrb[66].mxu1 }
 0x2bd   : > { %v3058_v17 = vpop.f32.mrb[67].mxu1  ;;  %v17670_v44 = vmul.f32 %v14404_v8, %v14404_v8  ;;  %v17672_v26 = vmul.f32 %v14404_v8, %v14383_v56 }
 0x2be   : > { %2882 = vadd.xlane.f32.xlu1 %v2881_v36  ;;  %v17677_v37 = vmul.f32 %v3058_v17, %v3058_v17  ;;  %v17679_v27 = vmul.f32 %v3058_v17, %v2963_v12 }
 0x2bf   : > { %2879 = vadd.xlane.f32.xlu0 %v2878_v6  ;;  %v3457_v45 = vadd.f32 %v17670_v44, %v17668_v13  ;;  %v3445_v56 = vmul.f32 2.0, %v17672_v26 }
 0x2c0   : > { %v14407_v48 = vpop.f32.mrb[68].mxu1  ;;  %v3456_v41 = vadd.f32 %v17677_v37, %v17675_v16  ;;  %v3444_v7 = vmul.f32 2.0, %v17679_v27 }
 0x2c1   : > { %v3068_v10 = vpop.f32.mrb[69].mxu1  ;;  %v3463_v33 = vadd.f32 0.0001, %v3457_v45  ;;  %v17690_v29 = vmul.f32 %v14407_v48, %v14407_v48  ;;  %v17692_v50 = vmul.f32 %v14407_v48, %v14386_v0  ;;  %v3451_v28 = vadd.f32 0.0001, %v3445_v56 }
 0x2c2   : > { %2851 = vadd.xlane.f32.xlu1 %v2850_v57  ;;  %v3462_v40 = vadd.f32 0.0001, %v3456_v41  ;;  %v17695_v54 = vmul.f32 %v3068_v10, %v3068_v10  ;;  %v17697_v32 = vmul.f32 %v3068_v10, %v2973_v61  ;;  %v3450_v24 = vadd.f32 0.0001, %v3444_v7 }
 0x2c3   : > { %2848 = vadd.xlane.f32.xlu0 %v2847_v47  ;;  %16117 = vrcp.f32 %v3463_v33  ;;  %v3459_v23 = vadd.f32 %v17690_v29, %v17683_v49  ;;  %v3447_v58 = vmul.f32 2.0, %v17692_v50 }
 0x2c4   : > { %v14410_v51 = vpop.f32.mrb[70].mxu1  ;;  %16119 = vrcp.f32 %v3462_v40  ;;  %v3458_v53 = vadd.f32 %v17695_v54, %v17685_v39  ;;  %v3446_v61 = vmul.f32 2.0, %v17697_v32 }
 0x2c5   : > { %v3078_v18 = vpop.f32.mrb[71].mxu1  ;;  %v3465_v31 = vadd.f32 0.0001, %v3459_v23  ;;  %v17705_v5 = vmul.f32 %v14410_v51, %v14410_v51  ;;  %v17707_v11 = vmul.f32 %v14410_v51, %v14389_v21 }
 0x2c6   : > { %v3464_v19 = vadd.f32 0.0001, %v3458_v53  ;;  %v17711_v14 = vmul.f32 %v3078_v18, %v3078_v18  ;;  %v17713_v1 = vmul.f32 %v3078_v18, %v2983_v30  ;;  %v3453_v30 = vadd.f32 0.0001, %v3447_v58 }
 0x2c7   : > { %16121 = vrcp.f32 %v3465_v31  ;;  %v3461_v15 = vadd.f32 %v17705_v5, %v17703_v20  ;;  %v3449_v22 = vmul.f32 2.0, %v17707_v11  ;;  %v3452_v36 = vadd.f32 0.0001, %v3446_v61 }
 0x2c8   : > { %v14425_v42 = vpop.f32.mrb[72].mxu1  ;;  %16123 = vrcp.f32 %v3464_v19  ;;  %v3460_v62 = vadd.f32 %v17711_v14, %v17709_v34 }
 0x2c9   : > { %v3391_v43 = vsub.f32 %v14425_v42, %v17668_v13  ;;  %v3153_v60 = vpop.f32.mrb[73].mxu1  ;;  %v3467_v12 = vadd.f32 0.0001, %v3461_v15  ;;  %v3448_v13 = vmul.f32 2.0, %v17713_v1 }
 0x2ca   : > { %v3390_v46 = vsub.f32 %v3153_v60, %v17675_v16  ;;  %v3466_v35 = vadd.f32 0.0001, %v3460_v62 }
 0x2cb   : > { %16125 = vrcp.f32 %v3467_v12  ;;  %v3454_v33 = vadd.f32 0.0001, %v3448_v13 }
 0x2cc   : > { %v14428_v4 = vpop.f32.mrb[74].mxu1  ;;  %16127 = vrcp.f32 %v3466_v35 }
 0x2cd   : > { %v16118_v38 = vpop.eup %16117  ;;  %v3393_v25 = vsub.f32 %v14428_v4, %v17683_v49  ;;  %v3163_v0 = vpop.f32.mrb[75].mxu1 }
 0x2ce   : > { %v16120_v9 = vpop.eup %16119  ;;  %v3392_v63 = vsub.f32 %v3163_v0, %v17685_v39  ;;  %v17727_v52 = vmul.f32 %v16118_v38, %v3451_v28  ;;  %v3455_v39 = vadd.f32 0.0001, %v3449_v22 }
 0x2cf   : > { %v17729_v2 = vmul.f32 %v16120_v9, %v3450_v24 }
 0x2d0   : > { %v14431_v21 = vpop.f32.mrb[76].mxu1 }
 0x2d1   : > { %v16122_v55 = vpop.eup %16121  ;;  %v3395_v8 = vsub.f32 %v14431_v21, %v17703_v20  ;;  %v3173_v17 = vpop.f32.mrb[77].mxu1 }
 0x2d2   : > { %v16124_v6 = vpop.eup %16123  ;;  %v3394_v16 = vsub.f32 %v3173_v17, %v17709_v34  ;;  %v17735_v45 = vmul.f32 %v16122_v55, %v3453_v30 }
 0x2d3   : > { %v17737_v48 = vmul.f32 %v16124_v6, %v3452_v36 }
 0x2d4   : > { %v14446_v49 = vpop.f32.mrb[78].mxu1 }
 0x2d5   : > { %v16126_v41 = vpop.eup %16125  ;;  %v3397_v10 = vsub.f32 %v14446_v49, %v17670_v44  ;;  %v3248_v57 = vpop.f32.mrb[79].mxu1 }
 0x2d6   : > { %v16128_v47 = vpop.eup %16127  ;;  %v3396_v40 = vsub.f32 %v3248_v57, %v17677_v37  ;;  %v17741_v23 = vmul.f32 %v16126_v41, %v3455_v39 }
 0x2d7   : > { %v3421_v51 = vadd.f32 %v3397_v10, %v3391_v43  ;;  %v17743_v53 = vmul.f32 %v16128_v47, %v3454_v33 }
 0x2d8   : > { %v3420_v18 = vadd.f32 %v3396_v40, %v3390_v46  ;;  %v14449_v20 = vpop.f32.mrb[80].mxu1 }
 0x2d9   : > { %v3427_v31 = vadd.f32 0.0009, %v3421_v51  ;;  %v3399_v34 = vsub.f32 %v14449_v20, %v17690_v29  ;;  %v3258_v19 = vpop.f32.mrb[81].mxu1 }
 0x2da   : > { %v3426_v15 = vadd.f32 0.0009, %v3420_v18  ;;  %v3398_v42 = vsub.f32 %v3258_v19, %v17695_v54 }
 0x2db   : > { %16129 = vrcp.f32 %v3427_v31  ;;  %v3423_v44 = vadd.f32 %v3399_v34, %v3393_v25 }
 0x2dc   : > { %16131 = vrcp.f32 %v3426_v15  ;;  %v3422_v62 = vadd.f32 %v3398_v42, %v3392_v63  ;;  %v14452_v56 = vpop.f32.mrb[82].mxu1 }
 0x2dd   : > { %v3429_v37 = vadd.f32 0.0009, %v3423_v44  ;;  %v3401_v60 = vsub.f32 %v14452_v56, %v17705_v5  ;;  %v3268_v43 = vpop.f32.mrb[83].mxu1 }
 0x2de   : > { %v3428_v12 = vadd.f32 0.0009, %v3422_v62  ;;  %v3400_v7 = vsub.f32 %v3268_v43, %v17711_v14 }
 0x2df   : > { %16133 = vrcp.f32 %v3429_v37  ;;  %v3425_v46 = vadd.f32 %v3401_v60, %v3395_v8 }
 0x2e0   : > { %16135 = vrcp.f32 %v3428_v12  ;;  %v3424_v29 = vadd.f32 %v3400_v7, %v3394_v16  ;;  %v14467_v35 = vpop.f32.mrb[84].mxu1 }
 0x2e1   : > { %v3431_v4 = vadd.f32 0.0009, %v3425_v46  ;;  %v3403_v54 = vsub.f32 %v14467_v35, %v17672_v26  ;;  %v3343_v28 = vpop.f32.mrb[85].mxu1 }
 0x2e2   : > { %v3430_v58 = vadd.f32 0.0009, %v3424_v29  ;;  %v3402_v38 = vsub.f32 %v3343_v28, %v17679_v27 }
 0x2e3   : > { %16137 = vrcp.f32 %v3431_v4  ;;  %v3409_v25 = vmul.f32 2.0, %v3403_v54 }
 0x2e4   : > { %16139 = vrcp.f32 %v3430_v58  ;;  %v3408_v5 = vmul.f32 2.0, %v3402_v38  ;;  %v14470_v0 = vpop.f32.mrb[86].mxu1 }
 0x2e5   : > { %v16130_v24 = vpop.eup %16129  ;;  %v3415_v61 = vadd.f32 0.0009, %v3409_v25  ;;  %v3405_v14 = vsub.f32 %v14470_v0, %v17692_v50  ;;  %v3353_v9 = vpop.f32.mrb[87].mxu1 }
 0x2e6   : > { %v16132_v63 = vpop.eup %16131  ;;  %v3414_v21 = vadd.f32 0.0009, %v3408_v5  ;;  %v3404_v30 = vsub.f32 %v3353_v9, %v17697_v32 }
 0x2e7   : > { %v3411_v22 = vmul.f32 2.0, %v3405_v14  ;;  %v3435_v26 = vmul.f32 %v16130_v24, %v3415_v61 }
 0x2e8   : > { %v3410_v55 = vmul.f32 2.0, %v3404_v30  ;;  %v14473_v8 = vpop.f32.mrb[88].mxu1  ;;  %v3433_v17 = vmul.f32 %v16132_v63, %v3414_v21 }
 0x2e9   : > { %v16134_v27 = vpop.eup %16133  ;;  %v3417_v36 = vadd.f32 0.0009, %v3411_v22  ;;  %v3407_v13 = vsub.f32 %v14473_v8, %v17707_v11  ;;  %v3363_v6 = vpop.f32.mrb[89].mxu1  ;;  %v3520_v16 = vsel %vm2181_vm2, %v3435_v26, 0.0  ;;  %v3481_v50 = vmul.f32 %v17727_v52, %v3435_v26 }
 0x2ea   : > { %v16136_v49 = vpop.eup %16135  ;;  %v3416_v39 = vadd.f32 0.0009, %v3410_v55  ;;  %v3406_v41 = vsub.f32 %v3363_v6, %v17713_v1  ;;  %3521 = vadd.xlane.f32.xlu1 %v3520_v16  ;;  %v3517_v32 = vsel %vm2181_vm2, %v3433_v17, 0.0  ;;  %v3480_v10 = vmul.f32 %v17729_v2, %v3433_v17 }
 0x2eb   : > { %v3413_v57 = vmul.f32 2.0, %v3407_v13  ;;  %3518 = vadd.xlane.f32.xlu0 %v3517_v32  ;;  %v3439_v33 = vmul.f32 %v16134_v27, %v3417_v36  ;;  %v3489_v1 = vsel %vm2181_vm2, %v3481_v50, 0.0 }
 0x2ec   : > { %v3412_v47 = vmul.f32 2.0, %v3406_v41  ;;  %v17759_v40 = vpop.f32.mrb[90].mxu1  ;;  %v3437_v11 = vmul.f32 %v16136_v49, %v3416_v39  ;;  %v3486_v2 = vsel %vm2181_vm2, %v3480_v10, 0.0 }
 0x2ed   : > { %v16138_v51 = vpop.eup %16137  ;;  %v3419_v18 = vadd.f32 0.0009, %v3413_v57  ;;  %v14554_v20 = vpop.f32.mrb[91].mxu1  ;;  %14673 = vmatmul.mubr.msk.f32.vlgmr.msra.gmra.mrb[126].mxu0 %vm4330_vm4, %v17759_v40  ;;  %v3483_v52 = vmul.f32 %v17735_v45, %v3439_v33  ;;  %v3526_v45 = vsel %vm2181_vm2, %v3439_v33, 0.0 }
 0x2ee   : > { %v16140_v31 = vpop.eup %16139  ;;  %v3418_v34 = vadd.f32 0.0009, %v3412_v47  ;;  %3490 = vadd.xlane.f32.xlu1 %v3489_v1  ;;  %14675 = vmatprep.mubr.msk.f32.mxu0 %vm16234_vm1, %v19519_v3  ;;  %v3482_v19 = vmul.f32 %v17737_v48, %v3437_v11  ;;  %v3523_v37 = vsel %vm2181_vm2, %v3437_v11, 0.0 }
 0x2ef   : > { %3487 = vadd.xlane.f32.xlu0 %v3486_v2  ;;  %v3443_v15 = vmul.f32 %v16138_v51, %v3419_v18  ;;  %v3495_v12 = vsel %vm2181_vm2, %v3483_v52, 0.0 }
 0x2f0   : > { %v17769_v42 = vpop.f32.mrb[92].mxu1  ;;  %v3441_v44 = vmul.f32 %v16140_v31, %v3418_v34 }
 0x2f1   : > { %v14557_v62 = vpop.f32.mrb[93].mxu1  ;;  %14676 = vmatmul.mubr.msk.f32.gmra.mrb[128].mxu0 %vm4330_vm4, %v17769_v42  ;;  %v3485_v56 = vmul.f32 %v17741_v23, %v3443_v15  ;;  %v3492_v23 = vsel %vm2181_vm2, %v3482_v19, 0.0  ;;  %v3532_v29 = vsel %vm2197_vm3, %v3443_v15, 0.0 }
 0x2f2   : > { %3527 = vadd.xlane.f32.xlu1 %v3526_v45  ;;  %14678 = vmatprep.mubr.msk.f32.mxu0 %vm16234_vm1, %v19519_v3  ;;  %v3484_v48 = vmul.f32 %v17743_v53, %v3441_v44  ;;  %v3529_v35 = vsel %vm2181_vm2, %v3441_v44, 0.0 }
 0x2f3   : > { %3524 = vadd.xlane.f32.xlu0 %v3523_v37  ;;  %v3501_v58 = vsel %vm2197_vm3, %v3485_v56, 0.0  ;;  %v6258_v37 = vld [vmem:[%s19476_s17] sm:$0xff]  ;;  %vm7635_vm3 = vcmask 1041408  }
 0x2f4   : > { %v17779_v60 = vpop.f32.mrb[94].mxu1  ;;  %v3498_v38 = vsel %vm2181_vm2, %v3484_v48, 0.0  ;;  %v6259_v48 = vld [vmem:[%s19476_s17 + $0x8] sm:$0xff]  ;;  %vm9225_vm2 = vcmask 48128  }
 0x2f5   : > { %v14560_v43 = vpop.f32.mrb[95].mxu1  ;;  %14679 = vmatmul.mubr.msk.f32.gmra.mrb[130].mxu0 %vm4330_vm4, %v17779_v60 }
 0x2f6   : > { %3496 = vadd.xlane.f32.xlu1 %v3495_v12  ;;  %14681 = vmatprep.mubr.msk.f32.mxu0 %vm16234_vm1, %v19519_v3  ;;  %v15904_v12 = vpack.c.bf16 %v6259_v48, %v6258_v37 }
 0x2f7   : > { %3493 = vadd.xlane.f32.xlu0 %v3492_v23 }
 0x2f8   : > { %v17787_v7 = vpop.f32.mrb[96].mxu1  ;;  %15905 = vmatprep.subr.bf16.mxu0 %v15904_v12 }
 0x2f9   : > { %v17791_v53 = vmul.f32 %v17787_v7, %v17759_v40  ;;  %v14575_v46 = vpop.f32.mrb[97].mxu1  ;;  %15907 = vmatpush3.bf16.msra.mxu0 %v15904_v12 }
 0x2fa   : > { %3533 = vadd.xlane.f32.xlu1 %v3532_v29 }
 0x2fb   : > { %3530 = vadd.xlane.f32.xlu0 %v3529_v35 }
 0x2fc   : > { %v17795_v4 = vpop.f32.mrb[98].mxu1 }
 0x2fd   : > { %v17799_v54 = vmul.f32 %v17795_v4, %v17769_v42  ;;  %v14578_v28 = vpop.f32.mrb[99].mxu1 }
 0x2fe   : > { %3502 = vadd.xlane.f32.xlu1 %v3501_v58 }
 0x2ff   : > { %v2220_v25 = vpop.xlane.xlu1 %2219  ;;  %3499 = vadd.xlane.f32.xlu0 %v3498_v38 }
 0x300   : > { %v2217_v5 = vpop.xlane.xlu0 %2216  ;;  %v17803_v0 = vpop.f32.mrb[100].mxu1 }
 0x301   : > { %v2233_v24 = vadd.f32 %v2220_v25, %v2217_v5  ;;  %v17807_v61 = vmul.f32 %v17803_v0, %v17779_v60  ;;  %v14581_v14 = vpop.f32.mrb[101].mxu1 }
 0x303   : > { %v2226_v9 = vpop.xlane.xlu1 %2225 }
 0x304   : > { %v2187_v63 = vpop.xlane.xlu0 %2186  ;;  %v17809_v21 = vpop.f32.mrb[102].mxu1 }
 0x305   : > { %v14596_v30 = vpop.f32.mrb[103].mxu1  ;;  %14682 = vmatmul.mubr.msk.f32.gmra.mrb[132].mxu0 %vm4330_vm4, %v17809_v21 }
 0x306   : > { %14684 = vmatprep.mubr.msk.f32.mxu0 %vm16234_vm1, %v19519_v3 }
 0x307   : > { %v2193_v22 = vpop.xlane.xlu1 %2192 }
 0x308   : > { %v2184_v26 = vpop.xlane.xlu0 %2183  ;;  %v17815_v55 = vpop.f32.mrb[104].mxu1 }
 0x309   : > { %v2201_v8 = vadd.f32 %v2187_v63, %v2184_v26  ;;  %v14599_v17 = vpop.f32.mrb[105].mxu1  ;;  %14685 = vmatmul.mubr.msk.f32.gmra.mrb[134].mxu0 %vm4330_vm4, %v17815_v55  ;;  %v6260_v63 = vld [vmem:[%s19476_s17 + $0x10] sm:$0xff] }
 0x30a   : > { %14687 = vmatprep.mubr.msk.f32.mxu0 %vm16234_vm1, %v19519_v3  ;;  %15036 = vmatprep.subr.mxu0 %v6260_v63 }
 0x30b   : > { %v2190_v27 = vpop.xlane.xlu1 %2189  ;;  %15037 = vmatpush3.msra.mxu0 %v6260_v63 }
 0x30c   : > { %v2202_v36 = vadd.f32 %v2201_v8, %v2190_v27  ;;  %v2223_v13 = vpop.xlane.xlu0 %2222  ;;  %v17821_v6 = vpop.f32.mrb[106].mxu1 }
 0x30d   : > { %v2234_v16 = vadd.f32 %v2233_v24, %v2223_v13  ;;  %v14602_v50 = vpop.f32.mrb[107].mxu1  ;;  %14688 = vmatmul.mubr.msk.f32.gmra.mrb[136].mxu0 %vm4330_vm4, %v17821_v6 }
 0x30e   : > { %v2203_v49 = vadd.f32 %v2202_v36, %v2193_v22  ;;  %14690 = vmatprep.mubr.msk.f32.mxu0 %vm16234_vm1, %v19519_v3 }
 0x30f   : > { %v2232_v39 = vpop.xlane.xlu1 %2231  ;;  %v2235_v41 = vadd.f32 %v2234_v16, %v2226_v9 }
 0x310   : > { %v2229_v32 = vpop.xlane.xlu0 %2228  ;;  %v17827_v10 = vpop.f32.mrb[108].mxu1  ;;  %v2237_v11 = vsel %vm2205_vm5, %v2232_v39, 0.0 }
 0x311   : > { %v2236_v57 = vadd.f32 %v2235_v41, %v2229_v32  ;;  %v17831_v33 = vmul.f32 %v17827_v10, %v17809_v21  ;;  %v14617_v47 = vpop.f32.mrb[109].mxu1 }
 0x313   : > { %v17834_v51 = vadd.f32 %v2237_v11, %v2236_v57  ;;  %v2200_v18 = vpop.xlane.xlu1 %2199  ;;  %v4303_v11 = vmul.f32 %v17759_v40, %v17759_v40 }
 0x314   : > { %v2196_v20 = vpop.xlane.xlu0 %2195  ;;  %v17836_v1 = vpop.f32.mrb[110].mxu1  ;;  %v2206_v2 = vsel %vm2205_vm5, %v2200_v18, 0.0 }
 0x315   : > { %v2204_v52 = vadd.f32 %v2203_v49, %v2196_v20  ;;  %v17840_v31 = vmul.f32 %v17836_v1, %v17815_v55  ;;  %v14620_v34 = vpop.f32.mrb[111].mxu1  ;;  %v2239_v16 = vrot.slane %v17834_v51, 4 }
 0x317   : > { %v17843_v19 = vadd.f32 %v2206_v2, %v2204_v52  ;;  %v2240_v32 = vadd.f32 %v2239_v16, %v17834_v51 }
 0x318   : > { %v17845_v15 = vpop.f32.mrb[112].mxu1 }
 0x319   : > { %v17849_v44 = vmul.f32 %v17845_v15, %v17821_v6  ;;  %v14623_v62 = vpop.f32.mrb[113].mxu1  ;;  %v2208_v57 = vrot.slane %v17843_v19, 4  ;;  %v2241_v34 = vrot.slane %v2240_v32, 2 }
 0x31b   : > { %v2209_v2 = vadd.f32 %v2208_v57, %v17843_v19 }
 0x31c   : > { %v17851_v45 = vpop.f32.mrb[114].mxu1 }
 0x31d   : > { %v14638_v56 = vpop.f32.mrb[115].mxu1  ;;  %14691 = vmatmul.mubr.msk.f32.gmra.mrb[138].mxu0 %vm4330_vm4, %v17851_v45 }
 0x31e   : > { %14693 = vmatprep.mubr.msk.f32.mxu0 %vm16234_vm1, %v19519_v3  ;;  %v4304_v56 = vmul.f32 %v17769_v42, %v17769_v42 }
 0x320   : > { %v17863_v43 = vpop.f32.mrb[116].mxu1 }
 0x321   : > { %v14641_v23 = vpop.f32.mrb[117].mxu1  ;;  %14694 = vmatmul.mubr.msk.f32.gmra.mrb[140].mxu0 %vm4330_vm4, %v17863_v43 }
 0x322   : > { %14696 = vmatprep.mubr.msk.f32.mxu0 %vm16234_vm1, %v19519_v3  ;;  %v2242_v23 = vadd.f32 %v2241_v34, %v2240_v32 }
 0x324   : > { %v17869_v46 = vpop.f32.mrb[118].mxu1 }
 0x325   : > { %v14644_v29 = vpop.f32.mrb[119].mxu1  ;;  %14697 = vmatmul.mubr.msk.f32.gmra.mrb[142].mxu0 %vm4330_vm4, %v17869_v46 }
 0x326   : > { %14699 = vmatprep.mubr.msk.f32.mxu0 %vm16234_vm1, %v19519_v3  ;;  %v2210_v29 = vrot.slane %v2209_v2, 2 }
 0x328   : > { %v17875_v35 = vpop.f32.mrb[120].mxu1 }
 0x329   : > { %v17879_v28 = vmul.f32 %v17875_v35, %v17851_v45  ;;  %14700 = vmatmul.mubr.msk.f32.gmra.mrb[144].mxu0 %vm4330_vm4, %v17787_v7  ;;  %v14659_v58 = vpop.f32.mrb[121].mxu1 }
 0x32a   : > { %14702 = vmatprep.mubr.msk.f32.mxu0 %vm16234_vm1, %v19519_v3 }
 0x32c   : > { %v17885_v38 = vpop.f32.mrb[122].mxu1 }
 0x32d   : > { %v17889_v25 = vmul.f32 %v17885_v38, %v17863_v43  ;;  %14703 = vmatmul.mubr.msk.f32.gmra.mrb[146].mxu0 %vm4330_vm4, %v17795_v4  ;;  %v14662_v5 = vpop.f32.mrb[123].mxu1 }
 0x32e   : > { %14705 = vmatprep.mubr.msk.f32.mxu0 %vm16234_vm1, %v19519_v3 }
 0x330   : > { %v17895_v24 = vpop.f32.mrb[124].mxu1 }
 0x331   : > { %v17899_v14 = vmul.f32 %v17895_v24, %v17869_v46  ;;  %14706 = vmatmul.mubr.msk.f32.gmra.mrb[148].mxu0 %vm4330_vm4, %v17803_v0  ;;  %v14665_v9 = vpop.f32.mrb[125].mxu1 }
 0x332   : > { %14708 = vmatprep.mubr.msk.f32.mxu0 %vm16234_vm1, %v19519_v3  ;;  %v4305_v9 = vmul.f32 %v17779_v60, %v17779_v60 }
 0x335   : > { %14709 = vmatmul.mubr.msk.f32.gmra.mrb[150].mxu0 %vm4330_vm4, %v17827_v10 }
 0x336   : > { %14711 = vmatprep.mubr.msk.f32.mxu0 %vm16234_vm1, %v19519_v3 }
 0x339   : > { %14712 = vmatmul.mubr.msk.f32.gmra.mrb[152].mxu0 %vm4330_vm4, %v17836_v1 }
 0x33a   : > { %14714 = vmatprep.mubr.msk.f32.mxu0 %vm16234_vm1, %v19519_v3 }
 0x33b   : > { %v2871_v30 = vpop.xlane.xlu1 %2870 }
 0x33c   : > { %v2868_v22 = vpop.xlane.xlu0 %2867 }
 0x33d   : > { %v2884_v26 = vadd.f32 %v2871_v30, %v2868_v22  ;;  %14715 = vmatmul.mubr.msk.f32.gmra.mrb[154].mxu0 %vm4330_vm4, %v17845_v15  ;;  %v2243_v22 = vrot.slane %v2242_v23, 1 }
 0x33e   : > { %14717 = vmatprep.mubr.msk.f32.mxu0 %vm16234_vm1, %v19519_v3 }
 0x33f   : > { %v2840_v8 = vpop.xlane.xlu1 %2839  ;;  %v2244_v16 = vadd.f32 %v2243_v22, %v2242_v23  ;;  %v4312_v23 = vmul.f32 %v17787_v7, %v17787_v7 }
 0x340   : > { %v2837_v17 = vpop.xlane.xlu0 %2836 }
 0x341   : > { %v2853_v27 = vadd.f32 %v2840_v8, %v2837_v17  ;;  %14718 = vmatmul.mubr.msk.f32.gmra.mrb[156].mxu0 %vm4330_vm4, %v17875_v35 }
 0x342   : > { %14720 = vmatprep.mubr.msk.f32.mxu0 %vm16234_vm1, %v19519_v3 }
 0x343   : > { %v2877_v36 = vpop.xlane.xlu1 %2876 }
 0x344   : > { %v2874_v13 = vpop.xlane.xlu0 %2873 }
 0x345   : > { %v2885_v50 = vadd.f32 %v2884_v26, %v2874_v13  ;;  %14721 = vmatmul.mubr.msk.f32.gmra.mrb[158].mxu0 %vm4330_vm4, %v17885_v38  ;;  %v2211_v26 = vadd.f32 %v2210_v29, %v2209_v2  ;;  %v4313_v29 = vmul.f32 %v17795_v4, %v17795_v4 }
 0x346   : > { %14723 = vmatprep.mubr.msk.f32.mxu0 %vm16234_vm1, %v19519_v3 }
 0x347   : > { %v2846_v49 = vpop.xlane.xlu1 %2845  ;;  %v2886_v39 = vadd.f32 %v2885_v50, %v2877_v36  ;;  %v2212_v50 = vrot.slane %v2211_v26, 1 }
 0x348   : > { %v2843_v41 = vpop.xlane.xlu0 %2842 }
 0x349   : > { %v2854_v47 = vadd.f32 %v2853_v27, %v2843_v41  ;;  %14724 = vmatmul.mubr.msk.f32.gmra.mrb[160].mxu0 %vm4330_vm4, %v17895_v24  ;;  %v4306_v27 = vmul.f32 %v17809_v21, %v17809_v21  ;;  %v4307_v41 = vmul.f32 %v17815_v55, %v17815_v55 }
 0x34a   : > { %14726 = vmatprep.mubr.msk.f32.mxu0 %vm16234_vm1, %v19519_v3 }
 0x34b   : > { %v2883_v18 = vpop.xlane.xlu1 %2882  ;;  %v2855_v20 = vadd.f32 %v2854_v47, %v2846_v49  ;;  %v2245_v47 = vmul.f32 0.0004725898, %v2244_v16 }
 0x34c   : > { %v2880_v52 = vpop.xlane.xlu0 %2879  ;;  %v2888_v51 = vsel %vm2205_vm5, %v2883_v18, 0.0 }
 0x34d   : > { %v2887_v62 = vadd.f32 %v2886_v39, %v2880_v52  ;;  %14727 = vmatmul.mubr.msk.f32.gmra.mrb[162].mxu0 %vm4330_vm4, %v4303_v11  ;;  %v2213_v11 = vadd.f32 %v2212_v50, %v2211_v26  ;;  %v4308_v52 = vmul.f32 %v17821_v6, %v17821_v6 }
 0x34e   : > { %14729 = vmatprep.mubr.msk.f32.mxu0 %vm16234_vm1, %v19519_v3 }
 0x34f   : > { %v2889_v37 = vadd.f32 %v2888_v51, %v2887_v62  ;;  %v2852_v48 = vpop.xlane.xlu1 %2851  ;;  %v2214_v62 = vmul.f32 0.0004725898, %v2213_v11 }
 0x350   : > { %v2849_v12 = vpop.xlane.xlu0 %2848  ;;  %v2857_v19 = vsel %vm2205_vm5, %v2852_v48, 0.0  ;;  %v4310_v48 = vmul.f32 %v17863_v43, %v17863_v43 }
 0x351   : > { %v2890_v58 = vrot.slane %v2889_v37, 4  ;;  %v2856_v5 = vadd.f32 %v2855_v20, %v2849_v12  ;;  %14730 = vmatmul.mubr.msk.f32.gmra.mrb[164].mxu0 %vm4330_vm4, %v4304_v56  ;;  %v4309_v56 = vmul.f32 %v17851_v45, %v17851_v45  ;;  %v4311_v12 = vmul.f32 %v17869_v46, %v17869_v46 }
 0x352   : > { %14732 = vmatprep.mubr.msk.f32.mxu0 %vm16234_vm1, %v19519_v3 }
 0x353   : > { %v2891_v63 = vadd.f32 %v2890_v58, %v2889_v37  ;;  %v2858_v30 = vadd.f32 %v2857_v19, %v2856_v5  ;;  %v4314_v58 = vmul.f32 %v17803_v0, %v17803_v0 }
 0x355   : > { %v2892_v8 = vrot.slane %v2891_v63, 2  ;;  %v2859_v17 = vrot.slane %v2858_v30, 4  ;;  %14733 = vmatmul.mubr.msk.f32.gmra.mrb[166].mxu0 %vm4330_vm4, %v4305_v9 }
 0x356   : > { %14735 = vmatprep.mubr.msk.f32.mxu0 %vm16234_vm1, %v19519_v3 }
 0x357   : > { %v2893_v36 = vadd.f32 %v2892_v8, %v2891_v63  ;;  %v2860_v13 = vadd.f32 %v2859_v17, %v2858_v30  ;;  %v4315_v63 = vmul.f32 %v17827_v10, %v17827_v10  ;;  %v4316_v8 = vmul.f32 %v17836_v1, %v17836_v1 }
 0x359   : > { %v2894_v49 = vrot.slane %v2893_v36, 1  ;;  %v2861_v39 = vrot.slane %v2860_v13, 2  ;;  %14736 = vmatmul.mubr.msk.f32.gmra.mrb[168].mxu0 %vm4330_vm4, %v4306_v27 }
 0x35a   : > { %14738 = vmatprep.mubr.msk.f32.mxu0 %vm16234_vm1, %v19519_v3 }
 0x35b   : > { %v2895_v32 = vadd.f32 %v2894_v49, %v2893_v36  ;;  %v2862_v57 = vadd.f32 %v2861_v39, %v2860_v13  ;;  %v4317_v13 = vmul.f32 %v17845_v15, %v17845_v15 }
 0x35d   : > { %v2896_v18 = vmul.f32 0.0004725898, %v2895_v32  ;;  %v2863_v20 = vrot.slane %v2862_v57, 1  ;;  %14739 = vmatmul.mubr.msk.f32.gmra.mrb[170].mxu0 %vm4330_vm4, %v4307_v41  ;;  %v4318_v41 = vmul.f32 %v17875_v35, %v17875_v35 }
 0x35e   : > { %14741 = vmatprep.mubr.msk.f32.mxu0 %vm16234_vm1, %v19519_v3 }
 0x35f   : > { %v17966_v34 = vsel %vm3548_vm6, %v2245_v47, %v2896_v18  ;;  %v2864_v2 = vadd.f32 %v2863_v20, %v2862_v57  ;;  %v4319_v20 = vmul.f32 %v17885_v38, %v17885_v38 }
 0x361   : > { %v2865_v51 = vmul.f32 0.0004725898, %v2864_v2  ;;  %14742 = vmatmul.mubr.msk.f32.gmra.mrb[172].mxu0 %vm4330_vm4, %v4308_v52 }
 0x362   : > { %14744 = vmatprep.mubr.msk.f32.mxu0 %vm16234_vm1, %v19519_v3 }
 0x363   : > { %v17974_v37 = vsel %vm3548_vm6, %v2214_v62, %v2865_v51 }
 0x365   : > { %14745 = vmatmul.mubr.msk.f32.gmra.mrb[174].mxu0 %vm4330_vm4, %v4309_v56 }
 0x366   : > { %14747 = vmatprep.mubr.msk.f32.mxu0 %vm16234_vm1, %v19519_v3 }
 0x369   : > { %14748 = vmatmul.mubr.msk.f32.gmra.mrb[176].mxu0 %vm4330_vm4, %v4310_v48 }
 0x36a   : > { %14750 = vmatprep.mubr.msk.f32.mxu0 %vm16234_vm1, %v19519_v3 }
 0x36d   : > { %14751 = vmatmul.mubr.msk.f32.gmra.mrb[178].mxu0 %vm4330_vm4, %v4311_v12  ;;  %v4320_v12 = vmul.f32 %v17895_v24, %v17895_v24 }
 0x36e   : > { %14753 = vmatprep.mubr.msk.f32.mxu0 %vm16234_vm1, %v19519_v3 }
 0x371   : > { %14754 = vmatmul.mubr.msk.f32.gmra.mrb[180].mxu0 %vm4330_vm4, %v4312_v23 }
 0x372   : > { %14756 = vmatprep.mubr.msk.f32.mxu0 %vm16234_vm1, %v19519_v3 }
 0x375   : > { %14757 = vmatmul.mubr.msk.f32.gmra.mrb[182].mxu0 %vm4330_vm4, %v4313_v29 }
 0x376   : > { %14759 = vmatprep.mubr.msk.f32.mxu0 %vm16234_vm1, %v19519_v3 }
 0x377   : > { %v3522_v5 = vpop.xlane.xlu1 %3521 }
 0x378   : > { %v3519_v19 = vpop.xlane.xlu0 %3518 }
 0x379   : > { %v3535_v9 = vadd.f32 %v3522_v5, %v3519_v19  ;;  %14760 = vmatmul.mubr.msk.f32.gmra.mrb[184].mxu0 %vm4330_vm4, %v4314_v58 }
 0x37a   : > { %14762 = vmatprep.mubr.msk.f32.mxu0 %vm16234_vm1, %v19519_v3 }
 0x37b   : > { %v3491_v30 = vpop.xlane.xlu1 %3490 }
 0x37c   : > { %v3488_v22 = vpop.xlane.xlu0 %3487 }
 0x37d   : > { %v3504_v26 = vadd.f32 %v3491_v30, %v3488_v22  ;;  %14763 = vmatmul.mubr.msk.f32.gmra.mrb[186].mxu0 %vm4330_vm4, %v4315_v63 }
 0x37e   : > { %14765 = vmatprep.mubr.msk.f32.mxu0 %vm16234_vm1, %v19519_v3 }
 0x37f   : > { %v3528_v17 = vpop.xlane.xlu1 %3527 }
 0x380   : > { %v3525_v27 = vpop.xlane.xlu0 %3524 }
 0x381   : > { %v3536_v36 = vadd.f32 %v3535_v9, %v3525_v27  ;;  %14766 = vmatmul.mubr.msk.f32.gmra.mrb[188].mxu0 %vm4330_vm4, %v4316_v8 }
 0x382   : > { %14768 = vmatprep.mubr.msk.f32.mxu0 %vm16234_vm1, %v19519_v3 }
 0x383   : > { %v3497_v16 = vpop.xlane.xlu1 %3496  ;;  %v3537_v50 = vadd.f32 %v3536_v36, %v3528_v17 }
 0x384   : > { %v3494_v49 = vpop.xlane.xlu0 %3493 }
 0x385   : > { %v3505_v39 = vadd.f32 %v3504_v26, %v3494_v49  ;;  %14769 = vmatmul.mubr.msk.f32.gmra.mrb[190].mxu0 %vm4330_vm4, %v4317_v13 }
 0x386   : > { %14771 = vmatprep.mubr.msk.f32.mxu0 %vm16234_vm1, %v19519_v3 }
 0x387   : > { %v3534_v32 = vpop.xlane.xlu1 %3533  ;;  %v3506_v57 = vadd.f32 %v3505_v39, %v3497_v16 }
 0x388   : > { %v3531_v47 = vpop.xlane.xlu0 %3530  ;;  %v3539_v18 = vsel %vm2205_vm5, %v3534_v32, 0.0 }
 0x389   : > { %v3538_v11 = vadd.f32 %v3537_v50, %v3531_v47  ;;  %14772 = vmatmul.mubr.msk.f32.gmra.mrb[192].mxu0 %vm4330_vm4, %v4318_v41 }
 0x38a   : > { %14774 = vmatprep.mubr.msk.f32.mxu0 %vm16234_vm1, %v19519_v3 }
 0x38b   : > { %v3540_v52 = vadd.f32 %v3539_v18, %v3538_v11  ;;  %v3503_v2 = vpop.xlane.xlu1 %3502 }
 0x38c   : > { %v3500_v62 = vpop.xlane.xlu0 %3499  ;;  %v3508_v48 = vsel %vm2205_vm5, %v3503_v2, 0.0 }
 0x38d   : > { %v3541_v51 = vrot.slane %v3540_v52, 4  ;;  %v3507_v56 = vadd.f32 %v3506_v57, %v3500_v62  ;;  %14775 = vmatmul.mubr.msk.f32.gmra.mrb[194].mxu0 %vm4330_vm4, %v4319_v20 }
 0x38e   : > { %14777 = vmatprep.mubr.msk.f32.mxu0 %vm16234_vm1, %v19519_v3 }
 0x38f   : > { %v3542_v23 = vadd.f32 %v3541_v51, %v3540_v52  ;;  %v3509_v29 = vadd.f32 %v3508_v48, %v3507_v56 }
 0x391   : > { %v3543_v58 = vrot.slane %v3542_v23, 2  ;;  %v3510_v5 = vrot.slane %v3509_v29, 4  ;;  %14778 = vmatmul.mubr.msk.f32.gmra.mrb[196].mxu0 %vm4330_vm4, %v4320_v12 }
 0x392   : > { %14780 = vmatprep.mubr.msk.f32.mxu0 %vm16234_vm1, %v19519_v3 }
 0x393   : > { %v3544_v19 = vadd.f32 %v3543_v58, %v3542_v23  ;;  %v3511_v9 = vadd.f32 %v3510_v5, %v3509_v29 }
 0x395   : > { %v3545_v63 = vrot.slane %v3544_v19, 1  ;;  %v3512_v30 = vrot.slane %v3511_v9, 2  ;;  %14781 = vmatmul.mubr.msk.f32.gmra.mrb[198].mxu0 %vm4330_vm4, %v17791_v53 }
 0x396   : > { %14783 = vmatprep.mubr.msk.f32.mxu0 %vm16234_vm1, %v19519_v3 }
 0x397   : > { %v3546_v22 = vadd.f32 %v3545_v63, %v3544_v19  ;;  %v3513_v26 = vadd.f32 %v3512_v30, %v3511_v9 }
 0x399   : > { %v3547_v8 = vmul.f32 0.0004725898, %v3546_v22  ;;  %v3514_v17 = vrot.slane %v3513_v26, 1  ;;  %14784 = vmatmul.mubr.msk.f32.gmra.mrb[200].mxu0 %vm4330_vm4, %v17799_v54 }
 0x39a   : > { %14786 = vmatprep.mubr.msk.f32.mxu0 %vm16234_vm1, %v19519_v3 }
 0x39b   : > { %v18046_v27 = vsel %vm3550_vm7, %v17966_v34, %v3547_v8  ;;  %v3515_v36 = vadd.f32 %v3514_v17, %v3513_v26 }
 0x39d   : > { %v3516_v53 = vmul.f32 0.0004725898, %v3515_v36  ;;  %14787 = vmatmul.mubr.msk.f32.gmra.mrb[202].mxu0 %vm4330_vm4, %v17807_v61 }
 0x39e   : > { %14789 = vmatprep.mubr.msk.f32.mxu0 %vm16234_vm1, %v19519_v3 }
 0x39f   : > { %v18054_v13 = vsel %vm3550_vm7, %v17974_v37, %v3516_v53 }
 0x3a1   : > { %14790 = vmatmul.mubr.msk.f32.gmra.mrb[204].mxu0 %vm4330_vm4, %v17831_v33 }
 0x3a2   : > { %14792 = vmatprep.mubr.msk.f32.mxu0 %vm16234_vm1, %v19519_v3 }
 0x3a5   : > { %14793 = vmatmul.mubr.msk.f32.gmra.mrb[206].mxu0 %vm4330_vm4, %v17840_v31 }
 0x3a6   : > { %14795 = vmatprep.mubr.msk.f32.mxu0 %vm16234_vm1, %v19519_v3 }
 0x3a9   : > { %14796 = vmatmul.mubr.msk.f32.gmra.mrb[208].mxu0 %vm4330_vm4, %v17849_v44 }
 0x3aa   : > { %14798 = vmatprep.mubr.msk.f32.mxu0 %vm16234_vm1, %v19519_v3 }
 0x3ad   : > { %14799 = vmatmul.mubr.msk.f32.gmra.mrb[210].mxu0 %vm4330_vm4, %v17879_v28 }
 0x3ae   : > { %14801 = vmatprep.mubr.msk.f32.mxu0 %vm16234_vm1, %v19519_v3 }
 0x3b1   : > { %14802 = vmatmul.mubr.msk.f32.gmra.mrb[212].mxu0 %vm4330_vm4, %v17889_v25 }
 0x3b2   : > { %14804 = vmatprep.mubr.msk.f32.mxu0 %vm16234_vm1, %v19519_v3 }
 0x3b5   : > { %14805 = vmatmul.mubr.msk.f32.gmra.mrb[214].mxu0 %vm4330_vm4, %v17899_v14 }
 0x3b6   : > { %15038 = vmatprep.mubr.msk.f32.mxu0 %vm4330_vm4, %v17759_v40 }
 0x3b9   : > { %15039 = vmatmul.mubr.msk.f32.vlgmr.msra.gmra.mrb[216].mxu0 %vm4330_vm4, %v17769_v42 }
 0x3ba   : > { %15041 = vmatprep.mubr.msk.f32.mxu0 %vm4330_vm4, %v17779_v60 }
 0x3bd   : > { %15042 = vmatmul.mubr.msk.f32.gmra.mrb[218].mxu0 %vm4330_vm4, %v17809_v21 }
 0x3be   : > { %15044 = vmatprep.mubr.msk.f32.mxu0 %vm4330_vm4, %v17815_v55  ;;  %v18102_v55 = vld [vmem:[%s19544_s24] sm:$0xff] }
 0x3c0   : > { %v4532_v54 = vpop.f32.mrb[126].mxu0 }
 0x3c1   : > { %v14674_v61 = vpop.f32.mrb[127].mxu0  ;;  %15045 = vmatmul.mubr.msk.f32.gmra.mrb[220].mxu0 %vm4330_vm4, %v17821_v6 }
 0x3c2   : > { %15047 = vmatprep.mubr.msk.f32.mxu0 %vm4330_vm4, %v17851_v45 }
 0x3c4   : > { %v4537_v40 = vpop.f32.mrb[128].mxu0 }
 0x3c5   : > { %v15860_v33 = vpack.c.bf16 %v4537_v40, %v4532_v54  ;;  %v14677_v42 = vpop.f32.mrb[129].mxu0  ;;  %15048 = vmatmul.mubr.msk.f32.gmra.mrb[222].mxu0 %vm4330_vm4, %v17863_v43 }
 0x3c6   : > { %15050 = vmatprep.mubr.msk.f32.mxu0 %vm4330_vm4, %v17869_v46 }
 0x3c7   : > { %15861 = vmatpush3.bf16.msra.mxu1 %v15860_v33 }
 0x3c8   : > { %v4542_v60 = vpop.f32.mrb[130].mxu0  ;;  %14811 = vmatprep.subr.mxu1 %v19519_v3 }
 0x3c9   : > { %v14680_v21 = vpop.f32.mrb[131].mxu0  ;;  %15051 = vmatmul.mubr.msk.f32.gmra.mrb[224].mxu0 %vm4330_vm4, %v17787_v7  ;;  %v18116_v7 = vld [vmem:[%s19544_s24 + $0x8] sm:$0xff] }
 0x3ca   : > { %15053 = vmatprep.mubr.msk.f32.mxu0 %vm4330_vm4, %v17795_v4  ;;  %v18129_v4 = vld [vmem:[%s19544_s24 + $0x10] sm:$0x3f] }
 0x3cb   : > { %14812 = vmatpush3.msra.mxu1 %v4542_v60 }
 0x3cc   : > { %15862 = vmatprep.subr.bf16.mxu1 %v19515_v59  ;;  %14814 = vmatmul.mubr.msk.f32.vlgmr.msra.gmra.mrb[126].mxu1 %vm4330_vm4, %v18102_v55 }
 0x3cd   : > { %15054 = vmatmul.mubr.msk.f32.gmra.mrb[226].mxu0 %vm4330_vm4, %v17803_v0  ;;  %14816 = vmatprep.mubr.msk.f32.mxu1 %vm16234_vm1, %v19519_v3 }
 0x3ce   : > { %15056 = vmatprep.mubr.msk.f32.mxu0 %vm4330_vm4, %v17827_v10 }
 0x3d0   : > { %14817 = vmatmul.mubr.msk.f32.gmra.mrb[128].mxu1 %vm4330_vm4, %v18116_v7 }
 0x3d1   : > { %15057 = vmatmul.mubr.msk.f32.gmra.mrb[228].mxu0 %vm4330_vm4, %v17836_v1  ;;  %14819 = vmatprep.mubr.msk.f32.mxu1 %vm16234_vm1, %v19519_v3 }
 0x3d2   : > { %15059 = vmatprep.mubr.msk.f32.mxu0 %vm4330_vm4, %v17845_v15 }
 0x3d4   : > { %14820 = vmatmul.mubr.msk.f32.gmra.mrb[130].mxu1 %vm4330_vm4, %v18129_v4 }
 0x3d5   : > { %15060 = vmatmul.mubr.msk.f32.gmra.mrb[230].mxu0 %vm4330_vm4, %v17875_v35  ;;  %14828 = vmatprep.mubr.msk.f32.mxu1 %vm16234_vm1, %v19519_v3 }
 0x3d6   : > { %15062 = vmatprep.mubr.msk.f32.mxu0 %vm4330_vm4, %v17885_v38 }
 0x3d8   : > { %v18141_v0 = vpop.f32.mrb[132].mxu0 }
 0x3d9   : > { %v14683_v6 = vpop.f32.mrb[133].mxu0  ;;  %15063 = vmatmul.mubr.msk.f32.gmra.mrb[232].mxu0 %vm4330_vm4, %v17895_v24 }
 0x3dc   : > { %v18145_v10 = vpop.f32.mrb[134].mxu0 }
 0x3dd   : > { %v15875_v1 = vpack.c.bf16 %v18145_v10, %v18141_v0  ;;  %v14686_v31 = vpop.f32.mrb[135].mxu0 }
 0x3e0   : > { %v18149_v15 = vpop.f32.mrb[136].mxu0 }
 0x3e1   : > { %v14689_v44 = vpop.f32.mrb[137].mxu0 }
 0x3f0   : > { %v18151_v45 = vpop.f32.mrb[138].mxu0 }
 0x3f1   : > { %v14692_v43 = vpop.f32.mrb[139].mxu0 }
 0x3f4   : > { %v18153_v46 = vpop.f32.mrb[140].mxu0 }
 0x3f5   : > { %v15890_v35 = vpack.c.bf16 %v18153_v46, %v18151_v45  ;;  %v14695_v28 = vpop.f32.mrb[141].mxu0 }
 0x3f8   : > { %v18157_v38 = vpop.f32.mrb[142].mxu0 }
 0x3f9   : > { %v14698_v25 = vpop.f32.mrb[143].mxu0 }
 0x3fc   : > { %v4577_v24 = vpop.f32.mrb[144].mxu0 }
 0x3fd   : > { %v14701_v14 = vpop.f32.mrb[145].mxu0 }
 0x400   : > { %v4582_v34 = vpop.f32.mrb[146].mxu0 }
 0x401   : > { %v15863_v37 = vpack.c.bf16 %v4582_v34, %v4577_v24  ;;  %v14704_v16 = vpop.f32.mrb[147].mxu0 }
 0x403   : > { %15864 = vmatpush3.bf16.msra.mxu1 %v15863_v37 }
 0x404   : > { %v4587_v50 = vpop.f32.mrb[148].mxu0  ;;  %14826 = vmatprep.subr.mxu1 %v19519_v3 }
 0x405   : > { %v14707_v49 = vpop.f32.mrb[149].mxu0 }
 0x407   : > { %14827 = vmatpush3.msra.mxu1 %v4587_v50 }
 0x408   : > { %v18160_v39 = vpop.f32.mrb[150].mxu0  ;;  %15865 = vmatprep.subr.bf16.mxu1 %v19515_v59  ;;  %14829 = vmatmul.mubr.msk.f32.vlgmr.msra.gmra.mrb[132].mxu1 %vm4330_vm4, %v18102_v55 }
 0x409   : > { %v14710_v41 = vpop.f32.mrb[151].mxu0  ;;  %14831 = vmatprep.mubr.msk.f32.mxu1 %vm16234_vm1, %v19519_v3 }
 0x40c   : > { %v18167_v32 = vpop.f32.mrb[152].mxu0  ;;  %14832 = vmatmul.mubr.msk.f32.gmra.mrb[134].mxu1 %vm4330_vm4, %v18116_v7 }
 0x40d   : > { %v15878_v57 = vpack.c.bf16 %v18167_v32, %v18160_v39  ;;  %v14713_v47 = vpop.f32.mrb[153].mxu0  ;;  %14834 = vmatprep.mubr.msk.f32.mxu1 %vm16234_vm1, %v19519_v3 }
 0x410   : > { %v18175_v11 = vpop.f32.mrb[154].mxu0  ;;  %14835 = vmatmul.mubr.msk.f32.gmra.mrb[136].mxu1 %vm4330_vm4, %v18129_v4 }
 0x411   : > { %v14716_v18 = vpop.f32.mrb[155].mxu0  ;;  %14843 = vmatprep.mubr.msk.f32.mxu1 %vm16234_vm1, %v19519_v3 }
 0x414   : > { %v18181_v20 = vpop.f32.mrb[156].mxu0 }
 0x415   : > { %v14719_v52 = vpop.f32.mrb[157].mxu0 }
 0x418   : > { %v18183_v2 = vpop.f32.mrb[158].mxu0 }
 0x419   : > { %v15893_v62 = vpack.c.bf16 %v18183_v2, %v18181_v20  ;;  %v14722_v51 = vpop.f32.mrb[159].mxu0 }
 0x41c   : > { %v18187_v56 = vpop.f32.mrb[160].mxu0 }
 0x41d   : > { %v14725_v48 = vpop.f32.mrb[161].mxu0 }
 0x420   : > { %v4622_v12 = vpop.f32.mrb[162].mxu0 }
 0x421   : > { %v14728_v23 = vpop.f32.mrb[163].mxu0 }
 0x424   : > { %v4627_v29 = vpop.f32.mrb[164].mxu0 }
 0x425   : > { %v15866_v58 = vpack.c.bf16 %v4627_v29, %v4622_v12  ;;  %v14731_v5 = vpop.f32.mrb[165].mxu0 }
 0x427   : > { %15867 = vmatpush3.bf16.msra.mxu1 %v15866_v58 }
 0x428   : > { %v4632_v19 = vpop.f32.mrb[166].mxu0  ;;  %14841 = vmatprep.subr.mxu1 %v19519_v3 }
 0x429   : > { %v14734_v9 = vpop.f32.mrb[167].mxu0 }
 0x42b   : > { %14842 = vmatpush3.msra.mxu1 %v4632_v19 }
 0x42c   : > { %v18190_v63 = vpop.f32.mrb[168].mxu0  ;;  %14844 = vmatmul.mubr.msk.f32.vlgmr.msra.gmra.mrb[138].mxu1 %vm4330_vm4, %v18102_v55  ;;  %15868 = vmatprep.subr.bf16.mxu1 %v19515_v59 }
 0x42d   : > { %v14737_v30 = vpop.f32.mrb[169].mxu0  ;;  %14846 = vmatprep.mubr.msk.f32.mxu1 %vm16234_vm1, %v19519_v3 }
 0x430   : > { %v18197_v22 = vpop.f32.mrb[170].mxu0  ;;  %14847 = vmatmul.mubr.msk.f32.gmra.mrb[140].mxu1 %vm4330_vm4, %v18116_v7 }
 0x431   : > { %v15881_v26 = vpack.c.bf16 %v18197_v22, %v18190_v63  ;;  %v14740_v8 = vpop.f32.mrb[171].mxu0  ;;  %14849 = vmatprep.mubr.msk.f32.mxu1 %vm16234_vm1, %v19519_v3 }
 0x434   : > { %v18205_v17 = vpop.f32.mrb[172].mxu0  ;;  %14850 = vmatmul.mubr.msk.f32.gmra.mrb[142].mxu1 %vm4330_vm4, %v18129_v4 }
 0x435   : > { %v14743_v36 = vpop.f32.mrb[173].mxu0  ;;  %14858 = vmatprep.mubr.msk.f32.mxu1 %vm16234_vm1, %v19519_v3 }
 0x438   : > { %v18211_v53 = vpop.f32.mrb[174].mxu0 }
 0x439   : > { %v14746_v54 = vpop.f32.mrb[175].mxu0 }
 0x43c   : > { %v18213_v61 = vpop.f32.mrb[176].mxu0 }
 0x43d   : > { %v15896_v40 = vpack.c.bf16 %v18213_v61, %v18211_v53  ;;  %v14749_v33 = vpop.f32.mrb[177].mxu0 }
 0x440   : > { %v18217_v42 = vpop.f32.mrb[178].mxu0 }
 0x441   : > { %v14752_v60 = vpop.f32.mrb[179].mxu0 }
 0x444   : > { %v4667_v21 = vpop.f32.mrb[180].mxu0 }
 0x445   : > { %v14755_v6 = vpop.f32.mrb[181].mxu0 }
 0x448   : > { %v4672_v31 = vpop.f32.mrb[182].mxu0 }
 0x449   : > { %v15869_v44 = vpack.c.bf16 %v4672_v31, %v4667_v21  ;;  %v14758_v43 = vpop.f32.mrb[183].mxu0 }
 0x44b   : > { %15870 = vmatpush3.bf16.msra.mxu1 %v15869_v44 }
 0x44c   : > { %v4677_v28 = vpop.f32.mrb[184].mxu0  ;;  %14856 = vmatprep.subr.mxu1 %v19519_v3 }
 0x44d   : > { %v14761_v25 = vpop.f32.mrb[185].mxu0 }
 0x44f   : > { %14857 = vmatpush3.msra.mxu1 %v4677_v28 }
 0x450   : > { %v18220_v24 = vpop.f32.mrb[186].mxu0  ;;  %14859 = vmatmul.mubr.msk.f32.vlgmr.msra.gmra.mrb[144].mxu1 %vm4330_vm4, %v18102_v55  ;;  %15871 = vmatprep.subr.bf16.mxu1 %v19515_v59 }
 0x451   : > { %v14764_v14 = vpop.f32.mrb[187].mxu0  ;;  %14861 = vmatprep.mubr.msk.f32.mxu1 %vm16234_vm1, %v19519_v3 }
 0x454   : > { %v18227_v34 = vpop.f32.mrb[188].mxu0  ;;  %14862 = vmatmul.mubr.msk.f32.gmra.mrb[146].mxu1 %vm4330_vm4, %v18116_v7 }
 0x455   : > { %v15884_v37 = vpack.c.bf16 %v18227_v34, %v18220_v24  ;;  %v14767_v16 = vpop.f32.mrb[189].mxu0  ;;  %14864 = vmatprep.mubr.msk.f32.mxu1 %vm16234_vm1, %v19519_v3 }
 0x458   : > { %v18235_v50 = vpop.f32.mrb[190].mxu0  ;;  %14865 = vmatmul.mubr.msk.f32.gmra.mrb[148].mxu1 %vm4330_vm4, %v18129_v4 }
 0x459   : > { %v14770_v49 = vpop.f32.mrb[191].mxu0  ;;  %14873 = vmatprep.mubr.msk.f32.mxu1 %vm16234_vm1, %v19519_v3 }
 0x45c   : > { %v18241_v41 = vpop.f32.mrb[192].mxu0 }
 0x45d   : > { %v14773_v47 = vpop.f32.mrb[193].mxu0 }
 0x460   : > { %v18243_v18 = vpop.f32.mrb[194].mxu0 }
 0x461   : > { %v15899_v52 = vpack.c.bf16 %v18243_v18, %v18241_v41  ;;  %v14776_v51 = vpop.f32.mrb[195].mxu0 }
 0x464   : > { %v18247_v48 = vpop.f32.mrb[196].mxu0 }
 0x465   : > { %v14779_v12 = vpop.f32.mrb[197].mxu0 }
 0x468   : > { %v4712_v23 = vpop.f32.mrb[198].mxu0 }
 0x469   : > { %v14782_v29 = vpop.f32.mrb[199].mxu0 }
 0x46c   : > { %v4717_v58 = vpop.f32.mrb[200].mxu0 }
 0x46d   : > { %v15872_v5 = vpack.c.bf16 %v4717_v58, %v4712_v23  ;;  %v14785_v19 = vpop.f32.mrb[201].mxu0 }
 0x46f   : > { %15873 = vmatpush3.bf16.msra.mxu1 %v15872_v5 }
 0x470   : > { %v4722_v9 = vpop.f32.mrb[202].mxu0  ;;  %14871 = vmatprep.subr.mxu1 %v19519_v3 }
 0x471   : > { %v14788_v30 = vpop.f32.mrb[203].mxu0 }
 0x473   : > { %14872 = vmatpush3.msra.mxu1 %v4722_v9 }
 0x474   : > { %v18250_v8 = vpop.f32.mrb[204].mxu0  ;;  %14874 = vmatmul.mubr.msk.f32.vlgmr.msra.gmra.mrb[150].mxu1 %vm4330_vm4, %v18102_v55  ;;  %15874 = vmatprep.subr.bf16.mxu1 %v19515_v59 }
 0x475   : > { %v14791_v36 = vpop.f32.mrb[205].mxu0  ;;  %15876 = vmatpush3.bf16.msra.mxu1 %v15875_v1  ;;  %14876 = vmatprep.mubr.msk.f32.mxu1 %vm16234_vm1, %v19519_v3 }
 0x476   : > { %14886 = vmatprep.subr.mxu1 %v19519_v3 }
 0x478   : > { %v18261_v54 = vpop.f32.mrb[206].mxu0  ;;  %14877 = vmatmul.mubr.msk.f32.gmra.mrb[152].mxu1 %vm4330_vm4, %v18116_v7 }
 0x479   : > { %v15887_v33 = vpack.c.bf16 %v18261_v54, %v18250_v8  ;;  %v14794_v60 = vpop.f32.mrb[207].mxu0  ;;  %14887 = vmatpush3.msra.mxu1 %v18149_v15  ;;  %14879 = vmatprep.mubr.msk.f32.mxu1 %vm16234_vm1, %v19519_v3 }
 0x47a   : > { %15877 = vmatprep.subr.bf16.mxu1 %v19515_v59 }
 0x47c   : > { %v18271_v0 = vpop.f32.mrb[208].mxu0  ;;  %14880 = vmatmul.mubr.msk.f32.gmra.mrb[154].mxu1 %vm4330_vm4, %v18129_v4 }
 0x47d   : > { %v14797_v10 = vpop.f32.mrb[209].mxu0  ;;  %14888 = vmatprep.mubr.msk.f32.mxu1 %vm16234_vm1, %v19519_v3 }
 0x480   : > { %v18277_v1 = vpop.f32.mrb[210].mxu0  ;;  %14889 = vmatmul.mubr.msk.f32.vlgmr.msra.gmra.mrb[156].mxu1 %vm4330_vm4, %v18102_v55 }
 0x481   : > { %15879 = vmatpush3.bf16.msra.mxu1 %v15878_v57  ;;  %v14800_v15 = vpop.f32.mrb[211].mxu0  ;;  %14891 = vmatprep.mubr.msk.f32.mxu1 %vm16234_vm1, %v19519_v3 }
 0x482   : > { %14901 = vmatprep.subr.mxu1 %v19519_v3 }
 0x484   : > { %v18287_v21 = vpop.f32.mrb[212].mxu0  ;;  %14892 = vmatmul.mubr.msk.f32.gmra.mrb[158].mxu1 %vm4330_vm4, %v18116_v7 }
 0x485   : > { %v15902_v6 = vpack.c.bf16 %v18287_v21, %v18277_v1  ;;  %14902 = vmatpush3.msra.mxu1 %v18175_v11  ;;  %v14803_v31 = vpop.f32.mrb[213].mxu0  ;;  %14894 = vmatprep.mubr.msk.f32.mxu1 %vm16234_vm1, %v19519_v3 }
 0x486   : > { %15880 = vmatprep.subr.bf16.mxu1 %v19515_v59 }
 0x488   : > { %v18297_v39 = vpop.f32.mrb[214].mxu0  ;;  %14895 = vmatmul.mubr.msk.f32.gmra.mrb[160].mxu1 %vm4330_vm4, %v18129_v4 }
 0x489   : > { %v14806_v32 = vpop.f32.mrb[215].mxu0  ;;  %14903 = vmatprep.mubr.msk.f32.mxu1 %vm16234_vm1, %v19519_v3 }
 0x48c   : > { %14904 = vmatmul.mubr.msk.f32.vlgmr.msra.gmra.mrb[162].mxu1 %vm4330_vm4, %v18102_v55  ;;  %v15040_v57 = vpop.f32.mrb[216].mxu0 }
 0x48d   : > { %15882 = vmatpush3.bf16.msra.mxu1 %v15881_v26  ;;  %v6327_v11 = vpop.f32.mrb[217].mxu0  ;;  %14906 = vmatprep.mubr.msk.f32.mxu1 %vm16234_vm1, %v19519_v3 }
 0x48e   : > { %v18310_v44 = vpack.c.bf16 %v15040_v57, %v6327_v11  ;;  %14916 = vmatprep.subr.mxu1 %v19519_v3 }
 0x490   : > { %14907 = vmatmul.mubr.msk.f32.gmra.mrb[164].mxu1 %vm4330_vm4, %v18116_v7  ;;  %v15043_v43 = vpop.f32.mrb[218].mxu0 }
 0x491   : > { %14917 = vmatpush3.msra.mxu1 %v18205_v17  ;;  %v18316_v28 = vpop.f32.mrb[219].mxu0  ;;  %14909 = vmatprep.mubr.msk.f32.mxu1 %vm16234_vm1, %v19519_v3 }
 0x492   : > { %15883 = vmatprep.subr.bf16.mxu1 %v19515_v59 }
 0x494   : > { %14910 = vmatmul.mubr.msk.f32.gmra.mrb[166].mxu1 %vm4330_vm4, %v18129_v4  ;;  %v18323_v63 = vpop.f32.mrb[220].mxu0 }
 0x495   : > { %v6347_v22 = vpop.f32.mrb[221].mxu0  ;;  %14918 = vmatprep.mubr.msk.f32.mxu1 %vm16234_vm1, %v19519_v3 }
 0x496   : > { %v18327_v26 = vpack.c.bf16 %v6347_v22, %v15043_v43  ;;  %v6256_v43 = vld [vmem:[%s19472_s13] sm:$0xff] }
 0x498   : > { %14919 = vmatmul.mubr.msk.f32.vlgmr.msra.gmra.mrb[168].mxu1 %vm4330_vm4, %v18102_v55  ;;  %v15049_v17 = vpop.f32.mrb[222].mxu0 }
 0x499   : > { %15885 = vmatpush3.bf16.msra.mxu1 %v15884_v37  ;;  %v6357_v25 = vpop.f32.mrb[223].mxu0  ;;  %14921 = vmatprep.mubr.msk.f32.mxu1 %vm16234_vm1, %v19519_v3 }
 0x49a   : > { %v18336_v14 = vpack.c.bf16 %v15049_v17, %v6357_v25  ;;  %14931 = vmatprep.subr.mxu1 %v19519_v3 }
 0x49c   : > { %14922 = vmatmul.mubr.msk.f32.gmra.mrb[170].mxu1 %vm4330_vm4, %v18116_v7  ;;  %v15052_v16 = vpop.f32.mrb[224].mxu0 }
 0x49d   : > { %14932 = vmatpush3.msra.mxu1 %v18235_v50  ;;  %v18342_v49 = vpop.f32.mrb[225].mxu0  ;;  %14924 = vmatprep.mubr.msk.f32.mxu1 %vm16234_vm1, %v19519_v3 }
 0x49e   : > { %15886 = vmatprep.subr.bf16.mxu1 %v19515_v59 }
 0x49f   : > { %v18347_v24 = vpop.f32.mrb[126].mxu1 }
 0x4a0   : > { %14925 = vmatmul.mubr.msk.f32.gmra.mrb[172].mxu1 %vm4330_vm4, %v18129_v4  ;;  %v18351_v34 = vpop.f32.mrb[226].mxu0  ;;  %v14815_v37 = vpop.f32.mrb[127].mxu1  ;;  %v18457_v45 = vmul.f32 %v18347_v24, %v18347_v24 }
 0x4a1   : > { %v6377_v47 = vpop.f32.mrb[227].mxu0  ;;  %14933 = vmatprep.mubr.msk.f32.mxu1 %vm16234_vm1, %v19519_v3 }
 0x4a2   : > { %v18355_v50 = vpack.c.bf16 %v6377_v47, %v15052_v16 }
 0x4a3   : > { %v18357_v51 = vpop.f32.mrb[128].mxu1 }
 0x4a4   : > { %14934 = vmatmul.mubr.msk.f32.vlgmr.msra.gmra.mrb[174].mxu1 %vm4330_vm4, %v18102_v55  ;;  %v15058_v12 = vpop.f32.mrb[228].mxu0  ;;  %v14818_v23 = vpop.f32.mrb[129].mxu1  ;;  %v18470_v2 = vmul.f32 %v18357_v51, %v18357_v51 }
 0x4a5   : > { %15888 = vmatpush3.bf16.msra.mxu1 %v15887_v33  ;;  %v6387_v29 = vpop.f32.mrb[229].mxu0  ;;  %14936 = vmatprep.mubr.msk.f32.mxu1 %vm16234_vm1, %v19519_v3 }
 0x4a6   : > { %v18366_v58 = vpack.c.bf16 %v15058_v12, %v6387_v29  ;;  %14946 = vmatprep.subr.mxu1 %v19519_v3 }
 0x4a7   : > { %v18369_v5 = vpop.f32.mrb[130].mxu1 }
 0x4a8   : > { %14937 = vmatmul.mubr.msk.f32.gmra.mrb[176].mxu1 %vm4330_vm4, %v18116_v7  ;;  %v15061_v19 = vpop.f32.mrb[230].mxu0  ;;  %v14821_v9 = vpop.f32.mrb[131].mxu1  ;;  %v18489_v41 = vmul.f32 %v18369_v5, %v18369_v5 }
 0x4a9   : > { %14947 = vmatpush3.msra.mxu1 %v18271_v0  ;;  %v18374_v30 = vpop.f32.mrb[231].mxu0  ;;  %14939 = vmatprep.mubr.msk.f32.mxu1 %vm16234_vm1, %v19519_v3 }
 0x4aa   : > { %15889 = vmatprep.subr.bf16.mxu1 %v19515_v59 }
 0x4ac   : > { %14940 = vmatmul.mubr.msk.f32.gmra.mrb[178].mxu1 %vm4330_vm4, %v18129_v4  ;;  %v18381_v8 = vpop.f32.mrb[232].mxu0 }
 0x4ad   : > { %v6407_v36 = vpop.f32.mrb[233].mxu0  ;;  %14948 = vmatprep.mubr.msk.f32.mxu1 %vm16234_vm1, %v19519_v3 }
 0x4ae   : > { %v18385_v54 = vpack.c.bf16 %v6407_v36, %v15061_v19 }
 0x4b0   : > { %14949 = vmatmul.mubr.msk.f32.vlgmr.msra.gmra.mrb[180].mxu1 %vm4330_vm4, %v18102_v55 }
 0x4b1   : > { %15891 = vmatpush3.bf16.msra.mxu1 %v15890_v35  ;;  %14951 = vmatprep.mubr.msk.f32.mxu1 %vm16234_vm1, %v19519_v3 }
 0x4b2   : > { %14961 = vmatprep.subr.mxu1 %v19519_v3 }
 0x4b4   : > { %14952 = vmatmul.mubr.msk.f32.gmra.mrb[182].mxu1 %vm4330_vm4, %v18116_v7 }
 0x4b5   : > { %14962 = vmatpush3.msra.mxu1 %v18157_v38  ;;  %14954 = vmatprep.mubr.msk.f32.mxu1 %vm16234_vm1, %v19519_v3 }
 0x4b6   : > { %15892 = vmatprep.subr.bf16.mxu1 %v19515_v59 }
 0x4b8   : > { %14955 = vmatmul.mubr.msk.f32.gmra.mrb[184].mxu1 %vm4330_vm4, %v18129_v4 }
 0x4b9   : > { %14963 = vmatprep.mubr.msk.f32.mxu1 %vm16234_vm1, %v19519_v3 }
 0x4bc   : > { %14964 = vmatmul.mubr.msk.f32.vlgmr.msra.gmra.mrb[186].mxu1 %vm4330_vm4, %v18102_v55 }
 0x4bd   : > { %15894 = vmatpush3.bf16.msra.mxu1 %v15893_v62  ;;  %14966 = vmatprep.mubr.msk.f32.mxu1 %vm16234_vm1, %v19519_v3 }
 0x4be   : > { %14976 = vmatprep.subr.mxu1 %v19519_v3 }
 0x4c0   : > { %14967 = vmatmul.mubr.msk.f32.gmra.mrb[188].mxu1 %vm4330_vm4, %v18116_v7 }
 0x4c1   : > { %14977 = vmatpush3.msra.mxu1 %v18187_v56  ;;  %14969 = vmatprep.mubr.msk.f32.mxu1 %vm16234_vm1, %v19519_v3 }
 0x4c2   : > { %15895 = vmatprep.subr.bf16.mxu1 %v19515_v59 }
 0x4c4   : > { %14970 = vmatmul.mubr.msk.f32.gmra.mrb[190].mxu1 %vm4330_vm4, %v18129_v4 }
 0x4c5   : > { %14978 = vmatprep.mubr.msk.f32.mxu1 %vm16234_vm1, %v19519_v3 }
 0x4c8   : > { %14979 = vmatmul.mubr.msk.f32.vlgmr.msra.gmra.mrb[192].mxu1 %vm4330_vm4, %v18102_v55 }
 0x4c9   : > { %15897 = vmatpush3.bf16.msra.mxu1 %v15896_v40  ;;  %14981 = vmatprep.mubr.msk.f32.mxu1 %vm16234_vm1, %v19519_v3 }
 0x4ca   : > { %14991 = vmatprep.subr.mxu1 %v19519_v3 }
 0x4cc   : > { %14982 = vmatmul.mubr.msk.f32.gmra.mrb[194].mxu1 %vm4330_vm4, %v18116_v7 }
 0x4cd   : > { %14992 = vmatpush3.msra.mxu1 %v18217_v42  ;;  %14984 = vmatprep.mubr.msk.f32.mxu1 %vm16234_vm1, %v19519_v3 }
 0x4ce   : > { %15898 = vmatprep.subr.bf16.mxu1 %v19515_v59 }
 0x4d0   : > { %14985 = vmatmul.mubr.msk.f32.gmra.mrb[196].mxu1 %vm4330_vm4, %v18129_v4 }
 0x4d1   : > { %14993 = vmatprep.mubr.msk.f32.mxu1 %vm16234_vm1, %v19519_v3 }
 0x4d4   : > { %14994 = vmatmul.mubr.msk.f32.vlgmr.msra.gmra.mrb[198].mxu1 %vm4330_vm4, %v18102_v55 }
 0x4d5   : > { %15900 = vmatpush3.bf16.msra.mxu1 %v15899_v52  ;;  %14996 = vmatprep.mubr.msk.f32.mxu1 %vm16234_vm1, %v19519_v3 }
 0x4d6   : > { %15006 = vmatprep.subr.mxu1 %v19519_v3 }
 0x4d8   : > { %14997 = vmatmul.mubr.msk.f32.gmra.mrb[200].mxu1 %vm4330_vm4, %v18116_v7 }
 0x4d9   : > { %15007 = vmatpush3.msra.mxu1 %v18247_v48  ;;  %14999 = vmatprep.mubr.msk.f32.mxu1 %vm16234_vm1, %v19519_v3 }
 0x4da   : > { %15901 = vmatprep.subr.bf16.mxu1 %v19515_v59 }
 0x4db   : > { %v4911_v46 = vpop.f32.mrb[132].mxu1 }
 0x4dc   : > { %15000 = vmatmul.mubr.msk.f32.gmra.mrb[202].mxu1 %vm4330_vm4, %v18129_v4  ;;  %v18461_v35 = vmul.f32 %v4911_v46, %v4911_v46  ;;  %v18464_v38 = vmul.f32 %v4911_v46, %v18347_v24  ;;  %v14830_v20 = vpop.f32.mrb[133].mxu1 }
 0x4dd   : > { %15008 = vmatprep.mubr.msk.f32.mxu1 %vm16234_vm1, %v19519_v3  ;;  %v6892_v20 = vld [vmem:[%s19468_s9 + $0x8] sm:$0xf] }
 0x4de   : > { %v5207_v62 = vadd.f32 %v18461_v35, %v18457_v45  ;;  %v5201_v10 = vmul.f32 2.0, %v18464_v38 }
 0x4df   : > { %v4916_v56 = vpop.f32.mrb[134].mxu1 }
 0x4e0   : > { %15009 = vmatmul.mubr.msk.f32.vlgmr.msra.gmra.mrb[204].mxu1 %vm4330_vm4, %v18102_v55  ;;  %v5210_v53 = vadd.f32 0.0001, %v5207_v62  ;;  %v18476_v61 = vmul.f32 %v4916_v56, %v4916_v56  ;;  %v18479_v40 = vmul.f32 %v4916_v56, %v18357_v51  ;;  %v14833_v42 = vpop.f32.mrb[135].mxu1  ;;  %v5204_v21 = vadd.f32 0.0001, %v5201_v10 }
 0x4e1   : > { %15903 = vmatpush3.bf16.msra.mxu1 %v15902_v6  ;;  %15011 = vmatprep.mubr.msk.f32.mxu1 %vm16234_vm1, %v19519_v3 }
 0x4e2   : > { %15021 = vmatprep.subr.mxu1 %v19519_v3  ;;  %16141 = vrcp.f32 %v5210_v53  ;;  %v5208_v18 = vadd.f32 %v18476_v61, %v18470_v2  ;;  %v5202_v6 = vmul.f32 2.0, %v18479_v40 }
 0x4e3   : > { %v4921_v52 = vpop.f32.mrb[136].mxu1 }
 0x4e4   : > { %15012 = vmatmul.mubr.msk.f32.gmra.mrb[206].mxu1 %vm4330_vm4, %v18116_v7  ;;  %v5211_v48 = vadd.f32 0.0001, %v5208_v18  ;;  %v18495_v33 = vmul.f32 %v4921_v52, %v4921_v52  ;;  %v18498_v60 = vmul.f32 %v4921_v52, %v18369_v5  ;;  %v14836_v0 = vpop.f32.mrb[137].mxu1 }
 0x4e5   : > { %15022 = vmatpush3.msra.mxu1 %v18297_v39  ;;  %15014 = vmatprep.mubr.msk.f32.mxu1 %vm16234_vm1, %v19519_v3  ;;  %v5205_v39 = vadd.f32 0.0001, %v5202_v6 }
 0x4e6   : > { %15909 = vmatprep.subr.bf16.mxu1 %v18310_v44  ;;  %16143 = vrcp.f32 %v5211_v48  ;;  %v5209_v1 = vadd.f32 %v18495_v33, %v18489_v41  ;;  %v5203_v32 = vmul.f32 2.0, %v18498_v60 }
 0x4e8   : > { %15015 = vmatmul.mubr.msk.f32.gmra.mrb[208].mxu1 %vm4330_vm4, %v18129_v4  ;;  %v5212_v15 = vadd.f32 0.0001, %v5209_v1 }
 0x4e9   : > { %15023 = vmatprep.mubr.msk.f32.mxu1 %vm16234_vm1, %v19519_v3 }
 0x4ea   : > { %16145 = vrcp.f32 %v5212_v15 }
 0x4ec   : > { %v16142_v31 = vpop.eup %16141  ;;  %15024 = vmatmul.mubr.msk.f32.vlgmr.msra.gmra.mrb[210].mxu1 %vm4330_vm4, %v18102_v55  ;;  %v5206_v55 = vadd.f32 0.0001, %v5203_v32 }
 0x4ed   : > { %15911 = vmatpush3.bf16.msra.mxu1 %v18310_v44  ;;  %15026 = vmatprep.mubr.msk.f32.mxu1 %vm16234_vm1, %v19519_v3  ;;  %v18518_v57 = vmul.f32 %v16142_v31, %v5204_v21 }
 0x4ee   : > { %15069 = vmatprep.subr.mxu1 %v18316_v28 }
 0x4f0   : > { %v16144_v11 = vpop.eup %16143  ;;  %15027 = vmatmul.mubr.msk.f32.gmra.mrb[212].mxu1 %vm4330_vm4, %v18116_v7  ;;  %v6257_v7 = vld [vmem:[%s19472_s13 + $0x8] sm:$0xf] }
 0x4f1   : > { %15070 = vmatpush3.msra.mxu1 %v18316_v28  ;;  %15029 = vmatprep.mubr.msk.f32.mxu1 %vm16234_vm1, %v19519_v3  ;;  %v18526_v44 = vmul.f32 %v16144_v11, %v5205_v39 }
 0x4f2   : > { %15913 = vmatprep.subr.bf16.mxu1 %v18355_v50 }
 0x4f4   : > { %v16146_v22 = vpop.eup %16145  ;;  %15030 = vmatmul.mubr.msk.f32.gmra.mrb[214].mxu1 %vm4330_vm4, %v18129_v4 }
 0x4f5   : > { %15071 = vmatprep.mubr.msk.f32.mxu1 %vm4330_vm4, %v6256_v43  ;;  %v18538_v28 = vmul.f32 %v16146_v22, %v5206_v55 }
 0x4f8   : > { %15072 = vmatmul.mubr.msk.f32.vlgmr.msra.gmra.mrb[216].mxu1 %vm4330_vm4, %v6257_v7 }
 0x4f9   : > { %15915 = vmatpush3.bf16.msra.mxu1 %v18355_v50  ;;  %15080 = vmatprep.mubr.msk.f32.mxu1 %vm4330_vm4, %v6256_v43 }
 0x4fa   : > { %15078 = vmatprep.subr.mxu1 %v18351_v34 }
 0x4fd   : > { %15079 = vmatpush3.msra.mxu1 %v18351_v34 }
 0x4fe   : > { %15081 = vmatmul.mubr.msk.f32.vlgmr.msra.gmra.mrb[218].mxu1 %vm4330_vm4, %v6257_v7  ;;  %15917 = vmatprep.subr.bf16.mxu1 %v18327_v26 }
 0x4ff   : > { %15919 = vmatpush3.bf16.msra.mxu1 %v18327_v26  ;;  %15089 = vmatprep.mubr.msk.f32.mxu1 %vm4330_vm4, %v6256_v43  ;;  %v4991_v4 = vpop.f32.mrb[138].mxu1 }
 0x500   : > { %15087 = vmatprep.subr.mxu1 %v18323_v63  ;;  %v5174_v17 = vsub.f32 %v4991_v4, %v18457_v45  ;;  %v14845_v25 = vpop.f32.mrb[139].mxu1 }
 0x503   : > { %15088 = vmatpush3.msra.mxu1 %v18323_v63  ;;  %v4996_v16 = vpop.f32.mrb[140].mxu1 }
 0x504   : > { %15090 = vmatmul.mubr.msk.f32.vlgmr.msra.gmra.mrb[220].mxu1 %vm4330_vm4, %v6257_v7  ;;  %15921 = vmatprep.subr.bf16.mxu1 %v18366_v58  ;;  %v5175_v24 = vsub.f32 %v4996_v16, %v18470_v2  ;;  %v14848_v34 = vpop.f32.mrb[141].mxu1 }
 0x505   : > { %15923 = vmatpush3.bf16.msra.mxu1 %v18366_v58  ;;  %15098 = vmatprep.mubr.msk.f32.mxu1 %vm4330_vm4, %v6256_v43 }
 0x506   : > { %15096 = vmatprep.subr.mxu1 %v18374_v30 }
 0x507   : > { %v5001_v26 = vpop.f32.mrb[142].mxu1 }
 0x508   : > { %v5176_v37 = vsub.f32 %v5001_v26, %v18489_v41  ;;  %v14851_v47 = vpop.f32.mrb[143].mxu1 }
 0x509   : > { %15097 = vmatpush3.msra.mxu1 %v18374_v30 }
 0x50a   : > { %15099 = vmatmul.mubr.msk.f32.vlgmr.msra.gmra.mrb[222].mxu1 %vm4330_vm4, %v6257_v7  ;;  %15925 = vmatprep.subr.bf16.mxu1 %v18336_v14 }
 0x50b   : > { %15927 = vmatpush3.bf16.msra.mxu1 %v18336_v14  ;;  %15107 = vmatprep.mubr.msk.f32.mxu1 %vm4330_vm4, %v6256_v43 }
 0x50c   : > { %15105 = vmatprep.subr.mxu1 %v18342_v49 }
 0x50f   : > { %15106 = vmatpush3.msra.mxu1 %v18342_v49 }
 0x510   : > { %15108 = vmatmul.mubr.msk.f32.vlgmr.msra.gmra.mrb[224].mxu1 %vm4330_vm4, %v6257_v7  ;;  %15929 = vmatprep.subr.bf16.mxu1 %v18385_v54 }
 0x511   : > { %15931 = vmatpush3.bf16.msra.mxu1 %v18385_v54  ;;  %15116 = vmatprep.mubr.msk.f32.mxu1 %vm4330_vm4, %v6256_v43 }
 0x512   : > { %15114 = vmatprep.subr.mxu1 %v18381_v8 }
 0x515   : > { %15115 = vmatpush3.msra.mxu1 %v18381_v8 }
 0x516   : > { %15117 = vmatmul.mubr.msk.f32.vlgmr.msra.gmra.mrb[226].mxu1 %vm4330_vm4, %v6257_v7  ;;  %15932 = vmatprep.subr.bf16.mxu1 %v19515_v59  ;;  %vm9782_vm4 = vcmask 27648  }
 0x517   : > { %15123 = vmatprep.mubr.msk.f32.mxu1 %vm16234_vm1, %v19519_v3 }
 0x523   : > { %v5071_v63 = vpop.f32.mrb[144].mxu1 }
 0x524   : > { %v5177_v14 = vsub.f32 %v5071_v63, %v18461_v35  ;;  %v14860_v49 = vpop.f32.mrb[145].mxu1  ;;  %v6891_v35 = vld [vmem:[%s19468_s9] sm:$0xff] }
 0x525   : > { %v15933_v2 = vpack.c.bf16 %v6892_v20, %v6891_v35 }
 0x526   : > { %v5189_v50 = vadd.f32 %v5177_v14, %v5174_v17 }
 0x527   : > { %v5076_v51 = vpop.f32.mrb[146].mxu1  ;;  %15935 = vmatpush3.bf16.msk.msra.mxu1 %vm18587_vm10, %v15933_v2 }
 0x528   : > { %v5178_v12 = vsub.f32 %v5076_v51, %v18476_v61  ;;  %v14863_v23 = vpop.f32.mrb[147].mxu1  ;;  %v5192_v30 = vadd.f32 0.0009, %v5189_v50  ;;  %16030 = vmatprep.subr.bf16.mxu1 %v19515_v59 }
 0x52a   : > { %v5190_v29 = vadd.f32 %v5178_v12, %v5175_v24  ;;  %16147 = vrcp.f32 %v5192_v30 }
 0x52b   : > { %v5081_v58 = vpop.f32.mrb[148].mxu1 }
 0x52c   : > { %v5179_v5 = vsub.f32 %v5081_v58, %v18495_v33  ;;  %v14866_v19 = vpop.f32.mrb[149].mxu1  ;;  %v5193_v8 = vadd.f32 0.0009, %v5190_v29 }
 0x52e   : > { %v5191_v9 = vadd.f32 %v5179_v5, %v5176_v37  ;;  %16149 = vrcp.f32 %v5193_v8 }
 0x530   : > { %v5194_v36 = vadd.f32 0.0009, %v5191_v9 }
 0x532   : > { %16151 = vrcp.f32 %v5194_v36 }
 0x534   : > { %v16148_v41 = vpop.eup %16147 }
 0x538   : > { %v16150_v21 = vpop.eup %16149 }
 0x53c   : > { %v16152_v22 = vpop.eup %16151 }
 0x547   : > { %v5151_v54 = vpop.f32.mrb[150].mxu1 }
 0x548   : > { %v5180_v45 = vsub.f32 %v5151_v54, %v18464_v38  ;;  %v14875_v46 = vpop.f32.mrb[151].mxu1 }
 0x54a   : > { %v5183_v62 = vmul.f32 2.0, %v5180_v45 }
 0x54b   : > { %v5156_v38 = vpop.f32.mrb[152].mxu1 }
 0x54c   : > { %v5186_v53 = vadd.f32 0.0009, %v5183_v62  ;;  %v5181_v61 = vsub.f32 %v5156_v38, %v18479_v40  ;;  %v14878_v42 = vpop.f32.mrb[153].mxu1 }
 0x54e   : > { %v5184_v18 = vmul.f32 2.0, %v5181_v61  ;;  %v5196_v52 = vmul.f32 %v16148_v41, %v5186_v53 }
 0x54f   : > { %v5161_v48 = vpop.f32.mrb[154].mxu1 }
 0x550   : > { %v5187_v33 = vadd.f32 0.0009, %v5184_v18  ;;  %v5182_v0 = vsub.f32 %v5161_v48, %v18498_v60  ;;  %v14881_v10 = vpop.f32.mrb[155].mxu1  ;;  %v5243_v1 = vsel %vm5222_vm11, %v5196_v52, 0.0  ;;  %v5219_v15 = vmul.f32 %v18518_v57, %v5196_v52 }
 0x551   : > { %5244 = vadd.xlane.f32.xlu1 %v5243_v1 }
 0x552   : > { %v5185_v6 = vmul.f32 2.0, %v5182_v0  ;;  %v5198_v40 = vmul.f32 %v16150_v21, %v5187_v33  ;;  %v5223_v11 = vsel %vm5222_vm11, %v5219_v15, 0.0 }
 0x553   : > { %v5328_v31 = vpop.f32.mrb[156].mxu1 }
 0x554   : > { %v5188_v39 = vadd.f32 0.0009, %v5185_v6  ;;  %v14890_v32 = vpop.f32.mrb[157].mxu1  ;;  %v5246_v55 = vsel %vm5222_vm11, %v5198_v40, 0.0  ;;  %v5220_v43 = vmul.f32 %v18526_v44, %v5198_v40  ;;  %v5662_v26 = vmul.f32 %v5328_v31, %v5328_v31 }
 0x555   : > { %5224 = vadd.xlane.f32.xlu1 %v5223_v11  ;;  %5247 = vadd.xlane.f32.xlu0 %v5246_v55 }
 0x556   : > { %v5200_v60 = vmul.f32 %v16152_v22, %v5188_v39  ;;  %v5226_v17 = vsel %vm5222_vm11, %v5220_v43, 0.0 }
 0x557   : > { %v5333_v7 = vpop.f32.mrb[158].mxu1 }
 0x558   : > { %v14893_v57 = vpop.f32.mrb[159].mxu1  ;;  %v5249_v4 = vsel %vm5229_vm12, %v5200_v60, 0.0  ;;  %v5221_v25 = vmul.f32 %v18538_v28, %v5200_v60  ;;  %v5663_v50 = vmul.f32 %v5333_v7, %v5333_v7 }
 0x559   : > { %5250 = vadd.xlane.f32.xlu1 %v5249_v4  ;;  %5227 = vadd.xlane.f32.xlu0 %v5226_v17 }
 0x55a   : > { %v5230_v34 = vsel %vm5229_vm12, %v5221_v25, 0.0 }
 0x55b   : > { %v5338_v16 = vpop.f32.mrb[160].mxu1 }
 0x55c   : > { %v14896_v24 = vpop.f32.mrb[161].mxu1  ;;  %v5664_v5 = vmul.f32 %v5338_v16, %v5338_v16 }
 0x55d   : > { %5231 = vadd.xlane.f32.xlu0 %v5230_v34 }
 0x55f   : > { %v5408_v44 = vpop.f32.mrb[162].mxu1 }
 0x560   : > { %v5665_v37 = vmul.f32 %v5408_v44, %v5408_v44  ;;  %v18605_v47 = vmul.f32 %v5408_v44, %v5328_v31  ;;  %v14905_v63 = vpop.f32.mrb[163].mxu1 }
 0x562   : > { %v5704_v14 = vadd.f32 %v5665_v37, %v5662_v26  ;;  %v5698_v54 = vmul.f32 2.0, %v18605_v47 }
 0x563   : > { %v5413_v49 = vpop.f32.mrb[164].mxu1 }
 0x564   : > { %v5707_v51 = vadd.f32 0.0001, %v5704_v14  ;;  %v5666_v12 = vmul.f32 %v5413_v49, %v5413_v49  ;;  %v5669_v23 = vmul.f32 %v5413_v49, %v5333_v7  ;;  %v14908_v28 = vpop.f32.mrb[165].mxu1  ;;  %v5701_v2 = vadd.f32 0.0001, %v5698_v54 }
 0x566   : > { %16153 = vrcp.f32 %v5707_v51  ;;  %v5705_v29 = vadd.f32 %v5666_v12, %v5663_v50  ;;  %v5699_v62 = vmul.f32 2.0, %v5669_v23 }
 0x567   : > { %v5418_v58 = vpop.f32.mrb[166].mxu1 }
 0x568   : > { %v5708_v19 = vadd.f32 0.0001, %v5705_v29  ;;  %v5667_v9 = vmul.f32 %v5418_v58, %v5418_v58  ;;  %v18607_v30 = vmul.f32 %v5418_v58, %v5338_v16  ;;  %v14911_v8 = vpop.f32.mrb[167].mxu1  ;;  %v5702_v18 = vadd.f32 0.0001, %v5699_v62 }
 0x56a   : > { %16155 = vrcp.f32 %v5708_v19  ;;  %v5706_v36 = vadd.f32 %v5667_v9, %v5664_v5  ;;  %v5700_v52 = vmul.f32 2.0, %v18607_v30 }
 0x56b   : > { %v5488_v45 = vpop.f32.mrb[168].mxu1 }
 0x56c   : > { %v5709_v46 = vadd.f32 0.0001, %v5706_v36  ;;  %v5671_v35 = vsub.f32 %v5488_v45, %v5662_v26  ;;  %v14920_v20 = vpop.f32.mrb[169].mxu1  ;;  %v5703_v15 = vadd.f32 0.0001, %v5700_v52 }
 0x56e   : > { %16157 = vrcp.f32 %v5709_v46 }
 0x56f   : > { %v5493_v38 = vpop.f32.mrb[170].mxu1 }
 0x570   : > { %v16154_v53 = vpop.eup %16153  ;;  %v5672_v61 = vsub.f32 %v5493_v38, %v5663_v50  ;;  %v14923_v42 = vpop.f32.mrb[171].mxu1 }
 0x571   : > { %v5711_v41 = vmul.f32 %v16154_v53, %v5701_v2 }
 0x573   : > { %v5498_v48 = vpop.f32.mrb[172].mxu1 }
 0x574   : > { %v16156_v33 = vpop.eup %16155  ;;  %v5673_v0 = vsub.f32 %v5498_v48, %v5664_v5  ;;  %v14926_v10 = vpop.f32.mrb[173].mxu1 }
 0x575   : > { %v5713_v1 = vmul.f32 %v16156_v33, %v5702_v18 }
 0x577   : > { %v5568_v21 = vpop.f32.mrb[174].mxu1 }
 0x578   : > { %v16158_v6 = vpop.eup %16157  ;;  %v5674_v40 = vsub.f32 %v5568_v21, %v5665_v37  ;;  %v14935_v31 = vpop.f32.mrb[175].mxu1 }
 0x579   : > { %v5715_v39 = vmul.f32 %v16158_v6, %v5703_v15 }
 0x57a   : > { %v5686_v32 = vadd.f32 %v5674_v40, %v5671_v35 }
 0x57b   : > { %v5573_v11 = vpop.f32.mrb[176].mxu1 }
 0x57c   : > { %v5689_v55 = vadd.f32 0.0009, %v5686_v32  ;;  %v5675_v43 = vsub.f32 %v5573_v11, %v5666_v12  ;;  %v14938_v22 = vpop.f32.mrb[177].mxu1 }
 0x57e   : > { %16159 = vrcp.f32 %v5689_v55  ;;  %v5687_v60 = vadd.f32 %v5675_v43, %v5672_v61 }
 0x57f   : > { %v5578_v7 = vpop.f32.mrb[178].mxu1 }
 0x580   : > { %v5690_v57 = vadd.f32 0.0009, %v5687_v60  ;;  %v5676_v4 = vsub.f32 %v5578_v7, %v5667_v9  ;;  %v14941_v17 = vpop.f32.mrb[179].mxu1 }
 0x582   : > { %16161 = vrcp.f32 %v5690_v57  ;;  %v5688_v25 = vadd.f32 %v5676_v4, %v5673_v0 }
 0x583   : > { %v5648_v16 = vpop.f32.mrb[180].mxu1 }
 0x584   : > { %v5691_v24 = vadd.f32 0.0009, %v5688_v25  ;;  %v5677_v34 = vsub.f32 %v5648_v16, %v18605_v47  ;;  %v14950_v44 = vpop.f32.mrb[181].mxu1 }
 0x586   : > { %16163 = vrcp.f32 %v5691_v24  ;;  %v5680_v26 = vmul.f32 2.0, %v5677_v34 }
 0x587   : > { %v5653_v37 = vpop.f32.mrb[182].mxu1 }
 0x588   : > { %v16160_v63 = vpop.eup %16159  ;;  %v5683_v14 = vadd.f32 0.0009, %v5680_v26  ;;  %v5678_v49 = vsub.f32 %v5653_v37, %v5669_v23  ;;  %v14953_v50 = vpop.f32.mrb[183].mxu1 }
 0x58a   : > { %v5681_v51 = vmul.f32 2.0, %v5678_v49  ;;  %v5693_v12 = vmul.f32 %v16160_v63, %v5683_v14 }
 0x58b   : > { %v5658_v28 = vpop.f32.mrb[184].mxu1 }
 0x58c   : > { %v16162_v29 = vpop.eup %16161  ;;  %v5684_v58 = vadd.f32 0.0009, %v5681_v51  ;;  %v5679_v5 = vsub.f32 %v5658_v28, %v18607_v30  ;;  %v14956_v19 = vpop.f32.mrb[185].mxu1  ;;  %v5738_v9 = vsel %vm5222_vm11, %v5693_v12, 0.0  ;;  %v5716_v8 = vmul.f32 %v5711_v41, %v5693_v12 }
 0x58d   : > { %5739 = vadd.xlane.f32.xlu1 %v5738_v9 }
 0x58e   : > { %v5682_v47 = vmul.f32 2.0, %v5679_v5  ;;  %v5695_v36 = vmul.f32 %v16162_v29, %v5684_v58  ;;  %v5719_v23 = vsel %vm5222_vm11, %v5716_v8, 0.0 }
 0x58f   : > { %v5823_v54 = vpop.f32.mrb[186].mxu1 }
 0x590   : > { %v16164_v45 = vpop.eup %16163  ;;  %v5685_v46 = vadd.f32 0.0009, %v5682_v47  ;;  %v14965_v35 = vpop.f32.mrb[187].mxu1  ;;  %v5741_v20 = vsel %vm5222_vm11, %v5695_v36, 0.0  ;;  %v5717_v2 = vmul.f32 %v5713_v1, %v5695_v36  ;;  %v6157_v33 = vmul.f32 %v5823_v54, %v5823_v54 }
 0x591   : > { %5720 = vadd.xlane.f32.xlu1 %v5719_v23  ;;  %5742 = vadd.xlane.f32.xlu0 %v5741_v20 }
 0x592   : > { %v5697_v62 = vmul.f32 %v16164_v45, %v5685_v46  ;;  %v5722_v61 = vsel %vm5222_vm11, %v5717_v2, 0.0 }
 0x593   : > { %v5828_v30 = vpop.f32.mrb[188].mxu1 }
 0x594   : > { %v14968_v38 = vpop.f32.mrb[189].mxu1  ;;  %v5744_v53 = vsel %vm5229_vm12, %v5697_v62, 0.0  ;;  %v5718_v42 = vmul.f32 %v5715_v39, %v5697_v62  ;;  %v6158_v6 = vmul.f32 %v5828_v30, %v5828_v30 }
 0x595   : > { %5745 = vadd.xlane.f32.xlu1 %v5744_v53  ;;  %5723 = vadd.xlane.f32.xlu0 %v5722_v61 }
 0x596   : > { %v5725_v52 = vsel %vm5229_vm12, %v5718_v42, 0.0 }
 0x597   : > { %v5833_v41 = vpop.f32.mrb[190].mxu1 }
 0x598   : > { %v14971_v18 = vpop.f32.mrb[191].mxu1  ;;  %v6159_v43 = vmul.f32 %v5833_v41, %v5833_v41 }
 0x599   : > { %5726 = vadd.xlane.f32.xlu0 %v5725_v52 }
 0x59b   : > { %v5903_v48 = vpop.f32.mrb[192].mxu1 }
 0x59c   : > { %v6160_v0 = vmul.f32 %v5903_v48, %v5903_v48  ;;  %v18619_v10 = vmul.f32 %v5903_v48, %v5823_v54  ;;  %v14980_v1 = vpop.f32.mrb[193].mxu1 }
 0x59e   : > { %v6199_v15 = vadd.f32 %v6160_v0, %v6157_v33  ;;  %v6193_v17 = vmul.f32 2.0, %v18619_v10 }
 0x59f   : > { %v5908_v21 = vpop.f32.mrb[194].mxu1 }
 0x5a0   : > { %v6202_v40 = vadd.f32 0.0001, %v6199_v15  ;;  %v6161_v31 = vmul.f32 %v5908_v21, %v5908_v21  ;;  %v6164_v32 = vmul.f32 %v5908_v21, %v5828_v30  ;;  %v14983_v39 = vpop.f32.mrb[195].mxu1  ;;  %v6196_v44 = vadd.f32 0.0001, %v6193_v17 }
 0x5a2   : > { %16165 = vrcp.f32 %v6202_v40  ;;  %v6200_v11 = vadd.f32 %v6161_v31, %v6158_v6  ;;  %v6194_v26 = vmul.f32 2.0, %v6164_v32 }
 0x5a3   : > { %v5913_v55 = vpop.f32.mrb[196].mxu1 }
 0x5a4   : > { %v6203_v22 = vadd.f32 0.0001, %v6200_v11  ;;  %v6162_v60 = vmul.f32 %v5913_v55, %v5913_v55  ;;  %v18621_v7 = vmul.f32 %v5913_v55, %v5833_v41  ;;  %v14986_v57 = vpop.f32.mrb[197].mxu1  ;;  %v6197_v51 = vadd.f32 0.0001, %v6194_v26 }
 0x5a6   : > { %16167 = vrcp.f32 %v6203_v22  ;;  %v6201_v4 = vadd.f32 %v6162_v60, %v6159_v43  ;;  %v6195_v12 = vmul.f32 2.0, %v18621_v7 }
 0x5a7   : > { %v5983_v25 = vpop.f32.mrb[198].mxu1 }
 0x5a8   : > { %v6204_v16 = vadd.f32 0.0001, %v6201_v4  ;;  %v6166_v24 = vsub.f32 %v5983_v25, %v6157_v33  ;;  %v14995_v34 = vpop.f32.mrb[199].mxu1  ;;  %v6198_v9 = vadd.f32 0.0001, %v6195_v12 }
 0x5aa   : > { %16169 = vrcp.f32 %v6204_v16 }
 0x5ab   : > { %v5988_v37 = vpop.f32.mrb[200].mxu1 }
 0x5ac   : > { %v16166_v63 = vpop.eup %16165  ;;  %v6167_v14 = vsub.f32 %v5988_v37, %v6158_v6  ;;  %v14998_v49 = vpop.f32.mrb[201].mxu1 }
 0x5ad   : > { %v6206_v50 = vmul.f32 %v16166_v63, %v6196_v44 }
 0x5af   : > { %v5993_v28 = vpop.f32.mrb[202].mxu1 }
 0x5b0   : > { %v16168_v29 = vpop.eup %16167  ;;  %v6168_v58 = vsub.f32 %v5993_v28, %v6159_v43  ;;  %v15001_v5 = vpop.f32.mrb[203].mxu1 }
 0x5b1   : > { %v6208_v19 = vmul.f32 %v16168_v29, %v6197_v51 }
 0x5b3   : > { %v6063_v8 = vpop.f32.mrb[204].mxu1 }
 0x5b4   : > { %v16170_v47 = vpop.eup %16169  ;;  %v6169_v36 = vsub.f32 %v6063_v8, %v6160_v0  ;;  %v15010_v54 = vpop.f32.mrb[205].mxu1 }
 0x5b5   : > { %v6210_v45 = vmul.f32 %v16170_v47, %v6198_v9 }
 0x5b6   : > { %v6181_v46 = vadd.f32 %v6169_v36, %v6166_v24 }
 0x5b7   : > { %v6068_v35 = vpop.f32.mrb[206].mxu1 }
 0x5b8   : > { %v6184_v23 = vadd.f32 0.0009, %v6181_v46  ;;  %v6170_v20 = vsub.f32 %v6068_v35, %v6161_v31  ;;  %v15013_v2 = vpop.f32.mrb[207].mxu1 }
 0x5ba   : > { %16171 = vrcp.f32 %v6184_v23  ;;  %v6182_v62 = vadd.f32 %v6170_v20, %v6167_v14 }
 0x5bb   : > { %v6073_v30 = vpop.f32.mrb[208].mxu1 }
 0x5bc   : > { %v6185_v38 = vadd.f32 0.0009, %v6182_v62  ;;  %v6171_v53 = vsub.f32 %v6073_v30, %v6162_v60  ;;  %v15016_v61 = vpop.f32.mrb[209].mxu1 }
 0x5be   : > { %16173 = vrcp.f32 %v6185_v38  ;;  %v6183_v42 = vadd.f32 %v6171_v53, %v6168_v58 }
 0x5bf   : > { %v6143_v41 = vpop.f32.mrb[210].mxu1 }
 0x5c0   : > { %v6186_v18 = vadd.f32 0.0009, %v6183_v42  ;;  %v6172_v52 = vsub.f32 %v6143_v41, %v18619_v10  ;;  %v15025_v48 = vpop.f32.mrb[211].mxu1 }
 0x5c2   : > { %16175 = vrcp.f32 %v6186_v18  ;;  %v6175_v33 = vmul.f32 2.0, %v6172_v52 }
 0x5c3   : > { %v6148_v0 = vpop.f32.mrb[212].mxu1 }
 0x5c4   : > { %v16172_v1 = vpop.eup %16171  ;;  %v6178_v15 = vadd.f32 0.0009, %v6175_v33  ;;  %v6173_v21 = vsub.f32 %v6148_v0, %v6164_v32  ;;  %v15028_v6 = vpop.f32.mrb[213].mxu1 }
 0x5c6   : > { %v6176_v40 = vmul.f32 2.0, %v6173_v21  ;;  %v6188_v31 = vmul.f32 %v16172_v1, %v6178_v15 }
 0x5c7   : > { %v6153_v39 = vpop.f32.mrb[214].mxu1 }
 0x5c8   : > { %v16174_v11 = vpop.eup %16173  ;;  %v6179_v55 = vadd.f32 0.0009, %v6176_v40  ;;  %v6174_v43 = vsub.f32 %v6153_v39, %v18621_v7  ;;  %v15031_v22 = vpop.f32.mrb[215].mxu1  ;;  %v6233_v60 = vsel %vm5222_vm11, %v6188_v31, 0.0  ;;  %v6211_v57 = vmul.f32 %v6206_v50, %v6188_v31 }
 0x5c9   : > { %6234 = vadd.xlane.f32.xlu0 %v6233_v60 }
 0x5ca   : > { %v6177_v10 = vmul.f32 2.0, %v6174_v43  ;;  %v6190_v4 = vmul.f32 %v16174_v11, %v6179_v55  ;;  %v6214_v7 = vsel %vm5222_vm11, %v6211_v57, 0.0 }
 0x5cb   : > { %v15073_v17 = vpop.f32.mrb[216].mxu1 }
 0x5cc   : > { %v16176_v25 = vpop.eup %16175  ;;  %v6180_v16 = vadd.f32 0.0009, %v6177_v10  ;;  %v18628_v32 = vpop.f32.mrb[217].mxu1  ;;  %v6236_v24 = vsel %vm5222_vm11, %v6190_v4, 0.0  ;;  %v6212_v34 = vmul.f32 %v6208_v19, %v6190_v4 }
 0x5cd   : > { %6237 = vadd.xlane.f32.xlu1 %v6236_v24  ;;  %15124 = vmatmul.mubr.msk.f32.vlgmr.msra.gmra.mrb[228].mxu1 %vm6939_vm13, %v18628_v32 }
 0x5ce   : > { %v6192_v44 = vmul.f32 %v16176_v25, %v6180_v16  ;;  %6215 = vadd.xlane.f32.xlu0 %v6214_v7  ;;  %15126 = vmatprep.mubr.msk.f32.mxu1 %vm16234_vm1, %v19519_v3  ;;  %v6217_v26 = vsel %vm5222_vm11, %v6212_v34, 0.0 }
 0x5d0   : > { %v6213_v37 = vmul.f32 %v6210_v45, %v6192_v44  ;;  %v6239_v51 = vsel %vm5229_vm12, %v6192_v44, 0.0 }
 0x5d1   : > { %v15082_v63 = vpop.f32.mrb[218].mxu1  ;;  %6218 = vadd.xlane.f32.xlu1 %v6217_v26 }
 0x5d2   : > { %v6563_v14 = vpop.f32.mrb[219].mxu1  ;;  %v6220_v49 = vsel %vm5229_vm12, %v6213_v37, 0.0 }
 0x5d3   : > { %v18639_v50 = vmul.f32 %v6563_v14, %v18628_v32  ;;  %6221 = vadd.xlane.f32.xlu0 %v6220_v49  ;;  %v6898_v36 = vmul.f32 %v6563_v14, %v6563_v14  ;;  %v6912_v35 = vrot.slane %v6563_v14, 4 }
 0x5d5   : > { %6240 = vadd.xlane.f32.xlu1 %v6239_v51  ;;  %v6927_v62 = vrot.slane %v6898_v36, 4 }
 0x5d7   : > { %v15091_v12 = vpop.f32.mrb[220].mxu1 }
 0x5d8   : > { %v6876_v28 = vrot.slane %v15091_v12, 4  ;;  %v6638_v29 = vpop.f32.mrb[221].mxu1 }
 0x5d9   : > { %v6875_v58 = vrot.slane %v6638_v29, 4 }
 0x5db   : > { %v18643_v5 = vsel %vm6874_vm8, %v15073_v17, %v6875_v58  ;;  %v18646_v19 = vsel %vm6874_vm8, %v6875_v58, %v6876_v28  ;;  %v6893_v17 = vmul.f32 %v18628_v32, %v18628_v32 }
 0x5dc   : > { %15127 = vmatmul.mubr.msk.f32.gmra.mrb[230].mxu1 %vm6939_vm13, %v18643_v5  ;;  %v6894_v25 = vmul.f32 %v18643_v5, %v18643_v5  ;;  %v6895_v16 = vmul.f32 %v18646_v19, %v18646_v19 }
 0x5dd   : > { %v15100_v9 = vpop.f32.mrb[222].mxu1  ;;  %15129 = vmatprep.mubr.msk.f32.mxu1 %vm16234_vm1, %v19519_v3 }
 0x5de   : > { %v6884_v8 = vrot.slane %v15100_v9, 4  ;;  %v6713_v47 = vpop.f32.mrb[223].mxu1  ;;  %v5245_v44 = vpop.xlane.xlu1 %5244 }
 0x5df   : > { %v6883_v54 = vrot.slane %v6713_v47, 4 }
 0x5e0   : > { %15130 = vmatmul.mubr.msk.f32.gmra.mrb[232].mxu1 %vm6939_vm13, %v18646_v19 }
 0x5e1   : > { %v18655_v45 = vsel %vm6874_vm8, %v6883_v54, %v6884_v8  ;;  %v18658_v46 = vsel %vm6874_vm8, %v15082_v63, %v6883_v54  ;;  %15132 = vmatprep.mubr.msk.f32.mxu1 %vm16234_vm1, %v19519_v3 }
 0x5e2   : > { %v6899_v23 = vmul.f32 %v18658_v46, %v18658_v46  ;;  %v6900_v20 = vmul.f32 %v18655_v45, %v18655_v45  ;;  %v6913_v2 = vrot.slane %v18658_v46, 4  ;;  %v6915_v30 = vrot.slane %v18655_v45, 4  ;;  %v18770_v26 = vpop.xlane.xlu1 %5224  ;;  %v5248_v63 = vpop.xlane.xlu0 %5247 }
 0x5e3   : > { %v15109_v38 = vpop.f32.mrb[224].mxu1  ;;  %v6904_v34 = vmul.f32 %v18658_v46, %v18643_v5  ;;  %v6905_v7 = vmul.f32 %v18655_v45, %v18646_v19  ;;  %v5252_v47 = vadd.f32 %v5248_v63, %v5245_v44 }
 0x5e4   : > { %v6928_v53 = vrot.slane %v6899_v23, 4  ;;  %v6930_v61 = vrot.slane %v6900_v20, 4  ;;  %v6897_v42 = vmul.f32 %v15109_v38, %v15109_v38  ;;  %v18668_v41 = vpop.f32.mrb[225].mxu1  ;;  %v18671_v18 = vsel %vm6874_vm8, %v15109_v38, %v6912_v35 }
 0x5e5   : > { %15133 = vmatmul.mubr.msk.f32.gmra.mrb[234].mxu1 %vm6939_vm13, %v18668_v41  ;;  %v18676_v52 = vsel %vm6874_vm8, %v6912_v35, %v6913_v2  ;;  %v18679_v48 = vsel %vm6874_vm8, %v6913_v2, %v6915_v30  ;;  %v6896_v24 = vmul.f32 %v18668_v41, %v18668_v41 }
 0x5e6   : > { %15135 = vmatprep.mubr.msk.f32.mxu1 %vm16234_vm1, %v19519_v3  ;;  %v6938_v33 = vsel %vm6874_vm8, %v6897_v42, %v6927_v62  ;;  %v6929_v0 = vsel %vm6874_vm8, %v6927_v62, %v6928_v53  ;;  %v6931_v1 = vsel %vm6874_vm8, %v6928_v53, %v6930_v61  ;;  %v5251_v37 = vpop.xlane.xlu1 %5250  ;;  %v18772_v49 = vpop.xlane.xlu0 %5227 }
 0x5e7   : > { %v5253_v8 = vsel %vm2205_vm5, %v5251_v37, 0.0 }
 0x5e8   : > { %v5254_v54 = vadd.f32 %v5253_v8, %v5252_v47 }
 0x5e9   : > { %v15118_v15 = vpop.f32.mrb[226].mxu1  ;;  %15136 = vmatmul.mubr.msk.f32.gmra.mrb[236].mxu1 %vm6939_vm13, %v18671_v18 }
 0x5ea   : > { %v6902_v21 = vmul.f32 %v15118_v15, %v15118_v15  ;;  %v6907_v6 = vmul.f32 %v15118_v15, %v15109_v38  ;;  %v6919_v40 = vrot.slane %v15118_v15, 4  ;;  %v6863_v31 = vpop.f32.mrb[227].mxu1  ;;  %15138 = vmatprep.mubr.msk.f32.mxu1 %vm16234_vm1, %v19519_v3  ;;  %v18783_v12 = vpop.xlane.xlu0 %5231  ;;  %v5255_v35 = vrot.slane %v5254_v54, 4 }
 0x5eb   : > { %v6901_v39 = vmul.f32 %v6863_v31, %v6863_v31  ;;  %v6906_v11 = vmul.f32 %v6863_v31, %v18668_v41  ;;  %v6917_v55 = vrot.slane %v6863_v31, 4 }
 0x5ec   : > { %v6934_v43 = vrot.slane %v6902_v21, 4  ;;  %v5256_v2 = vadd.f32 %v5255_v35, %v5254_v54 }
 0x5ed   : > { %v6932_v22 = vrot.slane %v6901_v39, 4  ;;  %15139 = vmatmul.mubr.msk.f32.gmra.mrb[238].mxu1 %vm6939_vm13, %v18676_v52  ;;  %v18694_v60 = vsel %vm6874_vm8, %v6915_v30, %v6917_v55  ;;  %v18697_v57 = vsel %vm6874_vm8, %v6917_v55, %v6919_v40 }
 0x5ee   : > { %15141 = vmatprep.mubr.msk.f32.mxu1 %vm16234_vm1, %v19519_v3  ;;  %v5257_v53 = vrot.slane %v5256_v2, 2 }
 0x5ef   : > { %v6933_v10 = vsel %vm6874_vm8, %v6930_v61, %v6932_v22  ;;  %v6935_v4 = vsel %vm6874_vm8, %v6932_v22, %v6934_v43 }
 0x5f0   : > { %v5258_v21 = vadd.f32 %v5257_v53, %v5256_v2 }
 0x5f1   : > { %15142 = vmatmul.mubr.msk.f32.gmra.mrb[240].mxu1 %vm6939_vm13, %v18679_v48 }
 0x5f2   : > { %15144 = vmatprep.mubr.msk.f32.mxu1 %vm16234_vm1, %v19519_v3  ;;  %v5259_v39 = vrot.slane %v5258_v21, 1 }
 0x5f4   : > { %v5260_v22 = vadd.f32 %v5259_v39, %v5258_v21 }
 0x5f5   : > { %15145 = vmatmul.mubr.msk.f32.gmra.mrb[242].mxu1 %vm6939_vm13, %v18694_v60 }
 0x5f6   : > { %15147 = vmatprep.mubr.msk.f32.mxu1 %vm16234_vm1, %v19519_v3 }
 0x5f9   : > { %15148 = vmatmul.mubr.msk.f32.gmra.mrb[244].mxu1 %vm6939_vm13, %v18697_v57 }
 0x5fa   : > { %15150 = vmatprep.mubr.msk.f32.mxu1 %vm16234_vm1, %v19519_v3 }
 0x5fd   : > { %15151 = vmatmul.mubr.msk.f32.gmra.mrb[246].mxu1 %vm6939_vm13, %v6893_v17 }
 0x5fe   : > { %15153 = vmatprep.mubr.msk.f32.mxu1 %vm16234_vm1, %v19519_v3 }
 0x601   : > { %15154 = vmatmul.mubr.msk.f32.gmra.mrb[248].mxu1 %vm6939_vm13, %v6894_v25  ;;  %v5261_v25 = vmul.f32 0.0020661156, %v5260_v22 }
 0x602   : > { %15156 = vmatprep.mubr.msk.f32.mxu1 %vm16234_vm1, %v19519_v3 }
 0x605   : > { %15157 = vmatmul.mubr.msk.f32.gmra.mrb[250].mxu1 %vm6939_vm13, %v6895_v16 }
 0x606   : > { %15159 = vmatprep.mubr.msk.f32.mxu1 %vm16234_vm1, %v19519_v3 }
 0x609   : > { %15160 = vmatmul.mubr.msk.f32.gmra.mrb[252].mxu1 %vm6939_vm13, %v6896_v24 }
 0x60a   : > { %15162 = vmatprep.mubr.msk.f32.mxu1 %vm16234_vm1, %v19519_v3 }
 0x60d   : > { %15163 = vmatmul.mubr.msk.f32.gmra.mrb[254].mxu1 %vm6939_vm13, %v6938_v33 }
 0x60e   : > { %15165 = vmatprep.mubr.msk.f32.mxu1 %vm16234_vm1, %v19519_v3 }
 0x611   : > { %15166 = vmatmul.mubr.msk.f32.gmra.mrb[0].mxu1 %vm6939_vm13, %v6929_v0 }
 0x612   : > { %15168 = vmatprep.mubr.msk.f32.mxu1 %vm16234_vm1, %v19519_v3 }
 0x615   : > { %15169 = vmatmul.mubr.msk.f32.gmra.mrb[2].mxu1 %vm6939_vm13, %v6931_v1 }
 0x616   : > { %15171 = vmatprep.mubr.msk.f32.mxu1 %vm16234_vm1, %v19519_v3 }
 0x619   : > { %15172 = vmatmul.mubr.msk.f32.gmra.mrb[4].mxu1 %vm6939_vm13, %v6933_v10 }
 0x61a   : > { %15174 = vmatprep.mubr.msk.f32.mxu1 %vm16234_vm1, %v19519_v3  ;;  %v5740_v14 = vpop.xlane.xlu1 %5739 }
 0x61d   : > { %15175 = vmatmul.mubr.msk.f32.gmra.mrb[6].mxu1 %vm6939_vm13, %v6935_v4 }
 0x61e   : > { %15177 = vmatprep.mubr.msk.f32.mxu1 %vm16234_vm1, %v19519_v3  ;;  %v18781_v51 = vpop.xlane.xlu1 %5720  ;;  %v5743_v29 = vpop.xlane.xlu0 %5742 }
 0x61f   : > { %v5747_v9 = vadd.f32 %v5743_v29, %v5740_v14 }
 0x621   : > { %15178 = vmatmul.mubr.msk.f32.gmra.mrb[8].mxu1 %vm6939_vm13, %v18639_v50  ;;  %v18777_v50 = vld [vmem:[%s19547_s30] sm:$0xff] }
 0x622   : > { %15180 = vmatprep.mubr.msk.f32.mxu1 %vm16234_vm1, %v19519_v3  ;;  %15196 = vmatprep.mubr.msk.f32.mxu0 %vm6939_vm13, %v18777_v50  ;;  %v5746_v28 = vpop.xlane.xlu1 %5745  ;;  %v18787_v46 = vpop.xlane.xlu0 %5723 }
 0x623   : > { %v5748_v58 = vsel %vm2205_vm5, %v5746_v28, 0.0 }
 0x624   : > { %v5749_v36 = vadd.f32 %v5748_v58, %v5747_v9  ;;  %v18807_v9 = vld [vmem:[%s19547_s30 + $0x8] sm:$0x3] }
 0x625   : > { %15181 = vmatmul.mubr.msk.f32.gmra.mrb[10].mxu1 %vm6939_vm13, %v6904_v34 }
 0x626   : > { %15183 = vmatprep.mubr.msk.f32.mxu1 %vm16234_vm1, %v19519_v3  ;;  %v5750_v45 = vrot.slane %v5749_v36, 4  ;;  %v18789_v62 = vpop.xlane.xlu0 %5726 }
 0x628   : > { %v5751_v20 = vadd.f32 %v5750_v45, %v5749_v36 }
 0x629   : > { %15184 = vmatmul.mubr.msk.f32.gmra.mrb[12].mxu1 %vm6939_vm13, %v6905_v7 }
 0x62a   : > { %15186 = vmatprep.mubr.msk.f32.mxu1 %vm16234_vm1, %v19519_v3  ;;  %v5752_v38 = vrot.slane %v5751_v20, 2 }
 0x62c   : > { %v5753_v0 = vadd.f32 %v5752_v38, %v5751_v20 }
 0x62d   : > { %15187 = vmatmul.mubr.msk.f32.gmra.mrb[14].mxu1 %vm6939_vm13, %v6906_v11 }
 0x62e   : > { %15189 = vmatprep.mubr.msk.f32.mxu1 %vm16234_vm1, %v19519_v3  ;;  %v5754_v40 = vrot.slane %v5753_v0, 1 }
 0x630   : > { %v5755_v55 = vadd.f32 %v5754_v40, %v5753_v0 }
 0x631   : > { %15190 = vmatmul.mubr.msk.f32.gmra.mrb[16].mxu1 %vm6939_vm13, %v6907_v6 }
 0x632   : > { %15332 = vmatprep.mubr.msk.f32.mxu1 %vm16234_vm1, %v19519_v3  ;;  %v5756_v4 = vmul.f32 0.0020661156, %v5755_v55 }
 0x634   : > { %v6254_v24 = vsel %vm3548_vm6, %v5261_v25, %v5756_v4 }
 0x656   : > { %v6235_v61 = vpop.xlane.xlu0 %6234 }
 0x65a   : > { %v6238_v23 = vpop.xlane.xlu1 %6237 }
 0x65b   : > { %v6242_v42 = vadd.f32 %v6238_v23, %v6235_v61 }
 0x65e   : > { %v18791_v30 = vpop.xlane.xlu1 %6218 }
 0x662   : > { %v6241_v33 = vpop.xlane.xlu1 %6240 }
 0x663   : > { %v6243_v1 = vsel %vm2205_vm5, %v6241_v33, 0.0 }
 0x664   : > { %v6244_v15 = vadd.f32 %v6243_v1, %v6242_v42 }
 0x666   : > { %v6245_v6 = vrot.slane %v6244_v15, 4 }
 0x668   : > { %v6246_v31 = vadd.f32 %v6245_v6, %v6244_v15 }
 0x66a   : > { %v6247_v11 = vrot.slane %v6246_v31, 2 }
 0x66c   : > { %v6248_v43 = vadd.f32 %v6247_v11, %v6246_v31 }
 0x66e   : > { %v6249_v10 = vrot.slane %v6248_v43, 1 }
 0x670   : > { %v6250_v17 = vadd.f32 %v6249_v10, %v6248_v43 }
 0x672   : > { %v6251_v16 = vmul.f32 0.0020661156, %v6250_v17 }
 0x674   : > { %v6255_v34 = vsel %vm3550_vm7, %v6254_v24, %v6251_v16 }
 0x675   : > { %v12573_v7 = vrot.slane %v6255_v34, 7 }
 0x677   : > { %v18798_v44 = vsel %vm11209_vm14, %v18046_v27, %v12573_v7 }
 0x6a0   : > { %v7069_v37 = vpop.f32.mrb[228].mxu1 }
 0x6a1   : > { %v15125_v63 = vpop.f32.mrb[229].mxu1 }
 0x6af   : > { %v7074_v14 = vpop.f32.mrb[230].mxu1 }
 0x6b0   : > { %v15936_v28 = vpack.c.bf16 %v7074_v14, %v7069_v37  ;;  %v15128_v29 = vpop.f32.mrb[231].mxu1  ;;  %v7661_v8 = vrot.slane %v7074_v14, 4 }
 0x6b2   : > { %15938 = vmatprep.subr.msk.bf16.mxu0 %vm18587_vm10, %v15936_v28 }
 0x6b3   : > { %v7079_v58 = vpop.f32.mrb[232].mxu1  ;;  %15941 = vmatpush3.bf16.msk.msra.mxu0 %vm18587_vm10, %v15936_v28 }
 0x6b4   : > { %v7662_v27 = vrot.slane %v7079_v58, 4  ;;  %v15131_v47 = vpop.f32.mrb[233].mxu1 }
 0x6b6   : > { %v7663_v36 = vsel %vm6874_vm8, %v7661_v8, %v7662_v27  ;;  %15197 = vmatmul.mubr.msk.f32.vlgmr.msra.gmra.mrb[234].mxu0 %vm6939_vm13, %v18807_v9 }
 0x6b7   : > { %v18812_v54 = vpack.c.bf16 %v7662_v27, %v7663_v36  ;;  %15203 = vmatprep.mubr.msk.f32.mxu0 %vm6939_vm13, %v18777_v50 }
 0x6b8   : > { %v7084_v45 = vpop.f32.mrb[234].mxu1 }
 0x6b9   : > { %v15134_v35 = vpop.f32.mrb[235].mxu1 }
 0x6bc   : > { %v7089_v23 = vpop.f32.mrb[236].mxu1 }
 0x6bd   : > { %v18816_v20 = vpack.c.bf16 %v7089_v23, %v7084_v45  ;;  %v15137_v2 = vpop.f32.mrb[237].mxu1  ;;  %v7269_v53 = vrot.slane %v7089_v23, 4 }
 0x6c0   : > { %v7094_v38 = vpop.f32.mrb[238].mxu1 }
 0x6c1   : > { %v7270_v61 = vrot.slane %v7094_v38, 4  ;;  %v15140_v42 = vpop.f32.mrb[239].mxu1 }
 0x6c3   : > { %v7271_v33 = vsel %vm6874_vm8, %v7269_v53, %v7270_v61 }
 0x6c4   : > { %v15942_v0 = vpack.c.bf16 %v7270_v61, %v7271_v33  ;;  %v7099_v1 = vpop.f32.mrb[240].mxu1 }
 0x6c5   : > { %v15143_v15 = vpop.f32.mrb[241].mxu1 }
 0x6c6   : > { %15944 = vmatprep.subr.msk.bf16.mxu0 %vm18587_vm10, %v15942_v0 }
 0x6c7   : > { %15947 = vmatpush3.bf16.msk.msra.mxu0 %vm18587_vm10, %v15942_v0 }
 0x6c8   : > { %v7104_v21 = vpop.f32.mrb[242].mxu1 }
 0x6c9   : > { %v18823_v6 = vpack.c.bf16 %v7104_v21, %v7099_v1  ;;  %v15146_v40 = vpop.f32.mrb[243].mxu1  ;;  %v8208_v39 = vrot.slane %v7104_v21, 4 }
 0x6ca   : > { %15204 = vmatmul.mubr.msk.f32.vlgmr.msra.gmra.mrb[236].mxu0 %vm6939_vm13, %v18807_v9 }
 0x6cb   : > { %15210 = vmatprep.mubr.msk.f32.mxu0 %vm6939_vm13, %v18777_v50 }
 0x6cc   : > { %v7109_v31 = vpop.f32.mrb[244].mxu1 }
 0x6cd   : > { %v8209_v11 = vrot.slane %v7109_v31, 4  ;;  %v15149_v55 = vpop.f32.mrb[245].mxu1 }
 0x6cf   : > { %v8210_v43 = vsel %vm6874_vm8, %v8208_v39, %v8209_v11 }
 0x6d0   : > { %v18830_v22 = vpack.c.bf16 %v8209_v11, %v8210_v43  ;;  %v7114_v10 = vpop.f32.mrb[246].mxu1 }
 0x6d1   : > { %v15152_v4 = vpop.f32.mrb[247].mxu1 }
 0x6d4   : > { %v7119_v17 = vpop.f32.mrb[248].mxu1 }
 0x6d5   : > { %v15948_v25 = vpack.c.bf16 %v7119_v17, %v7114_v10  ;;  %v15155_v16 = vpop.f32.mrb[249].mxu1  ;;  %v7821_v34 = vrot.slane %v7119_v17, 4 }
 0x6d7   : > { %15950 = vmatprep.subr.msk.bf16.mxu0 %vm18587_vm10, %v15948_v25 }
 0x6d8   : > { %v7124_v24 = vpop.f32.mrb[250].mxu1  ;;  %15953 = vmatpush3.bf16.msk.msra.mxu0 %vm18587_vm10, %v15948_v25 }
 0x6d9   : > { %v7822_v7 = vrot.slane %v7124_v24, 4  ;;  %v15158_v37 = vpop.f32.mrb[251].mxu1 }
 0x6db   : > { %v7823_v63 = vsel %vm6874_vm8, %v7821_v34, %v7822_v7  ;;  %15211 = vmatmul.mubr.msk.f32.vlgmr.msra.gmra.mrb[238].mxu0 %vm6939_vm13, %v18807_v9 }
 0x6dc   : > { %v15978_v14 = vpack.c.bf16 %v7822_v7, %v7823_v63  ;;  %v7129_v28 = vpop.f32.mrb[252].mxu1  ;;  %15217 = vmatprep.mubr.msk.f32.mxu0 %vm6939_vm13, %v18777_v50 }
 0x6dd   : > { %v15161_v29 = vpop.f32.mrb[253].mxu1 }
 0x6e0   : > { %v7134_v58 = vpop.f32.mrb[254].mxu1 }
 0x6e1   : > { %v18841_v8 = vpack.c.bf16 %v7134_v58, %v7129_v28  ;;  %v15164_v27 = vpop.f32.mrb[255].mxu1  ;;  %v7430_v36 = vrot.slane %v7134_v58, 4 }
 0x6e4   : > { %v7139_v47 = vpop.f32.mrb[0].mxu1 }
 0x6e5   : > { %v7431_v45 = vrot.slane %v7139_v47, 4  ;;  %v15167_v35 = vpop.f32.mrb[1].mxu1 }
 0x6e7   : > { %v7432_v23 = vsel %vm6874_vm8, %v7430_v36, %v7431_v45 }
 0x6e8   : > { %v15954_v2 = vpack.c.bf16 %v7431_v45, %v7432_v23  ;;  %v7144_v38 = vpop.f32.mrb[2].mxu1 }
 0x6e9   : > { %v15170_v53 = vpop.f32.mrb[3].mxu1 }
 0x6ea   : > { %15956 = vmatprep.subr.msk.bf16.mxu0 %vm18587_vm10, %v15954_v2 }
 0x6eb   : > { %15959 = vmatpush3.bf16.msk.msra.mxu0 %vm18587_vm10, %v15954_v2 }
 0x6ec   : > { %v7149_v61 = vpop.f32.mrb[4].mxu1 }
 0x6ed   : > { %v15984_v42 = vpack.c.bf16 %v7149_v61, %v7144_v38  ;;  %v15173_v33 = vpop.f32.mrb[5].mxu1  ;;  %v8367_v1 = vrot.slane %v7149_v61, 4 }
 0x6ee   : > { %15218 = vmatmul.mubr.msk.f32.vlgmr.msra.gmra.mrb[240].mxu0 %vm6939_vm13, %v18807_v9 }
 0x6ef   : > { %15224 = vmatprep.mubr.msk.f32.mxu0 %vm6939_vm13, %v18777_v50 }
 0x6f0   : > { %v7154_v0 = vpop.f32.mrb[6].mxu1 }
 0x6f1   : > { %v8368_v15 = vrot.slane %v7154_v0, 4  ;;  %v15176_v21 = vpop.f32.mrb[7].mxu1 }
 0x6f3   : > { %v8369_v40 = vsel %vm6874_vm8, %v8367_v1, %v8368_v15 }
 0x6f4   : > { %v16014_v31 = vpack.c.bf16 %v8368_v15, %v8369_v40  ;;  %v7159_v39 = vpop.f32.mrb[8].mxu1 }
 0x6f5   : > { %v15179_v11 = vpop.f32.mrb[9].mxu1 }
 0x6f8   : > { %v7164_v55 = vpop.f32.mrb[10].mxu1 }
 0x6f9   : > { %v15960_v43 = vpack.c.bf16 %v7164_v55, %v7159_v39  ;;  %v15182_v10 = vpop.f32.mrb[11].mxu1  ;;  %v7981_v17 = vrot.slane %v7164_v55, 4 }
 0x6fb   : > { %15962 = vmatprep.subr.msk.bf16.mxu0 %vm18587_vm10, %v15960_v43 }
 0x6fc   : > { %v7169_v4 = vpop.f32.mrb[12].mxu1  ;;  %15965 = vmatpush3.bf16.msk.msra.mxu0 %vm18587_vm10, %v15960_v43 }
 0x6fd   : > { %v7982_v25 = vrot.slane %v7169_v4, 4  ;;  %v15185_v16 = vpop.f32.mrb[13].mxu1  ;;  %15968 = vmatprep.subr.msk.bf16.mxu0 %vm18587_vm10, %v18812_v54 }
 0x6ff   : > { %v7983_v24 = vsel %vm6874_vm8, %v7981_v17, %v7982_v25  ;;  %15225 = vmatmul.mubr.msk.f32.vlgmr.msra.gmra.mrb[242].mxu0 %vm6939_vm13, %v18807_v9 }
 0x700   : > { %v15990_v34 = vpack.c.bf16 %v7982_v25, %v7983_v24  ;;  %v7174_v7 = vpop.f32.mrb[14].mxu1  ;;  %15971 = vmatpush3.bf16.msk.msra.mxu0 %vm18587_vm10, %v18812_v54  ;;  %15231 = vmatprep.mubr.msk.f32.mxu0 %vm6939_vm13, %v18777_v50 }
 0x701   : > { %v15188_v37 = vpop.f32.mrb[15].mxu1  ;;  %15974 = vmatprep.subr.msk.bf16.mxu0 %vm18587_vm10, %v18823_v6 }
 0x703   : > { %15232 = vmatmul.mubr.msk.f32.vlgmr.msra.gmra.mrb[244].mxu0 %vm6939_vm13, %v18807_v9 }
 0x704   : > { %v7179_v63 = vpop.f32.mrb[16].mxu1  ;;  %15977 = vmatpush3.bf16.msk.msra.mxu0 %vm18587_vm10, %v18823_v6  ;;  %15238 = vmatprep.mubr.msk.f32.mxu0 %vm6939_vm13, %v18777_v50  ;;  %v8600_v6 = vld [vmem:[%s19477_s18 + $0x8] sm:$0xf] }
 0x705   : > { %v16020_v54 = vpack.c.bf16 %v7179_v63, %v7174_v7  ;;  %v15191_v28 = vpop.f32.mrb[17].mxu1  ;;  %15980 = vmatprep.subr.msk.bf16.mxu0 %vm18587_vm10, %v15978_v14 }
 0x707   : > { %15239 = vmatmul.mubr.msk.f32.vlgmr.msra.gmra.mrb[246].mxu0 %vm6939_vm13, %v18807_v9 }
 0x708   : > { %15983 = vmatpush3.bf16.msk.msra.mxu0 %vm18587_vm10, %v15978_v14  ;;  %15245 = vmatprep.mubr.msk.f32.mxu0 %vm6939_vm13, %v18777_v50 }
 0x709   : > { %15986 = vmatprep.subr.msk.bf16.mxu0 %vm18587_vm10, %v15984_v42 }
 0x70b   : > { %15246 = vmatmul.mubr.msk.f32.vlgmr.msra.gmra.mrb[248].mxu0 %vm6939_vm13, %v18807_v9 }
 0x70c   : > { %15989 = vmatpush3.bf16.msk.msra.mxu0 %vm18587_vm10, %v15984_v42  ;;  %15252 = vmatprep.mubr.msk.f32.mxu0 %vm6939_vm13, %v18777_v50 }
 0x70d   : > { %15992 = vmatprep.subr.msk.bf16.mxu0 %vm18587_vm10, %v15990_v34 }
 0x70f   : > { %15253 = vmatmul.mubr.msk.f32.vlgmr.msra.gmra.mrb[250].mxu0 %vm6939_vm13, %v18807_v9 }
 0x710   : > { %15995 = vmatpush3.bf16.msk.msra.mxu0 %vm18587_vm10, %v15990_v34  ;;  %15259 = vmatprep.mubr.msk.f32.mxu0 %vm6939_vm13, %v18777_v50 }
 0x711   : > { %15998 = vmatprep.subr.msk.bf16.mxu0 %vm18587_vm10, %v18816_v20 }
 0x713   : > { %15260 = vmatmul.mubr.msk.f32.vlgmr.msra.gmra.mrb[252].mxu0 %vm6939_vm13, %v18807_v9 }
 0x714   : > { %16001 = vmatpush3.bf16.msk.msra.mxu0 %vm18587_vm10, %v18816_v20  ;;  %15266 = vmatprep.mubr.msk.f32.mxu0 %vm6939_vm13, %v18777_v50  ;;  %v8599_v20 = vld [vmem:[%s19477_s18] sm:$0xff] }
 0x715   : > { %16004 = vmatprep.subr.msk.bf16.mxu0 %vm18587_vm10, %v18830_v22 }
 0x717   : > { %15267 = vmatmul.mubr.msk.f32.vlgmr.msra.gmra.mrb[254].mxu0 %vm6939_vm13, %v18807_v9 }
 0x718   : > { %16007 = vmatpush3.bf16.msk.msra.mxu0 %vm18587_vm10, %v18830_v22  ;;  %15273 = vmatprep.mubr.msk.f32.mxu0 %vm6939_vm13, %v18777_v50  ;;  %v16027_v22 = vpack.c.bf16 %v8600_v6, %v8599_v20 }
 0x719   : > { %16010 = vmatprep.subr.msk.bf16.mxu0 %vm18587_vm10, %v18841_v8 }
 0x71b   : > { %15274 = vmatmul.mubr.msk.f32.vlgmr.msra.gmra.mrb[0].mxu0 %vm6939_vm13, %v18807_v9 }
 0x71c   : > { %16013 = vmatpush3.bf16.msk.msra.mxu0 %vm18587_vm10, %v18841_v8  ;;  %15280 = vmatprep.mubr.msk.f32.mxu0 %vm6939_vm13, %v18777_v50 }
 0x71d   : > { %16016 = vmatprep.subr.msk.bf16.mxu0 %vm18587_vm10, %v16014_v31 }
 0x71f   : > { %15281 = vmatmul.mubr.msk.f32.vlgmr.msra.gmra.mrb[2].mxu0 %vm6939_vm13, %v18807_v9 }
 0x720   : > { %16019 = vmatpush3.bf16.msk.msra.mxu0 %vm18587_vm10, %v16014_v31  ;;  %15287 = vmatprep.mubr.msk.f32.mxu0 %vm6939_vm13, %v18777_v50 }
 0x721   : > { %16022 = vmatprep.subr.msk.bf16.mxu0 %vm18587_vm10, %v16020_v54 }
 0x723   : > { %15288 = vmatmul.mubr.msk.f32.vlgmr.msra.gmra.mrb[4].mxu0 %vm6939_vm13, %v18807_v9 }
 0x724   : > { %16025 = vmatpush3.bf16.msk.msra.mxu0 %vm18587_vm10, %v16020_v54  ;;  %15294 = vmatprep.mubr.msk.f32.mxu0 %vm6939_vm13, %v18777_v50 }
 0x725   : > { %16026 = vmatprep.subr.bf16.mxu0 %v19515_v59 }
 0x727   : > { %15295 = vmatmul.mubr.msk.f32.vlgmr.msra.gmra.mrb[6].mxu0 %vm6939_vm13, %v18807_v9 }
 0x728   : > { %16029 = vmatpush3.bf16.msk.msra.mxu0 %vm18587_vm10, %v16027_v22  ;;  %15301 = vmatprep.mubr.msk.f32.mxu0 %vm16234_vm1, %v19519_v3 }
 0x729   : > { %16038 = vmatprep.subr.bf16.mxu0 %v19515_v59 }
 0x72b   : > { %15302 = vmatmul.mubr.msk.f32.vlgmr.msra.gmra.mrb[8].mxu0 %vm6939_vm13, %v18628_v32 }
 0x72c   : > { %15304 = vmatprep.mubr.msk.f32.mxu0 %vm16234_vm1, %v19519_v3 }
 0x72f   : > { %15305 = vmatmul.mubr.msk.f32.gmra.mrb[10].mxu0 %vm6939_vm13, %v18643_v5 }
 0x730   : > { %15307 = vmatprep.mubr.msk.f32.mxu0 %vm16234_vm1, %v19519_v3 }
 0x733   : > { %15308 = vmatmul.mubr.msk.f32.gmra.mrb[12].mxu0 %vm6939_vm13, %v18646_v19 }
 0x734   : > { %15310 = vmatprep.mubr.msk.f32.mxu0 %vm16234_vm1, %v19519_v3 }
 0x737   : > { %15311 = vmatmul.mubr.msk.f32.gmra.mrb[14].mxu0 %vm6939_vm13, %v18668_v41 }
 0x738   : > { %15313 = vmatprep.mubr.msk.f32.mxu0 %vm16234_vm1, %v19519_v3 }
 0x73b   : > { %15314 = vmatmul.mubr.msk.f32.gmra.mrb[16].mxu0 %vm6939_vm13, %v18671_v18 }
 0x73c   : > { %15316 = vmatprep.mubr.msk.f32.mxu0 %vm16234_vm1, %v19519_v3 }
 0x73f   : > { %15317 = vmatmul.mubr.msk.f32.gmra.mrb[18].mxu0 %vm6939_vm13, %v18676_v52 }
 0x740   : > { %15319 = vmatprep.mubr.msk.f32.mxu0 %vm16234_vm1, %v19519_v3 }
 0x743   : > { %15320 = vmatmul.mubr.msk.f32.gmra.mrb[20].mxu0 %vm6939_vm13, %v18679_v48 }
 0x744   : > { %15322 = vmatprep.mubr.msk.f32.mxu0 %vm16234_vm1, %v19519_v3 }
 0x747   : > { %15323 = vmatmul.mubr.msk.f32.gmra.mrb[22].mxu0 %vm6939_vm13, %v18694_v60 }
 0x748   : > { %15325 = vmatprep.mubr.msk.f32.mxu0 %vm16234_vm1, %v19519_v3 }
 0x74b   : > { %15326 = vmatmul.mubr.msk.f32.gmra.mrb[24].mxu0 %vm6939_vm13, %v18697_v57 }
 0x74c   : > { %15346 = vmatprep.mubr.msk.f32.mxu0 %vm16234_vm1, %v19519_v3 }
 0x789   : > { %v15198_v32 = vpop.f32.mrb[234].mxu0 }
 0x78a   : > { %v7258_v5 = vpop.f32.mrb[235].mxu0  ;;  %v7590_v19 = vmul.f32 %v15198_v32, %v15198_v32 }
 0x78b   : > { %v7589_v41 = vmul.f32 %v7258_v5, %v7258_v5 }
 0x79d   : > { %v15205_v18 = vpop.f32.mrb[236].mxu0 }
 0x79e   : > { %v7592_v52 = vmul.f32 %v15205_v18, %v15205_v18  ;;  %v7594_v48 = vmul.f32 %v15205_v18, %v15198_v32  ;;  %v7341_v50 = vpop.f32.mrb[237].mxu0 }
 0x79f   : > { %v7591_v9 = vmul.f32 %v7341_v50, %v7341_v50  ;;  %v7593_v14 = vmul.f32 %v7341_v50, %v7258_v5 }
 0x7a0   : > { %v7618_v60 = vadd.f32 %v7592_v52, %v7590_v19  ;;  %v7614_v57 = vmul.f32 2.0, %v7594_v48 }
 0x7a1   : > { %v7617_v29 = vadd.f32 %v7591_v9, %v7589_v41  ;;  %v7613_v27 = vmul.f32 2.0, %v7593_v14 }
 0x7a2   : > { %v7620_v58 = vadd.f32 0.0001, %v7618_v60  ;;  %v7616_v47 = vadd.f32 0.0001, %v7614_v57 }
 0x7a3   : > { %v7619_v8 = vadd.f32 0.0001, %v7617_v29  ;;  %v7615_v36 = vadd.f32 0.0001, %v7613_v27 }
 0x7a4   : > { %16177 = vrcp.f32 %v7620_v58 }
 0x7a5   : > { %16179 = vrcp.f32 %v7619_v8 }
 0x7ae   : > { %v16178_v45 = vpop.eup %16177  ;;  %v15212_v35 = vpop.f32.mrb[238].mxu0 }
 0x7af   : > { %v16180_v23 = vpop.eup %16179  ;;  %v7596_v2 = vsub.f32 %v15212_v35, %v7590_v19  ;;  %v7419_v38 = vpop.f32.mrb[239].mxu0  ;;  %v7624_v53 = vmul.f32 %v16178_v45, %v7616_v47 }
 0x7b0   : > { %v7595_v61 = vsub.f32 %v7419_v38, %v7589_v41  ;;  %v7622_v42 = vmul.f32 %v16180_v23, %v7615_v36 }
 0x7c1   : > { %v15219_v33 = vpop.f32.mrb[240].mxu0 }
 0x7c2   : > { %v7598_v0 = vsub.f32 %v15219_v33, %v7592_v52  ;;  %v7502_v1 = vpop.f32.mrb[241].mxu0 }
 0x7c3   : > { %v7597_v15 = vsub.f32 %v7502_v1, %v7591_v9 }
 0x7c4   : > { %v7606_v21 = vadd.f32 %v7598_v0, %v7596_v2 }
 0x7c5   : > { %v7605_v40 = vadd.f32 %v7597_v15, %v7595_v61 }
 0x7c6   : > { %v7608_v31 = vadd.f32 0.0009, %v7606_v21 }
 0x7c7   : > { %v7607_v39 = vadd.f32 0.0009, %v7605_v40 }
 0x7c8   : > { %16181 = vrcp.f32 %v7608_v31 }
 0x7c9   : > { %16183 = vrcp.f32 %v7607_v39 }
 0x7d2   : > { %v15226_v11 = vpop.f32.mrb[242].mxu0  ;;  %v16182_v34 = vpop.eup %16181 }
 0x7d3   : > { %v7600_v55 = vsub.f32 %v15226_v11, %v7594_v48  ;;  %v7580_v43 = vpop.f32.mrb[243].mxu0  ;;  %v16184_v37 = vpop.eup %16183 }
 0x7d4   : > { %v7599_v10 = vsub.f32 %v7580_v43, %v7593_v14 }
 0x7d5   : > { %v7602_v4 = vmul.f32 2.0, %v7600_v55 }
 0x7d6   : > { %v7601_v17 = vmul.f32 2.0, %v7599_v10  ;;  %v15233_v25 = vpop.f32.mrb[244].mxu0 }
 0x7d7   : > { %v7604_v16 = vadd.f32 0.0009, %v7602_v4  ;;  %v7733_v24 = vpop.f32.mrb[245].mxu0  ;;  %v8063_v54 = vmul.f32 %v15233_v25, %v15233_v25 }
 0x7d8   : > { %v7603_v7 = vadd.f32 0.0009, %v7601_v17  ;;  %v8062_v28 = vmul.f32 %v7733_v24, %v7733_v24 }
 0x7d9   : > { %v7612_v63 = vmul.f32 %v16182_v34, %v7604_v16 }
 0x7da   : > { %v15240_v20 = vpop.f32.mrb[246].mxu0  ;;  %v7610_v6 = vmul.f32 %v16184_v37, %v7603_v7 }
 0x7db   : > { %v8065_v22 = vmul.f32 %v15240_v20, %v15240_v20  ;;  %v8067_v32 = vmul.f32 %v15240_v20, %v15233_v25  ;;  %v7811_v5 = vpop.f32.mrb[247].mxu0  ;;  %v7648_v19 = vsel %vm7631_vm15, %v7612_v63, 0.0  ;;  %v7626_v41 = vmul.f32 %v7624_v53, %v7612_v63 }
 0x7dc   : > { %v8064_v18 = vmul.f32 %v7811_v5, %v7811_v5  ;;  %v8066_v52 = vmul.f32 %v7811_v5, %v7733_v24  ;;  %7649 = vadd.xlane.f32.xlu1 %v7648_v19  ;;  %v7645_v48 = vsel %vm7627_vm0, %v7610_v6, 0.0  ;;  %v7625_v50 = vmul.f32 %v7622_v42, %v7610_v6 }
 0x7dd   : > { %v8091_v9 = vadd.f32 %v8065_v22, %v8063_v54  ;;  %7646 = vadd.xlane.f32.xlu0 %v7645_v48  ;;  %v7632_v36 = vsel %vm7631_vm15, %v7626_v41, 0.0  ;;  %v8087_v53 = vmul.f32 2.0, %v8067_v32 }
 0x7de   : > { %v8090_v14 = vadd.f32 %v8064_v18, %v8062_v28  ;;  %v15247_v60 = vpop.f32.mrb[248].mxu0  ;;  %v7628_v29 = vsel %vm7627_vm0, %v7625_v50, 0.0  ;;  %v8086_v33 = vmul.f32 2.0, %v8066_v52 }
 0x7df   : > { %v8093_v58 = vadd.f32 0.0001, %v8091_v9  ;;  %v8069_v8 = vsub.f32 %v15247_v60, %v8063_v54  ;;  %v7893_v57 = vpop.f32.mrb[249].mxu0  ;;  %v8089_v31 = vadd.f32 0.0001, %v8087_v53 }
 0x7e0   : > { %v8092_v27 = vadd.f32 0.0001, %v8090_v14  ;;  %v8068_v47 = vsub.f32 %v7893_v57, %v8062_v28  ;;  %7629 = vadd.xlane.f32.xlu1 %v7628_v29  ;;  %v8088_v55 = vadd.f32 0.0001, %v8086_v33 }
 0x7e1   : > { %16185 = vrcp.f32 %v8093_v58  ;;  %7633 = vadd.xlane.f32.xlu0 %v7632_v36 }
 0x7e2   : > { %16187 = vrcp.f32 %v8092_v27  ;;  %v15254_v45 = vpop.f32.mrb[250].mxu0 }
 0x7e3   : > { %v8071_v35 = vsub.f32 %v15254_v45, %v8065_v22  ;;  %v7971_v23 = vpop.f32.mrb[251].mxu0 }
 0x7e4   : > { %v8070_v2 = vsub.f32 %v7971_v23, %v8064_v18 }
 0x7e5   : > { %v8079_v38 = vadd.f32 %v8071_v35, %v8069_v8 }
 0x7e6   : > { %v8078_v61 = vadd.f32 %v8070_v2, %v8068_v47  ;;  %v15261_v42 = vpop.f32.mrb[252].mxu0 }
 0x7e7   : > { %v8081_v0 = vadd.f32 0.0009, %v8079_v38  ;;  %v8073_v1 = vsub.f32 %v15261_v42, %v8067_v32  ;;  %v8053_v15 = vpop.f32.mrb[253].mxu0 }
 0x7e8   : > { %v8080_v21 = vadd.f32 0.0009, %v8078_v61  ;;  %v8072_v40 = vsub.f32 %v8053_v15, %v8066_v52 }
 0x7e9   : > { %16189 = vrcp.f32 %v8081_v0  ;;  %v8075_v25 = vmul.f32 2.0, %v8073_v1 }
 0x7ea   : > { %16191 = vrcp.f32 %v8080_v21  ;;  %v15268_v39 = vpop.f32.mrb[254].mxu0  ;;  %v8074_v24 = vmul.f32 2.0, %v8072_v40 }
 0x7eb   : > { %v16186_v11 = vpop.eup %16185  ;;  %v8198_v43 = vpop.f32.mrb[255].mxu0  ;;  %v8527_v34 = vmul.f32 %v15268_v39, %v15268_v39  ;;  %v8077_v22 = vadd.f32 0.0009, %v8075_v25 }
 0x7ec   : > { %v16188_v10 = vpop.eup %16187  ;;  %v8097_v4 = vmul.f32 %v16186_v11, %v8089_v31  ;;  %v8526_v54 = vmul.f32 %v8198_v43, %v8198_v43  ;;  %v8076_v41 = vadd.f32 0.0009, %v8074_v24 }
 0x7ed   : > { %v8095_v17 = vmul.f32 %v16188_v10, %v8088_v55 }
 0x7ee   : > { %v15275_v16 = vpop.f32.mrb[0].mxu0 }
 0x7ef   : > { %v8529_v7 = vmul.f32 %v15275_v16, %v15275_v16  ;;  %v8531_v37 = vmul.f32 %v15275_v16, %v15268_v39  ;;  %v8280_v63 = vpop.f32.mrb[1].mxu0 }
 0x7f0   : > { %v8528_v28 = vmul.f32 %v8280_v63, %v8280_v63  ;;  %v8530_v20 = vmul.f32 %v8280_v63, %v8198_v43 }
 0x7f1   : > { %v8555_v6 = vadd.f32 %v8529_v7, %v8527_v34  ;;  %v8551_v38 = vmul.f32 2.0, %v8531_v37 }
 0x7f2   : > { %v8554_v32 = vadd.f32 %v8528_v28, %v8526_v54  ;;  %v15282_v5 = vpop.f32.mrb[2].mxu0  ;;  %v8550_v42 = vmul.f32 2.0, %v8530_v20 }
 0x7f3   : > { %v16190_v19 = vpop.eup %16189  ;;  %v8557_v18 = vadd.f32 0.0001, %v8555_v6  ;;  %v8533_v52 = vsub.f32 %v15282_v5, %v8527_v34  ;;  %v8357_v48 = vpop.f32.mrb[3].mxu0  ;;  %v8553_v31 = vadd.f32 0.0001, %v8551_v38 }
 0x7f4   : > { %v16192_v50 = vpop.eup %16191  ;;  %v8556_v9 = vadd.f32 0.0001, %v8554_v32  ;;  %v8532_v14 = vsub.f32 %v8357_v48, %v8526_v54  ;;  %v8085_v60 = vmul.f32 %v16190_v19, %v8077_v22  ;;  %v8552_v55 = vadd.f32 0.0001, %v8550_v42  ;;  %v8598_v54 = vld [vmem:[%s19473_s14] sm:$0x3f] }
 0x7f5   : > { %16193 = vrcp.f32 %v8557_v18  ;;  %v8083_v29 = vmul.f32 %v16192_v50, %v8076_v41 }
 0x7f6   : > { %16195 = vrcp.f32 %v8556_v9  ;;  %v15289_v58 = vpop.f32.mrb[4].mxu0  ;;  %v8118_v8 = vsel %vm7631_vm15, %v8085_v60, 0.0  ;;  %v8099_v57 = vmul.f32 %v8097_v4, %v8085_v60 }
 0x7f7   : > { %v8535_v27 = vsub.f32 %v15289_v58, %v8529_v7  ;;  %8119 = vadd.xlane.f32.xlu1 %v8118_v8  ;;  %v8439_v47 = vpop.f32.mrb[5].mxu0  ;;  %v8115_v36 = vsel %vm7627_vm0, %v8083_v29, 0.0  ;;  %v8098_v45 = vmul.f32 %v8095_v17, %v8083_v29 }
 0x7f8   : > { %v8534_v35 = vsub.f32 %v8439_v47, %v8528_v28  ;;  %8116 = vadd.xlane.f32.xlu0 %v8115_v36  ;;  %v8103_v15 = vsel %vm7631_vm15, %v8099_v57, 0.0 }
 0x7f9   : > { %v8543_v23 = vadd.f32 %v8535_v27, %v8533_v52  ;;  %v8100_v2 = vsel %vm7627_vm0, %v8098_v45, 0.0 }
 0x7fa   : > { %v8542_v53 = vadd.f32 %v8534_v35, %v8532_v14  ;;  %v15296_v61 = vpop.f32.mrb[6].mxu0 }
 0x7fb   : > { %v8545_v33 = vadd.f32 0.0009, %v8543_v23  ;;  %v8537_v0 = vsub.f32 %v15296_v61, %v8531_v37  ;;  %8101 = vadd.xlane.f32.xlu1 %v8100_v2  ;;  %v8517_v1 = vpop.f32.mrb[7].mxu0 }
 0x7fc   : > { %v8544_v21 = vadd.f32 0.0009, %v8542_v53  ;;  %v8536_v40 = vsub.f32 %v8517_v1, %v8530_v20  ;;  %8104 = vadd.xlane.f32.xlu0 %v8103_v15 }
 0x7fd   : > { %16197 = vrcp.f32 %v8545_v33  ;;  %v8539_v25 = vmul.f32 2.0, %v8537_v0 }
 0x7fe   : > { %16199 = vrcp.f32 %v8544_v21  ;;  %v8670_v39 = vpop.f32.mrb[8].mxu0  ;;  %v8538_v24 = vmul.f32 2.0, %v8536_v40 }
 0x7ff   : > { %v16194_v11 = vpop.eup %16193  ;;  %v15303_v43 = vpop.f32.mrb[9].mxu0  ;;  %v8541_v37 = vadd.f32 0.0009, %v8539_v25 }
 0x800   : > { %v16196_v10 = vpop.eup %16195  ;;  %v8561_v4 = vmul.f32 %v16194_v11, %v8553_v31  ;;  %v8540_v20 = vadd.f32 0.0009, %v8538_v24 }
 0x801   : > { %v8559_v17 = vmul.f32 %v16196_v10, %v8552_v55 }
 0x802   : > { %v8675_v16 = vpop.f32.mrb[10].mxu0 }
 0x803   : > { %v16031_v34 = vpack.c.bf16 %v8675_v16, %v8670_v39  ;;  %v15306_v7 = vpop.f32.mrb[11].mxu0  ;;  %v8869_v6 = vrot.slane %v8675_v16, 4 }
 0x805   : > { %16033 = vmatpush3.bf16.msk.msra.mxu1 %vm18587_vm10, %v16031_v34 }
 0x806   : > { %v8680_v63 = vpop.f32.mrb[12].mxu0  ;;  %16034 = vmatprep.subr.bf16.mxu1 %v19515_v59 }
 0x807   : > { %v16198_v28 = vpop.eup %16197  ;;  %v8870_v22 = vrot.slane %v8680_v63, 4  ;;  %v15309_v32 = vpop.f32.mrb[13].mxu0 }
 0x808   : > { %v16200_v5 = vpop.eup %16199  ;;  %v8549_v19 = vmul.f32 %v16198_v28, %v8541_v37  ;;  %15333 = vmatmul.mubr.msk.f32.vlgmr.msra.gmra.mrb[18].mxu1 %vm6939_vm13, %v8598_v54 }
 0x809   : > { %v8871_v41 = vsel %vm6874_vm8, %v8869_v6, %v8870_v22  ;;  %v8547_v18 = vmul.f32 %v16200_v5, %v8540_v20  ;;  %15339 = vmatprep.mubr.msk.f32.mxu1 %vm16234_vm1, %v19519_v3 }
 0x80a   : > { %v16039_v52 = vpack.c.bf16 %v8870_v22, %v8871_v41  ;;  %v8685_v48 = vpop.f32.mrb[14].mxu0  ;;  %v8582_v50 = vsel %vm7631_vm15, %v8549_v19, 0.0  ;;  %v8563_v9 = vmul.f32 %v8561_v4, %v8549_v19 }
 0x80b   : > { %v15312_v14 = vpop.f32.mrb[15].mxu0  ;;  %8583 = vadd.xlane.f32.xlu0 %v8582_v50  ;;  %v8579_v60 = vsel %vm7627_vm0, %v8547_v18, 0.0  ;;  %v8562_v29 = vmul.f32 %v8559_v17, %v8547_v18 }
 0x80c   : > { %16041 = vmatpush3.bf16.msk.msra.mxu0 %vm18587_vm10, %v16039_v52  ;;  %8580 = vadd.xlane.f32.xlu1 %v8579_v60  ;;  %v8567_v47 = vsel %vm7631_vm15, %v8563_v9, 0.0 }
 0x80d   : > { %v8564_v58 = vsel %vm7627_vm0, %v8562_v29, 0.0  ;;  %16046 = vmatprep.subr.bf16.mxu0 %v19515_v59 }
 0x80e   : > { %v8690_v8 = vpop.f32.mrb[16].mxu0 }
 0x80f   : > { %v16047_v57 = vpack.c.bf16 %v8690_v8, %v8685_v48  ;;  %v15315_v27 = vpop.f32.mrb[17].mxu0  ;;  %8565 = vadd.xlane.f32.xlu0 %v8564_v58  ;;  %15347 = vmatmul.mubr.msk.f32.vlgmr.msra.gmra.mrb[26].mxu0 %vm6939_vm13, %v8598_v54  ;;  %v8792_v45 = vrot.slane %v8690_v8, 4 }
 0x810   : > { %8568 = vadd.xlane.f32.xlu1 %v8567_v47  ;;  %15360 = vmatprep.mubr.msk.f32.mxu0 %vm16234_vm1, %v19519_v3 }
 0x811   : > { %16049 = vmatpush3.bf16.msk.msra.mxu0 %vm18587_vm10, %v16047_v57 }
 0x812   : > { %v8695_v36 = vpop.f32.mrb[18].mxu0 }
 0x813   : > { %v8793_v35 = vrot.slane %v8695_v36, 4  ;;  %v15318_v23 = vpop.f32.mrb[19].mxu0 }
 0x814   : > { %15361 = vmatmul.mubr.msk.f32.vlgmr.msra.gmra.mrb[28].mxu0 %vm6939_vm13, %v8598_v54 }
 0x815   : > { %v8794_v2 = vsel %vm6874_vm8, %v8792_v45, %v8793_v35 }
 0x816   : > { %v16035_v38 = vpack.c.bf16 %v8793_v35, %v8794_v2  ;;  %v8700_v53 = vpop.f32.mrb[20].mxu0 }
 0x817   : > { %v15321_v61 = vpop.f32.mrb[21].mxu0 }
 0x818   : > { %16037 = vmatpush3.bf16.msk.msra.mxu1 %vm18587_vm10, %v16035_v38 }
 0x819   : > { %16042 = vmatprep.subr.bf16.mxu1 %v19515_v59 }
 0x81a   : > { %v8705_v42 = vpop.f32.mrb[22].mxu0 }
 0x81b   : > { %v16043_v33 = vpack.c.bf16 %v8705_v42, %v8700_v53  ;;  %v15324_v0 = vpop.f32.mrb[23].mxu0  ;;  %15340 = vmatmul.mubr.msk.f32.vlgmr.msra.gmra.mrb[20].mxu1 %vm6939_vm13, %v8598_v54  ;;  %v9091_v15 = vrot.slane %v8705_v42, 4 }
 0x81c   : > { %15353 = vmatprep.mubr.msk.f32.mxu1 %vm16234_vm1, %v19519_v3 }
 0x81d   : > { %16045 = vmatpush3.bf16.msk.msra.mxu1 %vm18587_vm10, %v16043_v33 }
 0x81e   : > { %v8710_v1 = vpop.f32.mrb[24].mxu0  ;;  %16050 = vmatprep.subr.bf16.mxu1 %v19515_v59  ;;  %v9184_v59 = vld [vmem:[%s19469_s10] sm:$0x3f] }
 0x81f   : > { %v9092_v21 = vrot.slane %v8710_v1, 4  ;;  %v15327_v40 = vpop.f32.mrb[25].mxu0  ;;  %15370 = vmatprep.subr.msk.mxu0 %vm2205_vm5, %v9184_v59 }
 0x820   : > { %15354 = vmatmul.mubr.msk.f32.vlgmr.msra.gmra.mrb[22].mxu1 %vm6939_vm13, %v8598_v54  ;;  %15371 = vmatpush3.msk.msra.mxu0 %vm2205_vm5, %v9184_v59 }
 0x821   : > { %v9093_v31 = vsel %vm6874_vm8, %v9091_v15, %v9092_v21  ;;  %15367 = vmatprep.mubr.msk.f32.mxu1 %vm16234_vm1, %v19519_v3  ;;  %15420 = vmatprep.subr.mxu0 %v19519_v3  ;;  %v19106_v15 = vld [vmem:[%s19548_s1] sm:$0xf]  ;;  %s16238_s1 = smov 2  }
 0x822   : > { %v16051_v39 = vpack.c.bf16 %v9092_v21, %v9093_v31 }
 0x824   : > { %16053 = vmatpush3.bf16.msk.msra.mxu1 %vm18587_vm10, %v16051_v39  ;;  %vm11239_vm10 = vcmask 23552  }
 0x825   : > { %15390 = vmatprep.subr.mxu1 %v19519_v3 }
 0x827   : > { %15368 = vmatmul.mubr.msk.f32.vlgmr.msra.gmra.mrb[24].mxu1 %vm6939_vm13, %v8598_v54 }
 0x828   : > { %15392 = vmatprep.mubr.msk.f32.mxu1 %vm16234_vm1, %v19519_v3 }
 0x8db   : > { %v8786_v11 = vpop.f32.mrb[18].mxu1 }
 0x8dc   : > { %v15334_v56 = vpop.f32.mrb[19].mxu1 }
 0x8e2   : > { %v8941_v55 = vpop.f32.mrb[26].mxu0 }
 0x8e3   : > { %v9168_v43 = vrot.slane %v8941_v55, 2  ;;  %v15348_v10 = vpop.f32.mrb[27].mxu0 }
 0x8e5   : > { %v19056_v4 = vsel %vm2205_vm5, %v8786_v11, %v9168_v43 }
 0x8e6   : > { %15372 = vmatprep.mubr.msk.f32.mxu0 %vm9225_vm2, %v19056_v4  ;;  %v9185_v9 = vmul.f32 %v19056_v4, %v19056_v4 }
 0x8e7   : > { %v9086_v17 = vpop.f32.mrb[28].mxu0 }
 0x8e8   : > { %v9171_v25 = vrot.slane %v9086_v17, 4  ;;  %v15362_v16 = vpop.f32.mrb[29].mxu0  ;;  %v9206_v36 = vrot.slane %v9185_v9, 4 }
 0x8ea   : > { %v19061_v24 = vsel %vm6874_vm8, %v9168_v43, %v9171_v25  ;;  %v9187_v37 = vmul.f32 %v9171_v25, %v9171_v25 }
 0x8eb   : > { %15373 = vmatmul.mubr.msk.f32.vlgmr.msra.gmra.mrb[30].mxu0 %vm9225_vm2, %v19061_v24  ;;  %v9186_v63 = vmul.f32 %v19061_v24, %v19061_v24 }
 0x8ec   : > { %v9209_v6 = vrot.slane %v9187_v37, 4 }
 0x8ed   : > { %v9207_v32 = vrot.slane %v9186_v63, 4 }
 0x8ee   : > { %v8864_v34 = vpop.f32.mrb[20].mxu1 }
 0x8ef   : > { %v15341_v7 = vpop.f32.mrb[21].mxu1  ;;  %v9210_v41 = vsel %vm6874_vm8, %v9207_v32, %v9209_v6  ;;  %v9208_v42 = vsel %vm6874_vm8, %v9206_v36, %v9207_v32 }
 0x8f3   : > { %v9014_v54 = vpop.f32.mrb[22].mxu1 }
 0x8f4   : > { %v9176_v28 = vrot.slane %v9014_v54, 2  ;;  %v15355_v20 = vpop.f32.mrb[23].mxu1 }
 0x8f6   : > { %v9181_v22 = vsel %vm2205_vm5, %v8864_v34, %v9176_v28 }
 0x8f7   : > { %v9188_v5 = vmul.f32 %v9181_v22, %v9181_v22  ;;  %v9196_v19 = vrot.slane %v9181_v22, 6  ;;  %v9191_v33 = vmul.f32 %v9181_v22, %v19056_v4 }
 0x8f9   : > { %v9216_v18 = vrot.slane %v9188_v5, 2  ;;  %v19070_v52 = vsel %vm7635_vm3, %v9171_v25, %v9196_v19 }
 0x8fa   : > { %v9163_v48 = vpop.f32.mrb[24].mxu1  ;;  %15375 = vmatprep.mubr.msk.f32.mxu0 %vm9225_vm2, %v19070_v52 }
 0x8fb   : > { %v9179_v50 = vrot.slane %v9163_v48, 4  ;;  %v9224_v14 = vsel %vm2205_vm5, %v9210_v41, %v9216_v18  ;;  %v15369_v60 = vpop.f32.mrb[25].mxu1 }
 0x8fd   : > { %v9182_v29 = vsel %vm6874_vm8, %v9176_v28, %v9179_v50  ;;  %v9193_v58 = vmul.f32 %v9179_v50, %v9171_v25  ;;  %v9199_v8 = vrot.slane %v9179_v50, 6  ;;  %v9190_v57 = vmul.f32 %v9179_v50, %v9179_v50 }
 0x8fe   : > { %v9189_v27 = vmul.f32 %v9182_v29, %v9182_v29  ;;  %v9197_v47 = vrot.slane %v9182_v29, 6  ;;  %v9192_v0 = vmul.f32 %v9182_v29, %v19061_v24 }
 0x8ff   : > { %v9219_v45 = vrot.slane %v9190_v57, 2 }
 0x900   : > { %v9217_v35 = vrot.slane %v9189_v27, 2  ;;  %v19079_v23 = vsel %vm7635_vm3, %v9196_v19, %v9197_v47  ;;  %v19082_v2 = vsel %vm7635_vm3, %v9197_v47, %v9199_v8 }
 0x901   : > { %15376 = vmatmul.mubr.msk.f32.gmra.mrb[32].mxu0 %vm9225_vm2, %v19079_v23  ;;  %v9223_v38 = vsel %vm6874_vm8, %v19082_v2, %v9206_v36  ;;  %v10637_v36 = vld [vmem:[%s19478_s19] sm:$0x3f] }
 0x902   : > { %15378 = vmatprep.mubr.msk.f32.mxu0 %vm9225_vm2, %v9223_v38  ;;  %v9218_v53 = vsel %vm2205_vm5, %v9216_v18, %v9217_v35  ;;  %v9220_v61 = vsel %vm2205_vm5, %v9217_v35, %v9219_v45 }
 0x905   : > { %15379 = vmatmul.mubr.msk.f32.gmra.mrb[34].mxu0 %vm9225_vm2, %v9208_v42 }
 0x906   : > { %15381 = vmatprep.mubr.msk.f32.mxu0 %vm9225_vm2, %v9224_v14 }
 0x909   : > { %15382 = vmatmul.mubr.msk.f32.gmra.mrb[36].mxu0 %vm9225_vm2, %v9218_v53 }
 0x90a   : > { %15384 = vmatprep.mubr.msk.f32.mxu0 %vm9225_vm2, %v9220_v61 }
 0x90d   : > { %15385 = vmatmul.mubr.msk.f32.gmra.mrb[38].mxu0 %vm9225_vm2, %v9191_v33 }
 0x90e   : > { %15387 = vmatprep.mubr.msk.f32.mxu0 %vm9225_vm2, %v9192_v0 }
 0x911   : > { %15388 = vmatmul.mubr.msk.f32.gmra.mrb[40].mxu0 %vm9225_vm2, %v9193_v58 }
 0x912   : > { %15422 = vmatprep.mubr.msk.f32.mxu0 %vm16234_vm1, %v19519_v3 }
 0x9be   : > { %v15374_v1 = vpop.f32.mrb[30].mxu0 }
 0x9bf   : > { %v9807_v21 = vrot.slane %v15374_v1, 6  ;;  %v9327_v40 = vpop.f32.mrb[31].mxu0  ;;  %v10220_v56 = vrot.slane %v15374_v1, 4 }
 0x9c0   : > { %v9806_v31 = vrot.slane %v9327_v40, 6  ;;  %15391 = vmatpush3.msk.msra.mxu1 %vm2205_vm5, %v9327_v40 }
 0x9c1   : > { %15393 = vmatmul.mubr.msk.f32.vlgmr.msra.gmra.mrb[26].mxu1 %vm9225_vm2, %v19106_v15  ;;  %15395 = vmatprep.subr.mxu1 %v19519_v3 }
 0x9c2   : > { %15397 = vmatprep.mubr.msk.f32.mxu1 %vm16234_vm1, %v19519_v3  ;;  %v9808_v39 = vsel %vm7635_vm3, %v9806_v31, %v9807_v21 }
 0x9d4   : > { %v15377_v59 = vpop.f32.mrb[32].mxu0 }
 0x9d5   : > { %v9337_v11 = vpop.f32.mrb[33].mxu0  ;;  %15421 = vmatpush3.msk.msra.mxu0 %vm2205_vm5, %v15377_v59  ;;  %v10295_v34 = vrot.slane %v15377_v59, 6 }
 0x9d6   : > { %v9463_v55 = vrot.slane %v9337_v11, 2  ;;  %v10221_v43 = vrot.slane %v9337_v11, 4  ;;  %15423 = vmatmul.mubr.msk.f32.vlgmr.msra.gmra.mrb[42].mxu0 %vm9225_vm2, %v19106_v15  ;;  %15430 = vmatprep.subr.mxu0 %v19519_v3 }
 0x9d7   : > { %15432 = vmatprep.mubr.msk.f32.mxu0 %vm16234_vm1, %v19519_v3 }
 0x9d8   : > { %v15380_v10 = vpop.f32.mrb[34].mxu0  ;;  %15396 = vmatpush3.msk.msra.mxu1 %vm2205_vm5, %v9463_v55  ;;  %v10222_v17 = vsel %vm6874_vm8, %v10220_v56, %v10221_v43 }
 0x9d9   : > { %v9539_v25 = vrot.slane %v15380_v10, 4  ;;  %v9347_v16 = vpop.f32.mrb[35].mxu0  ;;  %15398 = vmatmul.mubr.msk.f32.vlgmr.msra.gmra.mrb[28].mxu1 %vm9225_vm2, %v19106_v15  ;;  %15400 = vmatprep.subr.mxu1 %v19519_v3  ;;  %v9954_v27 = vrot.slane %v15380_v10, 2 }
 0x9da   : > { %v9538_v7 = vrot.slane %v9347_v16, 4  ;;  %v10296_v37 = vrot.slane %v9347_v16, 6  ;;  %15402 = vmatprep.mubr.msk.f32.mxu1 %vm16234_vm1, %v19519_v3 }
 0x9dc   : > { %v15383_v63 = vpop.f32.mrb[36].mxu0  ;;  %v9540_v54 = vsel %vm6874_vm8, %v9538_v7, %v9539_v25  ;;  %v10297_v28 = vsel %vm7635_vm3, %v10295_v34, %v10296_v37 }
 0x9dd   : > { %v9616_v20 = vrot.slane %v15383_v63, 6  ;;  %v9357_v6 = vpop.f32.mrb[37].mxu0  ;;  %15401 = vmatpush3.msk.msra.mxu1 %vm2205_vm5, %v9540_v54  ;;  %v10028_v41 = vrot.slane %v15383_v63, 4 }
 0x9de   : > { %v9615_v22 = vrot.slane %v9357_v6, 6  ;;  %15403 = vmatmul.mubr.msk.f32.vlgmr.msra.gmra.mrb[30].mxu1 %vm9225_vm2, %v19106_v15  ;;  %15405 = vmatprep.subr.mxu1 %v19519_v3 }
 0x9df   : > { %15407 = vmatprep.mubr.msk.f32.mxu1 %vm16234_vm1, %v19519_v3 }
 0x9e0   : > { %v9617_v32 = vsel %vm7635_vm3, %v9615_v22, %v9616_v20  ;;  %v15386_v5 = vpop.f32.mrb[38].mxu0 }
 0x9e1   : > { %15406 = vmatpush3.msk.msra.mxu1 %vm2205_vm5, %v9617_v32  ;;  %v9367_v19 = vpop.f32.mrb[39].mxu0  ;;  %v10104_v60 = vrot.slane %v15386_v5, 6 }
 0x9e2   : > { %15408 = vmatmul.mubr.msk.f32.vlgmr.msra.gmra.mrb[32].mxu1 %vm9225_vm2, %v19106_v15  ;;  %15410 = vmatprep.subr.mxu1 %v19519_v3  ;;  %v10029_v18 = vrot.slane %v9367_v19, 4  ;;  %v10442_v47 = vrot.slane %v9367_v19, 2 }
 0x9e3   : > { %15411 = vmatpush3.msk.msra.mxu1 %vm2205_vm5, %v15386_v5  ;;  %15412 = vmatprep.mubr.msk.f32.mxu1 %vm16234_vm1, %v19519_v3 }
 0x9e4   : > { %15415 = vmatprep.subr.mxu1 %v19519_v3  ;;  %v15389_v48 = vpop.f32.mrb[40].mxu0  ;;  %v10030_v50 = vsel %vm6874_vm8, %v10028_v41, %v10029_v18 }
 0x9e5   : > { %v10517_v9 = vrot.slane %v15389_v48, 4  ;;  %v9377_v14 = vpop.f32.mrb[41].mxu0  ;;  %15431 = vmatpush3.msk.msra.mxu0 %vm2205_vm5, %v10030_v50 }
 0x9e6   : > { %15413 = vmatmul.mubr.msk.f32.vlgmr.msra.gmra.mrb[34].mxu1 %vm9225_vm2, %v19106_v15  ;;  %v10105_v29 = vrot.slane %v9377_v14, 6  ;;  %v10516_v58 = vrot.slane %v9377_v14, 4  ;;  %15433 = vmatmul.mubr.msk.f32.vlgmr.msra.gmra.mrb[44].mxu0 %vm9225_vm2, %v19106_v15 }
 0x9e7   : > { %15416 = vmatpush3.msk.msra.mxu1 %vm2205_vm5, %v9808_v39  ;;  %15417 = vmatprep.mubr.msk.f32.mxu1 %vm16234_vm1, %v19519_v3 }
 0x9e8   : > { %15425 = vmatprep.subr.mxu1 %v19519_v3  ;;  %v10106_v8 = vsel %vm7635_vm3, %v10104_v60, %v10105_v29  ;;  %15440 = vmatprep.subr.mxu0 %v19519_v3  ;;  %v10518_v57 = vsel %vm6874_vm8, %v10516_v58, %v10517_v9 }
 0x9e9   : > { %15441 = vmatpush3.msk.msra.mxu0 %vm2205_vm5, %v10222_v17  ;;  %15442 = vmatprep.mubr.msk.f32.mxu0 %vm16234_vm1, %v19519_v3 }
 0x9ea   : > { %15418 = vmatmul.mubr.msk.f32.vlgmr.msra.gmra.mrb[36].mxu1 %vm9225_vm2, %v19106_v15  ;;  %15443 = vmatmul.mubr.msk.f32.vlgmr.msra.gmra.mrb[46].mxu0 %vm9225_vm2, %v19106_v15 }
 0x9eb   : > { %15426 = vmatpush3.msk.msra.mxu1 %vm2205_vm5, %v9954_v27  ;;  %15427 = vmatprep.mubr.msk.f32.mxu1 %vm16234_vm1, %v19519_v3 }
 0x9ec   : > { %15435 = vmatprep.subr.mxu1 %v19519_v3  ;;  %15450 = vmatprep.subr.mxu0 %v19519_v3 }
 0x9ed   : > { %15451 = vmatpush3.msk.msra.mxu0 %vm2205_vm5, %v9357_v6  ;;  %15452 = vmatprep.mubr.msk.f32.mxu0 %vm16234_vm1, %v19519_v3 }
 0x9ee   : > { %15428 = vmatmul.mubr.msk.f32.vlgmr.msra.gmra.mrb[38].mxu1 %vm9225_vm2, %v19106_v15  ;;  %15453 = vmatmul.mubr.msk.f32.vlgmr.msra.gmra.mrb[48].mxu0 %vm9225_vm2, %v19106_v15 }
 0x9ef   : > { %15436 = vmatpush3.msk.msra.mxu1 %vm2205_vm5, %v10106_v8  ;;  %15437 = vmatprep.mubr.msk.f32.mxu1 %vm16234_vm1, %v19519_v3 }
 0x9f0   : > { %15445 = vmatprep.subr.mxu1 %v19519_v3  ;;  %15460 = vmatprep.subr.mxu0 %v19519_v3 }
 0x9f1   : > { %15461 = vmatpush3.msk.msra.mxu0 %vm2205_vm5, %v10518_v57  ;;  %15462 = vmatprep.mubr.msk.f32.mxu0 %vm16234_vm1, %v19519_v3 }
 0x9f2   : > { %15438 = vmatmul.mubr.msk.f32.vlgmr.msra.gmra.mrb[40].mxu1 %vm9225_vm2, %v19106_v15  ;;  %15463 = vmatmul.mubr.msk.f32.vlgmr.msra.gmra.mrb[50].mxu0 %vm9225_vm2, %v19106_v15 }
 0x9f3   : > { %15446 = vmatpush3.msk.msra.mxu1 %vm2205_vm5, %v10297_v28  ;;  %15447 = vmatprep.mubr.msk.f32.mxu1 %vm16234_vm1, %v19519_v3 }
 0x9f4   : > { %15455 = vmatprep.subr.mxu1 %v19519_v3  ;;  %15482 = vmatprep.subr.mxu0 %v19519_v3 }
 0x9f5   : > { %15484 = vmatprep.mubr.msk.f32.mxu0 %vm16234_vm1, %v19519_v3 }
 0x9f6   : > { %15448 = vmatmul.mubr.msk.f32.vlgmr.msra.gmra.mrb[42].mxu1 %vm9225_vm2, %v19106_v15 }
 0x9f7   : > { %15456 = vmatpush3.msk.msra.mxu1 %vm2205_vm5, %v10442_v47  ;;  %15457 = vmatprep.mubr.msk.f32.mxu1 %vm16234_vm1, %v19519_v3 }
 0x9f8   : > { %15465 = vmatprep.subr.mxu1 %v19519_v3 }
 0x9fa   : > { %15458 = vmatmul.mubr.msk.f32.vlgmr.msra.gmra.mrb[44].mxu1 %vm9225_vm2, %v19106_v15 }
 0x9fb   : > { %15466 = vmatpush3.msk.msra.mxu1 %vm2205_vm5, %v10637_v36  ;;  %15467 = vmatprep.mubr.msk.f32.mxu1 %vm16234_vm1, %v19519_v3 }
 0x9fc   : > { %15507 = vmatprep.subr.mxu1 %v19519_v3 }
 0x9fe   : > { %15468 = vmatmul.mubr.msk.f32.vlgmr.msra.gmra.mrb[46].mxu1 %vm9225_vm2, %v19056_v4 }
 0x9ff   : > { %15470 = vmatprep.mubr.msk.f32.mxu1 %vm16234_vm1, %v19519_v3 }
 0xa02   : > { %15471 = vmatmul.mubr.msk.f32.gmra.mrb[48].mxu1 %vm9225_vm2, %v19061_v24 }
 0xa03   : > { %15473 = vmatprep.mubr.msk.f32.mxu1 %vm16234_vm1, %v19519_v3 }
 0xa06   : > { %15474 = vmatmul.mubr.msk.f32.gmra.mrb[50].mxu1 %vm9225_vm2, %v19070_v52 }
 0xa07   : > { %15476 = vmatprep.mubr.msk.f32.mxu1 %vm16234_vm1, %v19519_v3 }
 0xa0a   : > { %15477 = vmatmul.mubr.msk.f32.gmra.mrb[52].mxu1 %vm9225_vm2, %v19079_v23 }
 0xa0b   : > { %15479 = vmatprep.mubr.msk.f32.mxu1 %vm16234_vm1, %v19519_v3 }
 0xa0e   : > { %15480 = vmatmul.mubr.msk.f32.gmra.mrb[54].mxu1 %vm9225_vm2, %v19082_v2 }
 0xa0f   : > { %15509 = vmatprep.mubr.msk.f32.mxu1 %vm16234_vm1, %v19519_v3 }
 0xa94   : > { %v9458_v4 = vpop.f32.mrb[26].mxu1 }
 0xa95   : > { %v15394_v24 = vpop.f32.mrb[27].mxu1  ;;  %v9763_v38 = vmul.f32 %v9458_v4, %v9458_v4 }
 0xaa9   : > { %v9950_v45 = vpop.f32.mrb[42].mxu0 }
 0xaaa   : > { %v15424_v35 = vpop.f32.mrb[43].mxu0  ;;  %v10180_v39 = vmul.f32 %v9950_v45, %v9950_v45 }
 0xaac   : > { %v9532_v52 = vpop.f32.mrb[28].mxu1 }
 0xaad   : > { %v9764_v53 = vmul.f32 %v9532_v52, %v9532_v52  ;;  %v9765_v61 = vmul.f32 %v9532_v52, %v9458_v4  ;;  %v15399_v42 = vpop.f32.mrb[29].mxu1 }
 0xaaf   : > { %v9777_v33 = vadd.f32 %v9764_v53, %v9763_v38  ;;  %v9775_v59 = vmul.f32 2.0, %v9765_v61 }
 0xab1   : > { %v9778_v23 = vadd.f32 0.0001, %v9777_v33  ;;  %v9609_v0 = vpop.f32.mrb[30].mxu1  ;;  %v9776_v34 = vadd.f32 0.0001, %v9775_v59 }
 0xab2   : > { %v9766_v1 = vsub.f32 %v9609_v0, %v9763_v38  ;;  %v15404_v15 = vpop.f32.mrb[31].mxu1 }
 0xab3   : > { %16201 = vrcp.f32 %v9778_v23 }
 0xab5   : > { %v9686_v21 = vpop.f32.mrb[32].mxu1 }
 0xab6   : > { %v9767_v2 = vsub.f32 %v9686_v21, %v9764_v53  ;;  %v15409_v40 = vpop.f32.mrb[33].mxu1 }
 0xab8   : > { %v9771_v31 = vadd.f32 %v9767_v2, %v9766_v1 }
 0xab9   : > { %v9759_v11 = vpop.f32.mrb[34].mxu1  ;;  %v10099_v56 = vpop.f32.mrb[44].mxu0 }
 0xaba   : > { %v9772_v55 = vadd.f32 0.0009, %v9771_v31  ;;  %v9768_v43 = vsub.f32 %v9759_v11, %v9765_v61  ;;  %v15414_v10 = vpop.f32.mrb[35].mxu1  ;;  %v10183_v17 = vsub.f32 %v10099_v56, %v10180_v39  ;;  %v15434_v25 = vpop.f32.mrb[45].mxu0  ;;  %v19236_v56 = vld [vmem:[%s19474_s15] sm:$0x7] }
 0xabc   : > { %16203 = vrcp.f32 %v9772_v55  ;;  %v9769_v5 = vmul.f32 2.0, %v9768_v43 }
 0xabd   : > { %v16202_v16 = vpop.eup %16201  ;;  %v9877_v7 = vpop.f32.mrb[36].mxu1 }
 0xabe   : > { %v10291_v37 = vpop.f32.mrb[46].mxu0  ;;  %v10179_v63 = vmul.f32 %v9877_v7, %v9877_v7  ;;  %v15419_v54 = vpop.f32.mrb[37].mxu1  ;;  %v10181_v28 = vmul.f32 %v9950_v45, %v9877_v7  ;;  %v9780_v6 = vmul.f32 %v16202_v16, %v9776_v34  ;;  %v9770_v29 = vadd.f32 0.0009, %v9769_v5 }
 0xabf   : > { %v15444_v20 = vpop.f32.mrb[47].mxu0  ;;  %v10591_v32 = vmul.f32 %v10291_v37, %v10291_v37 }
 0xac0   : > { %v10193_v22 = vadd.f32 %v10180_v39, %v10179_v63  ;;  %v10191_v45 = vmul.f32 2.0, %v10181_v28 }
 0xac1   : > { %v10023_v19 = vpop.f32.mrb[38].mxu1  ;;  %v10438_v41 = vpop.f32.mrb[48].mxu0 }
 0xac2   : > { %v10194_v18 = vadd.f32 0.0001, %v10193_v22  ;;  %v10182_v48 = vsub.f32 %v10023_v19, %v10179_v63  ;;  %v15429_v50 = vpop.f32.mrb[39].mxu1  ;;  %v10594_v9 = vsub.f32 %v10438_v41, %v10591_v32  ;;  %v15454_v14 = vpop.f32.mrb[49].mxu0  ;;  %v10192_v1 = vadd.f32 0.0001, %v10191_v45 }
 0xac4   : > { %16205 = vrcp.f32 %v10194_v18  ;;  %v10187_v60 = vadd.f32 %v10183_v17, %v10182_v48 }
 0xac5   : > { %v10175_v58 = vpop.f32.mrb[40].mxu1  ;;  %v10587_v8 = vpop.f32.mrb[50].mxu0 }
 0xac6   : > { %v16204_v57 = vpop.eup %16203  ;;  %v10188_v27 = vadd.f32 0.0009, %v10187_v60  ;;  %v10184_v47 = vsub.f32 %v10175_v58, %v10181_v28  ;;  %v15439_v36 = vpop.f32.mrb[41].mxu1 }
 0xac7   : > { %v15464_v4 = vpop.f32.mrb[51].mxu0  ;;  %v9774_v24 = vmul.f32 %v16204_v57, %v9770_v29 }
 0xac8   : > { %16207 = vrcp.f32 %v10188_v27  ;;  %v10185_v15 = vmul.f32 2.0, %v10184_v47 }
 0xac9   : > { %v10366_v35 = vpop.f32.mrb[42].mxu1  ;;  %v9794_v52 = vsel %vm9782_vm4, %v9774_v24, 0.0  ;;  %v9781_v38 = vmul.f32 %v9780_v6, %v9774_v24 }
 0xaca   : > { %v10592_v53 = vmul.f32 %v10366_v35, %v10366_v35  ;;  %v10593_v61 = vmul.f32 %v10366_v35, %v10291_v37  ;;  %v15449_v42 = vpop.f32.mrb[43].mxu1  ;;  %9795 = vadd.xlane.f32.xlu1 %v9794_v52  ;;  %v10186_v55 = vadd.f32 0.0009, %v10185_v15 }
 0xacb   : > { %v9783_v33 = vsel %vm9782_vm4, %v9781_v38, 0.0 }
 0xacc   : > { %v10605_v23 = vadd.f32 %v10592_v53, %v10591_v32  ;;  %v10596_v0 = vsub.f32 %v10587_v8, %v10593_v61  ;;  %9784 = vadd.xlane.f32.xlu0 %v9783_v33  ;;  %v10603_v34 = vmul.f32 2.0, %v10593_v61 }
 0xacd   : > { %v10511_v21 = vpop.f32.mrb[44].mxu1 }
 0xace   : > { %v16206_v2 = vpop.eup %16205  ;;  %v10606_v40 = vadd.f32 0.0001, %v10605_v23  ;;  %v10595_v31 = vsub.f32 %v10511_v21, %v10592_v53  ;;  %v15459_v39 = vpop.f32.mrb[45].mxu1  ;;  %v10604_v32 = vadd.f32 0.0001, %v10603_v34  ;;  %v10597_v5 = vmul.f32 2.0, %v10596_v0 }
 0xacf   : > { %v10196_v59 = vmul.f32 %v16206_v2, %v10192_v1  ;;  %v11201_v53 = vld [vmem:[%s19470_s11] sm:$0x7] }
 0xad0   : > { %16209 = vrcp.f32 %v10606_v40  ;;  %v10599_v11 = vadd.f32 %v10595_v31, %v10594_v9  ;;  %v10598_v29 = vadd.f32 0.0009, %v10597_v5 }
 0xad1   : > { %v10709_v43 = vpop.f32.mrb[46].mxu1 }
 0xad2   : > { %v16208_v10 = vpop.eup %16207  ;;  %v10600_v17 = vadd.f32 0.0009, %v10599_v11  ;;  %v15469_v25 = vpop.f32.mrb[47].mxu1  ;;  %15483 = vmatpush3.msk.msra.mxu0 %vm2205_vm5, %v10709_v43  ;;  %v10884_v54 = vrot.slane %v10709_v43, 6 }
 0xad3   : > { %15485 = vmatmul.mubr.msk.f32.vlgmr.msra.gmra.mrb[52].mxu0 %vm9225_vm2, %v19236_v56  ;;  %15487 = vmatprep.subr.mxu0 %v19519_v3  ;;  %v10190_v16 = vmul.f32 %v16208_v10, %v10186_v55 }
 0xad4   : > { %16211 = vrcp.f32 %v10600_v17  ;;  %15489 = vmatprep.mubr.msk.f32.mxu0 %vm16234_vm1, %v19519_v3 }
 0xad5   : > { %v10714_v7 = vpop.f32.mrb[48].mxu1  ;;  %v10209_v37 = vsel %vm9782_vm4, %v10190_v16, 0.0  ;;  %v10197_v63 = vmul.f32 %v10196_v59, %v10190_v16 }
 0xad6   : > { %v10885_v28 = vrot.slane %v10714_v7, 6  ;;  %v15472_v20 = vpop.f32.mrb[49].mxu1  ;;  %10210 = vadd.xlane.f32.xlu1 %v10209_v37  ;;  %v11032_v18 = vrot.slane %v10714_v7, 4 }
 0xad7   : > { %v10198_v6 = vsel %vm9782_vm4, %v10197_v63, 0.0 }
 0xad8   : > { %v10886_v22 = vsel %vm7635_vm3, %v10884_v54, %v10885_v28  ;;  %10199 = vadd.xlane.f32.xlu0 %v10198_v6 }
 0xad9   : > { %v10719_v19 = vpop.f32.mrb[50].mxu1 }
 0xada   : > { %v16210_v41 = vpop.eup %16209  ;;  %v10810_v48 = vrot.slane %v10719_v19, 2  ;;  %v11033_v50 = vrot.slane %v10719_v19, 4  ;;  %v15475_v9 = vpop.f32.mrb[51].mxu1 }
 0xadb   : > { %v10608_v14 = vmul.f32 %v16210_v41, %v10604_v32 }
 0xadc   : > { %15488 = vmatpush3.msk.msra.mxu0 %vm2205_vm5, %v10810_v48  ;;  %v11034_v60 = vsel %vm6874_vm8, %v11032_v18, %v11033_v50 }
 0xadd   : > { %v10724_v58 = vpop.f32.mrb[52].mxu1  ;;  %15490 = vmatmul.mubr.msk.f32.vlgmr.msra.gmra.mrb[54].mxu0 %vm9225_vm2, %v19236_v56  ;;  %15492 = vmatprep.subr.mxu0 %v19519_v3 }
 0xade   : > { %v16212_v8 = vpop.eup %16211  ;;  %v15478_v57 = vpop.f32.mrb[53].mxu1  ;;  %15493 = vmatpush3.msk.msra.mxu0 %vm2205_vm5, %v10886_v22  ;;  %15494 = vmatprep.mubr.msk.f32.mxu0 %vm16234_vm1, %v19519_v3  ;;  %v11108_v24 = vrot.slane %v10724_v58, 6 }
 0xadf   : > { %15497 = vmatprep.subr.mxu0 %v19519_v3  ;;  %v10602_v27 = vmul.f32 %v16212_v8, %v10598_v29  ;;  %v19307_v57 = vld [vmem:[%s19465_s6] sm:$0x1] }
 0xae1   : > { %v10729_v47 = vpop.f32.mrb[54].mxu1  ;;  %15495 = vmatmul.mubr.msk.f32.vlgmr.msra.gmra.mrb[56].mxu0 %vm9225_vm2, %v19236_v56  ;;  %v10621_v36 = vsel %vm9782_vm4, %v10602_v27, 0.0  ;;  %v10609_v4 = vmul.f32 %v10608_v14, %v10602_v27 }
 0xae2   : > { %v11109_v45 = vrot.slane %v10729_v47, 6  ;;  %15498 = vmatpush3.msk.msra.mxu0 %vm2205_vm5, %v10724_v58  ;;  %10622 = vadd.xlane.f32.xlu1 %v10621_v36  ;;  %v15481_v35 = vpop.f32.mrb[55].mxu1 }
 0xae3   : > { %15499 = vmatprep.mubr.msk.f32.mxu0 %vm16234_vm1, %v19519_v3  ;;  %15502 = vmatprep.subr.mxu0 %v19519_v3  ;;  %v10610_v52 = vsel %vm9782_vm4, %v10609_v4, 0.0 }
 0xae4   : > { %v11110_v38 = vsel %vm7635_vm3, %v11108_v24, %v11109_v45  ;;  %10611 = vadd.xlane.f32.xlu0 %v10610_v52 }
 0xae5   : > { %15500 = vmatmul.mubr.msk.f32.vlgmr.msra.gmra.mrb[58].mxu0 %vm9225_vm2, %v19236_v56  ;;  %15508 = vmatpush3.msk.msra.mxu1 %vm2205_vm5, %v11110_v38 }
 0xae6   : > { %15503 = vmatpush3.msk.msra.mxu0 %vm2205_vm5, %v11034_v60  ;;  %15510 = vmatmul.mubr.msk.f32.vlgmr.msra.gmra.mrb[56].mxu1 %vm9225_vm2, %v19236_v56 }
 0xae7   : > { %15504 = vmatprep.mubr.msk.f32.mxu0 %vm16234_vm1, %v19519_v3  ;;  %15523 = vmatprep.subr.mxu1 %v19519_v3 }
 0xae8   : > { %15525 = vmatprep.mubr.msk.f32.mxu1 %vm16234_vm1, %v19519_v3  ;;  %15512 = vmatprep.subr.msk.mxu0 %vm11189_vm9, %v11201_v53 }
 0xae9   : > { %15505 = vmatmul.mubr.msk.f32.vlgmr.msra.gmra.mrb[60].mxu0 %vm9225_vm2, %v19236_v56 }
 0xaea   : > { %15513 = vmatpush3.msk.msra.mxu0 %vm11189_vm9, %v11201_v53 }
 0xaeb   : > { %15538 = vmatprep.subr.mxu0 %v19519_v3 }
 0xba6   : > { %v10805_v61 = vpop.f32.mrb[52].mxu0 }
 0xba7   : > { %v15486_v42 = vpop.f32.mrb[53].mxu0 }
 0xbb0   : > { %v10879_v33 = vpop.f32.mrb[54].mxu0 }
 0xbb1   : > { %v15491_v23 = vpop.f32.mrb[55].mxu0 }
 0xbb4   : > { %v10955_v0 = vpop.f32.mrb[56].mxu0 }
 0xbb5   : > { %v11184_v1 = vrot.slane %v10955_v0, 5  ;;  %v15496_v15 = vpop.f32.mrb[57].mxu0 }
 0xbb7   : > { %v11190_v21 = vsel %vm11189_vm9, %v10805_v61, %v11184_v1 }
 0xbb8   : > { %v11028_v2 = vpop.f32.mrb[58].mxu0 }
 0xbb9   : > { %v11193_v40 = vrot.slane %v11028_v2, 5  ;;  %v11179_v31 = vpop.f32.mrb[56].mxu1  ;;  %v15501_v39 = vpop.f32.mrb[59].mxu0 }
 0xbba   : > { %v11196_v59 = vrot.slane %v11179_v31, 2  ;;  %v15511_v11 = vpop.f32.mrb[57].mxu1 }
 0xbbb   : > { %v11198_v56 = vsel %vm11189_vm9, %v10879_v33, %v11193_v40 }
 0xbbc   : > { %v11205_v55 = vmul.f32 %v11196_v59, %v11196_v59  ;;  %v11211_v43 = vrot.slane %v11196_v59, 7  ;;  %v11103_v10 = vpop.f32.mrb[60].mxu0  ;;  %v11199_v17 = vsel %vm2205_vm5, %v11198_v56, %v11196_v59 }
 0xbbd   : > { %v11187_v25 = vrot.slane %v11103_v10, 2  ;;  %v11204_v16 = vmul.f32 %v11199_v17, %v11199_v17  ;;  %v11210_v34 = vrot.slane %v11199_v17, 7  ;;  %v15506_v7 = vpop.f32.mrb[61].mxu0 }
 0xbbe   : > { %v11225_v37 = vrot.slane %v11205_v55, 5 }
 0xbbf   : > { %v11203_v63 = vmul.f32 %v11187_v25, %v11187_v25  ;;  %v11207_v54 = vmul.f32 %v11196_v59, %v11187_v25  ;;  %v11191_v28 = vsel %vm2205_vm5, %v11190_v21, %v11187_v25  ;;  %v11224_v20 = vrot.slane %v11204_v16, 5 }
 0xbc0   : > { %v11202_v6 = vmul.f32 %v11191_v28, %v11191_v28  ;;  %v11206_v22 = vmul.f32 %v11199_v17, %v11191_v28  ;;  %15514 = vmatprep.mubr.msk.f32.mxu0 %vm11239_vm10, %v11191_v28  ;;  %v11235_v32 = vsel %vm11209_vm14, %v11187_v25, %v11210_v34  ;;  %v11212_v5 = vsel %vm11209_vm14, %v11210_v34, %v11211_v43 }
 0xbc1   : > { %v11218_v19 = vrot.slane %v11203_v63, 6  ;;  %v11232_v41 = vrot.slane %v11207_v54, 4  ;;  %15515 = vmatmul.mubr.msk.f32.vlgmr.msra.gmra.mrb[62].mxu0 %vm11239_vm10, %v11235_v32  ;;  %v11226_v18 = vsel %vm11189_vm9, %v11224_v20, %v11225_v37 }
 0xbc2   : > { %v11217_v48 = vrot.slane %v11202_v6, 6  ;;  %v11231_v50 = vrot.slane %v11206_v22, 4 }
 0xbc4   : > { %v11236_v9 = vsel %vm7635_vm3, %v11212_v5, %v11217_v48  ;;  %v11219_v14 = vsel %vm7635_vm3, %v11217_v48, %v11218_v19  ;;  %v11238_v60 = vsel %vm6874_vm8, %v11226_v18, %v11231_v50  ;;  %v11233_v29 = vsel %vm6874_vm8, %v11231_v50, %v11232_v41 }
 0xbc5   : > { %15517 = vmatprep.mubr.msk.f32.mxu0 %vm11239_vm10, %v11236_v9  ;;  %v11237_v58 = vsel %vm11189_vm9, %v11219_v14, %v11224_v20 }
 0xbc6   : > { %15518 = vmatmul.mubr.msk.f32.gmra.mrb[64].mxu0 %vm11239_vm10, %v11237_v58 }
 0xbc7   : > { %15520 = vmatprep.mubr.msk.f32.mxu0 %vm11239_vm10, %v11238_v60 }
 0xbca   : > { %15521 = vmatmul.mubr.msk.f32.gmra.mrb[66].mxu0 %vm11239_vm10, %v11233_v29 }
 0xbcb   : > { %15540 = vmatprep.mubr.msk.f32.mxu0 %vm16234_vm1, %v19519_v3 }
 0xc94   : > { %v15516_v8 = vpop.f32.mrb[62].mxu0 }
 0xc95   : > { %v11432_v27 = vrot.slane %v15516_v8, 1  ;;  %v12144_v47 = vrot.slane %v15516_v8, 6  ;;  %v11326_v36 = vpop.f32.mrb[63].mxu0  ;;  %v12218_v38 = vrot.slane %v15516_v8, 7  ;;  %v11823_v11 = vrot.slane %v15516_v8, 4 }
 0xc96   : > { %v12143_v4 = vrot.slane %v11326_v36, 6  ;;  %15524 = vmatpush3.msk.msra.mxu1 %vm11189_vm9, %v11326_v36  ;;  %v11750_v42 = vrot.slane %v11326_v36, 3 }
 0xc97   : > { %15526 = vmatmul.mubr.msk.f32.vlgmr.msra.gmra.mrb[58].mxu1 %vm11239_vm10, %v19307_v57  ;;  %15528 = vmatprep.subr.mxu1 %v19519_v3 }
 0xc98   : > { %15529 = vmatpush3.msk.msra.mxu1 %vm11189_vm9, %v11432_v27  ;;  %15530 = vmatprep.mubr.msk.f32.mxu1 %vm16234_vm1, %v19519_v3  ;;  %v12145_v24 = vsel %vm7635_vm3, %v12143_v4, %v12144_v47 }
 0xc99   : > { %v15519_v45 = vpop.f32.mrb[64].mxu0  ;;  %15533 = vmatprep.subr.mxu1 %v19519_v3 }
 0xc9a   : > { %v11580_v35 = vrot.slane %v15519_v45, 3  ;;  %v11336_v52 = vpop.f32.mrb[65].mxu0  ;;  %v11969_v15 = vrot.slane %v15519_v45, 6 }
 0xc9b   : > { %v11506_v53 = vrot.slane %v11336_v52, 2  ;;  %v12219_v61 = vrot.slane %v11336_v52, 7  ;;  %15531 = vmatmul.mubr.msk.f32.vlgmr.msra.gmra.mrb[60].mxu1 %vm11239_vm10, %v19307_v57  ;;  %v11896_v31 = vrot.slane %v11336_v52, 5 }
 0xc9c   : > { %15535 = vmatprep.mubr.msk.f32.mxu1 %vm16234_vm1, %v19519_v3  ;;  %15539 = vmatpush3.msk.msra.mxu0 %vm11189_vm9, %v11580_v35 }
 0xc9d   : > { %v15522_v33 = vpop.f32.mrb[66].mxu0  ;;  %15534 = vmatpush3.msk.msra.mxu1 %vm11189_vm9, %v11506_v53  ;;  %15541 = vmatmul.mubr.msk.f32.vlgmr.msra.gmra.mrb[68].mxu0 %vm11239_vm10, %v19307_v57  ;;  %v12220_v23 = vsel %vm11209_vm14, %v12218_v38, %v12219_v61 }
 0xc9e   : > { %v12046_v0 = vrot.slane %v15522_v33, 7  ;;  %v11346_v1 = vpop.f32.mrb[67].mxu0  ;;  %15543 = vmatprep.subr.mxu1 %v19519_v3  ;;  %15548 = vmatprep.subr.mxu0 %v19519_v3  ;;  %v12438_v55 = vrot.slane %v15522_v33, 2 }
 0xc9f   : > { %v11654_v21 = vrot.slane %v11346_v1, 4  ;;  %v11970_v2 = vrot.slane %v11346_v1, 6  ;;  %v12045_v40 = vrot.slane %v11346_v1, 7  ;;  %15536 = vmatmul.mubr.msk.f32.vlgmr.msra.gmra.mrb[62].mxu1 %vm11239_vm10, %v19307_v57  ;;  %15549 = vmatpush3.msk.msra.mxu0 %vm11189_vm9, %v11750_v42  ;;  %v12365_v56 = vrot.slane %v11346_v1, 1 }
 0xca0   : > { %15545 = vmatprep.mubr.msk.f32.mxu1 %vm16234_vm1, %v19519_v3  ;;  %15550 = vmatprep.mubr.msk.f32.mxu0 %vm16234_vm1, %v19519_v3 }
 0xca1   : > { %15544 = vmatpush3.msk.msra.mxu1 %vm11189_vm9, %v11654_v21  ;;  %15551 = vmatmul.mubr.msk.f32.vlgmr.msra.gmra.mrb[70].mxu0 %vm11239_vm10, %v19307_v57  ;;  %v11971_v39 = vsel %vm7635_vm3, %v11969_v15, %v11970_v2  ;;  %v12047_v59 = vsel %vm11209_vm14, %v12045_v40, %v12046_v0 }
 0xca2   : > { %15553 = vmatprep.subr.mxu1 %v19519_v3  ;;  %15558 = vmatprep.subr.mxu0 %v19519_v3 }
 0xca3   : > { %15546 = vmatmul.mubr.msk.f32.vlgmr.msra.gmra.mrb[64].mxu1 %vm11239_vm10, %v19307_v57  ;;  %15559 = vmatpush3.msk.msra.mxu0 %vm11189_vm9, %v11896_v31 }
 0xca4   : > { %15554 = vmatpush3.msk.msra.mxu1 %vm11189_vm9, %v11823_v11  ;;  %15555 = vmatprep.mubr.msk.f32.mxu1 %vm16234_vm1, %v19519_v3 }
 0xca5   : > { %15560 = vmatprep.mubr.msk.f32.mxu0 %vm16234_vm1, %v19519_v3  ;;  %15563 = vmatprep.subr.mxu1 %v19519_v3 }
 0xca6   : > { %15561 = vmatmul.mubr.msk.f32.vlgmr.msra.gmra.mrb[72].mxu0 %vm11239_vm10, %v19307_v57  ;;  %15568 = vmatprep.subr.mxu0 %v19519_v3 }
 0xca7   : > { %15556 = vmatmul.mubr.msk.f32.vlgmr.msra.gmra.mrb[66].mxu1 %vm11239_vm10, %v19307_v57  ;;  %15569 = vmatpush3.msk.msra.mxu0 %vm11189_vm9, %v12047_v59 }
 0xca8   : > { %15564 = vmatpush3.msk.msra.mxu1 %vm11189_vm9, %v11971_v39  ;;  %15565 = vmatprep.mubr.msk.f32.mxu1 %vm16234_vm1, %v19519_v3 }
 0xca9   : > { %15570 = vmatprep.mubr.msk.f32.mxu0 %vm16234_vm1, %v19519_v3  ;;  %15573 = vmatprep.subr.mxu1 %v19519_v3 }
 0xcaa   : > { %15571 = vmatmul.mubr.msk.f32.vlgmr.msra.gmra.mrb[74].mxu0 %vm11239_vm10, %v19307_v57  ;;  %15578 = vmatprep.subr.mxu0 %v19519_v3 }
 0xcab   : > { %15566 = vmatmul.mubr.msk.f32.vlgmr.msra.gmra.mrb[68].mxu1 %vm11239_vm10, %v19307_v57  ;;  %15579 = vmatpush3.msk.msra.mxu0 %vm11189_vm9, %v12220_v23 }
 0xcac   : > { %15574 = vmatpush3.msk.msra.mxu1 %vm11189_vm9, %v12145_v24  ;;  %15575 = vmatprep.mubr.msk.f32.mxu1 %vm16234_vm1, %v19519_v3 }
 0xcad   : > { %15580 = vmatprep.mubr.msk.f32.mxu0 %vm16234_vm1, %v19519_v3  ;;  %15583 = vmatprep.subr.mxu1 %v19519_v3 }
 0xcae   : > { %15581 = vmatmul.mubr.msk.f32.vlgmr.msra.gmra.mrb[76].mxu0 %vm11239_vm10, %v19307_v57  ;;  %15588 = vmatprep.subr.mxu0 %v19519_v3 }
 0xcaf   : > { %15576 = vmatmul.mubr.msk.f32.vlgmr.msra.gmra.mrb[70].mxu1 %vm11239_vm10, %v19307_v57  ;;  %15589 = vmatpush3.msk.msra.mxu0 %vm11189_vm9, %v12365_v56 }
 0xcb0   : > { %15584 = vmatpush3.msk.msra.mxu1 %vm11189_vm9, %v15519_v45  ;;  %15585 = vmatprep.mubr.msk.f32.mxu1 %vm16234_vm1, %v19519_v3 }
 0xcb1   : > { %15590 = vmatprep.mubr.msk.f32.mxu0 %vm16234_vm1, %v19519_v3  ;;  %15593 = vmatprep.subr.mxu1 %v19519_v3 }
 0xcb2   : > { %15591 = vmatmul.mubr.msk.f32.vlgmr.msra.gmra.mrb[78].mxu0 %vm11239_vm10, %v19307_v57 }
 0xcb3   : > { %15586 = vmatmul.mubr.msk.f32.vlgmr.msra.gmra.mrb[72].mxu1 %vm11239_vm10, %v19307_v57 }
 0xcb4   : > { %15594 = vmatpush3.msk.msra.mxu1 %vm11189_vm9, %v12438_v55  ;;  %15595 = vmatprep.mubr.msk.f32.mxu1 %vm16234_vm1, %v19519_v3  ;;  %vm12570_vm1 = vcmask 20480  }
 0xcb7   : > { %15596 = vmatmul.mubr.msk.f32.vlgmr.msra.gmra.mrb[74].mxu1 %vm11239_vm10, %v19307_v57 }
 0xd6a   : > { %v11427_v43 = vpop.f32.mrb[58].mxu1 }
 0xd6b   : > { %v15527_v10 = vpop.f32.mrb[59].mxu1  ;;  %v11727_v25 = vmul.f32 %v11427_v43, %v11427_v43 }
 0xd6e   : > { %v11501_v17 = vpop.f32.mrb[60].mxu1 }
 0xd6f   : > { %v11728_v16 = vmul.f32 %v11501_v17, %v11501_v17  ;;  %v11729_v34 = vmul.f32 %v11501_v17, %v11427_v43  ;;  %v15532_v7 = vpop.f32.mrb[61].mxu1 }
 0xd70   : > { %v11649_v37 = vpop.f32.mrb[68].mxu0 }
 0xd71   : > { %v11741_v63 = vadd.f32 %v11728_v16, %v11727_v25  ;;  %v11731_v54 = vsub.f32 %v11649_v37, %v11728_v16  ;;  %v15542_v28 = vpop.f32.mrb[69].mxu0  ;;  %v11739_v60 = vmul.f32 2.0, %v11729_v34 }
 0xd72   : > { %v11575_v20 = vpop.f32.mrb[62].mxu1 }
 0xd73   : > { %v11742_v6 = vadd.f32 0.0001, %v11741_v63  ;;  %v11730_v22 = vsub.f32 %v11575_v20, %v11727_v25  ;;  %v15537_v32 = vpop.f32.mrb[63].mxu1  ;;  %v11740_v24 = vadd.f32 0.0001, %v11739_v60 }
 0xd74   : > { %v11819_v5 = vpop.f32.mrb[70].mxu0 }
 0xd75   : > { %16213 = vrcp.f32 %v11742_v6  ;;  %v11735_v3 = vadd.f32 %v11731_v54, %v11730_v22  ;;  %v15552_v19 = vpop.f32.mrb[71].mxu0  ;;  %v12120_v18 = vmul.f32 %v11819_v5, %v11819_v5 }
 0xd76   : > { %v11723_v41 = vpop.f32.mrb[64].mxu1 }
 0xd77   : > { %v11736_v48 = vadd.f32 0.0009, %v11735_v3  ;;  %v11732_v50 = vsub.f32 %v11723_v41, %v11729_v34  ;;  %v15547_v9 = vpop.f32.mrb[65].mxu1 }
 0xd79   : > { %16215 = vrcp.f32 %v11736_v48  ;;  %v11965_v14 = vpop.f32.mrb[72].mxu0  ;;  %v11733_v45 = vmul.f32 2.0, %v11732_v50 }
 0xd7a   : > { %v11892_v29 = vpop.f32.mrb[66].mxu1  ;;  %v12123_v58 = vsub.f32 %v11965_v14, %v12120_v18  ;;  %v15562_v8 = vpop.f32.mrb[73].mxu0 }
 0xd7b   : > { %v12121_v57 = vmul.f32 %v11892_v29, %v11892_v29  ;;  %v12122_v27 = vmul.f32 %v11892_v29, %v11819_v5  ;;  %v15557_v47 = vpop.f32.mrb[67].mxu1  ;;  %v11734_v15 = vadd.f32 0.0009, %v11733_v45 }
 0xd7d   : > { %v12134_v36 = vadd.f32 %v12121_v57, %v12120_v18  ;;  %v12116_v4 = vpop.f32.mrb[74].mxu0  ;;  %v12132_v25 = vmul.f32 2.0, %v12122_v27 }
 0xd7e   : > { %v12040_v35 = vpop.f32.mrb[68].mxu1  ;;  %v12125_v52 = vsub.f32 %v12116_v4, %v12122_v27  ;;  %v15572_v38 = vpop.f32.mrb[75].mxu0 }
 0xd7f   : > { %v16214_v53 = vpop.eup %16213  ;;  %v12135_v61 = vadd.f32 0.0001, %v12134_v36  ;;  %v12124_v42 = vsub.f32 %v12040_v35, %v12121_v57  ;;  %v15567_v33 = vpop.f32.mrb[69].mxu1  ;;  %v12133_v20 = vadd.f32 0.0001, %v12132_v25 }
 0xd80   : > { %v11744_v23 = vmul.f32 %v16214_v53, %v11740_v24  ;;  %v12126_v6 = vmul.f32 2.0, %v12125_v52  ;;  %v6216_v4 = vpop.xlane.xlu0 %6215  ;;  %v7650_v35 = vpop.xlane.xlu1 %7649 }
 0xd81   : > { %16217 = vrcp.f32 %v12135_v61  ;;  %v12128_v0 = vadd.f32 %v12124_v42, %v12123_v58  ;;  %v12289_v1 = vpop.f32.mrb[76].mxu0 }
 0xd82   : > { %v12214_v21 = vpop.f32.mrb[70].mxu1  ;;  %v12512_v2 = vmul.f32 %v12289_v1, %v12289_v1  ;;  %v15582_v40 = vpop.f32.mrb[77].mxu0  ;;  %v12127_v18 = vadd.f32 0.0009, %v12126_v6 }
 0xd83   : > { %v16216_v31 = vpop.eup %16215  ;;  %v12129_v39 = vadd.f32 0.0009, %v12128_v0  ;;  %v12511_v59 = vmul.f32 %v12214_v21, %v12214_v21  ;;  %v12513_v11 = vmul.f32 %v12289_v1, %v12214_v21  ;;  %v15577_v56 = vpop.f32.mrb[71].mxu1  ;;  %v5729_v40 = vsel %vm2205_vm5, %v18789_v62, 0.0 }
 0xd84   : > { %v19397_v55 = vmul.f32 %v16216_v31, %v11734_v15  ;;  %v6222_v24 = vpop.xlane.xlu0 %6221  ;;  %v7630_v38 = vpop.xlane.xlu1 %7629  ;;  %v6223_v31 = vadd.f32 %v18791_v30, %v6216_v4  ;;  %v5728_v56 = vadd.f32 %v18787_v46, %v18781_v51 }
 0xd85   : > { %16219 = vrcp.f32 %v12129_v39  ;;  %v12525_v43 = vadd.f32 %v12512_v2, %v12511_v59  ;;  %v12434_v10 = vpop.f32.mrb[78].mxu0  ;;  %v12523_v48 = vmul.f32 2.0, %v12513_v11 }
 0xd86   : > { %v19400_v17 = vmul.f32 %v11744_v23, %v19397_v55  ;;  %v12361_v16 = vpop.f32.mrb[72].mxu1  ;;  %v12515_v34 = vsub.f32 %v12434_v10, %v12512_v2  ;;  %v15592_v7 = vpop.f32.mrb[79].mxu0  ;;  %v5234_v2 = vsel %vm2205_vm5, %v18783_v12, 0.0 }
 0xd87   : > { %v12526_v37 = vadd.f32 0.0001, %v12525_v43  ;;  %v12514_v63 = vsub.f32 %v12361_v16, %v12511_v59  ;;  %v15587_v54 = vpop.f32.mrb[73].mxu1  ;;  %v12524_v14 = vadd.f32 0.0001, %v12523_v48  ;;  %v6224_v43 = vsel %vm2205_vm5, %v6222_v24, 0.0 }
 0xd88   : > { %v7647_v45 = vpop.xlane.xlu0 %7646  ;;  %v8120_v61 = vpop.xlane.xlu1 %8119  ;;  %v5730_v16 = vadd.f32 %v5729_v40, %v5728_v56 }
 0xd89   : > { %16221 = vrcp.f32 %v12526_v37  ;;  %v12519_v28 = vadd.f32 %v12515_v34, %v12514_v63  ;;  %v6225_v34 = vadd.f32 %v6224_v43, %v6223_v31  ;;  %v8121_v63 = vsel %vm7635_vm3, %v8120_v61, 0.0 }
 0xd8a   : > { %v12507_v22 = vpop.f32.mrb[74].mxu1 }
 0xd8b   : > { %v16218_v32 = vpop.eup %16217  ;;  %v12520_v5 = vadd.f32 0.0009, %v12519_v28  ;;  %v12516_v3 = vsub.f32 %v12507_v22, %v12513_v11  ;;  %v15597_v19 = vpop.f32.mrb[75].mxu1  ;;  %v5233_v11 = vadd.f32 %v18772_v49, %v18770_v26  ;;  %v5731_v28 = vrot.slane %v5730_v16, 4 }
 0xd8c   : > { %v12137_v41 = vmul.f32 %v16218_v32, %v12133_v20  ;;  %v7634_v52 = vpop.xlane.xlu0 %7633  ;;  %v8102_v33 = vpop.xlane.xlu1 %8101  ;;  %v7651_v20 = vsel %vm7635_vm3, %v7650_v35, 0.0  ;;  %v6226_v22 = vrot.slane %v6225_v34, 4 }
 0xd8d   : > { %16223 = vrcp.f32 %v12520_v5  ;;  %v12517_v60 = vmul.f32 2.0, %v12516_v3  ;;  %v5235_v12 = vadd.f32 %v5234_v2, %v5233_v11  ;;  %v7636_v62 = vsel %vm7635_vm3, %v7634_v52, 0.0 }
 0xd8e   : > { %v7637_v49 = vadd.f32 %v7636_v62, %v7630_v38 }
 0xd8f   : > { %v16220_v50 = vpop.eup %16219  ;;  %v12518_v57 = vadd.f32 0.0009, %v12517_v60  ;;  %v5236_v54 = vrot.slane %v5235_v12, 4 }
 0xd90   : > { %v12131_v9 = vmul.f32 %v16220_v50, %v12127_v18  ;;  %v8117_v53 = vpop.xlane.xlu0 %8116  ;;  %v8581_v0 = vpop.xlane.xlu1 %8580  ;;  %v7652_v50 = vadd.f32 %v7651_v20, %v7647_v45 }
 0xd91   : > { %v8122_v32 = vadd.f32 %v8121_v63, %v8117_v53 }
 0xd92   : > { %12545 = vrot.lane.b32.xlu1 %v12131_v9, %s16237_s23  ;;  %v12138_v29 = vmul.f32 %v12137_v41, %v12131_v9  ;;  %v7638_v9 = vrot.slane %v7637_v49, 4  ;;  %v7653_v53 = vrot.slane %v7652_v50, 4 }
 0xd93   : > { %v16222_v58 = vpop.eup %16221 }
 0xd94   : > { %12535 = vrot.lane.b32.xlu0 %v12138_v29, %s16237_s23  ;;  %v12528_v8 = vmul.f32 %v16222_v58, %v12524_v14  ;;  %v8105_v42 = vpop.xlane.xlu0 %8104  ;;  %v8569_v15 = vpop.xlane.xlu1 %8568  ;;  %v5237_v29 = vadd.f32 %v5236_v54, %v5235_v12  ;;  %v5732_v58 = vadd.f32 %v5731_v28, %v5730_v16  ;;  %v7639_v45 = vadd.f32 %v7638_v9, %v7637_v49 }
 0xd95   : > { %v8106_v10 = vsel %vm7635_vm3, %v8105_v42, 0.0  ;;  %v8570_v25 = vsel %vm7635_vm3, %v8569_v15, 0.0 }
 0xd96   : > { %v8107_v30 = vadd.f32 %v8106_v10, %v8102_v33  ;;  %v5733_v33 = vrot.slane %v5732_v58, 2  ;;  %v7640_v56 = vrot.slane %v7639_v45, 2 }
 0xd97   : > { %v16224_v27 = vpop.eup %16223 }
 0xd98   : > { %v12522_v47 = vmul.f32 %v16224_v27, %v12518_v57  ;;  %v8584_v23 = vpop.xlane.xlu0 %8583  ;;  %v9796_v39 = vpop.xlane.xlu1 %9795  ;;  %v8108_v5 = vrot.slane %v8107_v30, 4  ;;  %v6227_v27 = vadd.f32 %v6226_v22, %v6225_v34 }
 0xd99   : > { %v8585_v51 = vsel %vm7635_vm3, %v8584_v23, 0.0  ;;  %v9797_v4 = vsel %vm6874_vm8, %v9796_v39, 0.0  ;;  %v7654_v39 = vadd.f32 %v7653_v53, %v7652_v50 }
 0xd9a   : > { %v12529_v36 = vmul.f32 %v12528_v8, %v12522_v47  ;;  %v8586_v41 = vadd.f32 %v8585_v51, %v8581_v0  ;;  %v9798_v23 = vrot.slane %v9797_v4, 4  ;;  %v6228_v15 = vrot.slane %v6227_v27, 2 }
 0xd9b   : > { %v7655_v51 = vrot.slane %v7654_v39, 2 }
 0xd9c   : > { %12539 = vrot.lane.b32.xlu1 %v12529_v36, %s16238_s1  ;;  %v8566_v1 = vpop.xlane.xlu0 %8565  ;;  %v10211_v7 = vpop.xlane.xlu1 %10210  ;;  %v8109_v36 = vadd.f32 %v8108_v5, %v8107_v30  ;;  %v8587_v24 = vrot.slane %v8586_v41, 4  ;;  %v9799_v12 = vadd.f32 %v9798_v23, %v9797_v4  ;;  %v6229_v34 = vadd.f32 %v6228_v15, %v6227_v27 }
 0xd9d   : > { %v8571_v26 = vadd.f32 %v8570_v25, %v8566_v1  ;;  %v10212_v14 = vsel %vm6874_vm8, %v10211_v7, 0.0  ;;  %v5238_v1 = vrot.slane %v5237_v29, 2  ;;  %v5734_v25 = vadd.f32 %v5733_v33, %v5732_v58 }
 0xd9e   : > { %v10213_v52 = vrot.slane %v10212_v14, 4  ;;  %v8110_v2 = vrot.slane %v8109_v36, 2  ;;  %v8588_v40 = vadd.f32 %v8587_v24, %v8586_v41  ;;  %v6230_v5 = vrot.slane %v6229_v34, 1 }
 0xd9f   : > { %v8572_v18 = vrot.slane %v8571_v26, 4  ;;  %v5239_v62 = vadd.f32 %v5238_v1, %v5237_v29  ;;  %v5735_v20 = vrot.slane %v5734_v25, 1  ;;  %v7656_v9 = vadd.f32 %v7655_v51, %v7654_v39 }
 0xda0   : > { %12549 = vrot.lane.b32.xlu1 %v12522_v47, %s16238_s1  ;;  %v9785_v21 = vpop.xlane.xlu0 %9784  ;;  %v10623_v19 = vpop.xlane.xlu1 %10622  ;;  %v8123_v47 = vrot.slane %v8122_v32, 4  ;;  %v8111_v7 = vadd.f32 %v8110_v2, %v8109_v36 }
 0xda1   : > { %v9786_v3 = vsel %vm6874_vm8, %v9785_v21, 0.0  ;;  %v10624_v57 = vsel %vm6874_vm8, %v10623_v19, 0.0  ;;  %v8573_v35 = vadd.f32 %v8572_v18, %v8571_v26  ;;  %v5736_v58 = vadd.f32 %v5735_v20, %v5734_v25 }
 0xda2   : > { %v9787_v8 = vrot.slane %v9786_v3, 4  ;;  %v10625_v61 = vrot.slane %v10624_v57, 4  ;;  %v8124_v21 = vadd.f32 %v8123_v47, %v8122_v32  ;;  %v5240_v32 = vrot.slane %v5239_v62, 1 }
 0xda3   : > { %v8574_v31 = vrot.slane %v8573_v35, 2  ;;  %v8112_v19 = vrot.slane %v8111_v7, 1  ;;  %v6231_v47 = vadd.f32 %v6230_v5, %v6229_v34  ;;  %v7657_v53 = vrot.slane %v7656_v9, 1 }
 0xda4   : > { %v10200_v59 = vpop.xlane.xlu0 %10199  ;;  %v9788_v0 = vadd.f32 %v9787_v8, %v9786_v3  ;;  %v10626_v43 = vadd.f32 %v10625_v61, %v10624_v57  ;;  %v8125_v30 = vrot.slane %v8124_v21, 2  ;;  %v5241_v27 = vadd.f32 %v5240_v32, %v5239_v62 }
 0xda5   : > { %v10201_v46 = vsel %vm6874_vm8, %v10200_v59, 0.0  ;;  %v10214_v59 = vadd.f32 %v10213_v52, %v10212_v14  ;;  %v8575_v63 = vadd.f32 %v8574_v31, %v8573_v35  ;;  %v8113_v4 = vadd.f32 %v8112_v19, %v8111_v7 }
 0xda6   : > { %v10202_v48 = vrot.slane %v10201_v46, 4  ;;  %v9789_v16 = vrot.slane %v9788_v0, 2  ;;  %v10627_v54 = vrot.slane %v10626_v43, 2  ;;  %v8126_v3 = vadd.f32 %v8125_v30, %v8124_v21 }
 0xda7   : > { %v10215_v26 = vrot.slane %v10214_v59, 2  ;;  %v8576_v18 = vrot.slane %v8575_v63, 1  ;;  %v5737_v33 = vmul.f32 0.0020661156, %v5736_v58  ;;  %v5242_v1 = vmul.f32 0.0020661156, %v5241_v27 }
 0xda8   : > { %v10612_v37 = vpop.xlane.xlu0 %10611  ;;  %v10203_v38 = vadd.f32 %v10202_v48, %v10201_v46  ;;  %v7641_v46 = vadd.f32 %v7640_v56, %v7639_v45  ;;  %v9790_v22 = vadd.f32 %v9789_v16, %v9788_v0  ;;  %v8127_v36 = vrot.slane %v8126_v3, 1 }
 0xda9   : > { %v10613_v6 = vsel %vm6874_vm8, %v10612_v37, 0.0  ;;  %v8589_v37 = vrot.slane %v8588_v40, 2  ;;  %v10216_v48 = vadd.f32 %v10215_v26, %v10214_v59  ;;  %v8577_v35 = vadd.f32 %v8576_v18, %v8575_v63 }
 0xdaa   : > { %v10614_v60 = vrot.slane %v10613_v6, 4  ;;  %v10204_v11 = vrot.slane %v10203_v38, 2  ;;  %v7642_v14 = vrot.slane %v7641_v46, 1  ;;  %v9791_v57 = vrot.slane %v9790_v22, 1 }
 0xdab   : > { %v8590_v41 = vadd.f32 %v8589_v37, %v8588_v40  ;;  %v10217_v52 = vrot.slane %v10216_v48, 1  ;;  %v6232_v15 = vmul.f32 0.0020661156, %v6231_v47  ;;  %v8128_v21 = vadd.f32 %v8127_v36, %v8126_v3 }
 0xdac   : > { %v10615_v42 = vadd.f32 %v10614_v60, %v10613_v6  ;;  %v10205_v49 = vadd.f32 %v10204_v11, %v10203_v38  ;;  %v9800_v6 = vrot.slane %v9799_v12, 2  ;;  %v10628_v60 = vadd.f32 %v10627_v54, %v10626_v43 }
 0xdad   : > { %v8591_v24 = vrot.slane %v8590_v41, 1  ;;  %v7643_v45 = vadd.f32 %v7642_v14, %v7641_v46  ;;  %v9792_v0 = vadd.f32 %v9791_v57, %v9790_v22  ;;  %v8114_v2 = vmul.f32 0.01, %v8113_v4 }
 0xdae   : > { %v10616_v10 = vrot.slane %v10615_v42, 2  ;;  %v10206_v50 = vrot.slane %v10205_v49, 1  ;;  %v9801_v8 = vadd.f32 %v9800_v6, %v9799_v12  ;;  %v10629_v61 = vrot.slane %v10628_v60, 1 }
 0xdaf   : > { %v8592_v40 = vadd.f32 %v8591_v24, %v8590_v41  ;;  %v8578_v31 = vmul.f32 0.01, %v8577_v35  ;;  %v10218_v59 = vadd.f32 %v10217_v52, %v10216_v48  ;;  %v7658_v39 = vadd.f32 %v7657_v53, %v7656_v9 }
 0xdb0   : > { %v10617_v28 = vadd.f32 %v10616_v10, %v10615_v42  ;;  %v10207_v38 = vadd.f32 %v10206_v50, %v10205_v49  ;;  %v9802_v23 = vrot.slane %v9801_v8, 1  ;;  %v7644_v56 = vmul.f32 0.01, %v7643_v45 }
 0xdb1   : > { %v10630_v43 = vadd.f32 %v10629_v61, %v10628_v60  ;;  %v6252_v25 = vsel %vm3548_vm6, %v5242_v1, %v5737_v33  ;;  %v9793_v16 = vmul.f32 0.0625, %v9792_v0  ;;  %v8129_v34 = vmul.f32 0.01, %v8128_v21 }
 0xdb2   : > { %v10618_v29 = vrot.slane %v10617_v28, 1  ;;  %v10208_v11 = vmul.f32 0.0625, %v10207_v38  ;;  %v9803_v12 = vadd.f32 %v9802_v23, %v9801_v8  ;;  %v6253_v62 = vsel %vm3550_vm7, %v6252_v25, %v6232_v15 }
 0xdb3   : > { %v8594_v30 = vsel %vm3548_vm6, %v7644_v56, %v8114_v2  ;;  %v8593_v7 = vmul.f32 0.01, %v8592_v40  ;;  %v10219_v63 = vmul.f32 0.0625, %v10218_v59  ;;  %v7659_v49 = vmul.f32 0.01, %v7658_v39 }
 0xdb4   : > { %v10619_v42 = vadd.f32 %v10618_v29, %v10617_v28  ;;  %v8595_v37 = vsel %vm3550_vm7, %v8594_v30, %v8578_v31  ;;  %v10632_v26 = vsel %vm3548_vm6, %v9793_v16, %v10208_v11  ;;  %v10631_v51 = vmul.f32 0.0625, %v10630_v43 }
 0xdb5   : > { %v12555_v28 = vrot.slane %v6253_v62, 7  ;;  %v9804_v20 = vmul.f32 0.0625, %v9803_v12  ;;  %v8596_v22 = vsel %vm3548_vm6, %v7659_v49, %v8129_v34  ;;  %v12558_v32 = vrot.slane %v8595_v37, 6 }
 0xdb6   : > { %v10620_v10 = vmul.f32 0.0625, %v10619_v42  ;;  %v8597_v5 = vsel %vm3550_vm7, %v8596_v22, %v8593_v7 }
 0xdb7   : > { %v10634_v3 = vsel %vm3548_vm6, %v9804_v20, %v10219_v63  ;;  %v12566_v9 = vsel %vm11209_vm14, %v18054_v13, %v12555_v28  ;;  %v12576_v14 = vrot.slane %v8597_v5, 6 }
 0xdb8   : > { %v10633_v46 = vsel %vm3550_vm7, %v10632_v26, %v10620_v10  ;;  %v10635_v41 = vsel %vm3550_vm7, %v10634_v3, %v10631_v51  ;;  %v12567_v29 = vsel %vm7635_vm3, %v12566_v9, %v12558_v32 }
 0xdb9   : > { %v12561_v19 = vrot.slane %v10633_v46, 5  ;;  %v12579_v58 = vrot.slane %v10635_v41, 5  ;;  %v12585_v36 = vsel %vm7635_vm3, %v18798_v44, %v12576_v14 }
 0xdbb   : > { %v12568_v8 = vsel %vm11189_vm9, %v12567_v29, %v12561_v19  ;;  %v12586_v4 = vsel %vm11189_vm9, %v12585_v36, %v12579_v58 }
 0xe04   : > { %v12546_v54 = vpop.permute.xlu1 %12545 }
 0xe06   : > { %v12536_v6 = vpop.permute.xlu0 %12535 }
 0xe07   : > { %v12542_v18 = vsel %vm3548_vm6, %v19400_v17, %v12536_v6  ;;  %v12552_v17 = vsel %vm3548_vm6, %v19397_v55, %v12546_v54 }
 0xe0e   : > { %v12540_v48 = vpop.permute.xlu1 %12539 }
 0xe0f   : > { %v12543_v50 = vsel %vm3550_vm7, %v12542_v18, %v12540_v48 }
 0xe10   : > { %v12564_v60 = vrot.slane %v12543_v50, 4 }
 0xe12   : > { %v12569_v57 = vsel %vm6874_vm8, %v12568_v8, %v12564_v60  ;;  %v12550_v27 = vpop.permute.xlu1 %12549 }
 0xe13   : > { %12571 = vst.msk [vmem:[%s681_s29] sm:$0x1f] %vm12570_vm1, %v12569_v57  ;;  %v12553_v13 = vsel %vm3550_vm7, %v12552_v17, %v12550_v27 }
 0xe14   : > { %v12582_v47 = vrot.slane %v12553_v13, 4 }
 0xe16   : > { %v12587_v24 = vsel %vm6874_vm8, %v12586_v4, %v12582_v47 }
 0xe17   : > { %12588 = vst.msk [vmem:[%s685_s0] sm:$0x1f] %vm12570_vm1, %v12587_v24 }
 0xe18 PF: > { %s32_s2 = sadd.s32 1, %s16231_s2  }
 0xe19   : > { %p29_p4 = scmp.ge.s32.totalorder %s32_s2, 4  }
 0xe1b   :  { %31 = sbr.rel (!%p29_p4) target bundleno = 7 (0x7), region = 145 }

</bundles_post_ra>
